<compile_context>
chip_gen: v7x
topology: tpu7x:2x2x1
jax: 0.10.0
libtpu: 0.0.40
codegen_flags: <defaults>
</compile_context>

<pallas_src>
import math

import jax
import jax.numpy as jnp
from jax.experimental import pallas as pl
from jax.experimental.pallas import tpu as pltpu

_BN_EPS = 1e-6          # nn.BatchNorm2d(dim, eps=1e-06) in the module spec
_GRN_EPS = 1e-6
_GELU_A = 0.7978845608028654          # sqrt(2/pi)
_GELU_B = 0.035677408136300125        # 0.044715 * sqrt(2/pi)


def _gelu_tanh(x):
    # tanh-approx GELU: the transcendental goes to the EUP (free slot); only ~7 VALU ops
    # per element remain.  Max abs deviation from exact erf-GELU ~5e-4.
    x2 = x * x
    inner = x * (_GELU_A + _GELU_B * x2)
    return 0.5 * x * (1.0 + jnp.tanh(inner))


# --------------------------------------------------------------------------------------
# Pass 1: depthwise 7x7 conv (lane-dense) + per-sample partial BatchNorm sums
# --------------------------------------------------------------------------------------
def _dwconv_stats_kernel(xp_ref, wt_ref, bt_ref, y_ref, st_ref):
    # xp_ref: (1, H+6, (W+8)*C)  zero-padded input, lane-dense
    # wt_ref: (7, 7, W*C)        depthwise weights tiled along W (constant-index block)
    # bt_ref: (1, W*C)           depthwise bias tiled along W
    # y_ref : (1, H, W*C)        conv output (lane-dense store)
    # st_ref: (1, 2, W*C)        per-sample [sum, sum_of_squares] over H
    H = y_ref.shape[1]
    WC = y_ref.shape[2]
    WpC = xp_ref.shape[2]
    C = (WpC - WC) // 8              # W was padded by 8 columns total (4 left, 4 right)

    wt = wt_ref[...]                 # (7, 7, W*C)

    acc = jnp.zeros((H, WC), jnp.float32)
    for kh in range(7):
        # Slice the ref per kh (not the whole padded sample) to bound vreg pressure.
        row = xp_ref[0, kh:kh + H, :]            # (H, (W+8)*C)
        for kw in range(7):
            off = (kw + 1) * C       # left pad is 4 columns, conv pad is 3 -> +1 column
            acc = acc + row[:, off:off + WC] * wt[kh, kw, :]
    y = acc + bt_ref[...]            # (H, W*C)

    y_ref[...] = y.reshape(1, H, WC)
    # one-pass partial BatchNorm statistics (sum, sum-of-squares over H for this sample)
    st_ref[:, 0:1, :] = jnp.sum(y, axis=0, keepdims=True).reshape(1, 1, WC)
    st_ref[:, 1:2, :] = jnp.sum(y * y, axis=0, keepdims=True).reshape(1, 1, WC)


# --------------------------------------------------------------------------------------
# Pass 2: pwconv1 (BN folded) -> GELU -> GRN -> pwconv2 (transposed) -> residual
# --------------------------------------------------------------------------------------
def _mlp_grn_kernel(y_ref, x_ref, w1_ref, b1_ref, gg_ref, w2t_ref, b2_ref, o_ref):
    # y_ref : (1, M, C)   dwconv output (BatchNorm already folded into w1/b1)
    # x_ref : (1, C, M)   residual input in NCHW layout (lane-dense, no transpose)
    # w1_ref: (C, 4C)     BN-folded pwconv1 weight
    # b1_ref: (1, 4C)     BN-folded pwconv1 bias
    # gg_ref: (1, 4C)     GRN gamma
    # w2t_ref:(C, 4C)     pwconv2 weight, pre-transposed
    # b2_ref: (C, 1)      pwconv2 bias with GRN beta folded in
    # o_ref : (1, C, M)   residual-added output, NCHW, lane-dense store
    _, M, C = y_ref.shape

    # pwconv1 (MXU) + tanh-GELU (EUP).  h is (M, 4C) with 4C = 128 -> lane-dense.
    h = jnp.dot(y_ref[0], w1_ref[...], preferred_element_type=jnp.float32) + b1_ref[...]
    h = _gelu_tanh(h)

    # GRN: L2 norm over spatial positions per channel -> local to this grid step.
    gx = jnp.sqrt(jnp.sum(h * h, axis=0, keepdims=True))            # (1, 4C)
    mu = jnp.mean(gx, axis=1, keepdims=True)                        # (1, 1)
    nx = gx * pl.reciprocal(mu + _GRN_EPS)                          # exact, scalar-sized
    hg = h * (gg_ref[...] * nx + 1.0)                               # beta folded into b2

    # pwconv2 in transposed form -> (C, M): lane-dense store, output already NCHW,
    # residual added from the original NCHW input (no activation transposes anywhere).
    o = jax.lax.dot_general(w2t_ref[...], hg,
                            dimension_numbers=(((1,), (1,)), ((), ())),
                            preferred_element_type=jnp.float32)      # (C, M)
    o_ref[...] = (x_ref[0] + o + b2_ref[...]).reshape(1, C, M)


# --------------------------------------------------------------------------------------
# Wrapper
# --------------------------------------------------------------------------------------
def convnextv2_block(x_nchw, params):
    """x_nchw: (N, C, H, W) float32, PyTorch layout."""
    dww, dwb, bng, bnb, w1, b1, grng, grnb, w2, b2 = params
    N, C, H, W = x_nchw.shape
    C4 = w1.shape[1]
    M = H * W

    x_nchw = x_nchw.astype(jnp.float32)
    x_res = x_nchw.reshape(N, C, M)                                  # free reshape (residual path)

    x_nhwc = jnp.transpose(x_nchw, (0, 2, 3, 1))                     # NHWC for the dwconv
    # Pad W by 4 (not 3) per side so the fused last dim (W+8)*C stays a multiple of 128;
    # the conv taps simply start one column later.
    Wp = W + 8
    xpad2 = jnp.pad(x_nhwc, ((0, 0), (3, 3), (4, 4), (0, 0))).reshape(N, H + 6, Wp * C)
    # TODO(synk): on v5e, fuse this pad/transpose into pass 1 (in-kernel halo memset +
    # interior DMA) to save one full HBM round trip of the padded activation.

    dwwt = jnp.tile(dww, (1, 1, W))                                  # (7, 7, W*C)
    dwbt = jnp.tile(dwb, (1, W))                                     # (1, W*C)
    # TODO(synk): at real ConvNeXt sizes pass the compact (7,7,C) weights and build the
    # W-tiled copy once in a persistent VMEM scratch instead of duplicating it in HBM.

    vmem_limit = 32 * 1024 * 1024

    conv_cost = pl.CostEstimate(
        flops=2 * 49 * N * H * W * C,
        transcendentals=0,
        bytes_accessed=4 * (N * (H + 6) * Wp * C + N * H * W * C
                            + 2 * N * W * C + 50 * W * C))

    y2, stats = pl.pallas_call(
        _dwconv_stats_kernel,
        grid=(N,),
        in_specs=[
            pl.BlockSpec((1, H + 6, Wp * C), lambda n: (n, 0, 0)),
            pl.BlockSpec((7, 7, W * C), lambda n: (0, 0, 0)),
            pl.BlockSpec((1, W * C), lambda n: (0, 0)),
        ],
        out_specs=(
            pl.BlockSpec((1, H, W * C), lambda n: (n, 0, 0)),
            pl.BlockSpec((1, 2, W * C), lambda n: (n, 0, 0)),
        ),
        out_shape=(
            jax.ShapeDtypeStruct((N, H, W * C), jnp.float32),
            jax.ShapeDtypeStruct((N, 2, W * C), jnp.float32),
        ),
        compiler_params=pltpu.CompilerParams(
            dimension_semantics=("parallel",),
            vmem_limit_bytes=vmem_limit),
        cost_estimate=conv_cost,
    )(xpad2, dwwt, dwbt)

    # Finalize BatchNorm batch statistics across the N grid tiles (tiny XLA reduce) so
    # per-sample tiling does not change the math.  Training-mode BN: biased variance.
    st = stats.reshape(N, 2, W, C)
    cnt = float(N * H * W)
    s1 = jnp.sum(st[:, 0], axis=(0, 1))                              # (C,)
    s2 = jnp.sum(st[:, 1], axis=(0, 1))                              # (C,)
    mean = s1 / cnt
    var = s2 / cnt - mean * mean
    inv = jax.lax.rsqrt(var + _BN_EPS)
    bn_scale = bng[0] * inv                                          # (C,)
    bn_shift = bnb[0] - mean * bn_scale                              # (C,)

    # Fold the BN affine into pwconv1 and GRN beta into pwconv2's bias (tiny XLA ops);
    # the MXU absorbs the scale for free and the kernel drops ~3 VALU ops per element.
    w1f = bn_scale[:, None] * w1                                     # (C, 4C)
    b1f = bn_shift[None, :] @ w1 + b1                                # (1, 4C)
    w2t = jnp.transpose(w2)                                          # (C, 4C)
    b2f = (grnb @ w2 + b2).reshape(C, 1)                             # (C, 1)

    y_mc = y2.reshape(N, M, C)                                       # same HBM bytes, free

    mlp_cost = pl.CostEstimate(
        flops=4 * N * M * C * C4 + 12 * N * M * C4,
        transcendentals=N * M * C4,                                  # one tanh per element
        bytes_accessed=4 * (3 * N * M * C + 2 * C * C4 + 3 * C4 + C))

    out_ncm = pl.pallas_call(
        _mlp_grn_kernel,
        grid=(N,),
        in_specs=[
            pl.BlockSpec((1, M, C), lambda n: (n, 0, 0)),            # dwconv output
            pl.BlockSpec((1, C, M), lambda n: (n, 0, 0)),            # residual (NCHW)
            pl.BlockSpec((C, C4), lambda n: (0, 0)),                 # w1 (BN folded)
            pl.BlockSpec((1, C4), lambda n: (0, 0)),                 # b1 (BN folded)
            pl.BlockSpec((1, C4), lambda n: (0, 0)),                 # GRN gamma
            pl.BlockSpec((C, C4), lambda n: (0, 0)),                 # w2 transposed
            pl.BlockSpec((C, 1), lambda n: (0, 0)),                  # b2 (+GRN beta)
        ],
        out_specs=pl.BlockSpec((1, C, M), lambda n: (n, 0, 0)),
        out_shape=jax.ShapeDtypeStruct((N, C, M), jnp.float32),
        compiler_params=pltpu.CompilerParams(
            dimension_semantics=("parallel",),
            vmem_limit_bytes=vmem_limit),
        cost_estimate=mlp_cost,
    )(y_mc, x_res, w1f, b1f, grng, w2t, b2f)

    # TODO(synk): for v7x with N==1, add a second parallel grid axis (H-tiles in pass 1,
    # M-tiles + two-phase GRN in pass 2) so both TensorCores are fed.
    return out_ncm.reshape(N, C, H, W)                               # free reshape, already NCHW


# --------------------------------------------------------------------------------------
# Plain-JAX reference mirroring the PyTorch forward pass (exact-erf GELU)
# --------------------------------------------------------------------------------------
def _reference(x_nchw, params):
    dww, dwb, bng, bnb, w1, b1, grng, grnb, w2, b2 = params
    C = x_nchw.shape[1]
    w_oihw = jnp.transpose(dww, (2, 0, 1))[:, None, :, :]            # (C,1,7,7)
    y = jax.lax.conv_general_dilated(
        x_nchw, w_oihw, window_strides=(1, 1), padding=((3, 3), (3, 3)),
        dimension_numbers=("NCHW", "OIHW", "NCHW"), feature_group_count=C)
    y = y + dwb[0][None, :, None, None]
    mean = jnp.mean(y, axis=(0, 2, 3), keepdims=True)
    var = jnp.mean((y - mean) ** 2, axis=(0, 2, 3), keepdims=True)
    y = (y - mean) * jax.lax.rsqrt(var + _BN_EPS)
    y = y * bng[0][None, :, None, None] + bnb[0][None, :, None, None]
    y = jnp.transpose(y, (0, 2, 3, 1))                               # NHWC
    h = jax.nn.gelu(y @ w1 + b1[0], approximate=False)
    gx = jnp.sqrt(jnp.sum(h * h, axis=(1, 2), keepdims=True))
    nx = gx / (jnp.mean(gx, axis=-1, keepdims=True) + _GRN_EPS)
    h = grng[0][None, None] * (h * nx) + grnb[0][None, None] + h
    o = h @ w2 + b2[0]
    return x_nchw + jnp.transpose(o, (0, 3, 1, 2))


if __name__ == "__main__":
    key = jax.random.PRNGKey(0)
    dim = 32                      # Block(dim=32)  -> hidden = 4*dim = 128
    N, H, W = 2, 16, 16
    ks = jax.random.split(key, 11)

    x = jax.random.normal(ks[0], (N, dim, H, W), jnp.float32)

    # Deterministic synthetic parameters (shapes follow Block.__init__).
    dww = 0.05 * jax.random.normal(ks[1], (7, 7, dim), jnp.float32)    # Conv2d weight -> HWC
    dwb = 0.05 * jax.random.normal(ks[2], (1, dim), jnp.float32)       # Conv2d bias
    bng = 1.0 + 0.1 * jax.random.normal(ks[3], (1, dim), jnp.float32)  # BN weight
    bnb = 0.1 * jax.random.normal(ks[4], (1, dim), jnp.float32)        # BN bias
    w1 = jax.random.normal(ks[5], (dim, 4 * dim), jnp.float32) / math.sqrt(dim)
    b1 = 0.05 * jax.random.normal(ks[6], (1, 4 * dim), jnp.float32)
    grng = 0.1 * jax.random.normal(ks[7], (1, 4 * dim), jnp.float32)   # GRN gamma
    grnb = 0.1 * jax.random.normal(ks[8], (1, 4 * dim), jnp.float32)   # GRN beta
    w2 = jax.random.normal(ks[9], (4 * dim, dim), jnp.float32) / math.sqrt(4 * dim)
    b2 = 0.05 * jax.random.normal(ks[10], (1, dim), jnp.float32)
    params = (dww, dwb, bng, bnb, w1, b1, grng, grnb, w2, b2)

    out = convnextv2_block(x, params)
    out = jax.block_until_ready(out)

    ref = _reference(x, params)
    assert out.shape == x.shape
    err = float(jnp.max(jnp.abs(out - ref)))
    if err < 1e-2:
        print("KERNEL_OK")
    else:
        print(f"MISMATCH max_abs_err={err}")
</pallas_src>

<mosaic_0001>
module attributes {stable_mosaic.version = 11 : i64} {
  func.func @_dwconv_stats_kernel(%arg0: i32, %arg1: memref<1x22x768xf32, #tpu.memory_space<vmem>>, %arg2: memref<7x7x512xf32, #tpu.memory_space<vmem>>, %arg3: memref<1x512xf32, #tpu.memory_space<vmem>>, %arg4: memref<1x16x512xf32, #tpu.memory_space<vmem>>, %arg5: memref<1x2x512xf32, #tpu.memory_space<vmem>>) attributes {dimension_semantics = [#tpu.dimension_semantics<parallel>], iteration_bounds = array<i64: 2>, scalar_prefetch = 0 : i64, scratch_operands = 0 : i64, tpu.core_type = #tpu.core_type<tc>, window_params = [{transform_indices = @transform_0, window_bounds = array<i64: 1, 22, 768>}, {pipeline_mode = #tpu.pipeline_mode<synchronous>, transform_indices = @transform_1, window_bounds = array<i64: 7, 7, 512>}, {pipeline_mode = #tpu.pipeline_mode<synchronous>, transform_indices = @transform_2, window_bounds = array<i64: 1, 512>}, {transform_indices = @transform_3, window_bounds = array<i64: 1, 16, 512>}, {transform_indices = @transform_4, window_bounds = array<i64: 1, 2, 512>}]} {
    %c0 = arith.constant 0 : index
    %c0_0 = arith.constant 0 : index
    %c0_1 = arith.constant 0 : index
    %0 = vector.load %arg2[%c0, %c0_0, %c0_1] : memref<7x7x512xf32, #tpu.memory_space<vmem>>, vector<7x7x512xf32>
    %cst = arith.constant 0.000000e+00 : f32
    %1 = vector.broadcast %cst : f32 to vector<16x512xf32>
    %c0_2 = arith.constant 0 : index
    %c0_3 = arith.constant 0 : index
    %c0_4 = arith.constant 0 : index
    %2 = vector.load %arg1[%c0_2, %c0_3, %c0_4] : memref<1x22x768xf32, #tpu.memory_space<vmem>>, vector<1x16x768xf32>
    %3 = vector.shape_cast %2 : vector<1x16x768xf32> to vector<16x768xf32>
    %4 = vector.extract_strided_slice %3 {offsets = [0, 32], sizes = [16, 512], strides = [1, 1]} : vector<16x768xf32> to vector<16x512xf32>
    %5 = vector.extract_strided_slice %0 {offsets = [0, 0, 0], sizes = [1, 1, 512], strides = [1, 1, 1]} : vector<7x7x512xf32> to vector<1x1x512xf32>
    %6 = vector.shape_cast %5 : vector<1x1x512xf32> to vector<512xf32>
    %7 = vector.shape_cast %6 : vector<512xf32> to vector<1x512xf32>
    %8 = vector.broadcast %7 : vector<1x512xf32> to vector<16x512xf32>
    %9 = arith.mulf %4, %8 : vector<16x512xf32>
    %10 = arith.addf %1, %9 : vector<16x512xf32>
    %11 = vector.extract_strided_slice %3 {offsets = [0, 64], sizes = [16, 512], strides = [1, 1]} : vector<16x768xf32> to vector<16x512xf32>
    %12 = vector.extract_strided_slice %0 {offsets = [0, 1, 0], sizes = [1, 1, 512], strides = [1, 1, 1]} : vector<7x7x512xf32> to vector<1x1x512xf32>
    %13 = vector.shape_cast %12 : vector<1x1x512xf32> to vector<512xf32>
    %14 = vector.shape_cast %13 : vector<512xf32> to vector<1x512xf32>
    %15 = vector.broadcast %14 : vector<1x512xf32> to vector<16x512xf32>
    %16 = arith.mulf %11, %15 : vector<16x512xf32>
    %17 = arith.addf %10, %16 : vector<16x512xf32>
    %18 = vector.extract_strided_slice %3 {offsets = [0, 96], sizes = [16, 512], strides = [1, 1]} : vector<16x768xf32> to vector<16x512xf32>
    %19 = vector.extract_strided_slice %0 {offsets = [0, 2, 0], sizes = [1, 1, 512], strides = [1, 1, 1]} : vector<7x7x512xf32> to vector<1x1x512xf32>
    %20 = vector.shape_cast %19 : vector<1x1x512xf32> to vector<512xf32>
    %21 = vector.shape_cast %20 : vector<512xf32> to vector<1x512xf32>
    %22 = vector.broadcast %21 : vector<1x512xf32> to vector<16x512xf32>
    %23 = arith.mulf %18, %22 : vector<16x512xf32>
    %24 = arith.addf %17, %23 : vector<16x512xf32>
    %25 = vector.extract_strided_slice %3 {offsets = [0, 128], sizes = [16, 512], strides = [1, 1]} : vector<16x768xf32> to vector<16x512xf32>
    %26 = vector.extract_strided_slice %0 {offsets = [0, 3, 0], sizes = [1, 1, 512], strides = [1, 1, 1]} : vector<7x7x512xf32> to vector<1x1x512xf32>
    %27 = vector.shape_cast %26 : vector<1x1x512xf32> to vector<512xf32>
    %28 = vector.shape_cast %27 : vector<512xf32> to vector<1x512xf32>
    %29 = vector.broadcast %28 : vector<1x512xf32> to vector<16x512xf32>
    %30 = arith.mulf %25, %29 : vector<16x512xf32>
    %31 = arith.addf %24, %30 : vector<16x512xf32>
    %32 = vector.extract_strided_slice %3 {offsets = [0, 160], sizes = [16, 512], strides = [1, 1]} : vector<16x768xf32> to vector<16x512xf32>
    %33 = vector.extract_strided_slice %0 {offsets = [0, 4, 0], sizes = [1, 1, 512], strides = [1, 1, 1]} : vector<7x7x512xf32> to vector<1x1x512xf32>
    %34 = vector.shape_cast %33 : vector<1x1x512xf32> to vector<512xf32>
    %35 = vector.shape_cast %34 : vector<512xf32> to vector<1x512xf32>
    %36 = vector.broadcast %35 : vector<1x512xf32> to vector<16x512xf32>
    %37 = arith.mulf %32, %36 : vector<16x512xf32>
    %38 = arith.addf %31, %37 : vector<16x512xf32>
    %39 = vector.extract_strided_slice %3 {offsets = [0, 192], sizes = [16, 512], strides = [1, 1]} : vector<16x768xf32> to vector<16x512xf32>
    %40 = vector.extract_strided_slice %0 {offsets = [0, 5, 0], sizes = [1, 1, 512], strides = [1, 1, 1]} : vector<7x7x512xf32> to vector<1x1x512xf32>
    %41 = vector.shape_cast %40 : vector<1x1x512xf32> to vector<512xf32>
    %42 = vector.shape_cast %41 : vector<512xf32> to vector<1x512xf32>
    %43 = vector.broadcast %42 : vector<1x512xf32> to vector<16x512xf32>
    %44 = arith.mulf %39, %43 : vector<16x512xf32>
    %45 = arith.addf %38, %44 : vector<16x512xf32>
    %46 = vector.extract_strided_slice %3 {offsets = [0, 224], sizes = [16, 512], strides = [1, 1]} : vector<16x768xf32> to vector<16x512xf32>
    %47 = vector.extract_strided_slice %0 {offsets = [0, 6, 0], sizes = [1, 1, 512], strides = [1, 1, 1]} : vector<7x7x512xf32> to vector<1x1x512xf32>
    %48 = vector.shape_cast %47 : vector<1x1x512xf32> to vector<512xf32>
    %49 = vector.shape_cast %48 : vector<512xf32> to vector<1x512xf32>
    %50 = vector.broadcast %49 : vector<1x512xf32> to vector<16x512xf32>
    %51 = arith.mulf %46, %50 : vector<16x512xf32>
    %52 = arith.addf %45, %51 : vector<16x512xf32>
    %c0_5 = arith.constant 0 : index
    %c1 = arith.constant 1 : index
    %c0_6 = arith.constant 0 : index
    %53 = vector.load %arg1[%c0_5, %c1, %c0_6] : memref<1x22x768xf32, #tpu.memory_space<vmem>>, vector<1x16x768xf32>
    %54 = vector.shape_cast %53 : vector<1x16x768xf32> to vector<16x768xf32>
    %55 = vector.extract_strided_slice %54 {offsets = [0, 32], sizes = [16, 512], strides = [1, 1]} : vector<16x768xf32> to vector<16x512xf32>
    %56 = vector.extract_strided_slice %0 {offsets = [1, 0, 0], sizes = [1, 1, 512], strides = [1, 1, 1]} : vector<7x7x512xf32> to vector<1x1x512xf32>
    %57 = vector.shape_cast %56 : vector<1x1x512xf32> to vector<512xf32>
    %58 = vector.shape_cast %57 : vector<512xf32> to vector<1x512xf32>
    %59 = vector.broadcast %58 : vector<1x512xf32> to vector<16x512xf32>
    %60 = arith.mulf %55, %59 : vector<16x512xf32>
    %61 = arith.addf %52, %60 : vector<16x512xf32>
    %62 = vector.extract_strided_slice %54 {offsets = [0, 64], sizes = [16, 512], strides = [1, 1]} : vector<16x768xf32> to vector<16x512xf32>
    %63 = vector.extract_strided_slice %0 {offsets = [1, 1, 0], sizes = [1, 1, 512], strides = [1, 1, 1]} : vector<7x7x512xf32> to vector<1x1x512xf32>
    %64 = vector.shape_cast %63 : vector<1x1x512xf32> to vector<512xf32>
    %65 = vector.shape_cast %64 : vector<512xf32> to vector<1x512xf32>
    %66 = vector.broadcast %65 : vector<1x512xf32> to vector<16x512xf32>
    %67 = arith.mulf %62, %66 : vector<16x512xf32>
    %68 = arith.addf %61, %67 : vector<16x512xf32>
    %69 = vector.extract_strided_slice %54 {offsets = [0, 96], sizes = [16, 512], strides = [1, 1]} : vector<16x768xf32> to vector<16x512xf32>
    %70 = vector.extract_strided_slice %0 {offsets = [1, 2, 0], sizes = [1, 1, 512], strides = [1, 1, 1]} : vector<7x7x512xf32> to vector<1x1x512xf32>
    %71 = vector.shape_cast %70 : vector<1x1x512xf32> to vector<512xf32>
    %72 = vector.shape_cast %71 : vector<512xf32> to vector<1x512xf32>
    %73 = vector.broadcast %72 : vector<1x512xf32> to vector<16x512xf32>
    %74 = arith.mulf %69, %73 : vector<16x512xf32>
    %75 = arith.addf %68, %74 : vector<16x512xf32>
    %76 = vector.extract_strided_slice %54 {offsets = [0, 128], sizes = [16, 512], strides = [1, 1]} : vector<16x768xf32> to vector<16x512xf32>
    %77 = vector.extract_strided_slice %0 {offsets = [1, 3, 0], sizes = [1, 1, 512], strides = [1, 1, 1]} : vector<7x7x512xf32> to vector<1x1x512xf32>
    %78 = vector.shape_cast %77 : vector<1x1x512xf32> to vector<512xf32>
    %79 = vector.shape_cast %78 : vector<512xf32> to vector<1x512xf32>
    %80 = vector.broadcast %79 : vector<1x512xf32> to vector<16x512xf32>
    %81 = arith.mulf %76, %80 : vector<16x512xf32>
    %82 = arith.addf %75, %81 : vector<16x512xf32>
    %83 = vector.extract_strided_slice %54 {offsets = [0, 160], sizes = [16, 512], strides = [1, 1]} : vector<16x768xf32> to vector<16x512xf32>
    %84 = vector.extract_strided_slice %0 {offsets = [1, 4, 0], sizes = [1, 1, 512], strides = [1, 1, 1]} : vector<7x7x512xf32> to vector<1x1x512xf32>
    %85 = vector.shape_cast %84 : vector<1x1x512xf32> to vector<512xf32>
    %86 = vector.shape_cast %85 : vector<512xf32> to vector<1x512xf32>
    %87 = vector.broadcast %86 : vector<1x512xf32> to vector<16x512xf32>
    %88 = arith.mulf %83, %87 : vector<16x512xf32>
    %89 = arith.addf %82, %88 : vector<16x512xf32>
    %90 = vector.extract_strided_slice %54 {offsets = [0, 192], sizes = [16, 512], strides = [1, 1]} : vector<16x768xf32> to vector<16x512xf32>
    %91 = vector.extract_strided_slice %0 {offsets = [1, 5, 0], sizes = [1, 1, 512], strides = [1, 1, 1]} : vector<7x7x512xf32> to vector<1x1x512xf32>
    %92 = vector.shape_cast %91 : vector<1x1x512xf32> to vector<512xf32>
    %93 = vector.shape_cast %92 : vector<512xf32> to vector<1x512xf32>
    %94 = vector.broadcast %93 : vector<1x512xf32> to vector<16x512xf32>
    %95 = arith.mulf %90, %94 : vector<16x512xf32>
    %96 = arith.addf %89, %95 : vector<16x512xf32>
    %97 = vector.extract_strided_slice %54 {offsets = [0, 224], sizes = [16, 512], strides = [1, 1]} : vector<16x768xf32> to vector<16x512xf32>
    %98 = vector.extract_strided_slice %0 {offsets = [1, 6, 0], sizes = [1, 1, 512], strides = [1, 1, 1]} : vector<7x7x512xf32> to vector<1x1x512xf32>
    %99 = vector.shape_cast %98 : vector<1x1x512xf32> to vector<512xf32>
    %100 = vector.shape_cast %99 : vector<512xf32> to vector<1x512xf32>
    %101 = vector.broadcast %100 : vector<1x512xf32> to vector<16x512xf32>
    %102 = arith.mulf %97, %101 : vector<16x512xf32>
    %103 = arith.addf %96, %102 : vector<16x512xf32>
    %c0_7 = arith.constant 0 : index
    %c2 = arith.constant 2 : index
    %c0_8 = arith.constant 0 : index
    %104 = vector.load %arg1[%c0_7, %c2, %c0_8] : memref<1x22x768xf32, #tpu.memory_space<vmem>>, vector<1x16x768xf32>
    %105 = vector.shape_cast %104 : vector<1x16x768xf32> to vector<16x768xf32>
    %106 = vector.extract_strided_slice %105 {offsets = [0, 32], sizes = [16, 512], strides = [1, 1]} : vector<16x768xf32> to vector<16x512xf32>
    %107 = vector.extract_strided_slice %0 {offsets = [2, 0, 0], sizes = [1, 1, 512], strides = [1, 1, 1]} : vector<7x7x512xf32> to vector<1x1x512xf32>
    %108 = vector.shape_cast %107 : vector<1x1x512xf32> to vector<512xf32>
    %109 = vector.shape_cast %108 : vector<512xf32> to vector<1x512xf32>
    %110 = vector.broadcast %109 : vector<1x512xf32> to vector<16x512xf32>
    %111 = arith.mulf %106, %110 : vector<16x512xf32>
    %112 = arith.addf %103, %111 : vector<16x512xf32>
    %113 = vector.extract_strided_slice %105 {offsets = [0, 64], sizes = [16, 512], strides = [1, 1]} : vector<16x768xf32> to vector<16x512xf32>
    %114 = vector.extract_strided_slice %0 {offsets = [2, 1, 0], sizes = [1, 1, 512], strides = [1, 1, 1]} : vector<7x7x512xf32> to vector<1x1x512xf32>
    %115 = vector.shape_cast %114 : vector<1x1x512xf32> to vector<512xf32>
    %116 = vector.shape_cast %115 : vector<512xf32> to vector<1x512xf32>
    %117 = vector.broadcast %116 : vector<1x512xf32> to vector<16x512xf32>
    %118 = arith.mulf %113, %117 : vector<16x512xf32>
    %119 = arith.addf %112, %118 : vector<16x512xf32>
    %120 = vector.extract_strided_slice %105 {offsets = [0, 96], sizes = [16, 512], strides = [1, 1]} : vector<16x768xf32> to vector<16x512xf32>
    %121 = vector.extract_strided_slice %0 {offsets = [2, 2, 0], sizes = [1, 1, 512], strides = [1, 1, 1]} : vector<7x7x512xf32> to vector<1x1x512xf32>
    %122 = vector.shape_cast %121 : vector<1x1x512xf32> to vector<512xf32>
    %123 = vector.shape_cast %122 : vector<512xf32> to vector<1x512xf32>
    %124 = vector.broadcast %123 : vector<1x512xf32> to vector<16x512xf32>
    %125 = arith.mulf %120, %124 : vector<16x512xf32>
    %126 = arith.addf %119, %125 : vector<16x512xf32>
    %127 = vector.extract_strided_slice %105 {offsets = [0, 128], sizes = [16, 512], strides = [1, 1]} : vector<16x768xf32> to vector<16x512xf32>
    %128 = vector.extract_strided_slice %0 {offsets = [2, 3, 0], sizes = [1, 1, 512], strides = [1, 1, 1]} : vector<7x7x512xf32> to vector<1x1x512xf32>
    %129 = vector.shape_cast %128 : vector<1x1x512xf32> to vector<512xf32>
    %130 = vector.shape_cast %129 : vector<512xf32> to vector<1x512xf32>
    %131 = vector.broadcast %130 : vector<1x512xf32> to vector<16x512xf32>
    %132 = arith.mulf %127, %131 : vector<16x512xf32>
    %133 = arith.addf %126, %132 : vector<16x512xf32>
    %134 = vector.extract_strided_slice %105 {offsets = [0, 160], sizes = [16, 512], strides = [1, 1]} : vector<16x768xf32> to vector<16x512xf32>
    %135 = vector.extract_strided_slice %0 {offsets = [2, 4, 0], sizes = [1, 1, 512], strides = [1, 1, 1]} : vector<7x7x512xf32> to vector<1x1x512xf32>
    %136 = vector.shape_cast %135 : vector<1x1x512xf32> to vector<512xf32>
    %137 = vector.shape_cast %136 : vector<512xf32> to vector<1x512xf32>
    %138 = vector.broadcast %137 : vector<1x512xf32> to vector<16x512xf32>
    %139 = arith.mulf %134, %138 : vector<16x512xf32>
    %140 = arith.addf %133, %139 : vector<16x512xf32>
    %141 = vector.extract_strided_slice %105 {offsets = [0, 192], sizes = [16, 512], strides = [1, 1]} : vector<16x768xf32> to vector<16x512xf32>
    %142 = vector.extract_strided_slice %0 {offsets = [2, 5, 0], sizes = [1, 1, 512], strides = [1, 1, 1]} : vector<7x7x512xf32> to vector<1x1x512xf32>
    %143 = vector.shape_cast %142 : vector<1x1x512xf32> to vector<512xf32>
    %144 = vector.shape_cast %143 : vector<512xf32> to vector<1x512xf32>
    %145 = vector.broadcast %144 : vector<1x512xf32> to vector<16x512xf32>
    %146 = arith.mulf %141, %145 : vector<16x512xf32>
    %147 = arith.addf %140, %146 : vector<16x512xf32>
    %148 = vector.extract_strided_slice %105 {offsets = [0, 224], sizes = [16, 512], strides = [1, 1]} : vector<16x768xf32> to vector<16x512xf32>
    %149 = vector.extract_strided_slice %0 {offsets = [2, 6, 0], sizes = [1, 1, 512], strides = [1, 1, 1]} : vector<7x7x512xf32> to vector<1x1x512xf32>
    %150 = vector.shape_cast %149 : vector<1x1x512xf32> to vector<512xf32>
    %151 = vector.shape_cast %150 : vector<512xf32> to vector<1x512xf32>
    %152 = vector.broadcast %151 : vector<1x512xf32> to vector<16x512xf32>
    %153 = arith.mulf %148, %152 : vector<16x512xf32>
    %154 = arith.addf %147, %153 : vector<16x512xf32>
    %c0_9 = arith.constant 0 : index
    %c3 = arith.constant 3 : index
    %c0_10 = arith.constant 0 : index
    %155 = vector.load %arg1[%c0_9, %c3, %c0_10] : memref<1x22x768xf32, #tpu.memory_space<vmem>>, vector<1x16x768xf32>
    %156 = vector.shape_cast %155 : vector<1x16x768xf32> to vector<16x768xf32>
    %157 = vector.extract_strided_slice %156 {offsets = [0, 32], sizes = [16, 512], strides = [1, 1]} : vector<16x768xf32> to vector<16x512xf32>
    %158 = vector.extract_strided_slice %0 {offsets = [3, 0, 0], sizes = [1, 1, 512], strides = [1, 1, 1]} : vector<7x7x512xf32> to vector<1x1x512xf32>
    %159 = vector.shape_cast %158 : vector<1x1x512xf32> to vector<512xf32>
    %160 = vector.shape_cast %159 : vector<512xf32> to vector<1x512xf32>
    %161 = vector.broadcast %160 : vector<1x512xf32> to vector<16x512xf32>
    %162 = arith.mulf %157, %161 : vector<16x512xf32>
    %163 = arith.addf %154, %162 : vector<16x512xf32>
    %164 = vector.extract_strided_slice %156 {offsets = [0, 64], sizes = [16, 512], strides = [1, 1]} : vector<16x768xf32> to vector<16x512xf32>
    %165 = vector.extract_strided_slice %0 {offsets = [3, 1, 0], sizes = [1, 1, 512], strides = [1, 1, 1]} : vector<7x7x512xf32> to vector<1x1x512xf32>
    %166 = vector.shape_cast %165 : vector<1x1x512xf32> to vector<512xf32>
    %167 = vector.shape_cast %166 : vector<512xf32> to vector<1x512xf32>
    %168 = vector.broadcast %167 : vector<1x512xf32> to vector<16x512xf32>
    %169 = arith.mulf %164, %168 : vector<16x512xf32>
    %170 = arith.addf %163, %169 : vector<16x512xf32>
    %171 = vector.extract_strided_slice %156 {offsets = [0, 96], sizes = [16, 512], strides = [1, 1]} : vector<16x768xf32> to vector<16x512xf32>
    %172 = vector.extract_strided_slice %0 {offsets = [3, 2, 0], sizes = [1, 1, 512], strides = [1, 1, 1]} : vector<7x7x512xf32> to vector<1x1x512xf32>
    %173 = vector.shape_cast %172 : vector<1x1x512xf32> to vector<512xf32>
    %174 = vector.shape_cast %173 : vector<512xf32> to vector<1x512xf32>
    %175 = vector.broadcast %174 : vector<1x512xf32> to vector<16x512xf32>
    %176 = arith.mulf %171, %175 : vector<16x512xf32>
    %177 = arith.addf %170, %176 : vector<16x512xf32>
    %178 = vector.extract_strided_slice %156 {offsets = [0, 128], sizes = [16, 512], strides = [1, 1]} : vector<16x768xf32> to vector<16x512xf32>
    %179 = vector.extract_strided_slice %0 {offsets = [3, 3, 0], sizes = [1, 1, 512], strides = [1, 1, 1]} : vector<7x7x512xf32> to vector<1x1x512xf32>
    %180 = vector.shape_cast %179 : vector<1x1x512xf32> to vector<512xf32>
    %181 = vector.shape_cast %180 : vector<512xf32> to vector<1x512xf32>
    %182 = vector.broadcast %181 : vector<1x512xf32> to vector<16x512xf32>
    %183 = arith.mulf %178, %182 : vector<16x512xf32>
    %184 = arith.addf %177, %183 : vector<16x512xf32>
    %185 = vector.extract_strided_slice %156 {offsets = [0, 160], sizes = [16, 512], strides = [1, 1]} : vector<16x768xf32> to vector<16x512xf32>
    %186 = vector.extract_strided_slice %0 {offsets = [3, 4, 0], sizes = [1, 1, 512], strides = [1, 1, 1]} : vector<7x7x512xf32> to vector<1x1x512xf32>
    %187 = vector.shape_cast %186 : vector<1x1x512xf32> to vector<512xf32>
    %188 = vector.shape_cast %187 : vector<512xf32> to vector<1x512xf32>
    %189 = vector.broadcast %188 : vector<1x512xf32> to vector<16x512xf32>
    %190 = arith.mulf %185, %189 : vector<16x512xf32>
    %191 = arith.addf %184, %190 : vector<16x512xf32>
    %192 = vector.extract_strided_slice %156 {offsets = [0, 192], sizes = [16, 512], strides = [1, 1]} : vector<16x768xf32> to vector<16x512xf32>
    %193 = vector.extract_strided_slice %0 {offsets = [3, 5, 0], sizes = [1, 1, 512], strides = [1, 1, 1]} : vector<7x7x512xf32> to vector<1x1x512xf32>
    %194 = vector.shape_cast %193 : vector<1x1x512xf32> to vector<512xf32>
    %195 = vector.shape_cast %194 : vector<512xf32> to vector<1x512xf32>
    %196 = vector.broadcast %195 : vector<1x512xf32> to vector<16x512xf32>
    %197 = arith.mulf %192, %196 : vector<16x512xf32>
    %198 = arith.addf %191, %197 : vector<16x512xf32>
    %199 = vector.extract_strided_slice %156 {offsets = [0, 224], sizes = [16, 512], strides = [1, 1]} : vector<16x768xf32> to vector<16x512xf32>
    %200 = vector.extract_strided_slice %0 {offsets = [3, 6, 0], sizes = [1, 1, 512], strides = [1, 1, 1]} : vector<7x7x512xf32> to vector<1x1x512xf32>
    %201 = vector.shape_cast %200 : vector<1x1x512xf32> to vector<512xf32>
    %202 = vector.shape_cast %201 : vector<512xf32> to vector<1x512xf32>
    %203 = vector.broadcast %202 : vector<1x512xf32> to vector<16x512xf32>
    %204 = arith.mulf %199, %203 : vector<16x512xf32>
    %205 = arith.addf %198, %204 : vector<16x512xf32>
    %c0_11 = arith.constant 0 : index
    %c4 = arith.constant 4 : index
    %c0_12 = arith.constant 0 : index
    %206 = vector.load %arg1[%c0_11, %c4, %c0_12] : memref<1x22x768xf32, #tpu.memory_space<vmem>>, vector<1x16x768xf32>
    %207 = vector.shape_cast %206 : vector<1x16x768xf32> to vector<16x768xf32>
    %208 = vector.extract_strided_slice %207 {offsets = [0, 32], sizes = [16, 512], strides = [1, 1]} : vector<16x768xf32> to vector<16x512xf32>
    %209 = vector.extract_strided_slice %0 {offsets = [4, 0, 0], sizes = [1, 1, 512], strides = [1, 1, 1]} : vector<7x7x512xf32> to vector<1x1x512xf32>
    %210 = vector.shape_cast %209 : vector<1x1x512xf32> to vector<512xf32>
    %211 = vector.shape_cast %210 : vector<512xf32> to vector<1x512xf32>
    %212 = vector.broadcast %211 : vector<1x512xf32> to vector<16x512xf32>
    %213 = arith.mulf %208, %212 : vector<16x512xf32>
    %214 = arith.addf %205, %213 : vector<16x512xf32>
    %215 = vector.extract_strided_slice %207 {offsets = [0, 64], sizes = [16, 512], strides = [1, 1]} : vector<16x768xf32> to vector<16x512xf32>
    %216 = vector.extract_strided_slice %0 {offsets = [4, 1, 0], sizes = [1, 1, 512], strides = [1, 1, 1]} : vector<7x7x512xf32> to vector<1x1x512xf32>
    %217 = vector.shape_cast %216 : vector<1x1x512xf32> to vector<512xf32>
    %218 = vector.shape_cast %217 : vector<512xf32> to vector<1x512xf32>
    %219 = vector.broadcast %218 : vector<1x512xf32> to vector<16x512xf32>
    %220 = arith.mulf %215, %219 : vector<16x512xf32>
    %221 = arith.addf %214, %220 : vector<16x512xf32>
    %222 = vector.extract_strided_slice %207 {offsets = [0, 96], sizes = [16, 512], strides = [1, 1]} : vector<16x768xf32> to vector<16x512xf32>
    %223 = vector.extract_strided_slice %0 {offsets = [4, 2, 0], sizes = [1, 1, 512], strides = [1, 1, 1]} : vector<7x7x512xf32> to vector<1x1x512xf32>
    %224 = vector.shape_cast %223 : vector<1x1x512xf32> to vector<512xf32>
    %225 = vector.shape_cast %224 : vector<512xf32> to vector<1x512xf32>
    %226 = vector.broadcast %225 : vector<1x512xf32> to vector<16x512xf32>
    %227 = arith.mulf %222, %226 : vector<16x512xf32>
    %228 = arith.addf %221, %227 : vector<16x512xf32>
    %229 = vector.extract_strided_slice %207 {offsets = [0, 128], sizes = [16, 512], strides = [1, 1]} : vector<16x768xf32> to vector<16x512xf32>
    %230 = vector.extract_strided_slice %0 {offsets = [4, 3, 0], sizes = [1, 1, 512], strides = [1, 1, 1]} : vector<7x7x512xf32> to vector<1x1x512xf32>
    %231 = vector.shape_cast %230 : vector<1x1x512xf32> to vector<512xf32>
    %232 = vector.shape_cast %231 : vector<512xf32> to vector<1x512xf32>
    %233 = vector.broadcast %232 : vector<1x512xf32> to vector<16x512xf32>
    %234 = arith.mulf %229, %233 : vector<16x512xf32>
    %235 = arith.addf %228, %234 : vector<16x512xf32>
    %236 = vector.extract_strided_slice %207 {offsets = [0, 160], sizes = [16, 512], strides = [1, 1]} : vector<16x768xf32> to vector<16x512xf32>
    %237 = vector.extract_strided_slice %0 {offsets = [4, 4, 0], sizes = [1, 1, 512], strides = [1, 1, 1]} : vector<7x7x512xf32> to vector<1x1x512xf32>
    %238 = vector.shape_cast %237 : vector<1x1x512xf32> to vector<512xf32>
    %239 = vector.shape_cast %238 : vector<512xf32> to vector<1x512xf32>
    %240 = vector.broadcast %239 : vector<1x512xf32> to vector<16x512xf32>
    %241 = arith.mulf %236, %240 : vector<16x512xf32>
    %242 = arith.addf %235, %241 : vector<16x512xf32>
    %243 = vector.extract_strided_slice %207 {offsets = [0, 192], sizes = [16, 512], strides = [1, 1]} : vector<16x768xf32> to vector<16x512xf32>
    %244 = vector.extract_strided_slice %0 {offsets = [4, 5, 0], sizes = [1, 1, 512], strides = [1, 1, 1]} : vector<7x7x512xf32> to vector<1x1x512xf32>
    %245 = vector.shape_cast %244 : vector<1x1x512xf32> to vector<512xf32>
    %246 = vector.shape_cast %245 : vector<512xf32> to vector<1x512xf32>
    %247 = vector.broadcast %246 : vector<1x512xf32> to vector<16x512xf32>
    %248 = arith.mulf %243, %247 : vector<16x512xf32>
    %249 = arith.addf %242, %248 : vector<16x512xf32>
    %250 = vector.extract_strided_slice %207 {offsets = [0, 224], sizes = [16, 512], strides = [1, 1]} : vector<16x768xf32> to vector<16x512xf32>
    %251 = vector.extract_strided_slice %0 {offsets = [4, 6, 0], sizes = [1, 1, 512], strides = [1, 1, 1]} : vector<7x7x512xf32> to vector<1x1x512xf32>
    %252 = vector.shape_cast %251 : vector<1x1x512xf32> to vector<512xf32>
    %253 = vector.shape_cast %252 : vector<512xf32> to vector<1x512xf32>
    %254 = vector.broadcast %253 : vector<1x512xf32> to vector<16x512xf32>
    %255 = arith.mulf %250, %254 : vector<16x512xf32>
    %256 = arith.addf %249, %255 : vector<16x512xf32>
    %c0_13 = arith.constant 0 : index
    %c5 = arith.constant 5 : index
    %c0_14 = arith.constant 0 : index
    %257 = vector.load %arg1[%c0_13, %c5, %c0_14] : memref<1x22x768xf32, #tpu.memory_space<vmem>>, vector<1x16x768xf32>
    %258 = vector.shape_cast %257 : vector<1x16x768xf32> to vector<16x768xf32>
    %259 = vector.extract_strided_slice %258 {offsets = [0, 32], sizes = [16, 512], strides = [1, 1]} : vector<16x768xf32> to vector<16x512xf32>
    %260 = vector.extract_strided_slice %0 {offsets = [5, 0, 0], sizes = [1, 1, 512], strides = [1, 1, 1]} : vector<7x7x512xf32> to vector<1x1x512xf32>
    %261 = vector.shape_cast %260 : vector<1x1x512xf32> to vector<512xf32>
    %262 = vector.shape_cast %261 : vector<512xf32> to vector<1x512xf32>
    %263 = vector.broadcast %262 : vector<1x512xf32> to vector<16x512xf32>
    %264 = arith.mulf %259, %263 : vector<16x512xf32>
    %265 = arith.addf %256, %264 : vector<16x512xf32>
    %266 = vector.extract_strided_slice %258 {offsets = [0, 64], sizes = [16, 512], strides = [1, 1]} : vector<16x768xf32> to vector<16x512xf32>
    %267 = vector.extract_strided_slice %0 {offsets = [5, 1, 0], sizes = [1, 1, 512], strides = [1, 1, 1]} : vector<7x7x512xf32> to vector<1x1x512xf32>
    %268 = vector.shape_cast %267 : vector<1x1x512xf32> to vector<512xf32>
    %269 = vector.shape_cast %268 : vector<512xf32> to vector<1x512xf32>
    %270 = vector.broadcast %269 : vector<1x512xf32> to vector<16x512xf32>
    %271 = arith.mulf %266, %270 : vector<16x512xf32>
    %272 = arith.addf %265, %271 : vector<16x512xf32>
    %273 = vector.extract_strided_slice %258 {offsets = [0, 96], sizes = [16, 512], strides = [1, 1]} : vector<16x768xf32> to vector<16x512xf32>
    %274 = vector.extract_strided_slice %0 {offsets = [5, 2, 0], sizes = [1, 1, 512], strides = [1, 1, 1]} : vector<7x7x512xf32> to vector<1x1x512xf32>
    %275 = vector.shape_cast %274 : vector<1x1x512xf32> to vector<512xf32>
    %276 = vector.shape_cast %275 : vector<512xf32> to vector<1x512xf32>
    %277 = vector.broadcast %276 : vector<1x512xf32> to vector<16x512xf32>
    %278 = arith.mulf %273, %277 : vector<16x512xf32>
    %279 = arith.addf %272, %278 : vector<16x512xf32>
    %280 = vector.extract_strided_slice %258 {offsets = [0, 128], sizes = [16, 512], strides = [1, 1]} : vector<16x768xf32> to vector<16x512xf32>
    %281 = vector.extract_strided_slice %0 {offsets = [5, 3, 0], sizes = [1, 1, 512], strides = [1, 1, 1]} : vector<7x7x512xf32> to vector<1x1x512xf32>
    %282 = vector.shape_cast %281 : vector<1x1x512xf32> to vector<512xf32>
    %283 = vector.shape_cast %282 : vector<512xf32> to vector<1x512xf32>
    %284 = vector.broadcast %283 : vector<1x512xf32> to vector<16x512xf32>
    %285 = arith.mulf %280, %284 : vector<16x512xf32>
    %286 = arith.addf %279, %285 : vector<16x512xf32>
    %287 = vector.extract_strided_slice %258 {offsets = [0, 160], sizes = [16, 512], strides = [1, 1]} : vector<16x768xf32> to vector<16x512xf32>
    %288 = vector.extract_strided_slice %0 {offsets = [5, 4, 0], sizes = [1, 1, 512], strides = [1, 1, 1]} : vector<7x7x512xf32> to vector<1x1x512xf32>
    %289 = vector.shape_cast %288 : vector<1x1x512xf32> to vector<512xf32>
    %290 = vector.shape_cast %289 : vector<512xf32> to vector<1x512xf32>
    %291 = vector.broadcast %290 : vector<1x512xf32> to vector<16x512xf32>
    %292 = arith.mulf %287, %291 : vector<16x512xf32>
    %293 = arith.addf %286, %292 : vector<16x512xf32>
    %294 = vector.extract_strided_slice %258 {offsets = [0, 192], sizes = [16, 512], strides = [1, 1]} : vector<16x768xf32> to vector<16x512xf32>
    %295 = vector.extract_strided_slice %0 {offsets = [5, 5, 0], sizes = [1, 1, 512], strides = [1, 1, 1]} : vector<7x7x512xf32> to vector<1x1x512xf32>
    %296 = vector.shape_cast %295 : vector<1x1x512xf32> to vector<512xf32>
    %297 = vector.shape_cast %296 : vector<512xf32> to vector<1x512xf32>
    %298 = vector.broadcast %297 : vector<1x512xf32> to vector<16x512xf32>
    %299 = arith.mulf %294, %298 : vector<16x512xf32>
    %300 = arith.addf %293, %299 : vector<16x512xf32>
    %301 = vector.extract_strided_slice %258 {offsets = [0, 224], sizes = [16, 512], strides = [1, 1]} : vector<16x768xf32> to vector<16x512xf32>
    %302 = vector.extract_strided_slice %0 {offsets = [5, 6, 0], sizes = [1, 1, 512], strides = [1, 1, 1]} : vector<7x7x512xf32> to vector<1x1x512xf32>
    %303 = vector.shape_cast %302 : vector<1x1x512xf32> to vector<512xf32>
    %304 = vector.shape_cast %303 : vector<512xf32> to vector<1x512xf32>
    %305 = vector.broadcast %304 : vector<1x512xf32> to vector<16x512xf32>
    %306 = arith.mulf %301, %305 : vector<16x512xf32>
    %307 = arith.addf %300, %306 : vector<16x512xf32>
    %c0_15 = arith.constant 0 : index
    %c6 = arith.constant 6 : index
    %c0_16 = arith.constant 0 : index
    %308 = vector.load %arg1[%c0_15, %c6, %c0_16] : memref<1x22x768xf32, #tpu.memory_space<vmem>>, vector<1x16x768xf32>
    %309 = vector.shape_cast %308 : vector<1x16x768xf32> to vector<16x768xf32>
    %310 = vector.extract_strided_slice %309 {offsets = [0, 32], sizes = [16, 512], strides = [1, 1]} : vector<16x768xf32> to vector<16x512xf32>
    %311 = vector.extract_strided_slice %0 {offsets = [6, 0, 0], sizes = [1, 1, 512], strides = [1, 1, 1]} : vector<7x7x512xf32> to vector<1x1x512xf32>
    %312 = vector.shape_cast %311 : vector<1x1x512xf32> to vector<512xf32>
    %313 = vector.shape_cast %312 : vector<512xf32> to vector<1x512xf32>
    %314 = vector.broadcast %313 : vector<1x512xf32> to vector<16x512xf32>
    %315 = arith.mulf %310, %314 : vector<16x512xf32>
    %316 = arith.addf %307, %315 : vector<16x512xf32>
    %317 = vector.extract_strided_slice %309 {offsets = [0, 64], sizes = [16, 512], strides = [1, 1]} : vector<16x768xf32> to vector<16x512xf32>
    %318 = vector.extract_strided_slice %0 {offsets = [6, 1, 0], sizes = [1, 1, 512], strides = [1, 1, 1]} : vector<7x7x512xf32> to vector<1x1x512xf32>
    %319 = vector.shape_cast %318 : vector<1x1x512xf32> to vector<512xf32>
    %320 = vector.shape_cast %319 : vector<512xf32> to vector<1x512xf32>
    %321 = vector.broadcast %320 : vector<1x512xf32> to vector<16x512xf32>
    %322 = arith.mulf %317, %321 : vector<16x512xf32>
    %323 = arith.addf %316, %322 : vector<16x512xf32>
    %324 = vector.extract_strided_slice %309 {offsets = [0, 96], sizes = [16, 512], strides = [1, 1]} : vector<16x768xf32> to vector<16x512xf32>
    %325 = vector.extract_strided_slice %0 {offsets = [6, 2, 0], sizes = [1, 1, 512], strides = [1, 1, 1]} : vector<7x7x512xf32> to vector<1x1x512xf32>
    %326 = vector.shape_cast %325 : vector<1x1x512xf32> to vector<512xf32>
    %327 = vector.shape_cast %326 : vector<512xf32> to vector<1x512xf32>
    %328 = vector.broadcast %327 : vector<1x512xf32> to vector<16x512xf32>
    %329 = arith.mulf %324, %328 : vector<16x512xf32>
    %330 = arith.addf %323, %329 : vector<16x512xf32>
    %331 = vector.extract_strided_slice %309 {offsets = [0, 128], sizes = [16, 512], strides = [1, 1]} : vector<16x768xf32> to vector<16x512xf32>
    %332 = vector.extract_strided_slice %0 {offsets = [6, 3, 0], sizes = [1, 1, 512], strides = [1, 1, 1]} : vector<7x7x512xf32> to vector<1x1x512xf32>
    %333 = vector.shape_cast %332 : vector<1x1x512xf32> to vector<512xf32>
    %334 = vector.shape_cast %333 : vector<512xf32> to vector<1x512xf32>
    %335 = vector.broadcast %334 : vector<1x512xf32> to vector<16x512xf32>
    %336 = arith.mulf %331, %335 : vector<16x512xf32>
    %337 = arith.addf %330, %336 : vector<16x512xf32>
    %338 = vector.extract_strided_slice %309 {offsets = [0, 160], sizes = [16, 512], strides = [1, 1]} : vector<16x768xf32> to vector<16x512xf32>
    %339 = vector.extract_strided_slice %0 {offsets = [6, 4, 0], sizes = [1, 1, 512], strides = [1, 1, 1]} : vector<7x7x512xf32> to vector<1x1x512xf32>
    %340 = vector.shape_cast %339 : vector<1x1x512xf32> to vector<512xf32>
    %341 = vector.shape_cast %340 : vector<512xf32> to vector<1x512xf32>
    %342 = vector.broadcast %341 : vector<1x512xf32> to vector<16x512xf32>
    %343 = arith.mulf %338, %342 : vector<16x512xf32>
    %344 = arith.addf %337, %343 : vector<16x512xf32>
    %345 = vector.extract_strided_slice %309 {offsets = [0, 192], sizes = [16, 512], strides = [1, 1]} : vector<16x768xf32> to vector<16x512xf32>
    %346 = vector.extract_strided_slice %0 {offsets = [6, 5, 0], sizes = [1, 1, 512], strides = [1, 1, 1]} : vector<7x7x512xf32> to vector<1x1x512xf32>
    %347 = vector.shape_cast %346 : vector<1x1x512xf32> to vector<512xf32>
    %348 = vector.shape_cast %347 : vector<512xf32> to vector<1x512xf32>
    %349 = vector.broadcast %348 : vector<1x512xf32> to vector<16x512xf32>
    %350 = arith.mulf %345, %349 : vector<16x512xf32>
    %351 = arith.addf %344, %350 : vector<16x512xf32>
    %352 = vector.extract_strided_slice %309 {offsets = [0, 224], sizes = [16, 512], strides = [1, 1]} : vector<16x768xf32> to vector<16x512xf32>
    %353 = vector.extract_strided_slice %0 {offsets = [6, 6, 0], sizes = [1, 1, 512], strides = [1, 1, 1]} : vector<7x7x512xf32> to vector<1x1x512xf32>
    %354 = vector.shape_cast %353 : vector<1x1x512xf32> to vector<512xf32>
    %355 = vector.shape_cast %354 : vector<512xf32> to vector<1x512xf32>
    %356 = vector.broadcast %355 : vector<1x512xf32> to vector<16x512xf32>
    %357 = arith.mulf %352, %356 : vector<16x512xf32>
    %358 = arith.addf %351, %357 : vector<16x512xf32>
    %c0_17 = arith.constant 0 : index
    %c0_18 = arith.constant 0 : index
    %359 = vector.load %arg3[%c0_17, %c0_18] : memref<1x512xf32, #tpu.memory_space<vmem>>, vector<1x512xf32>
    %360 = vector.broadcast %359 : vector<1x512xf32> to vector<16x512xf32>
    %361 = arith.addf %358, %360 : vector<16x512xf32>
    %362 = vector.shape_cast %361 : vector<16x512xf32> to vector<1x16x512xf32>
    %c0_19 = arith.constant 0 : index
    %c0_20 = arith.constant 0 : index
    %c0_21 = arith.constant 0 : index
    %363 = vector.load %arg4[%c0_19, %c0_20, %c0_21] : memref<1x16x512xf32, #tpu.memory_space<vmem>>, vector<1x16x512xf32>
    tpu.vector_store %arg4[%c0_19, %c0_20, %c0_21], %362 {strides = array<i32>} : memref<1x16x512xf32, #tpu.memory_space<vmem>>, vector<1x16x512xf32>,
    %cst_22 = arith.constant dense<0.000000e+00> : vector<512xf32>
    %364 = vector.multi_reduction <add>, %361, %cst_22 [0] : vector<16x512xf32> to vector<512xf32>
    %365 = vector.shape_cast %364 : vector<512xf32> to vector<1x512xf32>
    %366 = vector.shape_cast %365 : vector<1x512xf32> to vector<1x1x512xf32>
    %c0_23 = arith.constant 0 : index
    %c0_24 = arith.constant 0 : index
    %c0_25 = arith.constant 0 : index
    %367 = vector.load %arg5[%c0_23, %c0_24, %c0_25] : memref<1x2x512xf32, #tpu.memory_space<vmem>>, vector<1x1x512xf32>
    tpu.vector_store %arg5[%c0_23, %c0_24, %c0_25], %366 {strides = array<i32>} : memref<1x2x512xf32, #tpu.memory_space<vmem>>, vector<1x1x512xf32>,
    %368 = arith.mulf %361, %361 : vector<16x512xf32>
    %cst_26 = arith.constant dense<0.000000e+00> : vector<512xf32>
    %369 = vector.multi_reduction <add>, %368, %cst_26 [0] : vector<16x512xf32> to vector<512xf32>
    %370 = vector.shape_cast %369 : vector<512xf32> to vector<1x512xf32>
    %371 = vector.shape_cast %370 : vector<1x512xf32> to vector<1x1x512xf32>
    %c0_27 = arith.constant 0 : index
    %c1_28 = arith.constant 1 : index
    %c0_29 = arith.constant 0 : index
    %372 = vector.load %arg5[%c0_27, %c1_28, %c0_29] : memref<1x2x512xf32, #tpu.memory_space<vmem>>, vector<1x1x512xf32>
    tpu.vector_store %arg5[%c0_27, %c1_28, %c0_29], %371 {strides = array<i32>} : memref<1x2x512xf32, #tpu.memory_space<vmem>>, vector<1x1x512xf32>,
    return
  }
  func.func @transform_0(%arg0: i32) -> (i32, i32, i32) {
    %c0_i32 = arith.constant 0 : i32
    %c0_i32_0 = arith.constant 0 : i32
    %c0_i32_1 = arith.constant 0 : i32
    return %arg0, %c0_i32, %c0_i32_0 : i32, i32, i32
  }
  func.func @transform_1(%arg0: i32) -> (i32, i32, i32) {
    %c0_i32 = arith.constant 0 : i32
    %c0_i32_0 = arith.constant 0 : i32
    %c0_i32_1 = arith.constant 0 : i32
    %c0_i32_2 = arith.constant 0 : i32
    return %c0_i32, %c0_i32_0, %c0_i32_1 : i32, i32, i32
  }
  func.func @transform_2(%arg0: i32) -> (i32, i32) {
    %c0_i32 = arith.constant 0 : i32
    %c0_i32_0 = arith.constant 0 : i32
    %c0_i32_1 = arith.constant 0 : i32
    return %c0_i32, %c0_i32_0 : i32, i32
  }
  func.func @transform_3(%arg0: i32) -> (i32, i32, i32) {
    %c0_i32 = arith.constant 0 : i32
    %c0_i32_0 = arith.constant 0 : i32
    %c0_i32_1 = arith.constant 0 : i32
    return %arg0, %c0_i32, %c0_i32_0 : i32, i32, i32
  }
  func.func @transform_4(%arg0: i32) -> (i32, i32, i32) {
    %c0_i32 = arith.constant 0 : i32
    %c0_i32_0 = arith.constant 0 : i32
    %c0_i32_1 = arith.constant 0 : i32
    return %arg0, %c0_i32, %c0_i32_0 : i32, i32, i32
  }
}

</mosaic_0001>

<bundles_post_ra>
// kernel: tpu_custom_call.1
= control target key start
LH: loop header
LB: loop body
LE: loop exit
PB: predicated region body
PF: predicated region fallthrough
CT: control target
= control target key end

     0   :  { %10 = vsyncpa [#allocation3], 0  ;;  %s12381_s0 = inlined_call_operand.vmem [shape: f32[2,22,768], index: 0, kind: input, shape index: {}]   ;;  %s12382_s1 = inlined_call_operand.vmem [shape: f32[7,7,512], index: 1, kind: input, shape index: {}]   ;;  %s12383_s2 = inlined_call_operand.vmem [shape: f32[1,512], index: 2, kind: input, shape index: {}]   ;;  %s12384_s3 = inlined_call_operand.hbm [shape: f32[2,16,512], index: 3, kind: output, shape index: {0}]   ;;  %s12385_s4 = inlined_call_operand.hbm [shape: f32[2,2,512], index: 4, kind: output, shape index: {1}]  }
   0x1   :  { %12 = vsyncpa [#allocation3 + $0x1], 0 }
   0x2   :  { %13 = vsyncpa [#allocation5], 0 }
   0x3   :  { %15 = vsyncpa [#allocation5 + $0x1], 0  ;;  %s6945_s15 = smov 0   ;;  %s6947_s16 = smov 0  }
   0x4   :  { %s6949_s17 = smov 0   ;;  %s6951_s18 = smov 0  }
   0x5 LB: > { %s6966_s19 = sadd.s32 4294967295, %s6911_s18   ;;  %s6629_s20 = sadd.s32 4294967294, %s6911_s18   ;;  %s6911_s18 = sphi %s6951_s18, %s13419_s18   ;;  %s6907_s17 = sphi %s6949_s17, %s13418_s17   ;;  %s6903_s16 = sphi %s6947_s16, %s13417_s16   ;;  %s6899_s15 = sphi %s6945_s15, %s13416_s15  }
   0x6   : > { %s6970_s21 = sadd.s32 1, %s6911_s18   ;;  %s96_s22 = sadd.s32 1, %s6907_s17 }
   0x7   : > { %s93_s23 = ssub.s32 %s6911_s18, %s6970_s21  ;;  %p106_p0 = scmp.ne.s32.totalorder %s6907_s17, %s6903_s16 }
   0x8   : > { %p94_p1 = scmp.eq.s32.totalorder %s93_s23, 0  ;;  %p107_p2 = scmp.eq.s32.totalorder %s6966_s19, 1 }
   0x9   : > { %p112_p3 = scmp.ne.s32.totalorder %s6903_s16, %s6899_s15  ;;  %p113_p4 = scmp.eq.s32.totalorder %s6629_s20, 1 }
   0xa   : > { %s6981_s24 = scalar_select %p94_p1, %s6907_s17, %s96_s22  }
   0xb   : > { %p6983_p5 = por %p107_p2, %p106_p0  ;;  %p6987_p6 = por %p113_p4, %p112_p3 }
   0xc   : > { %p6632_p7 = scmp.ge.s32.totalorder %s6911_s18, 1  ;;  %p171_p8 = scmp.lt.s32.totalorder %s6911_s18, 3 }
   0xe   : > { %p172_p9 = pnand %p6632_p7, %p171_p8 }
  0x10   : > { %175 = sbr.rel (%p172_p9) target bundleno = 3557 (0xde5), region = 32 }
  0x17   : > { %v12386_v0 = vlaneseq  ;;  %v6999_v2 = vld [vmem:[%s12382_s1 + $0x10] sm:$0x7f]  ;;  %v7004_v3 = vld [vmem:[%s12382_s1] sm:$0x7f]  ;;  %v7012_v5 = vld [vmem:[%s12382_s1 + $0x18] sm:$0x7f] }
  0x18   : > { %v7017_v6 = vld [vmem:[%s12382_s1 + $0x8] sm:$0x7f]  ;;  %s6913_s9 = smov 32   ;;  %p202_p10 = scmp.lt.s32.totalorder %s6966_s19, 1  ;;  %vm332_vm0 = vcmask 523264   ;;  %vm381_vm1 = vcmask 785408  }
  0x19   : > { %v6994_v1 = vshrl.u32 %v12386_v0, 7  ;;  %s6914_s11 = smov 64   ;;  %s6915_s22 = smov 96   ;;  %vm930_vm2 = vcmask 1046528   ;;  %vm1823_vm3 = vcmask 1045504   ;;  %vm2716_vm4 = vcmask 1044480  }
  0x1a   : > { %s203_s10 = scalar_select %p202_p10, %s6966_s19, 1  ;;  %vm3609_vm5 = vcmask 1043456   ;;  %vm4502_vm6 = vcmask 1042432   ;;  %vm275_vm7 = vcmask 261120   ;;  %vm5395_vm8 = vcmask 1041408  }
  0x1b   : > { %12708 = vst [vmem:[#allocation8_spill] sm:$0xff] %v6994_v1  ;;  %v7007_v4 = vsub.s32 0, %v6994_v1  ;;  %v7030_v11 = vsub.s32 1, %v6994_v1  ;;  %v7047_v16 = vsub.s32 2, %v6994_v1  ;;  %v7056_v19 = vsub.s32 3, %v6994_v1  ;;  %s6646_s28 = sshll.u32 %s6966_s19, 7 }
  0x1c   : > { %s6647_s12 = smul.u32 144, %s203_s10  ;;  %v7118_v42 = vsub.s32 4, %v6994_v1  ;;  %v7133_v47 = vsub.s32 5, %v6994_v1  ;;  %v7148_v52 = vsub.s32 6, %v6994_v1  ;;  %vm6308_vm9 = vcmask 1047808   ;;  %s12294_s6 = scalar_lea.hbm %s12385_s4, %s6646_s28 }
  0x1d   : > { %12709 = vst [vmem:[#allocation9_spill] sm:$0xff] %v7007_v4  ;;  %v258_v7 = vrot.slane %v6999_v2, %v7007_v4  ;;  %v250_v8 = vrot.slane %v7004_v3, %v7007_v4  ;;  %v262_v9 = vrot.slane %v7012_v5, %v7007_v4  ;;  %v254_v10 = vrot.slane %v7017_v6, %v7007_v4  ;;  %s6917_s10 = smov [#allocation4]  }
  0x1e   : > { %12710 = vst [vmem:[#allocation10_spill] sm:$0xff] %v7030_v11  ;;  %v311_v12 = vrot.slane %v7017_v6, %v7030_v11  ;;  %v307_v13 = vrot.slane %v7004_v3, %v7030_v11  ;;  %v319_v14 = vrot.slane %v7012_v5, %v7030_v11  ;;  %v315_v15 = vrot.slane %v6999_v2, %v7030_v11  ;;  %s7061_s20 = scalar_lea.vmem %s12381_s0, %s6647_s12  ;;  %s6821_s12 = sshll.u32 %s6917_s10, 4  ;;  %s6822_s12 = int_to_ptr.vmem [resolvable:$false] %s6821_s12 }
  0x1f   : > { %271 = vrot.lane.b32.xlu1 %v258_v7, %s6913_s9  ;;  %267 = vrot.lane.b32.xlu0 %v250_v8, %s6913_s9  ;;  %12711 = vst [vmem:[#allocation11_spill] sm:$0xff] %v7047_v16  ;;  %v417_v17 = vrot.slane %v7017_v6, %v7047_v16  ;;  %v413_v18 = vrot.slane %v7004_v3, %v7047_v16  ;;  %12712 = vst [vmem:[#allocation12_spill] sm:$0xff] %v7056_v19  ;;  %v7074_v24 = vld [vmem:[%s7061_s20 + $0x10] sm:$0xff]  ;;  %v7077_v25 = vld [vmem:[%s7061_s20 + $0x8] sm:$0xff]  ;;  %s6823_s13 = scalar_lea.vmem %s6822_s12, 256 }
  0x20   : > { %v425_v20 = vrot.slane %v7012_v5, %v7047_v16  ;;  %v421_v21 = vrot.slane %v6999_v2, %v7047_v16  ;;  %v521_v22 = vrot.slane %v7017_v6, %v7056_v19  ;;  %v517_v23 = vrot.slane %v7004_v3, %v7056_v19  ;;  %v7088_v30 = vld [vmem:[%s7061_s20 + $0x20] sm:$0xff]  ;;  %v7091_v31 = vld [vmem:[%s7061_s20 + $0x18] sm:$0xff]  ;;  %v7108_v38 = vld [vmem:[%s7061_s20 + $0x50] sm:$0xff]  ;;  %12713 = vst [vmem:[#allocation13_spill] sm:$0xff] %v7118_v42 }
  0x21   : > { %v529_v26 = vrot.slane %v7012_v5, %v7056_v19  ;;  %v525_v29 = vrot.slane %v6999_v2, %v7056_v19  ;;  %v7098_v34 = vld [vmem:[%s7061_s20 + $0x40] sm:$0xff]  ;;  %v7101_v35 = vld [vmem:[%s7061_s20 + $0x38] sm:$0xff]  ;;  %v7111_v39 = vld [vmem:[%s7061_s20 + $0x48] sm:$0xff]  ;;  %v595_v43 = vrot.slane %v7017_v6, %v7118_v42  ;;  %v591_v44 = vrot.slane %v7004_v3, %v7118_v42  ;;  %12714 = vst [vmem:[#allocation14_spill] sm:$0xff] %v7133_v47 }
  0x22   : > { %v531_v27 = vmul.f32 %v521_v22, %v7074_v24  ;;  %v530_v28 = vmul.f32 %v517_v23, %v7077_v25  ;;  %v535_v36 = vmul.f32 %v521_v22, %v7098_v34  ;;  %v534_v37 = vmul.f32 %v517_v23, %v7101_v35  ;;  %12715 = vst [vmem:[#allocation15_spill] sm:$0xff] %v7148_v52  ;;  %v235_v61 = vld [vmem:[%s7061_s20] sm:$0xff]  ;;  %v7174_v62 = vld [vmem:[%s7061_s20 + $0x30] sm:$0xff] }
  0x23   : > { %273 = vrot.lane.b32.xlu1 %v262_v9, %s6913_s9  ;;  %269 = vrot.lane.b32.xlu0 %v254_v10, %s6913_s9  ;;  %v533_v32 = vmul.f32 %v529_v26, %v7088_v30  ;;  %v532_v33 = vmul.f32 %v525_v29, %v7091_v31  ;;  %v537_v40 = vmul.f32 %v529_v26, %v7108_v38 }
  0x24   : > { %v536_v41 = vmul.f32 %v525_v29, %v7111_v39  ;;  %v603_v45 = vrot.slane %v7012_v5, %v7118_v42  ;;  %v599_v46 = vrot.slane %v6999_v2, %v7118_v42  ;;  %v651_v48 = vrot.slane %v7017_v6, %v7133_v47 }
  0x25   : > { %v647_v49 = vrot.slane %v7004_v3, %v7133_v47  ;;  %v659_v50 = vrot.slane %v7012_v5, %v7133_v47  ;;  %v655_v51 = vrot.slane %v6999_v2, %v7133_v47  ;;  %v755_v53 = vrot.slane %v7017_v6, %v7148_v52 }
  0x26   : > { %v751_v54 = vrot.slane %v7004_v3, %v7148_v52  ;;  %v759_v55 = vrot.slane %v6999_v2, %v7148_v52  ;;  %v763_v56 = vrot.slane %v7012_v5, %v7148_v52 }
  0x27   : > { %326 = vrot.lane.b32.xlu1 %v311_v12, %s6914_s11  ;;  %324 = vrot.lane.b32.xlu0 %v307_v13, %s6914_s11 }
  0x2b   : > { %330 = vrot.lane.b32.xlu1 %v319_v14, %s6914_s11  ;;  %328 = vrot.lane.b32.xlu0 %v315_v15, %s6914_s11 }
  0x2f   : > { %432 = vrot.lane.b32.xlu1 %v417_v17, %s6915_s22  ;;  %430 = vrot.lane.b32.xlu0 %v413_v18, %s6915_s22 }
  0x33   : > { %436 = vrot.lane.b32.xlu1 %v425_v20, %s6915_s22  ;;  %434 = vrot.lane.b32.xlu0 %v421_v21, %s6915_s22 }
  0x37   : > { %548 = vrot.lane.b32.xlu1 %v531_v27, %s6913_s9  ;;  %546 = vrot.lane.b32.xlu0 %v530_v28, %s6913_s9 }
  0x3b   : > { %552 = vrot.lane.b32.xlu1 %v533_v32, %s6913_s9  ;;  %550 = vrot.lane.b32.xlu0 %v532_v33, %s6913_s9 }
  0x3f   : > { %556 = vrot.lane.b32.xlu1 %v535_v36, %s6913_s9  ;;  %554 = vrot.lane.b32.xlu0 %v534_v37, %s6913_s9 }
  0x43   : > { %560 = vrot.lane.b32.xlu1 %v537_v40, %s6913_s9  ;;  %558 = vrot.lane.b32.xlu0 %v536_v41, %s6913_s9 }
  0x47   : > { %610 = vrot.lane.b32.xlu1 %v595_v43, %s6913_s9  ;;  %608 = vrot.lane.b32.xlu0 %v591_v44, %s6913_s9 }
  0x4b   : > { %614 = vrot.lane.b32.xlu1 %v603_v45, %s6913_s9  ;;  %612 = vrot.lane.b32.xlu0 %v599_v46, %s6913_s9  ;;  %v7219_v46 = vld [vmem:[%s7061_s20 + $0x28] sm:$0xff] }
  0x4f   : > { %666 = vrot.lane.b32.xlu1 %v651_v48, %s6914_s11  ;;  %664 = vrot.lane.b32.xlu0 %v647_v49, %s6914_s11  ;;  %v7222_v48 = vld [vmem:[%s7061_s20 + $0x58] sm:$0xff] }
  0x53   : > { %670 = vrot.lane.b32.xlu1 %v659_v50, %s6914_s11  ;;  %668 = vrot.lane.b32.xlu0 %v655_v51, %s6914_s11 }
  0x57   : > { %770 = vrot.lane.b32.xlu1 %v755_v53, %s6915_s22  ;;  %768 = vrot.lane.b32.xlu0 %v751_v54, %s6915_s22 }
  0x5b   : > { %772 = vrot.lane.b32.xlu0 %v759_v55, %s6915_s22  ;;  %774 = vrot.lane.b32.xlu1 %v763_v56, %s6915_s22 }
  0x91   : > { %v7164_v57 = vpop.permute.xlu1 %271  ;;  %v7166_v58 = vpop.permute.xlu0 %267 }
  0x95   : > { %v7168_v59 = vpop.permute.xlu1 %273  ;;  %v7170_v60 = vpop.permute.xlu0 %269 }
  0x99   : > { %v327_v63 = vpop.permute.xlu1 %326  ;;  %v325_v2 = vpop.permute.xlu0 %324 }
  0x9a   : > { %v346_v3 = vmul.f32 %v325_v2, %v7174_v62  ;;  %v341_v5 = vmul.f32 %v325_v2, %v235_v61  ;;  %v333_v54 = vsel %vm332_vm0, %v325_v2, %v327_v63 }
  0x9b   : > { %v342_v56 = vmul.f32 %v333_v54, %v7077_v25 }
  0x9c   : > { %371 = vrot.lane.b32.xlu1 %v346_v3, %s6915_s22  ;;  %361 = vrot.lane.b32.xlu0 %v341_v5, %s6915_s22 }
  0x9d   : > { %v331_v6 = vpop.permute.xlu1 %330  ;;  %v329_v7 = vpop.permute.xlu0 %328 }
  0x9e   : > { %v350_v8 = vmul.f32 %v331_v6, %v7108_v38  ;;  %v345_v9 = vmul.f32 %v331_v6, %v7088_v30  ;;  %v334_v3 = vsel %vm332_vm0, %v327_v63, %v329_v7  ;;  %v335_v5 = vsel %vm332_vm0, %v329_v7, %v331_v6 }
  0x9f   : > { %v343_v2 = vmul.f32 %v334_v3, %v7074_v24  ;;  %v349_v7 = vmul.f32 %v335_v5, %v7111_v39 }
  0xa0   : > { %379 = vrot.lane.b32.xlu1 %v350_v8, %s6915_s22  ;;  %369 = vrot.lane.b32.xlu0 %v345_v9, %s6915_s22  ;;  %v344_v8 = vmul.f32 %v335_v5, %v7091_v31  ;;  %v348_v9 = vmul.f32 %v334_v3, %v7098_v34 }
  0xa1   : > { %v433_v10 = vpop.permute.xlu1 %432  ;;  %v431_v12 = vpop.permute.xlu0 %430 }
  0xa2   : > { %v451_v13 = vmul.f32 %v431_v12, %v7174_v62  ;;  %v446_v14 = vmul.f32 %v431_v12, %v235_v61  ;;  %v438_v63 = vsel %vm381_vm1, %v431_v12, %v433_v10 }
  0xa3   : > { %v447_v6 = vmul.f32 %v438_v63, %v7077_v25 }
  0xa4   : > { %476 = vrot.lane.b32.xlu1 %v451_v13, %s6914_s11  ;;  %466 = vrot.lane.b32.xlu0 %v446_v14, %s6914_s11  ;;  %v347_v13 = vmul.f32 %v333_v54, %v7101_v35 }
  0xa5   : > { %v437_v15 = vpop.permute.xlu1 %436  ;;  %v435_v17 = vpop.permute.xlu0 %434 }
  0xa6   : > { %v455_v18 = vmul.f32 %v437_v15, %v7108_v38  ;;  %v450_v20 = vmul.f32 %v437_v15, %v7088_v30  ;;  %v439_v14 = vsel %vm381_vm1, %v433_v10, %v435_v17 }
  0xa7   : > { %v448_v12 = vmul.f32 %v439_v14, %v7074_v24 }
  0xa8   : > { %484 = vrot.lane.b32.xlu1 %v455_v18, %s6914_s11  ;;  %474 = vrot.lane.b32.xlu0 %v450_v20, %s6914_s11  ;;  %v440_v18 = vsel %vm381_vm1, %v435_v17, %v437_v15 }
  0xa9   : > { %v7190_v21 = vpop.permute.xlu1 %548  ;;  %v7192_v22 = vpop.permute.xlu0 %546  ;;  %v449_v20 = vmul.f32 %v440_v18, %v7091_v31  ;;  %v454_v17 = vmul.f32 %v440_v18, %v7111_v39 }
  0xad   : > { %v7194_v23 = vpop.permute.xlu1 %552  ;;  %v7196_v26 = vpop.permute.xlu0 %550 }
  0xb1   : > { %v7198_v27 = vpop.permute.xlu1 %556  ;;  %v7200_v28 = vpop.permute.xlu0 %554 }
  0xb5   : > { %v7202_v29 = vpop.permute.xlu1 %560  ;;  %v7204_v32 = vpop.permute.xlu0 %558 }
  0xb6   : > { %12716 = vst [vmem:[#allocation16_spill] sm:$0xff] %v7202_v29  ;;  %12717 = vst [vmem:[#allocation17_spill] sm:$0xff] %v7204_v32  ;;  %v7468_v29 = vld [vmem:[%s7061_s20 + $0x68] sm:$0x1] }
  0xb9   : > { %v7206_v33 = vpop.permute.xlu1 %610  ;;  %v7208_v36 = vpop.permute.xlu0 %608 }
  0xbd   : > { %v7210_v37 = vpop.permute.xlu1 %614  ;;  %v7212_v40 = vpop.permute.xlu0 %612 }
  0xbe   : > { %12718 = vst [vmem:[#allocation18_spill] sm:$0xff] %v7210_v37  ;;  %12719 = vst [vmem:[#allocation19_spill] sm:$0xff] %v7212_v40 }
  0xc1   : > { %v667_v41 = vpop.permute.xlu1 %666  ;;  %v665_v43 = vpop.permute.xlu0 %664 }
  0xc2   : > { %v685_v44 = vmul.f32 %v665_v43, %v7101_v35  ;;  %v680_v45 = vmul.f32 %v665_v43, %v7077_v25  ;;  %v672_v10 = vsel %vm332_vm0, %v665_v43, %v667_v41 }
  0xc3   : > { %v681_v15 = vmul.f32 %v672_v10, %v7074_v24 }
  0xc4   : > { %710 = vrot.lane.b32.xlu1 %v685_v44, %s6915_s22  ;;  %700 = vrot.lane.b32.xlu0 %v680_v45, %s6915_s22  ;;  %v452_v44 = vmul.f32 %v438_v63, %v7101_v35 }
  0xc5   : > { %v671_v49 = vpop.permute.xlu1 %670  ;;  %v669_v50 = vpop.permute.xlu0 %668 }
  0xc6   : > { %v689_v51 = vmul.f32 %v671_v49, %v7222_v48  ;;  %v684_v53 = vmul.f32 %v671_v49, %v7219_v46  ;;  %v673_v45 = vsel %vm332_vm0, %v667_v41, %v669_v50 }
  0xc7   : > { %v682_v43 = vmul.f32 %v673_v45, %v7091_v31 }
  0xc8   : > { %718 = vrot.lane.b32.xlu1 %v689_v51, %s6915_s22  ;;  %708 = vrot.lane.b32.xlu0 %v684_v53, %s6915_s22  ;;  %v674_v51 = vsel %vm332_vm0, %v669_v50, %v671_v49 }
  0xc9   : > { %v769_v55 = vpop.permute.xlu0 %768  ;;  %v771_v53 = vpop.permute.xlu1 %770  ;;  %v683_v54 = vmul.f32 %v674_v51, %v7088_v30 }
  0xca   : > { %v784_v61 = vmul.f32 %v769_v55, %v7077_v25  ;;  %v453_v25 = vmul.f32 %v439_v14, %v7098_v34  ;;  %v776_v49 = vsel %vm381_vm1, %v769_v55, %v771_v53  ;;  %v789_v63 = vmul.f32 %v769_v55, %v7101_v35 }
  0xcb   : > { %v785_v5 = vmul.f32 %v776_v49, %v7074_v24 }
  0xcc   : > { %363 = vrot.lane.b32.xlu1 %v342_v56, %s6915_s22  ;;  %804 = vrot.lane.b32.xlu0 %v784_v61, %s6914_s11  ;;  %v687_v56 = vmul.f32 %v673_v45, %v7111_v39  ;;  %v686_v61 = vmul.f32 %v672_v10, %v7098_v34 }
  0xcd   : > { %v775_v41 = vpop.permute.xlu1 %774  ;;  %v773_v50 = vpop.permute.xlu0 %772 }
  0xce   : > { %v778_v3 = vsel %vm381_vm1, %v773_v50, %v775_v41  ;;  %v788_v24 = vmul.f32 %v775_v41, %v7219_v46  ;;  %v793_v46 = vmul.f32 %v775_v41, %v7222_v48 }
  0xcf   : > { %v792_v55 = vmul.f32 %v778_v3, %v7108_v38 }
  0xd0   : > { %367 = vrot.lane.b32.xlu1 %v344_v8, %s6915_s22  ;;  %365 = vrot.lane.b32.xlu0 %v343_v2, %s6915_s22  ;;  %v688_v8 = vmul.f32 %v674_v51, %v7108_v38  ;;  %v777_v2 = vsel %vm381_vm1, %v771_v53, %v773_v50 }
  0xd4   : > { %375 = vrot.lane.b32.xlu1 %v348_v9, %s6915_s22  ;;  %373 = vrot.lane.b32.xlu0 %v347_v13, %s6915_s22  ;;  %v787_v9 = vmul.f32 %v778_v3, %v7088_v30  ;;  %v786_v13 = vmul.f32 %v777_v2, %v7091_v31  ;;  %v7295_v30 = vld [vmem:[%s12382_s1 + $0x28] sm:$0x7f]  ;;  %v7300_v31 = vld [vmem:[%s12382_s1 + $0x20] sm:$0x7f] }
  0xd5   : > { %v871_v14 = vrot.slane %v7295_v30, %v7007_v4  ;;  %v867_v18 = vrot.slane %v7300_v31, %v7007_v4  ;;  %v983_v10 = vrot.slane %v7295_v30, %v7030_v11 }
  0xd8   : > { %468 = vrot.lane.b32.xlu1 %v447_v6, %s6914_s11  ;;  %377 = vrot.lane.b32.xlu0 %v349_v7, %s6915_s22  ;;  %v791_v6 = vmul.f32 %v777_v2, %v7111_v39  ;;  %v790_v7 = vmul.f32 %v776_v49, %v7098_v34 }
  0xdc   : > { %472 = vrot.lane.b32.xlu1 %v449_v20, %s6914_s11  ;;  %470 = vrot.lane.b32.xlu0 %v448_v12, %s6914_s11  ;;  %v7313_v20 = vld [vmem:[%s12382_s1 + $0x38] sm:$0x7f]  ;;  %v7318_v12 = vld [vmem:[%s12382_s1 + $0x30] sm:$0x7f] }
  0xdd   : > { %v987_v45 = vrot.slane %v7318_v12, %v7030_v11 }
  0xe0   : > { %480 = vrot.lane.b32.xlu1 %v453_v25, %s6914_s11  ;;  %478 = vrot.lane.b32.xlu0 %v452_v44, %s6914_s11  ;;  %v879_v25 = vrot.slane %v7313_v20, %v7007_v4  ;;  %v875_v44 = vrot.slane %v7318_v12, %v7007_v4 }
  0xe4   : > { %702 = vrot.lane.b32.xlu1 %v681_v15, %s6915_s22  ;;  %482 = vrot.lane.b32.xlu0 %v454_v17, %s6914_s11  ;;  %v979_v15 = vrot.slane %v7300_v31, %v7030_v11  ;;  %v991_v17 = vrot.slane %v7313_v20, %v7030_v11 }
  0xe8   : > { %706 = vrot.lane.b32.xlu1 %v683_v54, %s6915_s22  ;;  %704 = vrot.lane.b32.xlu0 %v682_v43, %s6915_s22 }
  0xec   : > { %714 = vrot.lane.b32.xlu1 %v687_v56, %s6915_s22  ;;  %712 = vrot.lane.b32.xlu0 %v686_v61, %s6915_s22 }
  0xf0   : > { %806 = vrot.lane.b32.xlu1 %v785_v5, %s6914_s11  ;;  %716 = vrot.lane.b32.xlu0 %v688_v8, %s6915_s22 }
  0xf4   : > { %810 = vrot.lane.b32.xlu1 %v787_v9, %s6914_s11  ;;  %808 = vrot.lane.b32.xlu0 %v786_v13, %s6914_s11 }
  0xf8   : > { %814 = vrot.lane.b32.xlu1 %v789_v63, %s6914_s11  ;;  %812 = vrot.lane.b32.xlu0 %v788_v24, %s6914_s11 }
  0xfc   : > { %818 = vrot.lane.b32.xlu1 %v791_v6, %s6914_s11  ;;  %816 = vrot.lane.b32.xlu0 %v790_v7, %s6914_s11 }
 0x100   : > { %822 = vrot.lane.b32.xlu1 %v793_v46, %s6914_s11  ;;  %820 = vrot.lane.b32.xlu0 %v792_v55, %s6914_s11 }
 0x104   : > { %886 = vrot.lane.b32.xlu1 %v871_v14, %s6913_s9  ;;  %884 = vrot.lane.b32.xlu0 %v867_v18, %s6913_s9 }
 0x108   : > { %890 = vrot.lane.b32.xlu1 %v879_v25, %s6913_s9  ;;  %888 = vrot.lane.b32.xlu0 %v875_v44, %s6913_s9 }
 0x10c   : > { %998 = vrot.lane.b32.xlu1 %v983_v10, %s6914_s11  ;;  %996 = vrot.lane.b32.xlu0 %v979_v15, %s6914_s11 }
 0x10e   : > { %v7340_v51 = vpop.permute.xlu1 %371  ;;  %v7342_v53 = vpop.permute.xlu0 %361 }
 0x10f   : > { %12720 = vst [vmem:[#allocation20_spill] sm:$0xff] %v7340_v51  ;;  %12721 = vst [vmem:[#allocation21_spill] sm:$0xff] %v7342_v53  ;;  %v7480_v53 = vld [vmem:[%s7061_s20 + $0x80] sm:$0x1] }
 0x110   : > { %1002 = vrot.lane.b32.xlu1 %v991_v17, %s6914_s11  ;;  %1000 = vrot.lane.b32.xlu0 %v987_v45, %s6914_s11 }
 0x112   : > { %v7344_v54 = vpop.permute.xlu1 %379  ;;  %v7346_v43 = vpop.permute.xlu0 %369 }
 0x113   : > { %12722 = vst [vmem:[#allocation22_spill] sm:$0xff] %v7346_v43 }
 0x116   : > { %v7348_v56 = vpop.permute.xlu1 %476  ;;  %v7350_v61 = vpop.permute.xlu0 %466 }
 0x117   : > { %12723 = vst [vmem:[#allocation23_spill] sm:$0xff] %v7348_v56  ;;  %12724 = vst [vmem:[#allocation24_spill] sm:$0xff] %v7350_v61  ;;  %v7443_v56 = vld [vmem:[%s7061_s20 + $0x18] sm:$0xfe] }
 0x11a   : > { %v7352_v41 = vpop.permute.xlu1 %484  ;;  %v7354_v49 = vpop.permute.xlu0 %474 }
 0x11b   : > { %12725 = vst [vmem:[#allocation25_spill] sm:$0xff] %v7352_v41  ;;  %12726 = vst [vmem:[#allocation26_spill] sm:$0xff] %v7354_v49 }
 0x136   : > { %v7356_v50 = vpop.permute.xlu1 %710  ;;  %v7358_v3 = vpop.permute.xlu0 %700 }
 0x137   : > { %12727 = vst [vmem:[#allocation27_spill] sm:$0xff] %v7356_v50  ;;  %12728 = vst [vmem:[#allocation28_spill] sm:$0xff] %v7358_v3 }
 0x13a   : > { %v7360_v5 = vpop.permute.xlu1 %718  ;;  %v7362_v8 = vpop.permute.xlu0 %708 }
 0x13b   : > { %12729 = vst [vmem:[#allocation29_spill] sm:$0xff] %v7360_v5  ;;  %12730 = vst [vmem:[#allocation30_spill] sm:$0xff] %v7362_v8 }
 0x13e   : > { %v7364_v2 = vpop.permute.xlu1 %363  ;;  %v7366_v9 = vpop.permute.xlu0 %804 }
 0x13f   : > { %12731 = vst [vmem:[#allocation31_spill] sm:$0xff] %v7364_v2  ;;  %12732 = vst [vmem:[#allocation32_spill] sm:$0xff] %v7366_v9 }
 0x142   : > { %v7368_v13 = vpop.permute.xlu1 %367  ;;  %v7370_v63 = vpop.permute.xlu0 %365 }
 0x143   : > { %12733 = vst [vmem:[#allocation33_spill] sm:$0xff] %v7368_v13  ;;  %12734 = vst [vmem:[#allocation34_spill] sm:$0xff] %v7370_v63  ;;  %v7463_v63 = vld [vmem:[%s7061_s20 + $0x70] sm:$0x1] }
 0x146   : > { %v7372_v24 = vpop.permute.xlu1 %375  ;;  %v7374_v6 = vpop.permute.xlu0 %373 }
 0x147   : > { %12735 = vst [vmem:[#allocation35_spill] sm:$0xff] %v7372_v24  ;;  %12736 = vst [vmem:[#allocation36_spill] sm:$0xff] %v7374_v6 }
 0x14a   : > { %v7376_v7 = vpop.permute.xlu1 %468  ;;  %v7378_v46 = vpop.permute.xlu0 %377 }
 0x14b   : > { %12737 = vst [vmem:[#allocation37_spill] sm:$0xff] %v7376_v7  ;;  %12738 = vst [vmem:[#allocation38_spill] sm:$0xff] %v7378_v46 }
 0x14e   : > { %v7380_v55 = vpop.permute.xlu1 %472  ;;  %v7382_v14 = vpop.permute.xlu0 %470 }
 0x14f   : > { %12739 = vst [vmem:[#allocation39_spill] sm:$0xff] %v7380_v55  ;;  %12740 = vst [vmem:[#allocation40_spill] sm:$0xff] %v7382_v14 }
 0x152   : > { %v7384_v18 = vpop.permute.xlu1 %480  ;;  %v7386_v25 = vpop.permute.xlu0 %478 }
 0x153   : > { %12741 = vst [vmem:[#allocation41_spill] sm:$0xff] %v7384_v18  ;;  %12742 = vst [vmem:[#allocation42_spill] sm:$0xff] %v7386_v25  ;;  %v7440_v18 = vld [vmem:[%s7061_s20 + $0x10] sm:$0xfe] }
 0x156   : > { %v7388_v44 = vpop.permute.xlu1 %702  ;;  %v7390_v10 = vpop.permute.xlu0 %482 }
 0x157   : > { %12743 = vst [vmem:[#allocation43_spill] sm:$0xff] %v7388_v44  ;;  %12744 = vst [vmem:[#allocation44_spill] sm:$0xff] %v7390_v10 }
 0x15a   : > { %v7392_v15 = vpop.permute.xlu1 %706  ;;  %v7394_v17 = vpop.permute.xlu0 %704 }
 0x15b   : > { %12745 = vst [vmem:[#allocation45_spill] sm:$0xff] %v7392_v15  ;;  %12746 = vst [vmem:[#allocation46_spill] sm:$0xff] %v7394_v17 }
 0x15e   : > { %v7396_v45 = vpop.permute.xlu1 %714  ;;  %v7398_v0 = vpop.permute.xlu0 %712 }
 0x15f   : > { %12747 = vst [vmem:[#allocation47_spill] sm:$0xff] %v7396_v45  ;;  %12748 = vst [vmem:[#allocation48_spill] sm:$0xff] %v7398_v0 }
 0x162   : > { %v7400_v1 = vpop.permute.xlu1 %806  ;;  %v7402_v9 = vpop.permute.xlu0 %716 }
 0x163   : > { %12749 = vst [vmem:[#allocation49_spill] sm:$0xff] %v7400_v1  ;;  %12750 = vst [vmem:[#allocation50_spill] sm:$0xff] %v7402_v9 }
 0x166   : > { %v7404_v50 = vpop.permute.xlu1 %810  ;;  %v7406_v8 = vpop.permute.xlu0 %808 }
 0x167   : > { %12751 = vst [vmem:[#allocation51_spill] sm:$0xff] %v7404_v50  ;;  %12752 = vst [vmem:[#allocation52_spill] sm:$0xff] %v7406_v8 }
 0x16a   : > { %v7408_v5 = vpop.permute.xlu1 %814  ;;  %v7410_v3 = vpop.permute.xlu0 %812 }
 0x16b   : > { %12753 = vst [vmem:[#allocation53_spill] sm:$0xff] %v7408_v5  ;;  %12754 = vst [vmem:[#allocation54_spill] sm:$0xff] %v7410_v3  ;;  %v7429_v5 = vld [vmem:[%s7061_s20] sm:$0xfe] }
 0x16e   : > { %v7412_v15 = vpop.permute.xlu1 %818  ;;  %v7414_v17 = vpop.permute.xlu0 %816 }
 0x16f   : > { %12755 = vst [vmem:[#allocation55_spill] sm:$0xff] %v7412_v15  ;;  %12756 = vst [vmem:[#allocation56_spill] sm:$0xff] %v7414_v17 }
 0x172   : > { %v7416_v45 = vpop.permute.xlu1 %822  ;;  %v7418_v0 = vpop.permute.xlu0 %820 }
 0x173   : > { %12757 = vst [vmem:[#allocation57_spill] sm:$0xff] %v7416_v45  ;;  %12758 = vst [vmem:[#allocation58_spill] sm:$0xff] %v7418_v0  ;;  %v7434_v0 = vld [vmem:[%s7061_s20 + $0x8] sm:$0xfe] }
 0x176   : > { %v7420_v1 = vpop.permute.xlu1 %886  ;;  %v7422_v9 = vpop.permute.xlu0 %884 }
 0x177   : > { %12759 = vst [vmem:[#allocation59_spill] sm:$0xff] %v7420_v1  ;;  %12760 = vst [vmem:[#allocation60_spill] sm:$0xff] %v7422_v9 }
 0x17a   : > { %v7424_v50 = vpop.permute.xlu1 %890  ;;  %v7426_v8 = vpop.permute.xlu0 %888 }
 0x17b   : > { %12761 = vst [vmem:[#allocation61_spill] sm:$0xff] %v7424_v50  ;;  %12762 = vst [vmem:[#allocation62_spill] sm:$0xff] %v7426_v8 }
 0x17e   : > { %v999_v3 = vpop.permute.xlu1 %998  ;;  %v997_v15 = vpop.permute.xlu0 %996 }
 0x17f   : > { %v1004_v17 = vsel %vm332_vm0, %v997_v15, %v999_v3  ;;  %v1012_v45 = vmul.f32 %v997_v15, %v7429_v5  ;;  %v1017_v1 = vmul.f32 %v997_v15, %v7174_v62 }
 0x180   : > { %v1013_v50 = vmul.f32 %v1004_v17, %v7434_v0  ;;  %v1018_v44 = vmul.f32 %v1004_v17, %v7101_v35 }
 0x181   : > { %v1042_v9 = vrot.slane %v1012_v45, 1  ;;  %v1043_v10 = vrot.slane %v1017_v1, 1  ;;  %v7448_v45 = vld [vmem:[%s7061_s20 + $0x60] sm:$0x1] }
 0x182   : > { %v1003_v8 = vpop.permute.xlu1 %1002  ;;  %v1001_v37 = vpop.permute.xlu0 %1000  ;;  %v1045_v55 = vrot.slane %v1013_v50, 1  ;;  %v1046_v46 = vrot.slane %v1018_v44, 1  ;;  %v7458_v50 = vld [vmem:[%s7061_s20 + $0x20] sm:$0xfe] }
 0x183   : > { %v1005_v25 = vsel %vm332_vm0, %v999_v3, %v1001_v37  ;;  %v1006_v14 = vsel %vm332_vm0, %v1001_v37, %v1003_v8  ;;  %v1044_v61 = vsel %vm930_vm2, %v1042_v9, %v1043_v10  ;;  %v1022_v37 = vmul.f32 %v997_v15, %v7448_v45 }
 0x184   : > { %v1014_v24 = vmul.f32 %v1005_v25, %v7440_v18  ;;  %v1015_v51 = vmul.f32 %v1006_v14, %v7443_v56  ;;  %v1019_v1 = vmul.f32 %v1005_v25, %v7098_v34  ;;  %v1020_v6 = vmul.f32 %v1006_v14, %v7111_v39  ;;  %1067 = vrot.lane.b32.xlu0 %v1044_v61, %s6915_s22 }
 0x185   : > { %v1047_v3 = vsel %vm930_vm2, %v1045_v55, %v1046_v46  ;;  %v1016_v9 = vmul.f32 %v1003_v8, %v7458_v50  ;;  %v1021_v55 = vmul.f32 %v1003_v8, %v7108_v38  ;;  %v1024_v15 = vmul.f32 %v1005_v25, %v7463_v63 }
 0x186   : > { %1069 = vrot.lane.b32.xlu1 %v1047_v3, %s6915_s22  ;;  %v1051_v44 = vrot.slane %v1015_v51, 1  ;;  %v1052_v7 = vrot.slane %v1020_v6, 1  ;;  %v1048_v49 = vrot.slane %v1014_v24, 1  ;;  %v1049_v40 = vrot.slane %v1019_v1, 1  ;;  %v7477_v1 = vld [vmem:[%s7061_s20 + $0x78] sm:$0x1] }
 0x187   : > { %v1057_v51 = vrot.slane %v1022_v37, 1  ;;  %v1054_v6 = vrot.slane %v1016_v9, 1  ;;  %v1055_v13 = vrot.slane %v1021_v55, 1  ;;  %v1023_v24 = vmul.f32 %v1004_v17, %v7468_v29 }
 0x188   : > { %v1053_v61 = vsel %vm930_vm2, %v1051_v44, %v1052_v7  ;;  %v1050_v3 = vsel %vm930_vm2, %v1048_v49, %v1049_v40  ;;  %v1025_v2 = vmul.f32 %v1006_v14, %v7477_v1  ;;  %v1061_v25 = vrot.slane %v1024_v15, 1 }
 0x189   : > { %1071 = vrot.lane.b32.xlu0 %v1050_v3, %s6915_s22  ;;  %v1058_v44 = vsel %vm930_vm2, %v1043_v10, %v1057_v51  ;;  %v1056_v49 = vsel %vm930_vm2, %v1054_v6, %v1055_v13  ;;  %v1059_v37 = vrot.slane %v1023_v24, 1  ;;  %v1026_v9 = vmul.f32 %v1003_v8, %v7480_v53 }
 0x18a   : > { %1073 = vrot.lane.b32.xlu1 %v1053_v61, %s6915_s22  ;;  %v1062_v17 = vsel %vm930_vm2, %v1049_v40, %v1061_v25  ;;  %v1063_v3 = vrot.slane %v1025_v2, 1  ;;  %v1122_v8 = vrot.slane %v7295_v30, %v7047_v16  ;;  %v1118_v40 = vrot.slane %v7300_v31, %v7047_v16 }
 0x18b   : > { %v1060_v55 = vsel %vm930_vm2, %v1046_v46, %v1059_v37  ;;  %v1065_v61 = vrot.slane %v1026_v9, 1  ;;  %v1130_v2 = vrot.slane %v7313_v20, %v7047_v16 }
 0x18c   : > { %v1064_v10 = vsel %vm930_vm2, %v1052_v7, %v1063_v3 }
 0x18d   : > { %1075 = vrot.lane.b32.xlu0 %v1056_v49, %s6915_s22  ;;  %v1066_v14 = vsel %vm930_vm2, %v1055_v13, %v1065_v61  ;;  %v1126_v13 = vrot.slane %v7318_v12, %v7047_v16 }
 0x18e   : > { %1077 = vrot.lane.b32.xlu1 %v1058_v44, %s6915_s22 }
 0x191   : > { %1079 = vrot.lane.b32.xlu0 %v1060_v55, %s6915_s22 }
 0x192   : > { %1081 = vrot.lane.b32.xlu1 %v1062_v17, %s6915_s22 }
 0x195   : > { %1083 = vrot.lane.b32.xlu0 %v1064_v10, %s6915_s22 }
 0x196   : > { %1085 = vrot.lane.b32.xlu1 %v1066_v14, %s6915_s22 }
 0x199   : > { %1135 = vrot.lane.b32.xlu0 %v1118_v40, %s6915_s22 }
 0x19a   : > { %1137 = vrot.lane.b32.xlu1 %v1122_v8, %s6915_s22 }
 0x19d   : > { %1139 = vrot.lane.b32.xlu0 %v1126_v13, %s6915_s22 }
 0x19e   : > { %1141 = vrot.lane.b32.xlu1 %v1130_v2, %s6915_s22 }
 0x1f6   : > { %v7508_v7 = vpop.permute.xlu0 %1067 }
 0x1f7   : > { %12763 = vst [vmem:[#allocation63_spill] sm:$0xff] %v7508_v7 }
 0x1f8   : > { %v7510_v46 = vpop.permute.xlu1 %1069 }
 0x1f9   : > { %12764 = vst [vmem:[#allocation64_spill] sm:$0xff] %v7510_v46 }
 0x1fb   : > { %v7514_v51 = vpop.permute.xlu0 %1071 }
 0x1fc   : > { %v7512_v15 = vpop.permute.xlu1 %1073  ;;  %12766 = vst [vmem:[#allocation66_spill] sm:$0xff] %v7514_v51 }
 0x1fd   : > { %12765 = vst [vmem:[#allocation65_spill] sm:$0xff] %v7512_v15 }
 0x1ff   : > { %v7518_v24 = vpop.permute.xlu0 %1075 }
 0x200   : > { %v7516_v6 = vpop.permute.xlu1 %1077  ;;  %12768 = vst [vmem:[#allocation68_spill] sm:$0xff] %v7518_v24 }
 0x201   : > { %12767 = vst [vmem:[#allocation67_spill] sm:$0xff] %v7516_v6 }
 0x203   : > { %v7522_v44 = vpop.permute.xlu0 %1079 }
 0x204   : > { %v7520_v25 = vpop.permute.xlu1 %1081  ;;  %12770 = vst [vmem:[#allocation70_spill] sm:$0xff] %v7522_v44 }
 0x205   : > { %12769 = vst [vmem:[#allocation69_spill] sm:$0xff] %v7520_v25 }
 0x207   : > { %v7526_v37 = vpop.permute.xlu0 %1083 }
 0x208   : > { %v7524_v49 = vpop.permute.xlu1 %1085  ;;  %12772 = vst [vmem:[#allocation72_spill] sm:$0xff] %v7526_v37 }
 0x209   : > { %12771 = vst [vmem:[#allocation71_spill] sm:$0xff] %v7524_v49 }
 0x20b   : > { %v1136_v17 = vpop.permute.xlu0 %1135 }
 0x20c   : > { %v1138_v9 = vpop.permute.xlu1 %1137  ;;  %v1151_v61 = vmul.f32 %v1136_v17, %v7429_v5  ;;  %v1156_v3 = vmul.f32 %v1136_v17, %v7174_v62 }
 0x20d   : > { %v1143_v55 = vsel %vm381_vm1, %v1136_v17, %v1138_v9 }
 0x20e   : > { %v1152_v14 = vmul.f32 %v1143_v55, %v7434_v0  ;;  %v1157_v10 = vmul.f32 %v1143_v55, %v7101_v35  ;;  %v1181_v8 = vrot.slane %v1151_v61, 1  ;;  %v1182_v40 = vrot.slane %v1156_v3, 1 }
 0x20f   : > { %v1140_v13 = vpop.permute.xlu0 %1139  ;;  %v1161_v3 = vmul.f32 %v1136_v17, %v7448_v45 }
 0x210   : > { %v1142_v2 = vpop.permute.xlu1 %1141  ;;  %v1184_v25 = vrot.slane %v1152_v14, 1  ;;  %v1185_v49 = vrot.slane %v1157_v10, 1  ;;  %v1144_v37 = vsel %vm381_vm1, %v1138_v9, %v1140_v13  ;;  %v1183_v44 = vsel %vm930_vm2, %v1181_v8, %v1182_v40 }
 0x211   : > { %v1145_v6 = vsel %vm381_vm1, %v1140_v13, %v1142_v2  ;;  %v1153_v5 = vmul.f32 %v1144_v37, %v7440_v18  ;;  %v1158_v24 = vmul.f32 %v1144_v37, %v7098_v34  ;;  %1206 = vrot.lane.b32.xlu0 %v1183_v44, %s6914_s11  ;;  %v1155_v9 = vmul.f32 %v1142_v2, %v7458_v50 }
 0x212   : > { %v1154_v62 = vmul.f32 %v1145_v6, %v7443_v56  ;;  %v1159_v15 = vmul.f32 %v1145_v6, %v7111_v39  ;;  %v1186_v61 = vsel %vm930_vm2, %v1184_v25, %v1185_v49  ;;  %v1160_v51 = vmul.f32 %v1142_v2, %v7108_v38 }
 0x213   : > { %1208 = vrot.lane.b32.xlu1 %v1186_v61, %s6914_s11  ;;  %v1187_v8 = vrot.slane %v1153_v5, 1  ;;  %v1188_v13 = vrot.slane %v1158_v24, 1  ;;  %v1193_v43 = vrot.slane %v1155_v9, 1  ;;  %v1162_v44 = vmul.f32 %v1143_v55, %v7468_v29 }
 0x214   : > { %v1190_v14 = vrot.slane %v1154_v62, 1  ;;  %v1191_v10 = vrot.slane %v1159_v15, 1  ;;  %v1163_v25 = vmul.f32 %v1144_v37, %v7463_v63  ;;  %v1196_v45 = vrot.slane %v1161_v3, 1 }
 0x215   : > { %v1189_v46 = vsel %vm930_vm2, %v1187_v8, %v1188_v13  ;;  %v1194_v17 = vrot.slane %v1160_v51, 1  ;;  %v1257_v15 = vrot.slane %v7300_v31, %v7056_v19  ;;  %v1261_v24 = vrot.slane %v7295_v30, %v7056_v19 }
 0x216   : > { %v1192_v7 = vsel %vm930_vm2, %v1190_v14, %v1191_v10  ;;  %1210 = vrot.lane.b32.xlu0 %v1189_v46, %s6914_s11  ;;  %v1164_v5 = vmul.f32 %v1145_v6, %v7477_v1  ;;  %v1198_v61 = vrot.slane %v1162_v44, 1  ;;  %v1200_v55 = vrot.slane %v1163_v25, 1 }
 0x217   : > { %1212 = vrot.lane.b32.xlu1 %v1192_v7, %s6914_s11  ;;  %v1195_v62 = vsel %vm930_vm2, %v1193_v43, %v1194_v17  ;;  %v1197_v37 = vsel %vm930_vm2, %v1182_v40, %v1196_v45  ;;  %v1165_v46 = vmul.f32 %v1142_v2, %v7480_v53  ;;  %v1270_v7 = vmul.f32 %v1257_v15, %v7434_v0 }
 0x218   : > { %v1274_v51 = vmul.f32 %v1257_v15, %v7101_v35  ;;  %v1265_v3 = vrot.slane %v7318_v12, %v7056_v19  ;;  %v1271_v6 = vmul.f32 %v1261_v24, %v7440_v18  ;;  %v1275_v43 = vmul.f32 %v1261_v24, %v7098_v34 }
 0x219   : > { %v1269_v40 = vrot.slane %v7313_v20, %v7056_v19  ;;  %v1202_v9 = vrot.slane %v1164_v5, 1  ;;  %v1199_v14 = vsel %vm930_vm2, %v1185_v49, %v1198_v61  ;;  %v1201_v2 = vsel %vm930_vm2, %v1188_v13, %v1200_v55 }
 0x21a   : > { %1214 = vrot.lane.b32.xlu0 %v1195_v62, %s6914_s11  ;;  %v1204_v8 = vrot.slane %v1165_v46, 1  ;;  %v1294_v44 = vrot.slane %v1270_v7, 1  ;;  %v1295_v25 = vrot.slane %v1274_v51, 1  ;;  %v1272_v45 = vmul.f32 %v1265_v3, %v7443_v56 }
 0x21b   : > { %1216 = vrot.lane.b32.xlu1 %v1197_v37, %s6914_s11  ;;  %v1276_v62 = vmul.f32 %v1265_v3, %v7111_v39  ;;  %v1297_v37 = vrot.slane %v1271_v6, 1  ;;  %v1298_v32 = vrot.slane %v1275_v43, 1  ;;  %v1273_v41 = vmul.f32 %v1269_v40, %v7458_v50 }
 0x21c   : > { %v1277_v5 = vmul.f32 %v1269_v40, %v7108_v38  ;;  %v1203_v49 = vsel %vm930_vm2, %v1191_v10, %v1202_v9  ;;  %v1205_v13 = vsel %vm930_vm2, %v1194_v17, %v1204_v8  ;;  %v1296_v61 = vsel %vm930_vm2, %v1294_v44, %v1295_v25 }
 0x21d   : > { %v1300_v55 = vrot.slane %v1272_v45, 1  ;;  %v1301_v46 = vrot.slane %v1276_v62, 1  ;;  %v1278_v7 = vmul.f32 %v1257_v15, %v7468_v29  ;;  %v1299_v51 = vsel %vm930_vm2, %v1297_v37, %v1298_v32 }
 0x21e   : > { %1218 = vrot.lane.b32.xlu0 %v1199_v14, %s6914_s11  ;;  %v1303_v6 = vrot.slane %v1273_v41, 1  ;;  %v1304_v43 = vrot.slane %v1277_v5, 1  ;;  %v1279_v14 = vmul.f32 %v1261_v24, %v7463_v63  ;;  %v1280_v9 = vmul.f32 %v1265_v3, %v7477_v1 }
 0x21f   : > { %1220 = vrot.lane.b32.xlu1 %v1201_v2, %s6914_s11  ;;  %v1302_v10 = vsel %vm930_vm2, %v1300_v55, %v1301_v46  ;;  %v1306_v17 = vrot.slane %v1278_v7, 1  ;;  %v1281_v15 = vmul.f32 %v1269_v40, %v7480_v53  ;;  %v1359_v40 = vrot.slane %v7300_v31, %v7118_v42 }
 0x220   : > { %v1305_v2 = vsel %vm930_vm2, %v1303_v6, %v1304_v43  ;;  %v1308_v8 = vrot.slane %v1279_v14, 1  ;;  %v1310_v24 = vrot.slane %v1280_v9, 1  ;;  %v1371_v37 = vrot.slane %v7313_v20, %v7118_v42 }
 0x221   : > { %v1307_v41 = vsel %vm930_vm2, %v1295_v25, %v1306_v17  ;;  %v1312_v45 = vrot.slane %v1281_v15, 1  ;;  %v1363_v25 = vrot.slane %v7295_v30, %v7118_v42  ;;  %v1470_v5 = vrot.slane %v7300_v31, %v7133_v47 }
 0x222   : > { %1222 = vrot.lane.b32.xlu0 %v1203_v49, %s6914_s11  ;;  %v1309_v44 = vsel %vm930_vm2, %v1298_v32, %v1308_v8  ;;  %v1311_v3 = vsel %vm930_vm2, %v1301_v46, %v1310_v24  ;;  %v1367_v32 = vrot.slane %v7318_v12, %v7118_v42  ;;  %v1474_v49 = vrot.slane %v7295_v30, %v7133_v47 }
 0x223   : > { %1224 = vrot.lane.b32.xlu1 %v1205_v13, %s6914_s11  ;;  %v1313_v62 = vsel %vm930_vm2, %v1304_v43, %v1312_v45  ;;  %v1478_v13 = vrot.slane %v7318_v12, %v7133_v47 }
 0x226   : > { %1314 = vrot.lane.b32.xlu0 %v1296_v61, %s6913_s9  ;;  %v1482_v61 = vrot.slane %v7313_v20, %v7133_v47 }
 0x227   : > { %1316 = vrot.lane.b32.xlu1 %v1299_v51, %s6913_s9 }
 0x22a   : > { %1318 = vrot.lane.b32.xlu0 %v1302_v10, %s6913_s9 }
 0x22b   : > { %1320 = vrot.lane.b32.xlu1 %v1305_v2, %s6913_s9 }
 0x22e   : > { %1322 = vrot.lane.b32.xlu0 %v1307_v41, %s6913_s9 }
 0x22f   : > { %1324 = vrot.lane.b32.xlu1 %v1309_v44, %s6913_s9 }
 0x232   : > { %1326 = vrot.lane.b32.xlu0 %v1311_v3, %s6913_s9 }
 0x233   : > { %1328 = vrot.lane.b32.xlu1 %v1313_v62, %s6913_s9 }
 0x236   : > { %1376 = vrot.lane.b32.xlu0 %v1359_v40, %s6913_s9 }
 0x237   : > { %1378 = vrot.lane.b32.xlu1 %v1363_v25, %s6913_s9 }
 0x23a   : > { %1380 = vrot.lane.b32.xlu0 %v1367_v32, %s6913_s9 }
 0x23b   : > { %1382 = vrot.lane.b32.xlu1 %v1371_v37, %s6913_s9 }
 0x23e   : > { %1487 = vrot.lane.b32.xlu0 %v1470_v5, %s6914_s11 }
 0x23f   : > { %1489 = vrot.lane.b32.xlu1 %v1474_v49, %s6914_s11 }
 0x242   : > { %1491 = vrot.lane.b32.xlu0 %v1478_v13, %s6914_s11 }
 0x243   : > { %1493 = vrot.lane.b32.xlu1 %v1482_v61, %s6914_s11 }
 0x283   : > { %v7626_v55 = vpop.permute.xlu0 %1206 }
 0x284   : > { %12773 = vst [vmem:[#allocation73_spill] sm:$0xff] %v7626_v55 }
 0x285   : > { %v7628_v46 = vpop.permute.xlu1 %1208 }
 0x286   : > { %12774 = vst [vmem:[#allocation74_spill] sm:$0xff] %v7628_v46 }
 0x288   : > { %v7630_v7 = vpop.permute.xlu0 %1210 }
 0x289   : > { %12775 = vst [vmem:[#allocation75_spill] sm:$0xff] %v7630_v7  ;;  %v7632_v51 = vpop.permute.xlu1 %1212 }
 0x28a   : > { %12776 = vst [vmem:[#allocation76_spill] sm:$0xff] %v7632_v51 }
 0x28c   : > { %v7634_v6 = vpop.permute.xlu0 %1214 }
 0x28d   : > { %12777 = vst [vmem:[#allocation77_spill] sm:$0xff] %v7634_v6  ;;  %v7636_v43 = vpop.permute.xlu1 %1216 }
 0x28e   : > { %12778 = vst [vmem:[#allocation78_spill] sm:$0xff] %v7636_v43 }
 0x290   : > { %v7638_v14 = vpop.permute.xlu0 %1218 }
 0x291   : > { %12779 = vst [vmem:[#allocation79_spill] sm:$0xff] %v7638_v14  ;;  %v7640_v10 = vpop.permute.xlu1 %1220 }
 0x292   : > { %12780 = vst [vmem:[#allocation80_spill] sm:$0xff] %v7640_v10 }
 0x294   : > { %v7642_v17 = vpop.permute.xlu0 %1222 }
 0x295   : > { %12781 = vst [vmem:[#allocation81_spill] sm:$0xff] %v7642_v17  ;;  %v7644_v9 = vpop.permute.xlu1 %1224 }
 0x296   : > { %12782 = vst [vmem:[#allocation82_spill] sm:$0xff] %v7644_v9 }
 0x298   : > { %v7646_v2 = vpop.permute.xlu0 %1314 }
 0x299   : > { %12783 = vst [vmem:[#allocation83_spill] sm:$0xff] %v7646_v2  ;;  %v7648_v8 = vpop.permute.xlu1 %1316 }
 0x29a   : > { %12784 = vst [vmem:[#allocation84_spill] sm:$0xff] %v7648_v8 }
 0x29c   : > { %v7650_v15 = vpop.permute.xlu0 %1318 }
 0x29d   : > { %12785 = vst [vmem:[#allocation85_spill] sm:$0xff] %v7650_v15  ;;  %v7652_v41 = vpop.permute.xlu1 %1320 }
 0x29e   : > { %12786 = vst [vmem:[#allocation86_spill] sm:$0xff] %v7652_v41 }
 0x2a0   : > { %v7654_v24 = vpop.permute.xlu0 %1322 }
 0x2a1   : > { %12787 = vst [vmem:[#allocation87_spill] sm:$0xff] %v7654_v24  ;;  %v7656_v44 = vpop.permute.xlu1 %1324 }
 0x2a2   : > { %12788 = vst [vmem:[#allocation88_spill] sm:$0xff] %v7656_v44 }
 0x2a4   : > { %v7658_v45 = vpop.permute.xlu0 %1326 }
 0x2a5   : > { %12789 = vst [vmem:[#allocation89_spill] sm:$0xff] %v7658_v45  ;;  %v7660_v3 = vpop.permute.xlu1 %1328 }
 0x2a6   : > { %12790 = vst [vmem:[#allocation90_spill] sm:$0xff] %v7660_v3 }
 0x2a8   : > { %v7662_v62 = vpop.permute.xlu0 %1376 }
 0x2a9   : > { %12791 = vst [vmem:[#allocation91_spill] sm:$0xff] %v7662_v62  ;;  %v7664_v40 = vpop.permute.xlu1 %1378 }
 0x2aa   : > { %12792 = vst [vmem:[#allocation92_spill] sm:$0xff] %v7664_v40 }
 0x2ac   : > { %v7666_v25 = vpop.permute.xlu0 %1380 }
 0x2ad   : > { %12793 = vst [vmem:[#allocation93_spill] sm:$0xff] %v7666_v25  ;;  %v7668_v32 = vpop.permute.xlu1 %1382 }
 0x2ae   : > { %12794 = vst [vmem:[#allocation94_spill] sm:$0xff] %v7668_v32 }
 0x2b0   : > { %v1488_v37 = vpop.permute.xlu0 %1487 }
 0x2b1   : > { %v1490_v5 = vpop.permute.xlu1 %1489  ;;  %v1503_v13 = vmul.f32 %v1488_v37, %v7434_v0  ;;  %v1508_v61 = vmul.f32 %v1488_v37, %v7101_v35 }
 0x2b2   : > { %v1495_v49 = vsel %vm332_vm0, %v1488_v37, %v1490_v5 }
 0x2b3   : > { %v1504_v45 = vmul.f32 %v1495_v49, %v7440_v18  ;;  %v1509_v3 = vmul.f32 %v1495_v49, %v7098_v34  ;;  %v1533_v62 = vrot.slane %v1503_v13, 1  ;;  %v1534_v40 = vrot.slane %v1508_v61, 1 }
 0x2b4   : > { %v1492_v24 = vpop.permute.xlu0 %1491 }
 0x2b5   : > { %v1494_v44 = vpop.permute.xlu1 %1493  ;;  %v1496_v25 = vsel %vm332_vm0, %v1490_v5, %v1492_v24  ;;  %v1536_v32 = vrot.slane %v1504_v45, 1  ;;  %v1537_v41 = vrot.slane %v1509_v3, 1  ;;  %v1535_v34 = vsel %vm930_vm2, %v1533_v62, %v1534_v40 }
 0x2b6   : > { %v1497_v15 = vsel %vm332_vm0, %v1492_v24, %v1494_v44  ;;  %v1505_v2 = vmul.f32 %v1496_v25, %v7443_v56  ;;  %v1510_v8 = vmul.f32 %v1496_v25, %v7111_v39  ;;  %1558 = vrot.lane.b32.xlu0 %v1535_v34, %s6915_s22  ;;  %v1513_v45 = vmul.f32 %v1488_v37, %v7468_v29  ;;  %v7686_v24 = vld [vmem:[%s7061_s20 + $0x28] sm:$0xfe] }
 0x2b7   : > { %v1506_v35 = vmul.f32 %v1497_v15, %v7458_v50  ;;  %v1511_v9 = vmul.f32 %v1497_v15, %v7108_v38  ;;  %v1538_v5 = vsel %vm930_vm2, %v1536_v32, %v1537_v41  ;;  %v1507_v38 = vmul.f32 %v1494_v44, %v7686_v24 }
 0x2b8   : > { %v1539_v13 = vrot.slane %v1505_v2, 1  ;;  %v1540_v17 = vrot.slane %v1510_v8, 1  ;;  %1560 = vrot.lane.b32.xlu1 %v1538_v5, %s6915_s22  ;;  %v1512_v2 = vmul.f32 %v1494_v44, %v7222_v48  ;;  %v1514_v62 = vmul.f32 %v1495_v49, %v7463_v63 }
 0x2b9   : > { %v1542_v3 = vrot.slane %v1506_v35, 1  ;;  %v1543_v61 = vrot.slane %v1511_v9, 1  ;;  %v1515_v32 = vmul.f32 %v1496_v25, %v7477_v1  ;;  %v1548_v37 = vrot.slane %v1513_v45, 1  ;;  %v7698_v9 = vld [vmem:[%s7061_s20 + $0x88] sm:$0x1] }
 0x2ba   : > { %v1541_v39 = vsel %vm930_vm2, %v1539_v13, %v1540_v17  ;;  %v1545_v34 = vrot.slane %v1507_v38, 1  ;;  %v1546_v35 = vrot.slane %v1512_v2, 1  ;;  %v1516_v13 = vmul.f32 %v1497_v15, %v7480_v53 }
 0x2bb   : > { %v1544_v8 = vsel %vm930_vm2, %v1542_v3, %v1543_v61  ;;  %1562 = vrot.lane.b32.xlu0 %v1541_v39, %s6915_s22  ;;  %v1550_v10 = vrot.slane %v1514_v62, 1  ;;  %v1552_v43 = vrot.slane %v1515_v32, 1  ;;  %v1549_v3 = vsel %vm930_vm2, %v1534_v40, %v1548_v37 }
 0x2bc   : > { %1564 = vrot.lane.b32.xlu1 %v1544_v8, %s6915_s22  ;;  %v1547_v5 = vsel %vm930_vm2, %v1545_v34, %v1546_v35  ;;  %v1517_v25 = vmul.f32 %v1494_v44, %v7698_v9  ;;  %v1554_v49 = vrot.slane %v1516_v13, 1  ;;  %v1609_v44 = vrot.slane %v7300_v31, %v7148_v52  ;;  %v7748_v13 = vld [vmem:[%s7061_s20 + $0x38] sm:$0xff] }
 0x2bd   : > { %v1551_v45 = vsel %vm930_vm2, %v1537_v41, %v1550_v10  ;;  %v1553_v39 = vsel %vm930_vm2, %v1540_v17, %v1552_v43  ;;  %v1613_v10 = vrot.slane %v7295_v30, %v7148_v52  ;;  %v1617_v43 = vrot.slane %v7318_v12, %v7148_v52 }
 0x2be   : > { %v1556_v15 = vrot.slane %v1517_v25, 1  ;;  %v1555_v38 = vsel %vm930_vm2, %v1543_v61, %v1554_v49  ;;  %v1621_v17 = vrot.slane %v7313_v20, %v7148_v52 }
 0x2bf   : > { %1566 = vrot.lane.b32.xlu0 %v1547_v5, %s6915_s22 }
 0x2c0   : > { %1568 = vrot.lane.b32.xlu1 %v1549_v3, %s6915_s22  ;;  %v1557_v40 = vsel %vm930_vm2, %v1546_v35, %v1556_v15 }
 0x2c3   : > { %1570 = vrot.lane.b32.xlu0 %v1551_v45, %s6915_s22 }
 0x2c4   : > { %1572 = vrot.lane.b32.xlu1 %v1553_v39, %s6915_s22  ;;  %v7754_v39 = vld [vmem:[%s7061_s20 + $0x40] sm:$0xff] }
 0x2c7   : > { %1574 = vrot.lane.b32.xlu0 %v1555_v38, %s6915_s22 }
 0x2c8   : > { %1576 = vrot.lane.b32.xlu1 %v1557_v40, %s6915_s22 }
 0x2cb   : > { %1626 = vrot.lane.b32.xlu0 %v1609_v44, %s6915_s22 }
 0x2cc   : > { %1628 = vrot.lane.b32.xlu1 %v1613_v10, %s6915_s22 }
 0x2cf   : > { %1630 = vrot.lane.b32.xlu0 %v1617_v43, %s6915_s22 }
 0x2d0   : > { %1632 = vrot.lane.b32.xlu1 %v1621_v17, %s6915_s22 }
 0x328   : > { %v7726_v31 = vpop.permute.xlu0 %1558 }
 0x329   : > { %12795 = vst [vmem:[#allocation95_spill] sm:$0xff] %v7726_v31 }
 0x32a   : > { %v7728_v41 = vpop.permute.xlu1 %1560 }
 0x32b   : > { %12796 = vst [vmem:[#allocation96_spill] sm:$0xff] %v7728_v41  ;;  %v7923_v41 = vld [vmem:[%s7061_s20 + $0x80] sm:$0x3] }
 0x32d   : > { %v7730_v30 = vpop.permute.xlu0 %1562 }
 0x32e   : > { %12797 = vst [vmem:[#allocation97_spill] sm:$0xff] %v7730_v30  ;;  %v7732_v61 = vpop.permute.xlu1 %1564  ;;  %v7906_v30 = vld [vmem:[%s7061_s20 + $0x68] sm:$0x3] }
 0x32f   : > { %12798 = vst [vmem:[#allocation98_spill] sm:$0xff] %v7732_v61 }
 0x331   : > { %v7734_v12 = vpop.permute.xlu0 %1566 }
 0x332   : > { %12799 = vst [vmem:[#allocation99_spill] sm:$0xff] %v7734_v12  ;;  %v7736_v2 = vpop.permute.xlu1 %1568 }
 0x333   : > { %12800 = vst [vmem:[#allocation100_spill] sm:$0xff] %v7736_v2 }
 0x335   : > { %v7738_v8 = vpop.permute.xlu0 %1570 }
 0x336   : > { %12801 = vst [vmem:[#allocation101_spill] sm:$0xff] %v7738_v8  ;;  %v7740_v20 = vpop.permute.xlu1 %1572 }
 0x337   : > { %12802 = vst [vmem:[#allocation102_spill] sm:$0xff] %v7740_v20 }
 0x339   : > { %v7742_v62 = vpop.permute.xlu0 %1574 }
 0x33a   : > { %12803 = vst [vmem:[#allocation103_spill] sm:$0xff] %v7742_v62  ;;  %v7744_v32 = vpop.permute.xlu1 %1576  ;;  %v7768_v62 = vld [vmem:[%s7061_s20 + $0x50] sm:$0xff] }
 0x33b   : > { %12804 = vst [vmem:[#allocation104_spill] sm:$0xff] %v7744_v32 }
 0x33d   : > { %v1627_v37 = vpop.permute.xlu0 %1626 }
 0x33e   : > { %v1629_v34 = vpop.permute.xlu1 %1628  ;;  %v1642_v35 = vmul.f32 %v1627_v37, %v7434_v0  ;;  %v1647_v5 = vmul.f32 %v7748_v13, %v1627_v37 }
 0x33f   : > { %v1634_v3 = vsel %vm381_vm1, %v1627_v37, %v1629_v34 }
 0x340   : > { %v1672_v25 = vrot.slane %v1642_v35, 1  ;;  %v1673_v49 = vrot.slane %v1647_v5, 1  ;;  %v1643_v45 = vmul.f32 %v1634_v3, %v7440_v18  ;;  %v1648_v15 = vmul.f32 %v7754_v39, %v1634_v3  ;;  %v7762_v5 = vld [vmem:[%s7061_s20 + $0x48] sm:$0xff] }
 0x341   : > { %v1631_v38 = vpop.permute.xlu0 %1630  ;;  %v1653_v8 = vmul.f32 %v1634_v3, %v7463_v63 }
 0x342   : > { %v1633_v40 = vpop.permute.xlu1 %1632  ;;  %v1635_v0 = vsel %vm381_vm1, %v1629_v34, %v1631_v38  ;;  %v1674_v44 = vsel %vm930_vm2, %v1672_v25, %v1673_v49  ;;  %v1675_v10 = vrot.slane %v1643_v45, 1  ;;  %v1676_v43 = vrot.slane %v1648_v15, 1 }
 0x343   : > { %v1636_v17 = vsel %vm381_vm1, %v1631_v38, %v1633_v40  ;;  %v1644_v35 = vmul.f32 %v1635_v0, %v7443_v56  ;;  %v1649_v18 = vmul.f32 %v7762_v5, %v1635_v0  ;;  %1697 = vrot.lane.b32.xlu0 %v1674_v44, %s6914_s11  ;;  %v1652_v45 = vmul.f32 %v1627_v37, %v7468_v29 }
 0x344   : > { %v1645_v32 = vmul.f32 %v1636_v17, %v7458_v50  ;;  %v1650_v34 = vmul.f32 %v7768_v62, %v1636_v17  ;;  %v1677_v25 = vsel %vm930_vm2, %v1675_v10, %v1676_v43  ;;  %v1646_v2 = vmul.f32 %v1633_v40, %v7686_v24 }
 0x345   : > { %v1678_v15 = vrot.slane %v1644_v35, 1  ;;  %v1679_v38 = vrot.slane %v1649_v18, 1  ;;  %1699 = vrot.lane.b32.xlu1 %v1677_v25, %s6914_s11  ;;  %v1651_v50 = vmul.f32 %v1633_v40, %v7222_v48  ;;  %v1654_v12 = vmul.f32 %v1635_v0, %v7477_v1 }
 0x346   : > { %v1681_v56 = vrot.slane %v1645_v32, 1  ;;  %v1682_v20 = vrot.slane %v1650_v34, 1  ;;  %v1687_v29 = vrot.slane %v1652_v45, 1  ;;  %v1684_v37 = vrot.slane %v1646_v2, 1 }
 0x347   : > { %v1680_v44 = vsel %vm930_vm2, %v1678_v15, %v1679_v38  ;;  %v1685_v32 = vrot.slane %v1651_v50, 1  ;;  %v1655_v35 = vmul.f32 %v1636_v17, %v7480_v53  ;;  %v1689_v18 = vrot.slane %v1653_v8, 1 }
 0x348   : > { %v1683_v10 = vsel %vm930_vm2, %v1681_v56, %v1682_v20  ;;  %1701 = vrot.lane.b32.xlu0 %v1680_v44, %s6914_s11  ;;  %v1691_v34 = vrot.slane %v1654_v12, 1  ;;  %v1688_v48 = vsel %vm930_vm2, %v1673_v49, %v1687_v29  ;;  %v1656_v63 = vmul.f32 %v1633_v40, %v7698_v9  ;;  %v7795_v12 = vld [vmem:[%s12382_s1 + $0x40] sm:$0x7f]  ;;  %v7800_v9 = vld [vmem:[%s12382_s1 + $0x48] sm:$0x7f] }
 0x349   : > { %1703 = vrot.lane.b32.xlu1 %v1683_v10, %s6914_s11  ;;  %v1686_v24 = vsel %vm930_vm2, %v1684_v37, %v1685_v32  ;;  %v1693_v1 = vrot.slane %v1655_v35, 1  ;;  %v1690_v2 = vsel %vm930_vm2, %v1676_v43, %v1689_v18  ;;  %v1760_v40 = vrot.slane %v7795_v12, %v7007_v4  ;;  %v7813_v43 = vld [vmem:[%s12382_s1 + $0x50] sm:$0x7f] }
 0x34a   : > { %v1692_v3 = vsel %vm930_vm2, %v1679_v38, %v1691_v34  ;;  %v1695_v53 = vrot.slane %v1656_v63, 1  ;;  %v1764_v0 = vrot.slane %v7800_v9, %v7007_v4  ;;  %v1768_v17 = vrot.slane %v7813_v43, %v7007_v4 }
 0x34b   : > { %v1694_v8 = vsel %vm930_vm2, %v1682_v20, %v1693_v1  ;;  %v7818_v20 = vld [vmem:[%s12382_s1 + $0x58] sm:$0x7f]  ;;  %v1872_v45 = vrot.slane %v7795_v12, %v7030_v11  ;;  %v1876_v15 = vrot.slane %v7800_v9, %v7030_v11  ;;  %v1880_v38 = vrot.slane %v7813_v43, %v7030_v11 }
 0x34c   : > { %1705 = vrot.lane.b32.xlu0 %v1686_v24, %s6914_s11  ;;  %v1696_v49 = vsel %vm930_vm2, %v1685_v32, %v1695_v53  ;;  %v1772_v25 = vrot.slane %v7818_v20, %v7007_v4  ;;  %v1884_v56 = vrot.slane %v7818_v20, %v7030_v11  ;;  %v7869_v53 = vld [vmem:[%s7061_s20] sm:$0xfc] }
 0x34d   : > { %1707 = vrot.lane.b32.xlu1 %v1688_v48, %s6914_s11 }
 0x350   : > { %1709 = vrot.lane.b32.xlu0 %v1690_v2, %s6914_s11 }
 0x351   : > { %1711 = vrot.lane.b32.xlu1 %v1692_v3, %s6914_s11 }
 0x354   : > { %1713 = vrot.lane.b32.xlu0 %v1694_v8, %s6914_s11 }
 0x355   : > { %1715 = vrot.lane.b32.xlu1 %v1696_v49, %s6914_s11  ;;  %v7872_v49 = vld [vmem:[%s7061_s20 + $0x8] sm:$0xfc] }
 0x358   : > { %1777 = vrot.lane.b32.xlu0 %v1760_v40, %s6913_s9 }
 0x359   : > { %1779 = vrot.lane.b32.xlu1 %v1764_v0, %s6913_s9 }
 0x35c   : > { %1781 = vrot.lane.b32.xlu0 %v1768_v17, %s6913_s9  ;;  %v7877_v17 = vld [vmem:[%s7061_s20 + $0x30] sm:$0xff] }
 0x35d   : > { %1783 = vrot.lane.b32.xlu1 %v1772_v25, %s6913_s9 }
 0x360   : > { %1889 = vrot.lane.b32.xlu0 %v1872_v45, %s6914_s11 }
 0x361   : > { %1891 = vrot.lane.b32.xlu1 %v1876_v15, %s6914_s11 }
 0x364   : > { %1893 = vrot.lane.b32.xlu0 %v1880_v38, %s6914_s11 }
 0x365   : > { %1895 = vrot.lane.b32.xlu1 %v1884_v56, %s6914_s11 }
 0x3b5   : > { %v7840_v44 = vpop.permute.xlu0 %1697 }
 0x3b6   : > { %12805 = vst [vmem:[#allocation105_spill] sm:$0xff] %v7840_v44  ;;  %v7902_v44 = vld [vmem:[%s7061_s20 + $0x20] sm:$0xfc] }
 0x3b7   : > { %v7842_v50 = vpop.permute.xlu1 %1699 }
 0x3b8   : > { %12806 = vst [vmem:[#allocation106_spill] sm:$0xff] %v7842_v50 }
 0x3ba   : > { %v7844_v10 = vpop.permute.xlu0 %1701 }
 0x3bb   : > { %12807 = vst [vmem:[#allocation107_spill] sm:$0xff] %v7844_v10  ;;  %v7846_v29 = vpop.permute.xlu1 %1703 }
 0x3bc   : > { %12808 = vst [vmem:[#allocation108_spill] sm:$0xff] %v7846_v29 }
 0x3be   : > { %v7848_v37 = vpop.permute.xlu0 %1705 }
 0x3bf   : > { %12809 = vst [vmem:[#allocation109_spill] sm:$0xff] %v7848_v37  ;;  %v7850_v32 = vpop.permute.xlu1 %1707 }
 0x3c0   : > { %12810 = vst [vmem:[#allocation110_spill] sm:$0xff] %v7850_v32 }
 0x3c2   : > { %v7852_v35 = vpop.permute.xlu0 %1709 }
 0x3c3   : > { %12811 = vst [vmem:[#allocation111_spill] sm:$0xff] %v7852_v35  ;;  %v7854_v24 = vpop.permute.xlu1 %1711  ;;  %v7887_v35 = vld [vmem:[%s7061_s20 + $0x18] sm:$0xfc] }
 0x3c4   : > { %12812 = vst [vmem:[#allocation112_spill] sm:$0xff] %v7854_v24 }
 0x3c6   : > { %v7856_v18 = vpop.permute.xlu0 %1713 }
 0x3c7   : > { %12813 = vst [vmem:[#allocation113_spill] sm:$0xff] %v7856_v18  ;;  %v7858_v34 = vpop.permute.xlu1 %1715 }
 0x3c8   : > { %12814 = vst [vmem:[#allocation114_spill] sm:$0xff] %v7858_v34  ;;  %v7883_v34 = vld [vmem:[%s7061_s20 + $0x10] sm:$0xfc] }
 0x3ca   : > { %v7860_v48 = vpop.permute.xlu0 %1777 }
 0x3cb   : > { %12815 = vst [vmem:[#allocation115_spill] sm:$0xff] %v7860_v48  ;;  %v7862_v63 = vpop.permute.xlu1 %1779 }
 0x3cc   : > { %12816 = vst [vmem:[#allocation116_spill] sm:$0xff] %v7862_v63 }
 0x3ce   : > { %v7864_v1 = vpop.permute.xlu0 %1781 }
 0x3cf   : > { %12817 = vst [vmem:[#allocation117_spill] sm:$0xff] %v7864_v1  ;;  %v7866_v2 = vpop.permute.xlu1 %1783 }
 0x3d0   : > { %12818 = vst [vmem:[#allocation118_spill] sm:$0xff] %v7866_v2 }
 0x3d2   : > { %v1890_v3 = vpop.permute.xlu0 %1889 }
 0x3d3   : > { %v1892_v8 = vpop.permute.xlu1 %1891  ;;  %v1905_v0 = vmul.f32 %v1890_v3, %v7869_v53  ;;  %v1910_v25 = vmul.f32 %v7877_v17, %v1890_v3 }
 0x3d4   : > { %v1897_v40 = vsel %vm332_vm0, %v1890_v3, %v1892_v8 }
 0x3d5   : > { %v1906_v45 = vmul.f32 %v1897_v40, %v7872_v49  ;;  %v1911_v15 = vmul.f32 %v7748_v13, %v1897_v40  ;;  %v1935_v56 = vrot.slane %v1905_v0, 2  ;;  %v1936_v1 = vrot.slane %v1910_v25, 2  ;;  %v7893_v0 = vld [vmem:[%s7061_s20 + $0x60] sm:$0x3] }
 0x3d6   : > { %v1894_v38 = vpop.permute.xlu0 %1893  ;;  %v1915_v10 = vmul.f32 %v1890_v3, %v7893_v0  ;;  %v1916_v3 = vmul.f32 %v1897_v40, %v7906_v30 }
 0x3d7   : > { %v1896_v18 = vpop.permute.xlu1 %1895  ;;  %v1898_v2 = vsel %vm332_vm0, %v1892_v8, %v1894_v38  ;;  %v1938_v24 = vrot.slane %v1906_v45, 2  ;;  %v1939_v32 = vrot.slane %v1911_v15, 2  ;;  %v1937_v25 = vsel %vm1823_vm3, %v1935_v56, %v1936_v1 }
 0x3d8   : > { %v1899_v48 = vsel %vm332_vm0, %v1894_v38, %v1896_v18  ;;  %v1907_v63 = vmul.f32 %v1898_v2, %v7883_v34  ;;  %v1912_v37 = vmul.f32 %v7754_v39, %v1898_v2  ;;  %1960 = vrot.lane.b32.xlu0 %v1937_v25, %s6915_s22  ;;  %v7912_v25 = vld [vmem:[%s7061_s20 + $0x70] sm:$0x3] }
 0x3d9   : > { %v1908_v29 = vmul.f32 %v1899_v48, %v7887_v35  ;;  %v1913_v8 = vmul.f32 %v7762_v5, %v1899_v48  ;;  %v1940_v38 = vsel %vm1823_vm3, %v1938_v24, %v1939_v32 }
 0x3da   : > { %v1941_v45 = vrot.slane %v1907_v63, 2  ;;  %v1942_v15 = vrot.slane %v1912_v37, 2  ;;  %1962 = vrot.lane.b32.xlu1 %v1940_v38, %s6915_s22  ;;  %v1909_v37 = vmul.f32 %v1896_v18, %v7902_v44  ;;  %v1914_v63 = vmul.f32 %v7768_v62, %v1896_v18 }
 0x3db   : > { %v1944_v50 = vrot.slane %v1908_v29, 2  ;;  %v1945_v61 = vrot.slane %v1913_v8, 2  ;;  %v1917_v29 = vmul.f32 %v1898_v2, %v7912_v25  ;;  %v1950_v8 = vrot.slane %v1915_v10, 2 }
 0x3dc   : > { %v1943_v56 = vsel %vm1823_vm3, %v1941_v45, %v1942_v15  ;;  %v1947_v38 = vrot.slane %v1909_v37, 2  ;;  %v1948_v31 = vrot.slane %v1914_v63, 2  ;;  %v7920_v45 = vld [vmem:[%s7061_s20 + $0x78] sm:$0x3]  ;;  %v1919_v10 = vmul.f32 %v1896_v18, %v7923_v41 }
 0x3dd   : > { %v1946_v24 = vsel %vm1823_vm3, %v1944_v50, %v1945_v61  ;;  %1964 = vrot.lane.b32.xlu0 %v1943_v56, %s6915_s22  ;;  %v1918_v14 = vmul.f32 %v1899_v48, %v7920_v45  ;;  %v1952_v50 = vrot.slane %v1916_v3, 2  ;;  %v1954_v51 = vrot.slane %v1917_v29, 2 }
 0x3de   : > { %1966 = vrot.lane.b32.xlu1 %v1946_v24, %s6915_s22  ;;  %v1949_v6 = vsel %vm1823_vm3, %v1947_v38, %v1948_v31  ;;  %v1951_v40 = vsel %vm1823_vm3, %v1936_v1, %v1950_v8  ;;  %v1958_v48 = vrot.slane %v1919_v10, 2 }
 0x3df   : > { %v1956_v2 = vrot.slane %v1918_v14, 2  ;;  %v1953_v56 = vsel %vm1823_vm3, %v1939_v32, %v1952_v50  ;;  %v1955_v37 = vsel %vm1823_vm3, %v1942_v15, %v1954_v51  ;;  %v2015_v14 = vrot.slane %v7800_v9, %v7047_v16 }
 0x3e0   : > { %v1959_v1 = vsel %vm1823_vm3, %v1948_v31, %v1958_v48  ;;  %v2019_v51 = vrot.slane %v7813_v43, %v7047_v16  ;;  %v2023_v31 = vrot.slane %v7818_v20, %v7047_v16 }
 0x3e1   : > { %1968 = vrot.lane.b32.xlu0 %v1949_v6, %s6915_s22  ;;  %v1957_v63 = vsel %vm1823_vm3, %v1945_v61, %v1956_v2  ;;  %v2011_v6 = vrot.slane %v7795_v12, %v7047_v16 }
 0x3e2   : > { %1970 = vrot.lane.b32.xlu1 %v1951_v40, %s6915_s22 }
 0x3e5   : > { %1972 = vrot.lane.b32.xlu0 %v1953_v56, %s6915_s22 }
 0x3e6   : > { %1974 = vrot.lane.b32.xlu1 %v1955_v37, %s6915_s22 }
 0x3e9   : > { %1976 = vrot.lane.b32.xlu0 %v1957_v63, %s6915_s22 }
 0x3ea   : > { %1978 = vrot.lane.b32.xlu1 %v1959_v1, %s6915_s22 }
 0x3ed   : > { %2028 = vrot.lane.b32.xlu0 %v2011_v6, %s6915_s22 }
 0x3ee   : > { %2030 = vrot.lane.b32.xlu1 %v2015_v14, %s6915_s22 }
 0x3f1   : > { %2032 = vrot.lane.b32.xlu0 %v2019_v51, %s6915_s22 }
 0x3f2   : > { %2034 = vrot.lane.b32.xlu1 %v2023_v31, %s6915_s22 }
 0x44a   : > { %v7951_v61 = vpop.permute.xlu0 %1960 }
 0x44b   : > { %12819 = vst [vmem:[#allocation119_spill] sm:$0xff] %v7951_v61 }
 0x44c   : > { %v7953_v32 = vpop.permute.xlu1 %1962 }
 0x44d   : > { %12820 = vst [vmem:[#allocation120_spill] sm:$0xff] %v7953_v32 }
 0x44f   : > { %v7955_v18 = vpop.permute.xlu0 %1964 }
 0x450   : > { %12821 = vst [vmem:[#allocation121_spill] sm:$0xff] %v7955_v18  ;;  %v7957_v15 = vpop.permute.xlu1 %1966 }
 0x451   : > { %12822 = vst [vmem:[#allocation122_spill] sm:$0xff] %v7957_v15 }
 0x453   : > { %v7959_v24 = vpop.permute.xlu0 %1968 }
 0x454   : > { %12823 = vst [vmem:[#allocation123_spill] sm:$0xff] %v7959_v24  ;;  %v7961_v3 = vpop.permute.xlu1 %1970 }
 0x455   : > { %12824 = vst [vmem:[#allocation124_spill] sm:$0xff] %v7961_v3 }
 0x457   : > { %v7963_v29 = vpop.permute.xlu0 %1972 }
 0x458   : > { %12825 = vst [vmem:[#allocation125_spill] sm:$0xff] %v7963_v29  ;;  %v7965_v8 = vpop.permute.xlu1 %1974 }
 0x459   : > { %12826 = vst [vmem:[#allocation126_spill] sm:$0xff] %v7965_v8 }
 0x45b   : > { %v7967_v38 = vpop.permute.xlu0 %1976 }
 0x45c   : > { %12827 = vst [vmem:[#allocation127_spill] sm:$0xff] %v7967_v38  ;;  %v7969_v50 = vpop.permute.xlu1 %1978 }
 0x45d   : > { %12828 = vst [vmem:[#allocation128_spill] sm:$0xff] %v7969_v50 }
 0x45f   : > { %v2029_v40 = vpop.permute.xlu0 %2028 }
 0x460   : > { %v2031_v10 = vpop.permute.xlu1 %2030  ;;  %v2044_v2 = vmul.f32 %v2029_v40, %v7869_v53  ;;  %v2049_v56 = vmul.f32 %v7877_v17, %v2029_v40 }
 0x461   : > { %v2036_v37 = vsel %vm381_vm1, %v2029_v40, %v2031_v10 }
 0x462   : > { %v2074_v48 = vrot.slane %v2044_v2, 2  ;;  %v2075_v63 = vrot.slane %v2049_v56, 2  ;;  %v2045_v1 = vmul.f32 %v2036_v37, %v7872_v49  ;;  %v2050_v6 = vmul.f32 %v7748_v13, %v2036_v37 }
 0x463   : > { %v2033_v14 = vpop.permute.xlu0 %2032  ;;  %v2055_v61 = vmul.f32 %v2036_v37, %v7906_v30 }
 0x464   : > { %v2035_v51 = vpop.permute.xlu1 %2034  ;;  %v2037_v31 = vsel %vm381_vm1, %v2031_v10, %v2033_v14  ;;  %v2076_v50 = vsel %vm1823_vm3, %v2074_v48, %v2075_v63  ;;  %v2077_v38 = vrot.slane %v2045_v1, 2  ;;  %v2078_v8 = vrot.slane %v2050_v6, 2 }
 0x465   : > { %v2038_v53 = vsel %vm381_vm1, %v2033_v14, %v2035_v51  ;;  %v2046_v3 = vmul.f32 %v2037_v31, %v7883_v34  ;;  %v2051_v29 = vmul.f32 %v7754_v39, %v2037_v31  ;;  %2099 = vrot.lane.b32.xlu0 %v2076_v50, %s6914_s11  ;;  %v2054_v10 = vmul.f32 %v2029_v40, %v7893_v0 }
 0x466   : > { %v2047_v2 = vmul.f32 %v2038_v53, %v7887_v35  ;;  %v2052_v56 = vmul.f32 %v7762_v5, %v2038_v53  ;;  %v2079_v24 = vsel %vm1823_vm3, %v2077_v38, %v2078_v8  ;;  %v2048_v14 = vmul.f32 %v2035_v51, %v7902_v44 }
 0x467   : > { %v2080_v15 = vrot.slane %v2046_v3, 2  ;;  %v2081_v48 = vrot.slane %v2051_v29, 2  ;;  %2101 = vrot.lane.b32.xlu1 %v2079_v24, %s6914_s11  ;;  %v2053_v50 = vmul.f32 %v7768_v62, %v2035_v51  ;;  %v2056_v32 = vmul.f32 %v2037_v31, %v7912_v25 }
 0x468   : > { %v2083_v1 = vrot.slane %v2047_v2, 2  ;;  %v2084_v6 = vrot.slane %v2052_v56, 2  ;;  %v2089_v0 = vrot.slane %v2054_v10, 2  ;;  %v2086_v3 = vrot.slane %v2048_v14, 2 }
 0x469   : > { %v2082_v18 = vsel %vm1823_vm3, %v2080_v15, %v2081_v48  ;;  %v2087_v24 = vrot.slane %v2053_v50, 2  ;;  %v2150_v29 = vrot.slane %v7795_v12, %v7056_v19  ;;  %v2154_v15 = vrot.slane %v7800_v9, %v7056_v19 }
 0x46a   : > { %v2085_v38 = vsel %vm1823_vm3, %v2083_v1, %v2084_v6  ;;  %2103 = vrot.lane.b32.xlu0 %v2082_v18, %s6914_s11  ;;  %v2057_v40 = vmul.f32 %v2038_v53, %v7920_v45  ;;  %v2091_v31 = vrot.slane %v2055_v61, 2  ;;  %v2093_v2 = vrot.slane %v2056_v32, 2 }
 0x46b   : > { %2105 = vrot.lane.b32.xlu1 %v2085_v38, %s6914_s11  ;;  %v2088_v37 = vsel %vm1823_vm3, %v2086_v3, %v2087_v24  ;;  %v2090_v56 = vsel %vm1823_vm3, %v2075_v63, %v2089_v0  ;;  %v2058_v18 = vmul.f32 %v2035_v51, %v7923_v41  ;;  %v2163_v10 = vmul.f32 %v2150_v29, %v7872_v49 }
 0x46c   : > { %v2167_v1 = vmul.f32 %v7748_v13, %v2150_v29  ;;  %v2158_v14 = vrot.slane %v7813_v43, %v7056_v19  ;;  %v2164_v53 = vmul.f32 %v2154_v15, %v7883_v34  ;;  %v2168_v61 = vmul.f32 %v7754_v39, %v2154_v15 }
 0x46d   : > { %v2162_v32 = vrot.slane %v7818_v20, %v7056_v19  ;;  %v2095_v63 = vrot.slane %v2057_v40, 2  ;;  %v2092_v50 = vsel %vm1823_vm3, %v2078_v8, %v2091_v31  ;;  %v2094_v51 = vsel %vm1823_vm3, %v2081_v48, %v2093_v2 }
 0x46e   : > { %2107 = vrot.lane.b32.xlu0 %v2088_v37, %s6914_s11  ;;  %v2097_v38 = vrot.slane %v2058_v18, 2  ;;  %v2187_v0 = vrot.slane %v2163_v10, 2  ;;  %v2188_v3 = vrot.slane %v2167_v1, 2  ;;  %v2165_v37 = vmul.f32 %v2158_v14, %v7887_v35 }
 0x46f   : > { %2109 = vrot.lane.b32.xlu1 %v2090_v56, %s6914_s11  ;;  %v2169_v56 = vmul.f32 %v7762_v5, %v2158_v14  ;;  %v2190_v7 = vrot.slane %v2164_v53, 2  ;;  %v2191_v55 = vrot.slane %v2168_v61, 2  ;;  %v2166_v46 = vmul.f32 %v2162_v32, %v7902_v44 }
 0x470   : > { %v2170_v40 = vmul.f32 %v7768_v62, %v2162_v32  ;;  %v2096_v8 = vsel %vm1823_vm3, %v2084_v6, %v2095_v63  ;;  %v2098_v48 = vsel %vm1823_vm3, %v2087_v24, %v2097_v38  ;;  %v2189_v31 = vsel %vm1823_vm3, %v2187_v0, %v2188_v3 }
 0x471   : > { %v2193_v2 = vrot.slane %v2165_v37, 2  ;;  %v2194_v18 = vrot.slane %v2169_v56, 2  ;;  %v2171_v10 = vmul.f32 %v2150_v29, %v7906_v30  ;;  %v2192_v1 = vsel %vm1823_vm3, %v2190_v7, %v2191_v55 }
 0x472   : > { %2111 = vrot.lane.b32.xlu0 %v2092_v50, %s6914_s11  ;;  %v2196_v53 = vrot.slane %v2166_v46, 2  ;;  %v2197_v61 = vrot.slane %v2170_v40, 2  ;;  %v2172_v50 = vmul.f32 %v2154_v15, %v7912_v25  ;;  %v2173_v63 = vmul.f32 %v2158_v14, %v7920_v45 }
 0x473   : > { %2113 = vrot.lane.b32.xlu1 %v2094_v51, %s6914_s11  ;;  %v2195_v6 = vsel %vm1823_vm3, %v2193_v2, %v2194_v18  ;;  %v2199_v24 = vrot.slane %v2171_v10, 2  ;;  %v2174_v29 = vmul.f32 %v2162_v32, %v7923_v41  ;;  %v2252_v32 = vrot.slane %v7795_v12, %v7118_v42 }
 0x474   : > { %v2198_v51 = vsel %vm1823_vm3, %v2196_v53, %v2197_v61  ;;  %v2201_v38 = vrot.slane %v2172_v50, 2  ;;  %v2203_v7 = vrot.slane %v2173_v63, 2  ;;  %v2264_v56 = vrot.slane %v7818_v20, %v7118_v42 }
 0x475   : > { %v2200_v46 = vsel %vm1823_vm3, %v2188_v3, %v2199_v24  ;;  %v2205_v0 = vrot.slane %v2174_v29, 2  ;;  %v2256_v3 = vrot.slane %v7800_v9, %v7118_v42  ;;  %v2363_v40 = vrot.slane %v7795_v12, %v7133_v47 }
 0x476   : > { %2115 = vrot.lane.b32.xlu0 %v2096_v8, %s6914_s11  ;;  %v2202_v15 = vsel %vm1823_vm3, %v2191_v55, %v2201_v38  ;;  %v2204_v14 = vsel %vm1823_vm3, %v2194_v18, %v2203_v7  ;;  %v2260_v55 = vrot.slane %v7813_v43, %v7118_v42  ;;  %v2367_v8 = vrot.slane %v7800_v9, %v7133_v47 }
 0x477   : > { %2117 = vrot.lane.b32.xlu1 %v2098_v48, %s6914_s11  ;;  %v2206_v37 = vsel %vm1823_vm3, %v2197_v61, %v2205_v0  ;;  %v2371_v48 = vrot.slane %v7813_v43, %v7133_v47 }
 0x47a   : > { %2207 = vrot.lane.b32.xlu0 %v2189_v31, %s6913_s9  ;;  %v2375_v31 = vrot.slane %v7818_v20, %v7133_v47 }
 0x47b   : > { %2209 = vrot.lane.b32.xlu1 %v2192_v1, %s6913_s9 }
 0x47e   : > { %2211 = vrot.lane.b32.xlu0 %v2195_v6, %s6913_s9 }
 0x47f   : > { %2213 = vrot.lane.b32.xlu1 %v2198_v51, %s6913_s9 }
 0x482   : > { %2215 = vrot.lane.b32.xlu0 %v2200_v46, %s6913_s9 }
 0x483   : > { %2217 = vrot.lane.b32.xlu1 %v2202_v15, %s6913_s9 }
 0x486   : > { %2219 = vrot.lane.b32.xlu0 %v2204_v14, %s6913_s9 }
 0x487   : > { %2221 = vrot.lane.b32.xlu1 %v2206_v37, %s6913_s9 }
 0x48a   : > { %2269 = vrot.lane.b32.xlu0 %v2252_v32, %s6913_s9 }
 0x48b   : > { %2271 = vrot.lane.b32.xlu1 %v2256_v3, %s6913_s9 }
 0x48e   : > { %2273 = vrot.lane.b32.xlu0 %v2260_v55, %s6913_s9 }
 0x48f   : > { %2275 = vrot.lane.b32.xlu1 %v2264_v56, %s6913_s9 }
 0x492   : > { %2380 = vrot.lane.b32.xlu0 %v2363_v40, %s6914_s11 }
 0x493   : > { %2382 = vrot.lane.b32.xlu1 %v2367_v8, %s6914_s11 }
 0x496   : > { %2384 = vrot.lane.b32.xlu0 %v2371_v48, %s6914_s11 }
 0x497   : > { %2386 = vrot.lane.b32.xlu1 %v2375_v31, %s6914_s11 }
 0x4d7   : > { %v8069_v2 = vpop.permute.xlu0 %2099 }
 0x4d8   : > { %12829 = vst [vmem:[#allocation129_spill] sm:$0xff] %v8069_v2 }
 0x4d9   : > { %v8071_v18 = vpop.permute.xlu1 %2101 }
 0x4da   : > { %12830 = vst [vmem:[#allocation130_spill] sm:$0xff] %v8071_v18 }
 0x4dc   : > { %v8073_v10 = vpop.permute.xlu0 %2103 }
 0x4dd   : > { %12831 = vst [vmem:[#allocation131_spill] sm:$0xff] %v8073_v10  ;;  %v8075_v1 = vpop.permute.xlu1 %2105 }
 0x4de   : > { %12832 = vst [vmem:[#allocation132_spill] sm:$0xff] %v8075_v1 }
 0x4e0   : > { %v8077_v53 = vpop.permute.xlu0 %2107 }
 0x4e1   : > { %12833 = vst [vmem:[#allocation133_spill] sm:$0xff] %v8077_v53  ;;  %v8079_v61 = vpop.permute.xlu1 %2109 }
 0x4e2   : > { %12834 = vst [vmem:[#allocation134_spill] sm:$0xff] %v8079_v61 }
 0x4e4   : > { %v8081_v50 = vpop.permute.xlu0 %2111 }
 0x4e5   : > { %12835 = vst [vmem:[#allocation135_spill] sm:$0xff] %v8081_v50  ;;  %v8083_v6 = vpop.permute.xlu1 %2113 }
 0x4e6   : > { %12836 = vst [vmem:[#allocation136_spill] sm:$0xff] %v8083_v6 }
 0x4e8   : > { %v8085_v24 = vpop.permute.xlu0 %2115 }
 0x4e9   : > { %12837 = vst [vmem:[#allocation137_spill] sm:$0xff] %v8085_v24  ;;  %v8087_v63 = vpop.permute.xlu1 %2117 }
 0x4ea   : > { %12838 = vst [vmem:[#allocation138_spill] sm:$0xff] %v8087_v63 }
 0x4ec   : > { %v8089_v51 = vpop.permute.xlu0 %2207 }
 0x4ed   : > { %12839 = vst [vmem:[#allocation139_spill] sm:$0xff] %v8089_v51  ;;  %v8091_v38 = vpop.permute.xlu1 %2209 }
 0x4ee   : > { %12840 = vst [vmem:[#allocation140_spill] sm:$0xff] %v8091_v38 }
 0x4f0   : > { %v8093_v29 = vpop.permute.xlu0 %2211 }
 0x4f1   : > { %12841 = vst [vmem:[#allocation141_spill] sm:$0xff] %v8093_v29  ;;  %v8095_v46 = vpop.permute.xlu1 %2213 }
 0x4f2   : > { %12842 = vst [vmem:[#allocation142_spill] sm:$0xff] %v8095_v46 }
 0x4f4   : > { %v8097_v7 = vpop.permute.xlu0 %2215 }
 0x4f5   : > { %12843 = vst [vmem:[#allocation143_spill] sm:$0xff] %v8097_v7  ;;  %v8099_v15 = vpop.permute.xlu1 %2217 }
 0x4f6   : > { %12844 = vst [vmem:[#allocation144_spill] sm:$0xff] %v8099_v15 }
 0x4f8   : > { %v8101_v0 = vpop.permute.xlu0 %2219 }
 0x4f9   : > { %12845 = vst [vmem:[#allocation145_spill] sm:$0xff] %v8101_v0  ;;  %v8103_v14 = vpop.permute.xlu1 %2221 }
 0x4fa   : > { %12846 = vst [vmem:[#allocation146_spill] sm:$0xff] %v8103_v14 }
 0x4fc   : > { %v8105_v37 = vpop.permute.xlu0 %2269 }
 0x4fd   : > { %12847 = vst [vmem:[#allocation147_spill] sm:$0xff] %v8105_v37  ;;  %v8107_v32 = vpop.permute.xlu1 %2271 }
 0x4fe   : > { %12848 = vst [vmem:[#allocation148_spill] sm:$0xff] %v8107_v32 }
 0x500   : > { %v8109_v3 = vpop.permute.xlu0 %2273 }
 0x501   : > { %12849 = vst [vmem:[#allocation149_spill] sm:$0xff] %v8109_v3  ;;  %v8111_v55 = vpop.permute.xlu1 %2275 }
 0x502   : > { %12850 = vst [vmem:[#allocation150_spill] sm:$0xff] %v8111_v55 }
 0x504   : > { %v2381_v56 = vpop.permute.xlu0 %2380 }
 0x505   : > { %v2383_v40 = vpop.permute.xlu1 %2382  ;;  %v2396_v48 = vmul.f32 %v2381_v56, %v7872_v49  ;;  %v2401_v31 = vmul.f32 %v7748_v13, %v2381_v56 }
 0x506   : > { %v2388_v8 = vsel %vm332_vm0, %v2381_v56, %v2383_v40 }
 0x507   : > { %v2397_v0 = vmul.f32 %v2388_v8, %v7883_v34  ;;  %v2402_v14 = vmul.f32 %v7754_v39, %v2388_v8  ;;  %v2426_v7 = vrot.slane %v2396_v48, 2  ;;  %v2427_v32 = vrot.slane %v2401_v31, 2 }
 0x508   : > { %v2385_v15 = vpop.permute.xlu0 %2384 }
 0x509   : > { %v2387_v37 = vpop.permute.xlu1 %2386  ;;  %v2389_v3 = vsel %vm332_vm0, %v2383_v40, %v2385_v15  ;;  %v2429_v55 = vrot.slane %v2397_v0, 2  ;;  %v2430_v46 = vrot.slane %v2402_v14, 2  ;;  %v2428_v48 = vsel %vm1823_vm3, %v2426_v7, %v2427_v32  ;;  %v8135_v7 = vld [vmem:[%s7061_s20 + $0x58] sm:$0xff] }
 0x50a   : > { %v2390_v29 = vsel %vm332_vm0, %v2385_v15, %v2387_v37  ;;  %v2398_v51 = vmul.f32 %v2389_v3, %v7887_v35  ;;  %v2403_v38 = vmul.f32 %v7762_v5, %v2389_v3  ;;  %2451 = vrot.lane.b32.xlu0 %v2428_v48, %s6915_s22  ;;  %v2406_v14 = vmul.f32 %v2381_v56, %v7906_v30  ;;  %v8129_v15 = vld [vmem:[%s7061_s20 + $0x28] sm:$0xfc] }
 0x50b   : > { %v2399_v63 = vmul.f32 %v2390_v29, %v7902_v44  ;;  %v2404_v24 = vmul.f32 %v7768_v62, %v2390_v29  ;;  %v2431_v0 = vsel %vm1823_vm3, %v2429_v55, %v2430_v46  ;;  %v2400_v53 = vmul.f32 %v2387_v37, %v8129_v15 }
 0x50c   : > { %v2432_v6 = vrot.slane %v2398_v51, 2  ;;  %v2433_v61 = vrot.slane %v2403_v38, 2  ;;  %2453 = vrot.lane.b32.xlu1 %v2431_v0, %s6915_s22  ;;  %v2405_v51 = vmul.f32 %v8135_v7, %v2387_v37  ;;  %v2407_v55 = vmul.f32 %v2388_v8, %v7912_v25 }
 0x50d   : > { %v2435_v40 = vrot.slane %v2399_v63, 2  ;;  %v2436_v31 = vrot.slane %v2404_v24, 2  ;;  %v2408_v56 = vmul.f32 %v2389_v3, %v7920_v45  ;;  %v2441_v63 = vrot.slane %v2406_v14, 2 }
 0x50e   : > { %v2434_v50 = vsel %vm1823_vm3, %v2432_v6, %v2433_v61  ;;  %v2438_v24 = vrot.slane %v2400_v53, 2  ;;  %v2439_v48 = vrot.slane %v2405_v51, 2  ;;  %v8144_v6 = vld [vmem:[%s7061_s20 + $0x88] sm:$0x3]  ;;  %v2409_v0 = vmul.f32 %v2390_v29, %v7923_v41 }
 0x50f   : > { %v2437_v38 = vsel %vm1823_vm3, %v2435_v40, %v2436_v31  ;;  %2455 = vrot.lane.b32.xlu0 %v2434_v50, %s6915_s22  ;;  %v2443_v10 = vrot.slane %v2407_v55, 2  ;;  %v2445_v2 = vrot.slane %v2408_v56, 2  ;;  %v2442_v40 = vsel %vm1823_vm3, %v2427_v32, %v2441_v63 }
 0x510   : > { %2457 = vrot.lane.b32.xlu1 %v2437_v38, %s6915_s22  ;;  %v2440_v1 = vsel %vm1823_vm3, %v2438_v24, %v2439_v48  ;;  %v2410_v3 = vmul.f32 %v2387_v37, %v8144_v6  ;;  %v2447_v53 = vrot.slane %v2409_v0, 2 }
 0x511   : > { %v2444_v50 = vsel %vm1823_vm3, %v2430_v46, %v2443_v10  ;;  %v2446_v8 = vsel %vm1823_vm3, %v2433_v61, %v2445_v2  ;;  %v2506_v10 = vrot.slane %v7800_v9, %v7148_v52  ;;  %v2510_v2 = vrot.slane %v7813_v43, %v7148_v52 }
 0x512   : > { %v2449_v29 = vrot.slane %v2410_v3, 2  ;;  %v2448_v14 = vsel %vm1823_vm3, %v2436_v31, %v2447_v53  ;;  %v2514_v61 = vrot.slane %v7818_v20, %v7148_v52 }
 0x513   : > { %2459 = vrot.lane.b32.xlu0 %v2440_v1, %s6915_s22  ;;  %v2502_v1 = vrot.slane %v7795_v12, %v7148_v52 }
 0x514   : > { %2461 = vrot.lane.b32.xlu1 %v2442_v40, %s6915_s22  ;;  %v2450_v32 = vsel %vm1823_vm3, %v2439_v48, %v2449_v29 }
 0x517   : > { %2463 = vrot.lane.b32.xlu0 %v2444_v50, %s6915_s22 }
 0x518   : > { %2465 = vrot.lane.b32.xlu1 %v2446_v8, %s6915_s22 }
 0x51b   : > { %2467 = vrot.lane.b32.xlu0 %v2448_v14, %s6915_s22 }
 0x51c   : > { %2469 = vrot.lane.b32.xlu1 %v2450_v32, %s6915_s22 }
 0x51f   : > { %2519 = vrot.lane.b32.xlu0 %v2502_v1, %s6915_s22 }
 0x520   : > { %2521 = vrot.lane.b32.xlu1 %v2506_v10, %s6915_s22 }
 0x523   : > { %2523 = vrot.lane.b32.xlu0 %v2510_v2, %s6915_s22 }
 0x524   : > { %2525 = vrot.lane.b32.xlu1 %v2514_v61, %s6915_s22 }
 0x57c   : > { %v8172_v12 = vpop.permute.xlu0 %2451 }
 0x57d   : > { %12851 = vst [vmem:[#allocation151_spill] sm:$0xff] %v8172_v12 }
 0x57e   : > { %v8174_v46 = vpop.permute.xlu1 %2453 }
 0x57f   : > { %12852 = vst [vmem:[#allocation152_spill] sm:$0xff] %v8174_v46 }
 0x581   : > { %v8176_v37 = vpop.permute.xlu0 %2455 }
 0x582   : > { %12853 = vst [vmem:[#allocation153_spill] sm:$0xff] %v8176_v37  ;;  %v8178_v9 = vpop.permute.xlu1 %2457 }
 0x583   : > { %12854 = vst [vmem:[#allocation154_spill] sm:$0xff] %v8178_v9 }
 0x585   : > { %v8180_v31 = vpop.permute.xlu0 %2459 }
 0x586   : > { %12855 = vst [vmem:[#allocation155_spill] sm:$0xff] %v8180_v31  ;;  %v8182_v43 = vpop.permute.xlu1 %2461 }
 0x587   : > { %12856 = vst [vmem:[#allocation156_spill] sm:$0xff] %v8182_v43 }
 0x589   : > { %v8184_v51 = vpop.permute.xlu0 %2463 }
 0x58a   : > { %12857 = vst [vmem:[#allocation157_spill] sm:$0xff] %v8184_v51  ;;  %v8186_v38 = vpop.permute.xlu1 %2465 }
 0x58b   : > { %12858 = vst [vmem:[#allocation158_spill] sm:$0xff] %v8186_v38  ;;  %v8354_v38 = vld [vmem:[%s7061_s20 + $0x80] sm:$0x7] }
 0x58d   : > { %v8188_v20 = vpop.permute.xlu0 %2467 }
 0x58e   : > { %12859 = vst [vmem:[#allocation159_spill] sm:$0xff] %v8188_v20  ;;  %v8190_v55 = vpop.permute.xlu1 %2469 }
 0x58f   : > { %12860 = vst [vmem:[#allocation160_spill] sm:$0xff] %v8190_v55 }
 0x591   : > { %v2520_v56 = vpop.permute.xlu0 %2519 }
 0x592   : > { %v2522_v63 = vpop.permute.xlu1 %2521  ;;  %v2535_v24 = vmul.f32 %v2520_v56, %v7872_v49  ;;  %v2540_v48 = vmul.f32 %v7748_v13, %v2520_v56 }
 0x593   : > { %v2527_v0 = vsel %vm381_vm1, %v2520_v56, %v2522_v63 }
 0x594   : > { %v2565_v40 = vrot.slane %v2535_v24, 2  ;;  %v2566_v3 = vrot.slane %v2540_v48, 2  ;;  %v2536_v53 = vmul.f32 %v2527_v0, %v7883_v34  ;;  %v2541_v50 = vmul.f32 %v7754_v39, %v2527_v0 }
 0x595   : > { %v2524_v8 = vpop.permute.xlu0 %2523 }
 0x596   : > { %v2526_v29 = vpop.permute.xlu1 %2525  ;;  %v2528_v14 = vsel %vm381_vm1, %v2522_v63, %v2524_v8  ;;  %v2567_v32 = vsel %vm1823_vm3, %v2565_v40, %v2566_v3  ;;  %v2568_v1 = vrot.slane %v2536_v53, 2  ;;  %v2569_v10 = vrot.slane %v2541_v50, 2 }
 0x597   : > { %v2529_v49 = vsel %vm381_vm1, %v2524_v8, %v2526_v29  ;;  %v2537_v2 = vmul.f32 %v2528_v14, %v7887_v35  ;;  %v2542_v61 = vmul.f32 %v7762_v5, %v2528_v14  ;;  %2590 = vrot.lane.b32.xlu0 %v2567_v32, %s6914_s11  ;;  %v2545_v63 = vmul.f32 %v2520_v56, %v7906_v30 }
 0x598   : > { %v2538_v34 = vmul.f32 %v2529_v49, %v7902_v44  ;;  %v2543_v24 = vmul.f32 %v7768_v62, %v2529_v49  ;;  %v2570_v48 = vsel %vm1823_vm3, %v2568_v1, %v2569_v10  ;;  %v2539_v35 = vmul.f32 %v2526_v29, %v8129_v15 }
 0x599   : > { %v2571_v55 = vrot.slane %v2537_v2, 2  ;;  %v2572_v40 = vrot.slane %v2542_v61, 2  ;;  %2592 = vrot.lane.b32.xlu1 %v2570_v48, %s6914_s11  ;;  %v2544_v32 = vmul.f32 %v8135_v7, %v2526_v29  ;;  %v2546_v44 = vmul.f32 %v2527_v0, %v7912_v25  ;;  %v8247_v48 = vld [vmem:[%s12382_s1 + $0x70] sm:$0x7f] }
 0x59a   : > { %v2574_v53 = vrot.slane %v2538_v34, 2  ;;  %v2575_v50 = vrot.slane %v2543_v24, 2  ;;  %v2547_v20 = vmul.f32 %v2528_v14, %v7920_v45  ;;  %v2580_v30 = vrot.slane %v2545_v63, 2  ;;  %v8252_v63 = vld [vmem:[%s12382_s1 + $0x78] sm:$0x7f] }
 0x59b   : > { %v2573_v8 = vsel %vm1823_vm3, %v2571_v55, %v2572_v40  ;;  %v2577_v56 = vrot.slane %v2539_v35, 2  ;;  %v2578_v2 = vrot.slane %v2544_v32, 2  ;;  %v2548_v61 = vmul.f32 %v2529_v49, %v7923_v41 }
 0x59c   : > { %v2576_v1 = vsel %vm1823_vm3, %v2574_v53, %v2575_v50  ;;  %2594 = vrot.lane.b32.xlu0 %v2573_v8, %s6914_s11  ;;  %v2582_v55 = vrot.slane %v2546_v44, 2  ;;  %v2584_v34 = vrot.slane %v2547_v20, 2  ;;  %v2581_v24 = vsel %vm1823_vm3, %v2566_v3, %v2580_v30  ;;  %v8229_v20 = vld [vmem:[%s12382_s1 + $0x60] sm:$0x7f] }
 0x59d   : > { %2596 = vrot.lane.b32.xlu1 %v2576_v1, %s6914_s11  ;;  %v2579_v15 = vsel %vm1823_vm3, %v2577_v56, %v2578_v2  ;;  %v2549_v25 = vmul.f32 %v2526_v29, %v8144_v6  ;;  %v2586_v45 = vrot.slane %v2548_v61, 2  ;;  %v8234_v6 = vld [vmem:[%s12382_s1 + $0x68] sm:$0x7f]  ;;  %v2665_v53 = vrot.slane %v8252_v63, %v7007_v4 }
 0x59e   : > { %v2583_v0 = vsel %vm1823_vm3, %v2569_v10, %v2582_v55  ;;  %v2585_v14 = vsel %vm1823_vm3, %v2572_v40, %v2584_v34  ;;  %v2653_v10 = vrot.slane %v8229_v20, %v7007_v4  ;;  %v2657_v49 = vrot.slane %v8234_v6, %v7007_v4 }
 0x59f   : > { %v2588_v41 = vrot.slane %v2549_v25, 2  ;;  %v2587_v3 = vsel %vm1823_vm3, %v2575_v50, %v2586_v45  ;;  %v2661_v40 = vrot.slane %v8247_v48, %v7007_v4  ;;  %v2765_v50 = vrot.slane %v8229_v20, %v7030_v11 }
 0x5a0   : > { %2598 = vrot.lane.b32.xlu0 %v2579_v15, %s6914_s11  ;;  %v2769_v35 = vrot.slane %v8234_v6, %v7030_v11  ;;  %v2773_v8 = vrot.slane %v8247_v48, %v7030_v11  ;;  %v2777_v32 = vrot.slane %v8252_v63, %v7030_v11 }
 0x5a1   : > { %2600 = vrot.lane.b32.xlu1 %v2581_v24, %s6914_s11  ;;  %v2589_v29 = vsel %vm1823_vm3, %v2578_v2, %v2588_v41 }
 0x5a4   : > { %2602 = vrot.lane.b32.xlu0 %v2583_v0, %s6914_s11 }
 0x5a5   : > { %2604 = vrot.lane.b32.xlu1 %v2585_v14, %s6914_s11 }
 0x5a8   : > { %2606 = vrot.lane.b32.xlu0 %v2587_v3, %s6914_s11  ;;  %v8303_v3 = vld [vmem:[%s7061_s20] sm:$0xf8] }
 0x5a9   : > { %2608 = vrot.lane.b32.xlu1 %v2589_v29, %s6914_s11 }
 0x5ac   : > { %2670 = vrot.lane.b32.xlu0 %v2653_v10, %s6913_s9  ;;  %v8306_v10 = vld [vmem:[%s7061_s20 + $0x8] sm:$0xf8] }
 0x5ad   : > { %2672 = vrot.lane.b32.xlu1 %v2657_v49, %s6913_s9 }
 0x5b0   : > { %2674 = vrot.lane.b32.xlu0 %v2661_v40, %s6913_s9 }
 0x5b1   : > { %2676 = vrot.lane.b32.xlu1 %v2665_v53, %s6913_s9 }
 0x5b4   : > { %2782 = vrot.lane.b32.xlu0 %v2765_v50, %s6914_s11 }
 0x5b5   : > { %2784 = vrot.lane.b32.xlu1 %v2769_v35, %s6914_s11 }
 0x5b8   : > { %2786 = vrot.lane.b32.xlu0 %v2773_v8, %s6914_s11 }
 0x5b9   : > { %2788 = vrot.lane.b32.xlu1 %v2777_v32, %s6914_s11 }
 0x609   : > { %v8274_v44 = vpop.permute.xlu0 %2590 }
 0x60a   : > { %12861 = vst [vmem:[#allocation161_spill] sm:$0xff] %v8274_v44 }
 0x60b   : > { %v8276_v1 = vpop.permute.xlu1 %2592 }
 0x60c   : > { %12862 = vst [vmem:[#allocation162_spill] sm:$0xff] %v8276_v1  ;;  %v8337_v1 = vld [vmem:[%s7061_s20 + $0x68] sm:$0x7] }
 0x60e   : > { %v8278_v30 = vpop.permute.xlu0 %2594 }
 0x60f   : > { %12863 = vst [vmem:[#allocation163_spill] sm:$0xff] %v8278_v30  ;;  %v8280_v56 = vpop.permute.xlu1 %2596  ;;  %v8333_v30 = vld [vmem:[%s7061_s20 + $0x20] sm:$0xf8] }
 0x610   : > { %12864 = vst [vmem:[#allocation164_spill] sm:$0xff] %v8280_v56 }
 0x612   : > { %v8282_v2 = vpop.permute.xlu0 %2598 }
 0x613   : > { %12865 = vst [vmem:[#allocation165_spill] sm:$0xff] %v8282_v2  ;;  %v8284_v61 = vpop.permute.xlu1 %2600 }
 0x614   : > { %12866 = vst [vmem:[#allocation166_spill] sm:$0xff] %v8284_v61 }
 0x616   : > { %v8286_v15 = vpop.permute.xlu0 %2602 }
 0x617   : > { %12867 = vst [vmem:[#allocation167_spill] sm:$0xff] %v8286_v15  ;;  %v8288_v55 = vpop.permute.xlu1 %2604 }
 0x618   : > { %12868 = vst [vmem:[#allocation168_spill] sm:$0xff] %v8288_v55 }
 0x61a   : > { %v8290_v34 = vpop.permute.xlu0 %2606 }
 0x61b   : > { %12869 = vst [vmem:[#allocation169_spill] sm:$0xff] %v8290_v34  ;;  %v8292_v24 = vpop.permute.xlu1 %2608 }
 0x61c   : > { %12870 = vst [vmem:[#allocation170_spill] sm:$0xff] %v8292_v24  ;;  %v8314_v24 = vld [vmem:[%s7061_s20 + $0x10] sm:$0xf8] }
 0x61e   : > { %v8294_v25 = vpop.permute.xlu0 %2670 }
 0x61f   : > { %12871 = vst [vmem:[#allocation171_spill] sm:$0xff] %v8294_v25  ;;  %v8296_v45 = vpop.permute.xlu1 %2672 }
 0x620   : > { %12872 = vst [vmem:[#allocation172_spill] sm:$0xff] %v8296_v45 }
 0x622   : > { %v8298_v0 = vpop.permute.xlu0 %2674 }
 0x623   : > { %12873 = vst [vmem:[#allocation173_spill] sm:$0xff] %v8298_v0  ;;  %v8300_v14 = vpop.permute.xlu1 %2676  ;;  %v8318_v0 = vld [vmem:[%s7061_s20 + $0x18] sm:$0xf8] }
 0x624   : > { %12874 = vst [vmem:[#allocation174_spill] sm:$0xff] %v8300_v14 }
 0x626   : > { %v2783_v41 = vpop.permute.xlu0 %2782 }
 0x627   : > { %v2785_v29 = vpop.permute.xlu1 %2784  ;;  %v2798_v40 = vmul.f32 %v2783_v41, %v8303_v3  ;;  %v2803_v53 = vmul.f32 %v7877_v17, %v2783_v41 }
 0x628   : > { %v2790_v49 = vsel %vm332_vm0, %v2783_v41, %v2785_v29 }
 0x629   : > { %v2799_v50 = vmul.f32 %v2790_v49, %v8306_v10  ;;  %v2804_v35 = vmul.f32 %v7748_v13, %v2790_v49  ;;  %v2828_v32 = vrot.slane %v2798_v40, 3  ;;  %v2829_v61 = vrot.slane %v2803_v53, 3  ;;  %v8324_v40 = vld [vmem:[%s7061_s20 + $0x60] sm:$0x7] }
 0x62a   : > { %v2787_v8 = vpop.permute.xlu0 %2786  ;;  %v2808_v56 = vmul.f32 %v2783_v41, %v8324_v40  ;;  %v2809_v41 = vmul.f32 %v2790_v49, %v8337_v1 }
 0x62b   : > { %v2789_v34 = vpop.permute.xlu1 %2788  ;;  %v2791_v55 = vsel %vm332_vm0, %v2785_v29, %v2787_v8  ;;  %v2831_v15 = vrot.slane %v2799_v50, 3  ;;  %v2832_v14 = vrot.slane %v2804_v35, 3  ;;  %v2830_v53 = vsel %vm2716_vm4, %v2828_v32, %v2829_v61 }
 0x62c   : > { %v2792_v25 = vsel %vm332_vm0, %v2787_v8, %v2789_v34  ;;  %v2800_v45 = vmul.f32 %v2791_v55, %v8314_v24  ;;  %v2805_v13 = vmul.f32 %v7754_v39, %v2791_v55  ;;  %2853 = vrot.lane.b32.xlu0 %v2830_v53, %s6915_s22  ;;  %v2807_v32 = vmul.f32 %v7768_v62, %v2789_v34 }
 0x62d   : > { %v2801_v2 = vmul.f32 %v2792_v25, %v8318_v0  ;;  %v2806_v29 = vmul.f32 %v7762_v5, %v2792_v25  ;;  %v2833_v8 = vsel %vm2716_vm4, %v2831_v15, %v2832_v14 }
 0x62e   : > { %v2834_v50 = vrot.slane %v2800_v45, 3  ;;  %v2835_v35 = vrot.slane %v2805_v13, 3  ;;  %2855 = vrot.lane.b32.xlu1 %v2833_v8, %s6915_s22  ;;  %v2802_v45 = vmul.f32 %v2789_v34, %v8333_v30  ;;  %v8343_v13 = vld [vmem:[%s7061_s20 + $0x70] sm:$0x7]  ;;  %v2841_v8 = vrot.slane %v2807_v32, 3 }
 0x62f   : > { %v2837_v39 = vrot.slane %v2801_v2, 3  ;;  %v2838_v44 = vrot.slane %v2806_v29, 3  ;;  %v2810_v2 = vmul.f32 %v2791_v55, %v8343_v13  ;;  %v2843_v29 = vrot.slane %v2808_v56, 3 }
 0x630   : > { %v2836_v5 = vsel %vm2716_vm4, %v2834_v50, %v2835_v35  ;;  %v2840_v53 = vrot.slane %v2802_v45, 3  ;;  %v8351_v50 = vld [vmem:[%s7061_s20 + $0x78] sm:$0x7]  ;;  %v2812_v56 = vmul.f32 %v2789_v34, %v8354_v38  ;;  %v2908_v34 = vrot.slane %v8234_v6, %v7047_v16 }
 0x631   : > { %v2839_v15 = vsel %vm2716_vm4, %v2837_v39, %v2838_v44  ;;  %2857 = vrot.lane.b32.xlu0 %v2836_v5, %s6915_s22  ;;  %v2811_v62 = vmul.f32 %v2792_v25, %v8351_v50  ;;  %v2845_v39 = vrot.slane %v2809_v41, 3  ;;  %v2847_v51 = vrot.slane %v2810_v2, 3 }
 0x632   : > { %2859 = vrot.lane.b32.xlu1 %v2839_v15, %s6915_s22  ;;  %v2842_v43 = vsel %vm2716_vm4, %v2840_v53, %v2841_v8  ;;  %v2844_v49 = vsel %vm2716_vm4, %v2829_v61, %v2843_v29  ;;  %v2851_v25 = vrot.slane %v2812_v56, 3 }
 0x633   : > { %v2849_v55 = vrot.slane %v2811_v62, 3  ;;  %v2846_v5 = vsel %vm2716_vm4, %v2832_v14, %v2845_v39  ;;  %v2848_v45 = vsel %vm2716_vm4, %v2835_v35, %v2847_v51  ;;  %v2912_v51 = vrot.slane %v8247_v48, %v7047_v16 }
 0x634   : > { %v2852_v61 = vsel %vm2716_vm4, %v2841_v8, %v2851_v25 }
 0x635   : > { %2861 = vrot.lane.b32.xlu0 %v2842_v43, %s6915_s22  ;;  %v2850_v32 = vsel %vm2716_vm4, %v2838_v44, %v2849_v55  ;;  %v2904_v43 = vrot.slane %v8229_v20, %v7047_v16  ;;  %v2916_v44 = vrot.slane %v8252_v63, %v7047_v16 }
 0x636   : > { %2863 = vrot.lane.b32.xlu1 %v2844_v49, %s6915_s22 }
 0x639   : > { %2865 = vrot.lane.b32.xlu0 %v2846_v5, %s6915_s22 }
 0x63a   : > { %2867 = vrot.lane.b32.xlu1 %v2848_v45, %s6915_s22 }
 0x63d   : > { %2869 = vrot.lane.b32.xlu0 %v2850_v32, %s6915_s22 }
 0x63e   : > { %2871 = vrot.lane.b32.xlu1 %v2852_v61, %s6915_s22 }
 0x641   : > { %2921 = vrot.lane.b32.xlu0 %v2904_v43, %s6915_s22  ;;  %v8407_v43 = vld [vmem:[%s7061_s20 + $0x38] sm:$0xff] }
 0x642   : > { %2923 = vrot.lane.b32.xlu1 %v2908_v34, %s6915_s22 }
 0x645   : > { %2925 = vrot.lane.b32.xlu0 %v2912_v51, %s6915_s22 }
 0x646   : > { %2927 = vrot.lane.b32.xlu1 %v2916_v44, %s6915_s22 }
 0x69e   : > { %v8382_v14 = vpop.permute.xlu0 %2853 }
 0x69f   : > { %12875 = vst [vmem:[#allocation175_spill] sm:$0xff] %v8382_v14 }
 0x6a0   : > { %v8384_v35 = vpop.permute.xlu1 %2855 }
 0x6a1   : > { %12876 = vst [vmem:[#allocation176_spill] sm:$0xff] %v8384_v35  ;;  %v8430_v35 = vld [vmem:[%s7061_s20 + $0x50] sm:$0xff] }
 0x6a3   : > { %v8386_v15 = vpop.permute.xlu0 %2857 }
 0x6a4   : > { %12877 = vst [vmem:[#allocation177_spill] sm:$0xff] %v8386_v15  ;;  %v8388_v41 = vpop.permute.xlu1 %2859 }
 0x6a5   : > { %12878 = vst [vmem:[#allocation178_spill] sm:$0xff] %v8388_v41 }
 0x6a7   : > { %v8390_v2 = vpop.permute.xlu0 %2861 }
 0x6a8   : > { %12879 = vst [vmem:[#allocation179_spill] sm:$0xff] %v8390_v2  ;;  %v8392_v29 = vpop.permute.xlu1 %2863  ;;  %v8421_v2 = vld [vmem:[%s7061_s20 + $0x48] sm:$0xff] }
 0x6a9   : > { %12880 = vst [vmem:[#allocation180_spill] sm:$0xff] %v8392_v29 }
 0x6ab   : > { %v8394_v53 = vpop.permute.xlu0 %2865 }
 0x6ac   : > { %12881 = vst [vmem:[#allocation181_spill] sm:$0xff] %v8394_v53  ;;  %v8396_v8 = vpop.permute.xlu1 %2867 }
 0x6ad   : > { %12882 = vst [vmem:[#allocation182_spill] sm:$0xff] %v8396_v8 }
 0x6af   : > { %v8398_v62 = vpop.permute.xlu0 %2869 }
 0x6b0   : > { %12883 = vst [vmem:[#allocation183_spill] sm:$0xff] %v8398_v62  ;;  %v8400_v39 = vpop.permute.xlu1 %2871 }
 0x6b1   : > { %12884 = vst [vmem:[#allocation184_spill] sm:$0xff] %v8400_v39 }
 0x6b3   : > { %v2922_v49 = vpop.permute.xlu0 %2921 }
 0x6b4   : > { %v2924_v56 = vpop.permute.xlu1 %2923  ;;  %v2937_v55 = vmul.f32 %v2922_v49, %v8303_v3  ;;  %v2942_v5 = vmul.f32 %v7877_v17, %v2922_v49 }
 0x6b5   : > { %v2929_v45 = vsel %vm381_vm1, %v2922_v49, %v2924_v56 }
 0x6b6   : > { %v2967_v25 = vrot.slane %v2937_v55, 3  ;;  %v2968_v32 = vrot.slane %v2942_v5, 3  ;;  %v2938_v61 = vmul.f32 %v2929_v45, %v8306_v10  ;;  %v2943_v34 = vmul.f32 %v8407_v43, %v2929_v45  ;;  %v8415_v5 = vld [vmem:[%s7061_s20 + $0x40] sm:$0xff] }
 0x6b7   : > { %v2926_v51 = vpop.permute.xlu0 %2925  ;;  %v2948_v9 = vmul.f32 %v2929_v45, %v8337_v1 }
 0x6b8   : > { %v2928_v44 = vpop.permute.xlu1 %2927  ;;  %v2930_v39 = vsel %vm381_vm1, %v2924_v56, %v2926_v51  ;;  %v2969_v3 = vsel %vm2716_vm4, %v2967_v25, %v2968_v32  ;;  %v2970_v62 = vrot.slane %v2938_v61, 3  ;;  %v2971_v8 = vrot.slane %v2943_v34, 3 }
 0x6b9   : > { %v2931_v17 = vsel %vm381_vm1, %v2926_v51, %v2928_v44  ;;  %v2939_v55 = vmul.f32 %v2930_v39, %v8314_v24  ;;  %v2944_v29 = vmul.f32 %v8415_v5, %v2930_v39  ;;  %2992 = vrot.lane.b32.xlu0 %v2969_v3, %s6914_s11  ;;  %v2947_v61 = vmul.f32 %v2922_v49, %v8324_v40 }
 0x6ba   : > { %v2940_v53 = vmul.f32 %v2931_v17, %v8318_v0  ;;  %v2945_v56 = vmul.f32 %v8421_v2, %v2931_v17  ;;  %v2972_v25 = vsel %vm2716_vm4, %v2970_v62, %v2971_v8  ;;  %v2941_v14 = vmul.f32 %v2928_v44, %v8333_v30 }
 0x6bb   : > { %v2973_v34 = vrot.slane %v2939_v55, 3  ;;  %v2974_v51 = vrot.slane %v2944_v29, 3  ;;  %2994 = vrot.lane.b32.xlu1 %v2972_v25, %s6914_s11  ;;  %v2946_v31 = vmul.f32 %v8430_v35, %v2928_v44  ;;  %v2949_v62 = vmul.f32 %v2930_v39, %v8343_v13 }
 0x6bc   : > { %v2976_v41 = vrot.slane %v2940_v53, 3  ;;  %v2977_v15 = vrot.slane %v2945_v56, 3  ;;  %v2982_v29 = vrot.slane %v2947_v61, 3  ;;  %v2979_v49 = vrot.slane %v2941_v14, 3 }
 0x6bd   : > { %v2975_v3 = vsel %vm2716_vm4, %v2973_v34, %v2974_v51  ;;  %v2980_v53 = vrot.slane %v2946_v31, 3  ;;  %v3043_v55 = vrot.slane %v8229_v20, %v7056_v19  ;;  %v3047_v56 = vrot.slane %v8234_v6, %v7056_v19 }
 0x6be   : > { %v2978_v40 = vsel %vm2716_vm4, %v2976_v41, %v2977_v15  ;;  %2996 = vrot.lane.b32.xlu0 %v2975_v3, %s6914_s11  ;;  %v2950_v25 = vmul.f32 %v2931_v17, %v8351_v50  ;;  %v2984_v39 = vrot.slane %v2948_v9, 3  ;;  %v2986_v34 = vrot.slane %v2949_v62, 3 }
 0x6bf   : > { %2998 = vrot.lane.b32.xlu1 %v2978_v40, %s6914_s11  ;;  %v2981_v45 = vsel %vm2716_vm4, %v2979_v49, %v2980_v53  ;;  %v2983_v41 = vsel %vm2716_vm4, %v2968_v32, %v2982_v29  ;;  %v2951_v14 = vmul.f32 %v2928_v44, %v8354_v38  ;;  %v3056_v31 = vmul.f32 %v3043_v55, %v8306_v10 }
 0x6c0   : > { %v3060_v61 = vmul.f32 %v8407_v43, %v3043_v55  ;;  %v3051_v3 = vrot.slane %v8247_v48, %v7056_v19  ;;  %v3057_v17 = vmul.f32 %v3047_v56, %v8314_v24  ;;  %v3061_v9 = vmul.f32 %v8415_v5, %v3047_v56 }
 0x6c1   : > { %v3055_v32 = vrot.slane %v8252_v63, %v7056_v19  ;;  %v2988_v62 = vrot.slane %v2950_v25, 3  ;;  %v2985_v40 = vsel %vm2716_vm4, %v2971_v8, %v2984_v39  ;;  %v2987_v44 = vsel %vm2716_vm4, %v2974_v51, %v2986_v34 }
 0x6c2   : > { %3000 = vrot.lane.b32.xlu0 %v2981_v45, %s6914_s11  ;;  %v2990_v29 = vrot.slane %v2951_v14, 3  ;;  %v3080_v49 = vrot.slane %v3056_v31, 3  ;;  %v3081_v45 = vrot.slane %v3060_v61, 3  ;;  %v3062_v37 = vmul.f32 %v8421_v2, %v3051_v3 }
 0x6c3   : > { %3002 = vrot.lane.b32.xlu1 %v2983_v41, %s6914_s11  ;;  %v3058_v41 = vmul.f32 %v3051_v3, %v8318_v0  ;;  %v3083_v12 = vrot.slane %v3057_v17, 3  ;;  %v3084_v46 = vrot.slane %v3061_v9, 3  ;;  %v3059_v18 = vmul.f32 %v3055_v32, %v8333_v30 }
 0x6c4   : > { %v3063_v25 = vmul.f32 %v8430_v35, %v3055_v32  ;;  %v2989_v8 = vsel %vm2716_vm4, %v2977_v15, %v2988_v62  ;;  %v2991_v51 = vsel %vm2716_vm4, %v2980_v53, %v2990_v29  ;;  %v3082_v39 = vsel %vm2716_vm4, %v3080_v49, %v3081_v45 }
 0x6c5   : > { %v3086_v34 = vrot.slane %v3058_v41, 3  ;;  %v3087_v14 = vrot.slane %v3062_v37, 3  ;;  %v3064_v31 = vmul.f32 %v3043_v55, %v8337_v1  ;;  %v3085_v61 = vsel %vm2716_vm4, %v3083_v12, %v3084_v46 }
 0x6c6   : > { %3004 = vrot.lane.b32.xlu0 %v2985_v40, %s6914_s11  ;;  %v3089_v17 = vrot.slane %v3059_v18, 3  ;;  %v3090_v9 = vrot.slane %v3063_v25, 3  ;;  %v3065_v40 = vmul.f32 %v3047_v56, %v8343_v13  ;;  %v3066_v62 = vmul.f32 %v3051_v3, %v8351_v50 }
 0x6c7   : > { %3006 = vrot.lane.b32.xlu1 %v2987_v44, %s6914_s11  ;;  %v3088_v15 = vsel %vm2716_vm4, %v3086_v34, %v3087_v14  ;;  %v3092_v53 = vrot.slane %v3064_v31, 3  ;;  %v3067_v55 = vmul.f32 %v3055_v32, %v8354_v38  ;;  %v3145_v32 = vrot.slane %v8229_v20, %v7118_v42 }
 0x6c8   : > { %v3091_v44 = vsel %vm2716_vm4, %v3089_v17, %v3090_v9  ;;  %v3094_v37 = vrot.slane %v3065_v40, 3  ;;  %v3096_v12 = vrot.slane %v3066_v62, 3  ;;  %v3157_v41 = vrot.slane %v8252_v63, %v7118_v42 }
 0x6c9   : > { %v3093_v18 = vsel %vm2716_vm4, %v3081_v45, %v3092_v53  ;;  %v3098_v29 = vrot.slane %v3067_v55, 3  ;;  %v3149_v45 = vrot.slane %v8234_v6, %v7118_v42  ;;  %v3256_v25 = vrot.slane %v8229_v20, %v7133_v47 }
 0x6ca   : > { %3008 = vrot.lane.b32.xlu0 %v2989_v8, %s6914_s11  ;;  %v3095_v56 = vsel %vm2716_vm4, %v3084_v46, %v3094_v37  ;;  %v3097_v3 = vsel %vm2716_vm4, %v3087_v14, %v3096_v12  ;;  %v3153_v46 = vrot.slane %v8247_v48, %v7118_v42  ;;  %v3260_v8 = vrot.slane %v8234_v6, %v7133_v47 }
 0x6cb   : > { %3010 = vrot.lane.b32.xlu1 %v2991_v51, %s6914_s11  ;;  %v3099_v49 = vsel %vm2716_vm4, %v3090_v9, %v3098_v29  ;;  %v3264_v51 = vrot.slane %v8247_v48, %v7133_v47 }
 0x6ce   : > { %3100 = vrot.lane.b32.xlu0 %v3082_v39, %s6913_s9  ;;  %v3268_v39 = vrot.slane %v8252_v63, %v7133_v47 }
 0x6cf   : > { %3102 = vrot.lane.b32.xlu1 %v3085_v61, %s6913_s9 }
 0x6d2   : > { %3104 = vrot.lane.b32.xlu0 %v3088_v15, %s6913_s9 }
 0x6d3   : > { %3106 = vrot.lane.b32.xlu1 %v3091_v44, %s6913_s9 }
 0x6d6   : > { %3108 = vrot.lane.b32.xlu0 %v3093_v18, %s6913_s9 }
 0x6d7   : > { %3110 = vrot.lane.b32.xlu1 %v3095_v56, %s6913_s9 }
 0x6da   : > { %3112 = vrot.lane.b32.xlu0 %v3097_v3, %s6913_s9 }
 0x6db   : > { %3114 = vrot.lane.b32.xlu1 %v3099_v49, %s6913_s9 }
 0x6de   : > { %3162 = vrot.lane.b32.xlu0 %v3145_v32, %s6913_s9 }
 0x6df   : > { %3164 = vrot.lane.b32.xlu1 %v3149_v45, %s6913_s9 }
 0x6e2   : > { %3166 = vrot.lane.b32.xlu0 %v3153_v46, %s6913_s9 }
 0x6e3   : > { %3168 = vrot.lane.b32.xlu1 %v3157_v41, %s6913_s9 }
 0x6e6   : > { %3273 = vrot.lane.b32.xlu0 %v3256_v25, %s6914_s11 }
 0x6e7   : > { %3275 = vrot.lane.b32.xlu1 %v3260_v8, %s6914_s11 }
 0x6ea   : > { %3277 = vrot.lane.b32.xlu0 %v3264_v51, %s6914_s11 }
 0x6eb   : > { %3279 = vrot.lane.b32.xlu1 %v3268_v39, %s6914_s11 }
 0x72b   : > { %v8512_v34 = vpop.permute.xlu0 %2992 }
 0x72c   : > { %12885 = vst [vmem:[#allocation185_spill] sm:$0xff] %v8512_v34 }
 0x72d   : > { %v8514_v14 = vpop.permute.xlu1 %2994 }
 0x72e   : > { %12886 = vst [vmem:[#allocation186_spill] sm:$0xff] %v8514_v14 }
 0x730   : > { %v8516_v31 = vpop.permute.xlu0 %2996 }
 0x731   : > { %12887 = vst [vmem:[#allocation187_spill] sm:$0xff] %v8516_v31  ;;  %v8518_v61 = vpop.permute.xlu1 %2998 }
 0x732   : > { %12888 = vst [vmem:[#allocation188_spill] sm:$0xff] %v8518_v61 }
 0x734   : > { %v8520_v17 = vpop.permute.xlu0 %3000 }
 0x735   : > { %12889 = vst [vmem:[#allocation189_spill] sm:$0xff] %v8520_v17  ;;  %v8522_v9 = vpop.permute.xlu1 %3002 }
 0x736   : > { %12890 = vst [vmem:[#allocation190_spill] sm:$0xff] %v8522_v9 }
 0x738   : > { %v8524_v40 = vpop.permute.xlu0 %3004 }
 0x739   : > { %12891 = vst [vmem:[#allocation191_spill] sm:$0xff] %v8524_v40  ;;  %v8526_v15 = vpop.permute.xlu1 %3006 }
 0x73a   : > { %12892 = vst [vmem:[#allocation192_spill] sm:$0xff] %v8526_v15 }
 0x73c   : > { %v8528_v53 = vpop.permute.xlu0 %3008 }
 0x73d   : > { %12893 = vst [vmem:[#allocation193_spill] sm:$0xff] %v8528_v53  ;;  %v8530_v62 = vpop.permute.xlu1 %3010 }
 0x73e   : > { %12894 = vst [vmem:[#allocation194_spill] sm:$0xff] %v8530_v62 }
 0x740   : > { %v8532_v44 = vpop.permute.xlu0 %3100 }
 0x741   : > { %12895 = vst [vmem:[#allocation195_spill] sm:$0xff] %v8532_v44  ;;  %v8534_v37 = vpop.permute.xlu1 %3102 }
 0x742   : > { %12896 = vst [vmem:[#allocation196_spill] sm:$0xff] %v8534_v37 }
 0x744   : > { %v8536_v55 = vpop.permute.xlu0 %3104 }
 0x745   : > { %12897 = vst [vmem:[#allocation197_spill] sm:$0xff] %v8536_v55  ;;  %v8538_v18 = vpop.permute.xlu1 %3106 }
 0x746   : > { %12898 = vst [vmem:[#allocation198_spill] sm:$0xff] %v8538_v18 }
 0x748   : > { %v8540_v12 = vpop.permute.xlu0 %3108 }
 0x749   : > { %12899 = vst [vmem:[#allocation199_spill] sm:$0xff] %v8540_v12  ;;  %v8542_v56 = vpop.permute.xlu1 %3110 }
 0x74a   : > { %12900 = vst [vmem:[#allocation200_spill] sm:$0xff] %v8542_v56 }
 0x74c   : > { %v8544_v29 = vpop.permute.xlu0 %3112 }
 0x74d   : > { %12901 = vst [vmem:[#allocation201_spill] sm:$0xff] %v8544_v29  ;;  %v8546_v3 = vpop.permute.xlu1 %3114 }
 0x74e   : > { %12902 = vst [vmem:[#allocation202_spill] sm:$0xff] %v8546_v3 }
 0x750   : > { %v8548_v49 = vpop.permute.xlu0 %3162 }
 0x751   : > { %12903 = vst [vmem:[#allocation203_spill] sm:$0xff] %v8548_v49  ;;  %v8550_v32 = vpop.permute.xlu1 %3164 }
 0x752   : > { %12904 = vst [vmem:[#allocation204_spill] sm:$0xff] %v8550_v32 }
 0x754   : > { %v8552_v45 = vpop.permute.xlu0 %3166 }
 0x755   : > { %12905 = vst [vmem:[#allocation205_spill] sm:$0xff] %v8552_v45  ;;  %v8554_v46 = vpop.permute.xlu1 %3168 }
 0x756   : > { %12906 = vst [vmem:[#allocation206_spill] sm:$0xff] %v8554_v46 }
 0x758   : > { %v3274_v41 = vpop.permute.xlu0 %3273 }
 0x759   : > { %v3276_v25 = vpop.permute.xlu1 %3275  ;;  %v3289_v51 = vmul.f32 %v3274_v41, %v8306_v10  ;;  %v3294_v39 = vmul.f32 %v8407_v43, %v3274_v41 }
 0x75a   : > { %v3281_v8 = vsel %vm332_vm0, %v3274_v41, %v3276_v25 }
 0x75b   : > { %v3290_v29 = vmul.f32 %v3281_v8, %v8314_v24  ;;  %v3295_v3 = vmul.f32 %v8415_v5, %v3281_v8  ;;  %v3319_v56 = vrot.slane %v3289_v51, 3  ;;  %v3320_v32 = vrot.slane %v3294_v39, 3 }
 0x75c   : > { %v3278_v12 = vpop.permute.xlu0 %3277 }
 0x75d   : > { %v3280_v49 = vpop.permute.xlu1 %3279  ;;  %v3282_v45 = vsel %vm332_vm0, %v3276_v25, %v3278_v12  ;;  %v3322_v46 = vrot.slane %v3290_v29, 3  ;;  %v3323_v18 = vrot.slane %v3295_v3, 3  ;;  %v3321_v15 = vsel %vm2716_vm4, %v3319_v56, %v3320_v32 }
 0x75e   : > { %v3283_v55 = vsel %vm332_vm0, %v3278_v12, %v3280_v49  ;;  %v3291_v44 = vmul.f32 %v3282_v45, %v8318_v0  ;;  %v3296_v37 = vmul.f32 %v8421_v2, %v3282_v45  ;;  %3344 = vrot.lane.b32.xlu0 %v3321_v15, %s6915_s22  ;;  %v3299_v29 = vmul.f32 %v3274_v41, %v8337_v1  ;;  %v8572_v12 = vld [vmem:[%s7061_s20 + $0x28] sm:$0xf8] }
 0x75f   : > { %v3292_v62 = vmul.f32 %v3283_v55, %v8333_v30  ;;  %v3297_v53 = vmul.f32 %v8430_v35, %v3283_v55  ;;  %v3324_v25 = vsel %vm2716_vm4, %v3322_v46, %v3323_v18  ;;  %v3293_v17 = vmul.f32 %v3280_v49, %v8572_v12 }
 0x760   : > { %v3325_v51 = vrot.slane %v3291_v44, 3  ;;  %v3326_v9 = vrot.slane %v3296_v37, 3  ;;  %3346 = vrot.lane.b32.xlu1 %v3324_v25, %s6915_s22  ;;  %v3298_v44 = vmul.f32 %v8135_v7, %v3280_v49  ;;  %v3300_v15 = vmul.f32 %v3281_v8, %v8343_v13 }
 0x761   : > { %v3328_v3 = vrot.slane %v3292_v62, 3  ;;  %v3329_v39 = vrot.slane %v3297_v53, 3  ;;  %v3301_v56 = vmul.f32 %v3282_v45, %v8351_v50  ;;  %v3334_v46 = vrot.slane %v3299_v29, 3  ;;  %v8584_v53 = vld [vmem:[%s7061_s20 + $0x88] sm:$0x7] }
 0x762   : > { %v3327_v40 = vsel %vm2716_vm4, %v3325_v51, %v3326_v9  ;;  %v3331_v41 = vrot.slane %v3293_v17, 3  ;;  %v3332_v62 = vrot.slane %v3298_v44, 3  ;;  %v3302_v51 = vmul.f32 %v3283_v55, %v8354_v38 }
 0x763   : > { %v3330_v37 = vsel %vm2716_vm4, %v3328_v3, %v3329_v39  ;;  %3348 = vrot.lane.b32.xlu0 %v3327_v40, %s6915_s22  ;;  %v3336_v61 = vrot.slane %v3300_v15, 3  ;;  %v3338_v31 = vrot.slane %v3301_v56, 3  ;;  %v3335_v3 = vsel %vm2716_vm4, %v3320_v32, %v3334_v46 }
 0x764   : > { %3350 = vrot.lane.b32.xlu1 %v3330_v37, %s6915_s22  ;;  %v3333_v25 = vsel %vm2716_vm4, %v3331_v41, %v3332_v62  ;;  %v3303_v45 = vmul.f32 %v3280_v49, %v8584_v53  ;;  %v3340_v17 = vrot.slane %v3302_v51, 3  ;;  %v3395_v49 = vrot.slane %v8229_v20, %v7148_v52 }
 0x765   : > { %v3337_v40 = vsel %vm2716_vm4, %v3323_v18, %v3336_v61  ;;  %v3339_v8 = vsel %vm2716_vm4, %v3326_v9, %v3338_v31  ;;  %v3399_v61 = vrot.slane %v8234_v6, %v7148_v52  ;;  %v3403_v31 = vrot.slane %v8247_v48, %v7148_v52 }
 0x766   : > { %v3342_v55 = vrot.slane %v3303_v45, 3  ;;  %v3341_v29 = vsel %vm2716_vm4, %v3329_v39, %v3340_v17  ;;  %v3407_v9 = vrot.slane %v8252_v63, %v7148_v52 }
 0x767   : > { %3352 = vrot.lane.b32.xlu0 %v3333_v25, %s6915_s22 }
 0x768   : > { %3354 = vrot.lane.b32.xlu1 %v3335_v3, %s6915_s22  ;;  %v3343_v32 = vsel %vm2716_vm4, %v3332_v62, %v3342_v55 }
 0x76b   : > { %3356 = vrot.lane.b32.xlu0 %v3337_v40, %s6915_s22 }
 0x76c   : > { %3358 = vrot.lane.b32.xlu1 %v3339_v8, %s6915_s22 }
 0x76f   : > { %3360 = vrot.lane.b32.xlu0 %v3341_v29, %s6915_s22 }
 0x770   : > { %3362 = vrot.lane.b32.xlu1 %v3343_v32, %s6915_s22 }
 0x773   : > { %3412 = vrot.lane.b32.xlu0 %v3395_v49, %s6915_s22 }
 0x774   : > { %3414 = vrot.lane.b32.xlu1 %v3399_v61, %s6915_s22 }
 0x777   : > { %3416 = vrot.lane.b32.xlu0 %v3403_v31, %s6915_s22 }
 0x778   : > { %3418 = vrot.lane.b32.xlu1 %v3407_v9, %s6915_s22 }
 0x7d0   : > { %v8612_v20 = vpop.permute.xlu0 %3344 }
 0x7d1   : > { %12907 = vst [vmem:[#allocation207_spill] sm:$0xff] %v8612_v20 }
 0x7d2   : > { %v8614_v18 = vpop.permute.xlu1 %3346 }
 0x7d3   : > { %12908 = vst [vmem:[#allocation208_spill] sm:$0xff] %v8614_v18 }
 0x7d5   : > { %v8616_v39 = vpop.permute.xlu0 %3348 }
 0x7d6   : > { %12909 = vst [vmem:[#allocation209_spill] sm:$0xff] %v8616_v39  ;;  %v8618_v6 = vpop.permute.xlu1 %3350 }
 0x7d7   : > { %12910 = vst [vmem:[#allocation210_spill] sm:$0xff] %v8618_v6 }
 0x7d9   : > { %v8620_v44 = vpop.permute.xlu0 %3352 }
 0x7da   : > { %12911 = vst [vmem:[#allocation211_spill] sm:$0xff] %v8620_v44  ;;  %v8622_v48 = vpop.permute.xlu1 %3354  ;;  %v8797_v44 = vld [vmem:[%s7061_s20 + $0x80] sm:$0xf] }
 0x7db   : > { %12912 = vst [vmem:[#allocation212_spill] sm:$0xff] %v8622_v48  ;;  %v8780_v48 = vld [vmem:[%s7061_s20 + $0x68] sm:$0xf] }
 0x7dd   : > { %v8624_v37 = vpop.permute.xlu0 %3356 }
 0x7de   : > { %12913 = vst [vmem:[#allocation213_spill] sm:$0xff] %v8624_v37  ;;  %v8626_v15 = vpop.permute.xlu1 %3358 }
 0x7df   : > { %12914 = vst [vmem:[#allocation214_spill] sm:$0xff] %v8626_v15 }
 0x7e1   : > { %v8628_v63 = vpop.permute.xlu0 %3360 }
 0x7e2   : > { %12915 = vst [vmem:[#allocation215_spill] sm:$0xff] %v8628_v63  ;;  %v8630_v56 = vpop.permute.xlu1 %3362 }
 0x7e3   : > { %12916 = vst [vmem:[#allocation216_spill] sm:$0xff] %v8630_v56 }
 0x7e5   : > { %v3413_v46 = vpop.permute.xlu0 %3412 }
 0x7e6   : > { %v3415_v41 = vpop.permute.xlu1 %3414  ;;  %v3428_v62 = vmul.f32 %v3413_v46, %v8306_v10  ;;  %v3433_v51 = vmul.f32 %v8407_v43, %v3413_v46 }
 0x7e7   : > { %v3420_v25 = vsel %vm381_vm1, %v3413_v46, %v3415_v41 }
 0x7e8   : > { %v3458_v3 = vrot.slane %v3428_v62, 3  ;;  %v3459_v45 = vrot.slane %v3433_v51, 3  ;;  %v3429_v17 = vmul.f32 %v3420_v25, %v8314_v24  ;;  %v3434_v40 = vmul.f32 %v8415_v5, %v3420_v25 }
 0x7e9   : > { %v3417_v8 = vpop.permute.xlu0 %3416 }
 0x7ea   : > { %v3419_v55 = vpop.permute.xlu1 %3418  ;;  %v3421_v29 = vsel %vm381_vm1, %v3415_v41, %v3417_v8  ;;  %v3460_v32 = vsel %vm2716_vm4, %v3458_v3, %v3459_v45  ;;  %v3461_v49 = vrot.slane %v3429_v17, 3  ;;  %v3462_v61 = vrot.slane %v3434_v40, 3 }
 0x7eb   : > { %v3422_v10 = vsel %vm381_vm1, %v3417_v8, %v3419_v55  ;;  %v3430_v31 = vmul.f32 %v3421_v29, %v8318_v0  ;;  %v3435_v9 = vmul.f32 %v8421_v2, %v3421_v29  ;;  %3483 = vrot.lane.b32.xlu0 %v3460_v32, %s6914_s11  ;;  %v3438_v41 = vmul.f32 %v3413_v46, %v8337_v1 }
 0x7ec   : > { %v3431_v24 = vmul.f32 %v3422_v10, %v8333_v30  ;;  %v3436_v62 = vmul.f32 %v8430_v35, %v3422_v10  ;;  %v3463_v51 = vsel %vm2716_vm4, %v3461_v49, %v3462_v61  ;;  %v3432_v0 = vmul.f32 %v3419_v55, %v8572_v12 }
 0x7ed   : > { %v3464_v56 = vrot.slane %v3430_v31, 3  ;;  %v3465_v3 = vrot.slane %v3435_v9, 3  ;;  %3485 = vrot.lane.b32.xlu1 %v3463_v51, %s6914_s11  ;;  %v3437_v32 = vmul.f32 %v8135_v7, %v3419_v55  ;;  %v3439_v30 = vmul.f32 %v3420_v25, %v8343_v13  ;;  %v8692_v51 = vld [vmem:[%s12382_s1 + $0x98] sm:$0x7f] }
 0x7ee   : > { %v3467_v17 = vrot.slane %v3431_v24, 3  ;;  %v3468_v40 = vrot.slane %v3436_v62, 3  ;;  %v3440_v63 = vmul.f32 %v3421_v29, %v8351_v50  ;;  %v3473_v1 = vrot.slane %v3438_v41, 3  ;;  %v8687_v62 = vld [vmem:[%s12382_s1 + $0x90] sm:$0x7f] }
 0x7ef   : > { %v3466_v8 = vsel %vm2716_vm4, %v3464_v56, %v3465_v3  ;;  %v3470_v46 = vrot.slane %v3432_v0, 3  ;;  %v3471_v31 = vrot.slane %v3437_v32, 3  ;;  %v3441_v9 = vmul.f32 %v3422_v10, %v8354_v38 }
 0x7f0   : > { %v3469_v49 = vsel %vm2716_vm4, %v3467_v17, %v3468_v40  ;;  %3487 = vrot.lane.b32.xlu0 %v3466_v8, %s6914_s11  ;;  %v3475_v56 = vrot.slane %v3439_v30, 3  ;;  %v3477_v24 = vrot.slane %v3440_v63, 3  ;;  %v3474_v7 = vsel %vm2716_vm4, %v3459_v45, %v3473_v1  ;;  %v8669_v63 = vld [vmem:[%s12382_s1 + $0x80] sm:$0x7f] }
 0x7f1   : > { %3489 = vrot.lane.b32.xlu1 %v3469_v49, %s6914_s11  ;;  %v3472_v12 = vsel %vm2716_vm4, %v3470_v46, %v3471_v31  ;;  %v3442_v13 = vmul.f32 %v3419_v55, %v8584_v53  ;;  %v3479_v50 = vrot.slane %v3441_v9, 3  ;;  %v8674_v53 = vld [vmem:[%s12382_s1 + $0x88] sm:$0x7f]  ;;  %v3554_v41 = vrot.slane %v8687_v62, %v7007_v4 }
 0x7f2   : > { %v3476_v25 = vsel %vm2716_vm4, %v3462_v61, %v3475_v56  ;;  %v3478_v29 = vsel %vm2716_vm4, %v3465_v3, %v3477_v24  ;;  %v3546_v61 = vrot.slane %v8669_v63, %v7007_v4  ;;  %v3550_v10 = vrot.slane %v8674_v53, %v7007_v4 }
 0x7f3   : > { %v3481_v38 = vrot.slane %v3442_v13, 3  ;;  %v3480_v45 = vsel %vm2716_vm4, %v3468_v40, %v3479_v50  ;;  %v3558_v3 = vrot.slane %v8692_v51, %v7007_v4  ;;  %v3658_v17 = vrot.slane %v8669_v63, %v7030_v11 }
 0x7f4   : > { %3491 = vrot.lane.b32.xlu0 %v3472_v12, %s6914_s11  ;;  %v3662_v40 = vrot.slane %v8674_v53, %v7030_v11  ;;  %v3666_v0 = vrot.slane %v8687_v62, %v7030_v11  ;;  %v3670_v8 = vrot.slane %v8692_v51, %v7030_v11 }
 0x7f5   : > { %3493 = vrot.lane.b32.xlu1 %v3474_v7, %s6914_s11  ;;  %v3482_v55 = vsel %vm2716_vm4, %v3471_v31, %v3481_v38  ;;  %v8743_v38 = vld [vmem:[%s7061_s20] sm:$0xf0] }
 0x7f8   : > { %3495 = vrot.lane.b32.xlu0 %v3476_v25, %s6914_s11 }
 0x7f9   : > { %3497 = vrot.lane.b32.xlu1 %v3478_v29, %s6914_s11 }
 0x7fc   : > { %3499 = vrot.lane.b32.xlu0 %v3480_v45, %s6914_s11 }
 0x7fd   : > { %3501 = vrot.lane.b32.xlu1 %v3482_v55, %s6914_s11  ;;  %v8746_v55 = vld [vmem:[%s7061_s20 + $0x8] sm:$0xf0] }
 0x800   : > { %3563 = vrot.lane.b32.xlu0 %v3546_v61, %s6913_s9 }
 0x801   : > { %3565 = vrot.lane.b32.xlu1 %v3550_v10, %s6913_s9 }
 0x804   : > { %3567 = vrot.lane.b32.xlu0 %v3554_v41, %s6913_s9  ;;  %v8751_v41 = vld [vmem:[%s7061_s20 + $0x30] sm:$0xff] }
 0x805   : > { %3569 = vrot.lane.b32.xlu1 %v3558_v3, %s6913_s9 }
 0x808   : > { %3675 = vrot.lane.b32.xlu0 %v3658_v17, %s6914_s11 }
 0x809   : > { %3677 = vrot.lane.b32.xlu1 %v3662_v40, %s6914_s11 }
 0x80c   : > { %3679 = vrot.lane.b32.xlu0 %v3666_v0, %s6914_s11 }
 0x80d   : > { %3681 = vrot.lane.b32.xlu1 %v3670_v8, %s6914_s11 }
 0x85d   : > { %v8714_v32 = vpop.permute.xlu0 %3483 }
 0x85e   : > { %12917 = vst [vmem:[#allocation217_spill] sm:$0xff] %v8714_v32  ;;  %v8776_v32 = vld [vmem:[%s7061_s20 + $0x20] sm:$0xf0] }
 0x85f   : > { %v8716_v30 = vpop.permute.xlu1 %3485 }
 0x860   : > { %12918 = vst [vmem:[#allocation218_spill] sm:$0xff] %v8716_v30 }
 0x862   : > { %v8718_v49 = vpop.permute.xlu0 %3487 }
 0x863   : > { %12919 = vst [vmem:[#allocation219_spill] sm:$0xff] %v8718_v49  ;;  %v8720_v1 = vpop.permute.xlu1 %3489 }
 0x864   : > { %12920 = vst [vmem:[#allocation220_spill] sm:$0xff] %v8720_v1 }
 0x866   : > { %v8722_v46 = vpop.permute.xlu0 %3491 }
 0x867   : > { %12921 = vst [vmem:[#allocation221_spill] sm:$0xff] %v8722_v46  ;;  %v8724_v31 = vpop.permute.xlu1 %3493 }
 0x868   : > { %12922 = vst [vmem:[#allocation222_spill] sm:$0xff] %v8724_v31 }
 0x86a   : > { %v8726_v9 = vpop.permute.xlu0 %3495 }
 0x86b   : > { %12923 = vst [vmem:[#allocation223_spill] sm:$0xff] %v8726_v9  ;;  %v8728_v12 = vpop.permute.xlu1 %3497 }
 0x86c   : > { %12924 = vst [vmem:[#allocation224_spill] sm:$0xff] %v8728_v12 }
 0x86e   : > { %v8730_v56 = vpop.permute.xlu0 %3499 }
 0x86f   : > { %12925 = vst [vmem:[#allocation225_spill] sm:$0xff] %v8730_v56  ;;  %v8732_v24 = vpop.permute.xlu1 %3501 }
 0x870   : > { %12926 = vst [vmem:[#allocation226_spill] sm:$0xff] %v8732_v24  ;;  %v8757_v24 = vld [vmem:[%s7061_s20 + $0x10] sm:$0xf0] }
 0x872   : > { %v8734_v7 = vpop.permute.xlu0 %3563 }
 0x873   : > { %12927 = vst [vmem:[#allocation227_spill] sm:$0xff] %v8734_v7  ;;  %v8736_v13 = vpop.permute.xlu1 %3565 }
 0x874   : > { %12928 = vst [vmem:[#allocation228_spill] sm:$0xff] %v8736_v13 }
 0x876   : > { %v8738_v50 = vpop.permute.xlu0 %3567 }
 0x877   : > { %12929 = vst [vmem:[#allocation229_spill] sm:$0xff] %v8738_v50  ;;  %v8740_v25 = vpop.permute.xlu1 %3569  ;;  %v8761_v50 = vld [vmem:[%s7061_s20 + $0x18] sm:$0xf0] }
 0x878   : > { %12930 = vst [vmem:[#allocation230_spill] sm:$0xff] %v8740_v25 }
 0x87a   : > { %v3676_v29 = vpop.permute.xlu0 %3675 }
 0x87b   : > { %v3678_v45 = vpop.permute.xlu1 %3677  ;;  %v3691_v10 = vmul.f32 %v3676_v29, %v8743_v38  ;;  %v3696_v3 = vmul.f32 %v8751_v41, %v3676_v29 }
 0x87c   : > { %v3683_v61 = vsel %vm332_vm0, %v3676_v29, %v3678_v45 }
 0x87d   : > { %v3692_v17 = vmul.f32 %v3683_v61, %v8746_v55  ;;  %v3697_v40 = vmul.f32 %v8407_v43, %v3683_v61  ;;  %v3721_v8 = vrot.slane %v3691_v10, 4  ;;  %v3722_v31 = vrot.slane %v3696_v3, 4  ;;  %v8767_v10 = vld [vmem:[%s7061_s20 + $0x60] sm:$0xf] }
 0x87e   : > { %v3680_v0 = vpop.permute.xlu0 %3679  ;;  %v3701_v49 = vmul.f32 %v3676_v29, %v8767_v10  ;;  %v3702_v29 = vmul.f32 %v3683_v61, %v8780_v48 }
 0x87f   : > { %v3682_v56 = vpop.permute.xlu1 %3681  ;;  %v3684_v12 = vsel %vm332_vm0, %v3678_v45, %v3680_v0  ;;  %v3724_v9 = vrot.slane %v3692_v17, 4  ;;  %v3725_v25 = vrot.slane %v3697_v40, 4  ;;  %v3723_v3 = vsel %vm3609_vm5, %v3721_v8, %v3722_v31 }
 0x880   : > { %v3685_v7 = vsel %vm332_vm0, %v3680_v0, %v3682_v56  ;;  %v3693_v13 = vmul.f32 %v3684_v12, %v8757_v24  ;;  %v3698_v46 = vmul.f32 %v8415_v5, %v3684_v12  ;;  %3746 = vrot.lane.b32.xlu0 %v3723_v3, %s6915_s22  ;;  %v8786_v3 = vld [vmem:[%s7061_s20 + $0x70] sm:$0xf] }
 0x881   : > { %v3694_v1 = vmul.f32 %v3685_v7, %v8761_v50  ;;  %v3699_v45 = vmul.f32 %v8421_v2, %v3685_v7  ;;  %v3726_v0 = vsel %vm3609_vm5, %v3724_v9, %v3725_v25 }
 0x882   : > { %v3727_v17 = vrot.slane %v3693_v13, 4  ;;  %v3728_v40 = vrot.slane %v3698_v46, 4  ;;  %3748 = vrot.lane.b32.xlu1 %v3726_v0, %s6915_s22  ;;  %v3695_v46 = vmul.f32 %v3682_v56, %v8776_v32  ;;  %v3700_v13 = vmul.f32 %v8430_v35, %v3682_v56 }
 0x883   : > { %v3730_v30 = vrot.slane %v3694_v1, 4  ;;  %v3731_v15 = vrot.slane %v3699_v45, 4  ;;  %v3703_v1 = vmul.f32 %v3684_v12, %v8786_v3  ;;  %v3736_v45 = vrot.slane %v3701_v49, 4 }
 0x884   : > { %v3729_v8 = vsel %vm3609_vm5, %v3727_v17, %v3728_v40  ;;  %v3733_v0 = vrot.slane %v3695_v46, 4  ;;  %v3734_v37 = vrot.slane %v3700_v13, 4  ;;  %v8794_v17 = vld [vmem:[%s7061_s20 + $0x78] sm:$0xf]  ;;  %v3705_v49 = vmul.f32 %v3682_v56, %v8797_v44 }
 0x885   : > { %v3732_v9 = vsel %vm3609_vm5, %v3730_v30, %v3731_v15  ;;  %3750 = vrot.lane.b32.xlu0 %v3729_v8, %s6915_s22  ;;  %v3704_v6 = vmul.f32 %v3685_v7, %v8794_v17  ;;  %v3738_v30 = vrot.slane %v3702_v29, 4  ;;  %v3740_v20 = vrot.slane %v3703_v1, 4 }
 0x886   : > { %3752 = vrot.lane.b32.xlu1 %v3732_v9, %s6915_s22  ;;  %v3735_v39 = vsel %vm3609_vm5, %v3733_v0, %v3734_v37  ;;  %v3737_v61 = vsel %vm3609_vm5, %v3722_v31, %v3736_v45  ;;  %v3744_v7 = vrot.slane %v3705_v49, 4 }
 0x887   : > { %v3742_v12 = vrot.slane %v3704_v6, 4  ;;  %v3739_v8 = vsel %vm3609_vm5, %v3725_v25, %v3738_v30  ;;  %v3741_v46 = vsel %vm3609_vm5, %v3728_v40, %v3740_v20  ;;  %v3801_v6 = vrot.slane %v8674_v53, %v7047_v16 }
 0x888   : > { %v3745_v31 = vsel %vm3609_vm5, %v3734_v37, %v3744_v7  ;;  %v3805_v20 = vrot.slane %v8687_v62, %v7047_v16  ;;  %v3809_v37 = vrot.slane %v8692_v51, %v7047_v16 }
 0x889   : > { %3754 = vrot.lane.b32.xlu0 %v3735_v39, %s6915_s22  ;;  %v3743_v13 = vsel %vm3609_vm5, %v3731_v15, %v3742_v12  ;;  %v3797_v39 = vrot.slane %v8669_v63, %v7047_v16 }
 0x88a   : > { %3756 = vrot.lane.b32.xlu1 %v3737_v61, %s6915_s22 }
 0x88d   : > { %3758 = vrot.lane.b32.xlu0 %v3739_v8, %s6915_s22 }
 0x88e   : > { %3760 = vrot.lane.b32.xlu1 %v3741_v46, %s6915_s22 }
 0x891   : > { %3762 = vrot.lane.b32.xlu0 %v3743_v13, %s6915_s22 }
 0x892   : > { %3764 = vrot.lane.b32.xlu1 %v3745_v31, %s6915_s22 }
 0x895   : > { %3814 = vrot.lane.b32.xlu0 %v3797_v39, %s6915_s22 }
 0x896   : > { %3816 = vrot.lane.b32.xlu1 %v3801_v6, %s6915_s22 }
 0x899   : > { %3818 = vrot.lane.b32.xlu0 %v3805_v20, %s6915_s22 }
 0x89a   : > { %3820 = vrot.lane.b32.xlu1 %v3809_v37, %s6915_s22 }
 0x8f2   : > { %v8825_v15 = vpop.permute.xlu0 %3746 }
 0x8f3   : > { %12931 = vst [vmem:[#allocation231_spill] sm:$0xff] %v8825_v15 }
 0x8f4   : > { %v8827_v56 = vpop.permute.xlu1 %3748 }
 0x8f5   : > { %12932 = vst [vmem:[#allocation232_spill] sm:$0xff] %v8827_v56 }
 0x8f7   : > { %v8829_v25 = vpop.permute.xlu0 %3750 }
 0x8f8   : > { %12933 = vst [vmem:[#allocation233_spill] sm:$0xff] %v8829_v25  ;;  %v8831_v40 = vpop.permute.xlu1 %3752 }
 0x8f9   : > { %12934 = vst [vmem:[#allocation234_spill] sm:$0xff] %v8831_v40 }
 0x8fb   : > { %v8833_v9 = vpop.permute.xlu0 %3754 }
 0x8fc   : > { %12935 = vst [vmem:[#allocation235_spill] sm:$0xff] %v8833_v9  ;;  %v8835_v29 = vpop.permute.xlu1 %3756 }
 0x8fd   : > { %12936 = vst [vmem:[#allocation236_spill] sm:$0xff] %v8835_v29 }
 0x8ff   : > { %v8837_v1 = vpop.permute.xlu0 %3758 }
 0x900   : > { %12937 = vst [vmem:[#allocation237_spill] sm:$0xff] %v8837_v1  ;;  %v8839_v45 = vpop.permute.xlu1 %3760 }
 0x901   : > { %12938 = vst [vmem:[#allocation238_spill] sm:$0xff] %v8839_v45 }
 0x903   : > { %v8841_v0 = vpop.permute.xlu0 %3762 }
 0x904   : > { %12939 = vst [vmem:[#allocation239_spill] sm:$0xff] %v8841_v0  ;;  %v8843_v30 = vpop.permute.xlu1 %3764 }
 0x905   : > { %12940 = vst [vmem:[#allocation240_spill] sm:$0xff] %v8843_v30 }
 0x907   : > { %v3815_v61 = vpop.permute.xlu0 %3814 }
 0x908   : > { %v3817_v49 = vpop.permute.xlu1 %3816  ;;  %v3830_v12 = vmul.f32 %v3815_v61, %v8743_v38  ;;  %v3835_v8 = vmul.f32 %v8751_v41, %v3815_v61 }
 0x909   : > { %v3822_v46 = vsel %vm381_vm1, %v3815_v61, %v3817_v49 }
 0x90a   : > { %v3860_v7 = vrot.slane %v3830_v12, 4  ;;  %v3861_v13 = vrot.slane %v3835_v8, 4  ;;  %v3831_v31 = vmul.f32 %v3822_v46, %v8746_v55  ;;  %v3836_v39 = vmul.f32 %v8407_v43, %v3822_v46 }
 0x90b   : > { %v3819_v6 = vpop.permute.xlu0 %3818  ;;  %v3841_v15 = vmul.f32 %v3822_v46, %v8780_v48 }
 0x90c   : > { %v3821_v20 = vpop.permute.xlu1 %3820  ;;  %v3823_v37 = vsel %vm381_vm1, %v3817_v49, %v3819_v6  ;;  %v3862_v30 = vsel %vm3609_vm5, %v3860_v7, %v3861_v13  ;;  %v3863_v0 = vrot.slane %v3831_v31, 4  ;;  %v3864_v45 = vrot.slane %v3836_v39, 4 }
 0x90d   : > { %v3824_v38 = vsel %vm381_vm1, %v3819_v6, %v3821_v20  ;;  %v3832_v29 = vmul.f32 %v3823_v37, %v8757_v24  ;;  %v3837_v1 = vmul.f32 %v8415_v5, %v3823_v37  ;;  %3885 = vrot.lane.b32.xlu0 %v3862_v30, %s6914_s11  ;;  %v3840_v49 = vmul.f32 %v3815_v61, %v8767_v10 }
 0x90e   : > { %v3833_v12 = vmul.f32 %v3824_v38, %v8761_v50  ;;  %v3838_v8 = vmul.f32 %v8421_v2, %v3824_v38  ;;  %v3865_v9 = vsel %vm3609_vm5, %v3863_v0, %v3864_v45  ;;  %v3834_v6 = vmul.f32 %v3821_v20, %v8776_v32 }
 0x90f   : > { %v3866_v40 = vrot.slane %v3832_v29, 4  ;;  %v3867_v7 = vrot.slane %v3837_v1, 4  ;;  %3887 = vrot.lane.b32.xlu1 %v3865_v9, %s6914_s11  ;;  %v3839_v30 = vmul.f32 %v8430_v35, %v3821_v20  ;;  %v3842_v56 = vmul.f32 %v3823_v37, %v8786_v3 }
 0x910   : > { %v3869_v31 = vrot.slane %v3833_v12, 4  ;;  %v3870_v39 = vrot.slane %v3838_v8, 4  ;;  %v3875_v10 = vrot.slane %v3840_v49, 4  ;;  %v3872_v29 = vrot.slane %v3834_v6, 4 }
 0x911   : > { %v3868_v25 = vsel %vm3609_vm5, %v3866_v40, %v3867_v7  ;;  %v3873_v9 = vrot.slane %v3839_v30, 4  ;;  %v3936_v1 = vrot.slane %v8669_v63, %v7056_v19  ;;  %v3940_v40 = vrot.slane %v8674_v53, %v7056_v19 }
 0x912   : > { %v3871_v0 = vsel %vm3609_vm5, %v3869_v31, %v3870_v39  ;;  %3889 = vrot.lane.b32.xlu0 %v3868_v25, %s6914_s11  ;;  %v3843_v61 = vmul.f32 %v3824_v38, %v8794_v17  ;;  %v3877_v37 = vrot.slane %v3841_v15, 4  ;;  %v3879_v12 = vrot.slane %v3842_v56, 4 }
 0x913   : > { %3891 = vrot.lane.b32.xlu1 %v3871_v0, %s6914_s11  ;;  %v3874_v46 = vsel %vm3609_vm5, %v3872_v29, %v3873_v9  ;;  %v3876_v8 = vsel %vm3609_vm5, %v3861_v13, %v3875_v10  ;;  %v3844_v25 = vmul.f32 %v3821_v20, %v8797_v44  ;;  %v3949_v49 = vmul.f32 %v3936_v1, %v8746_v55 }
 0x914   : > { %v3953_v31 = vmul.f32 %v8407_v43, %v3936_v1  ;;  %v3944_v6 = vrot.slane %v8687_v62, %v7056_v19  ;;  %v3950_v38 = vmul.f32 %v3940_v40, %v8757_v24  ;;  %v3954_v15 = vmul.f32 %v8415_v5, %v3940_v40 }
 0x915   : > { %v3948_v56 = vrot.slane %v8692_v51, %v7056_v19  ;;  %v3881_v13 = vrot.slane %v3843_v61, 4  ;;  %v3878_v30 = vsel %vm3609_vm5, %v3864_v45, %v3877_v37  ;;  %v3880_v20 = vsel %vm3609_vm5, %v3867_v7, %v3879_v12 }
 0x916   : > { %3893 = vrot.lane.b32.xlu0 %v3874_v46, %s6914_s11  ;;  %v3883_v0 = vrot.slane %v3844_v25, 4  ;;  %v3973_v43 = vrot.slane %v3949_v49, 4  ;;  %v3974_v10 = vrot.slane %v3953_v31, 4  ;;  %v3951_v29 = vmul.f32 %v3944_v6, %v8761_v50 }
 0x917   : > { %3895 = vrot.lane.b32.xlu1 %v3876_v8, %s6914_s11  ;;  %v3955_v46 = vmul.f32 %v8421_v2, %v3944_v6  ;;  %v3976_v5 = vrot.slane %v3950_v38, 4  ;;  %v3977_v8 = vrot.slane %v3954_v15, 4  ;;  %v3952_v18 = vmul.f32 %v3948_v56, %v8776_v32 }
 0x918   : > { %v3956_v61 = vmul.f32 %v8430_v35, %v3948_v56  ;;  %v3882_v45 = vsel %vm3609_vm5, %v3870_v39, %v3881_v13  ;;  %v3884_v7 = vsel %vm3609_vm5, %v3873_v9, %v3883_v0  ;;  %v3975_v37 = vsel %vm3609_vm5, %v3973_v43, %v3974_v10 }
 0x919   : > { %v3979_v12 = vrot.slane %v3951_v29, 4  ;;  %v3980_v25 = vrot.slane %v3955_v46, 4  ;;  %v3957_v2 = vmul.f32 %v3936_v1, %v8780_v48  ;;  %v3978_v49 = vsel %vm3609_vm5, %v3976_v5, %v3977_v8 }
 0x91a   : > { %3897 = vrot.lane.b32.xlu0 %v3878_v30, %s6914_s11  ;;  %v3982_v31 = vrot.slane %v3952_v18, 4  ;;  %v3983_v38 = vrot.slane %v3956_v61, 4  ;;  %v3958_v35 = vmul.f32 %v3940_v40, %v8786_v3  ;;  %v3959_v15 = vmul.f32 %v3944_v6, %v8794_v17 }
 0x91b   : > { %3899 = vrot.lane.b32.xlu1 %v3880_v20, %s6914_s11  ;;  %v3981_v39 = vsel %vm3609_vm5, %v3979_v12, %v3980_v25  ;;  %v3985_v9 = vrot.slane %v3957_v2, 4  ;;  %v3960_v1 = vmul.f32 %v3948_v56, %v8797_v44  ;;  %v4038_v56 = vrot.slane %v8669_v63, %v7118_v42 }
 0x91c   : > { %v3984_v13 = vsel %vm3609_vm5, %v3982_v31, %v3983_v38  ;;  %v3987_v30 = vrot.slane %v3958_v35, 4  ;;  %v3989_v40 = vrot.slane %v3959_v15, 4  ;;  %v4046_v29 = vrot.slane %v8687_v62, %v7118_v42 }
 0x91d   : > { %v3986_v18 = vsel %vm3609_vm5, %v3974_v10, %v3985_v9  ;;  %v3991_v0 = vrot.slane %v3960_v1, 4  ;;  %v4042_v10 = vrot.slane %v8674_v53, %v7118_v42  ;;  %v4050_v46 = vrot.slane %v8692_v51, %v7118_v42 }
 0x91e   : > { %3901 = vrot.lane.b32.xlu0 %v3882_v45, %s6914_s11  ;;  %v3988_v20 = vsel %vm3609_vm5, %v3977_v8, %v3987_v30  ;;  %v3990_v6 = vsel %vm3609_vm5, %v3980_v25, %v3989_v40  ;;  %v4149_v5 = vrot.slane %v8669_v63, %v7133_v47  ;;  %v4153_v8 = vrot.slane %v8674_v53, %v7133_v47 }
 0x91f   : > { %3903 = vrot.lane.b32.xlu1 %v3884_v7, %s6914_s11  ;;  %v3992_v43 = vsel %vm3609_vm5, %v3983_v38, %v3991_v0  ;;  %v4157_v61 = vrot.slane %v8687_v62, %v7133_v47  ;;  %v4161_v45 = vrot.slane %v8692_v51, %v7133_v47 }
 0x922   : > { %3993 = vrot.lane.b32.xlu0 %v3975_v37, %s6913_s9 }
 0x923   : > { %3995 = vrot.lane.b32.xlu1 %v3978_v49, %s6913_s9 }
 0x926   : > { %3997 = vrot.lane.b32.xlu0 %v3981_v39, %s6913_s9 }
 0x927   : > { %3999 = vrot.lane.b32.xlu1 %v3984_v13, %s6913_s9 }
 0x92a   : > { %4001 = vrot.lane.b32.xlu0 %v3986_v18, %s6913_s9 }
 0x92b   : > { %4003 = vrot.lane.b32.xlu1 %v3988_v20, %s6913_s9 }
 0x92e   : > { %4005 = vrot.lane.b32.xlu0 %v3990_v6, %s6913_s9 }
 0x92f   : > { %4007 = vrot.lane.b32.xlu1 %v3992_v43, %s6913_s9 }
 0x932   : > { %4055 = vrot.lane.b32.xlu0 %v4038_v56, %s6913_s9 }
 0x933   : > { %4057 = vrot.lane.b32.xlu1 %v4042_v10, %s6913_s9 }
 0x936   : > { %4059 = vrot.lane.b32.xlu0 %v4046_v29, %s6913_s9 }
 0x937   : > { %4061 = vrot.lane.b32.xlu1 %v4050_v46, %s6913_s9 }
 0x93a   : > { %4166 = vrot.lane.b32.xlu0 %v4149_v5, %s6914_s11 }
 0x93b   : > { %4168 = vrot.lane.b32.xlu1 %v4153_v8, %s6914_s11  ;;  %v8990_v8 = vld [vmem:[%s7061_s20 + $0x38] sm:$0xff] }
 0x93e   : > { %4170 = vrot.lane.b32.xlu0 %v4157_v61, %s6914_s11 }
 0x93f   : > { %4172 = vrot.lane.b32.xlu1 %v4161_v45, %s6914_s11 }
 0x97f   : > { %v8943_v7 = vpop.permute.xlu0 %3885 }
 0x980   : > { %12941 = vst [vmem:[#allocation241_spill] sm:$0xff] %v8943_v7 }
 0x981   : > { %v8945_v37 = vpop.permute.xlu1 %3887 }
 0x982   : > { %12942 = vst [vmem:[#allocation242_spill] sm:$0xff] %v8945_v37 }
 0x984   : > { %v8947_v12 = vpop.permute.xlu0 %3889 }
 0x985   : > { %12943 = vst [vmem:[#allocation243_spill] sm:$0xff] %v8947_v12  ;;  %v8949_v25 = vpop.permute.xlu1 %3891 }
 0x986   : > { %12944 = vst [vmem:[#allocation244_spill] sm:$0xff] %v8949_v25 }
 0x988   : > { %v8951_v2 = vpop.permute.xlu0 %3893 }
 0x989   : > { %12945 = vst [vmem:[#allocation245_spill] sm:$0xff] %v8951_v2  ;;  %v8953_v49 = vpop.permute.xlu1 %3895 }
 0x98a   : > { %12946 = vst [vmem:[#allocation246_spill] sm:$0xff] %v8953_v49  ;;  %v9015_v49 = vld [vmem:[%s7061_s20 + $0x28] sm:$0xf0] }
 0x98c   : > { %v8955_v31 = vpop.permute.xlu0 %3897 }
 0x98d   : > { %12947 = vst [vmem:[#allocation247_spill] sm:$0xff] %v8955_v31  ;;  %v8957_v38 = vpop.permute.xlu1 %3899 }
 0x98e   : > { %12948 = vst [vmem:[#allocation248_spill] sm:$0xff] %v8957_v38  ;;  %v9007_v38 = vld [vmem:[%s7061_s20 + $0x50] sm:$0xff] }
 0x990   : > { %v8959_v35 = vpop.permute.xlu0 %3901 }
 0x991   : > { %12949 = vst [vmem:[#allocation249_spill] sm:$0xff] %v8959_v35  ;;  %v8961_v39 = vpop.permute.xlu1 %3903 }
 0x992   : > { %12950 = vst [vmem:[#allocation250_spill] sm:$0xff] %v8961_v39 }
 0x994   : > { %v8963_v9 = vpop.permute.xlu0 %3993 }
 0x995   : > { %12951 = vst [vmem:[#allocation251_spill] sm:$0xff] %v8963_v9  ;;  %v8965_v15 = vpop.permute.xlu1 %3995 }
 0x996   : > { %12952 = vst [vmem:[#allocation252_spill] sm:$0xff] %v8965_v15  ;;  %v9002_v15 = vld [vmem:[%s7061_s20 + $0x48] sm:$0xff] }
 0x998   : > { %v8967_v13 = vpop.permute.xlu0 %3997 }
 0x999   : > { %12953 = vst [vmem:[#allocation253_spill] sm:$0xff] %v8967_v13  ;;  %v8969_v30 = vpop.permute.xlu1 %3999 }
 0x99a   : > { %12954 = vst [vmem:[#allocation254_spill] sm:$0xff] %v8969_v30 }
 0x99c   : > { %v8971_v1 = vpop.permute.xlu0 %4001 }
 0x99d   : > { %12955 = vst [vmem:[#allocation255_spill] sm:$0xff] %v8971_v1  ;;  %v8973_v18 = vpop.permute.xlu1 %4003 }
 0x99e   : > { %12956 = vst [vmem:[#allocation256_spill] sm:$0xff] %v8973_v18 }
 0x9a0   : > { %v8975_v40 = vpop.permute.xlu0 %4005 }
 0x9a1   : > { %12957 = vst [vmem:[#allocation257_spill] sm:$0xff] %v8975_v40  ;;  %v8977_v20 = vpop.permute.xlu1 %4007 }
 0x9a2   : > { %12958 = vst [vmem:[#allocation258_spill] sm:$0xff] %v8977_v20  ;;  %v8995_v20 = vld [vmem:[%s7061_s20 + $0x40] sm:$0xff] }
 0x9a4   : > { %v8979_v0 = vpop.permute.xlu0 %4055 }
 0x9a5   : > { %12959 = vst [vmem:[#allocation259_spill] sm:$0xff] %v8979_v0  ;;  %v8981_v6 = vpop.permute.xlu1 %4057 }
 0x9a6   : > { %12960 = vst [vmem:[#allocation260_spill] sm:$0xff] %v8981_v6 }
 0x9a8   : > { %v8983_v43 = vpop.permute.xlu0 %4059 }
 0x9a9   : > { %12961 = vst [vmem:[#allocation261_spill] sm:$0xff] %v8983_v43  ;;  %v8985_v56 = vpop.permute.xlu1 %4061 }
 0x9aa   : > { %12962 = vst [vmem:[#allocation262_spill] sm:$0xff] %v8985_v56 }
 0x9ac   : > { %v4167_v10 = vpop.permute.xlu0 %4166 }
 0x9ad   : > { %v4169_v29 = vpop.permute.xlu1 %4168  ;;  %v4182_v5 = vmul.f32 %v4167_v10, %v8746_v55  ;;  %v4187_v61 = vmul.f32 %v8990_v8, %v4167_v10 }
 0x9ae   : > { %v4174_v46 = vsel %vm332_vm0, %v4167_v10, %v4169_v29 }
 0x9af   : > { %v4183_v45 = vmul.f32 %v4174_v46, %v8757_v24  ;;  %v4188_v43 = vmul.f32 %v8995_v20, %v4174_v46  ;;  %v4212_v56 = vrot.slane %v4182_v5, 4  ;;  %v4213_v1 = vrot.slane %v4187_v61, 4 }
 0x9b0   : > { %v4171_v40 = vpop.permute.xlu0 %4170 }
 0x9b1   : > { %v4173_v0 = vpop.permute.xlu1 %4172  ;;  %v4175_v6 = vsel %vm332_vm0, %v4169_v29, %v4171_v40  ;;  %v4215_v18 = vrot.slane %v4183_v45, 4  ;;  %v4216_v30 = vrot.slane %v4188_v43, 4  ;;  %v4214_v29 = vsel %vm3609_vm5, %v4212_v56, %v4213_v1  ;;  %v9021_v56 = vld [vmem:[%s7061_s20 + $0x58] sm:$0xff] }
 0x9b2   : > { %v4176_v13 = vsel %vm332_vm0, %v4171_v40, %v4173_v0  ;;  %v4184_v9 = vmul.f32 %v4175_v6, %v8761_v50  ;;  %v4189_v39 = vmul.f32 %v9002_v15, %v4175_v6  ;;  %4237 = vrot.lane.b32.xlu0 %v4214_v29, %s6915_s22  ;;  %v4192_v43 = vmul.f32 %v4167_v10, %v8780_v48 }
 0x9b3   : > { %v4185_v35 = vmul.f32 %v4176_v13, %v8776_v32  ;;  %v4190_v5 = vmul.f32 %v9007_v38, %v4176_v13  ;;  %v4217_v40 = vsel %vm3609_vm5, %v4215_v18, %v4216_v30  ;;  %v4186_v12 = vmul.f32 %v4173_v0, %v9015_v49 }
 0x9b4   : > { %v4218_v61 = vrot.slane %v4184_v9, 4  ;;  %v4219_v45 = vrot.slane %v4189_v39, 4  ;;  %4239 = vrot.lane.b32.xlu1 %v4217_v40, %s6915_s22  ;;  %v4191_v39 = vmul.f32 %v9021_v56, %v4173_v0  ;;  %v4193_v18 = vmul.f32 %v4174_v46, %v8786_v3 }
 0x9b5   : > { %v4221_v31 = vrot.slane %v4185_v35, 4  ;;  %v4222_v2 = vrot.slane %v4190_v5, 4  ;;  %v4194_v10 = vmul.f32 %v4175_v6, %v8794_v17  ;;  %v4227_v35 = vrot.slane %v4192_v43, 4 }
 0x9b6   : > { %v4220_v25 = vsel %vm3609_vm5, %v4218_v61, %v4219_v45  ;;  %v4224_v5 = vrot.slane %v4186_v12, 4  ;;  %v4225_v29 = vrot.slane %v4191_v39, 4  ;;  %v9030_v61 = vld [vmem:[%s7061_s20 + $0x88] sm:$0xf]  ;;  %v4195_v40 = vmul.f32 %v4176_v13, %v8797_v44 }
 0x9b7   : > { %v4223_v9 = vsel %vm3609_vm5, %v4221_v31, %v4222_v2  ;;  %4241 = vrot.lane.b32.xlu0 %v4220_v25, %s6915_s22  ;;  %v4229_v37 = vrot.slane %v4193_v18, 4  ;;  %v4231_v34 = vrot.slane %v4194_v10, 4  ;;  %v4228_v31 = vsel %vm3609_vm5, %v4213_v1, %v4227_v35 }
 0x9b8   : > { %4243 = vrot.lane.b32.xlu1 %v4223_v9, %s6915_s22  ;;  %v4226_v7 = vsel %vm3609_vm5, %v4224_v5, %v4225_v29  ;;  %v4196_v6 = vmul.f32 %v4173_v0, %v9030_v61  ;;  %v4233_v12 = vrot.slane %v4195_v40, 4 }
 0x9b9   : > { %v4230_v25 = vsel %vm3609_vm5, %v4216_v30, %v4229_v37  ;;  %v4232_v46 = vsel %vm3609_vm5, %v4219_v45, %v4231_v34  ;;  %v4292_v37 = vrot.slane %v8674_v53, %v7148_v52  ;;  %v4296_v34 = vrot.slane %v8687_v62, %v7148_v52 }
 0x9ba   : > { %v4235_v13 = vrot.slane %v4196_v6, 4  ;;  %v4234_v43 = vsel %vm3609_vm5, %v4222_v2, %v4233_v12  ;;  %v4300_v2 = vrot.slane %v8692_v51, %v7148_v52 }
 0x9bb   : > { %4245 = vrot.lane.b32.xlu0 %v4226_v7, %s6915_s22  ;;  %v4288_v7 = vrot.slane %v8669_v63, %v7148_v52 }
 0x9bc   : > { %4247 = vrot.lane.b32.xlu1 %v4228_v31, %s6915_s22  ;;  %v4236_v1 = vsel %vm3609_vm5, %v4225_v29, %v4235_v13 }
 0x9bf   : > { %4249 = vrot.lane.b32.xlu0 %v4230_v25, %s6915_s22 }
 0x9c0   : > { %4251 = vrot.lane.b32.xlu1 %v4232_v46, %s6915_s22 }
 0x9c3   : > { %4253 = vrot.lane.b32.xlu0 %v4234_v43, %s6915_s22 }
 0x9c4   : > { %4255 = vrot.lane.b32.xlu1 %v4236_v1, %s6915_s22 }
 0x9c7   : > { %4305 = vrot.lane.b32.xlu0 %v4288_v7, %s6915_s22 }
 0x9c8   : > { %4307 = vrot.lane.b32.xlu1 %v4292_v37, %s6915_s22 }
 0x9cb   : > { %4309 = vrot.lane.b32.xlu0 %v4296_v34, %s6915_s22 }
 0x9cc   : > { %4311 = vrot.lane.b32.xlu1 %v4300_v2, %s6915_s22 }
 0xa24   : > { %v9058_v63 = vpop.permute.xlu0 %4237 }
 0xa25   : > { %12963 = vst [vmem:[#allocation263_spill] sm:$0xff] %v9058_v63 }
 0xa26   : > { %v9060_v30 = vpop.permute.xlu1 %4239 }
 0xa27   : > { %12964 = vst [vmem:[#allocation264_spill] sm:$0xff] %v9060_v30 }
 0xa29   : > { %v9062_v0 = vpop.permute.xlu0 %4241 }
 0xa2a   : > { %12965 = vst [vmem:[#allocation265_spill] sm:$0xff] %v9062_v0  ;;  %v9064_v53 = vpop.permute.xlu1 %4243 }
 0xa2b   : > { %12966 = vst [vmem:[#allocation266_spill] sm:$0xff] %v9064_v53 }
 0xa2d   : > { %v9066_v45 = vpop.permute.xlu0 %4245 }
 0xa2e   : > { %12967 = vst [vmem:[#allocation267_spill] sm:$0xff] %v9066_v45  ;;  %v9068_v62 = vpop.permute.xlu1 %4247 }
 0xa2f   : > { %12968 = vst [vmem:[#allocation268_spill] sm:$0xff] %v9068_v62 }
 0xa31   : > { %v9070_v39 = vpop.permute.xlu0 %4249 }
 0xa32   : > { %12969 = vst [vmem:[#allocation269_spill] sm:$0xff] %v9070_v39  ;;  %v9072_v9 = vpop.permute.xlu1 %4251  ;;  %v9223_v39 = vld [vmem:[%s7061_s20 + $0x68] sm:$0x1f] }
 0xa33   : > { %12970 = vst [vmem:[#allocation270_spill] sm:$0xff] %v9072_v9 }
 0xa35   : > { %v9074_v51 = vpop.permute.xlu0 %4253 }
 0xa36   : > { %12971 = vst [vmem:[#allocation271_spill] sm:$0xff] %v9074_v51  ;;  %v9076_v18 = vpop.permute.xlu1 %4255 }
 0xa37   : > { %12972 = vst [vmem:[#allocation272_spill] sm:$0xff] %v9076_v18 }
 0xa39   : > { %v4306_v10 = vpop.permute.xlu0 %4305 }
 0xa3a   : > { %v4308_v35 = vpop.permute.xlu1 %4307  ;;  %v4321_v5 = vmul.f32 %v4306_v10, %v8746_v55  ;;  %v4326_v29 = vmul.f32 %v8990_v8, %v4306_v10 }
 0xa3b   : > { %v4313_v40 = vsel %vm381_vm1, %v4306_v10, %v4308_v35 }
 0xa3c   : > { %v4351_v31 = vrot.slane %v4321_v5, 4  ;;  %v4352_v6 = vrot.slane %v4326_v29, 4  ;;  %v4322_v12 = vmul.f32 %v4313_v40, %v8757_v24  ;;  %v4327_v25 = vmul.f32 %v8995_v20, %v4313_v40 }
 0xa3d   : > { %v4310_v46 = vpop.permute.xlu0 %4309 }
 0xa3e   : > { %v4312_v13 = vpop.permute.xlu1 %4311  ;;  %v4314_v43 = vsel %vm381_vm1, %v4308_v35, %v4310_v46  ;;  %v4353_v1 = vsel %vm3609_vm5, %v4351_v31, %v4352_v6  ;;  %v4354_v7 = vrot.slane %v4322_v12, 4  ;;  %v4355_v37 = vrot.slane %v4327_v25, 4 }
 0xa3f   : > { %v4315_v55 = vsel %vm381_vm1, %v4310_v46, %v4312_v13  ;;  %v4323_v34 = vmul.f32 %v4314_v43, %v8761_v50  ;;  %v4328_v2 = vmul.f32 %v9002_v15, %v4314_v43  ;;  %4376 = vrot.lane.b32.xlu0 %v4353_v1, %s6914_s11  ;;  %v4331_v35 = vmul.f32 %v4306_v10, %v8780_v48 }
 0xa40   : > { %v4324_v24 = vmul.f32 %v4315_v55, %v8776_v32  ;;  %v4329_v5 = vmul.f32 %v9007_v38, %v4315_v55  ;;  %v4356_v29 = vsel %vm3609_vm5, %v4354_v7, %v4355_v37  ;;  %v4325_v50 = vmul.f32 %v4312_v13, %v9015_v49 }
 0xa41   : > { %v4357_v18 = vrot.slane %v4323_v34, 4  ;;  %v4358_v31 = vrot.slane %v4328_v2, 4  ;;  %4378 = vrot.lane.b32.xlu1 %v4356_v29, %s6914_s11  ;;  %v4330_v1 = vmul.f32 %v9021_v56, %v4312_v13  ;;  %v4332_v32 = vmul.f32 %v4313_v40, %v8786_v3  ;;  %v9133_v29 = vld [vmem:[%s12382_s1 + $0xb0] sm:$0x7f] }
 0xa42   : > { %v4360_v12 = vrot.slane %v4324_v24, 4  ;;  %v4361_v25 = vrot.slane %v4329_v5, 4  ;;  %v4333_v51 = vmul.f32 %v4314_v43, %v8794_v17  ;;  %v4366_v48 = vrot.slane %v4331_v35, 4  ;;  %12975 = vst [vmem:[#allocation275_spill] sm:$0xff] %v9133_v29  ;;  %v9138_v35 = vld [vmem:[%s12382_s1 + $0xb8] sm:$0x7f] }
 0xa43   : > { %v4359_v46 = vsel %vm3609_vm5, %v4357_v18, %v4358_v31  ;;  %v4363_v10 = vrot.slane %v4325_v50, 4  ;;  %v4364_v34 = vrot.slane %v4330_v1, 4  ;;  %v4334_v2 = vmul.f32 %v4315_v55, %v8797_v44  ;;  %12976 = vst [vmem:[#allocation276_spill] sm:$0xff] %v9138_v35 }
 0xa44   : > { %v4362_v7 = vsel %vm3609_vm5, %v4360_v12, %v4361_v25  ;;  %4380 = vrot.lane.b32.xlu0 %v4359_v46, %s6914_s11  ;;  %v4368_v18 = vrot.slane %v4332_v32, 4  ;;  %v4370_v24 = vrot.slane %v4333_v51, 4  ;;  %v4367_v5 = vsel %vm3609_vm5, %v4352_v6, %v4366_v48  ;;  %v9115_v51 = vld [vmem:[%s12382_s1 + $0xa0] sm:$0x7f] }
 0xa45   : > { %4382 = vrot.lane.b32.xlu1 %v4362_v7, %s6914_s11  ;;  %v4365_v49 = vsel %vm3609_vm5, %v4363_v10, %v4364_v34  ;;  %v4335_v3 = vmul.f32 %v4312_v13, %v9030_v61  ;;  %v4372_v17 = vrot.slane %v4334_v2, 4  ;;  %12973 = vst [vmem:[#allocation273_spill] sm:$0xff] %v9115_v51  ;;  %v9120_v61 = vld [vmem:[%s12382_s1 + $0xa8] sm:$0x7f]  ;;  %v4451_v12 = vrot.slane %v9138_v35, %v7007_v4 }
 0xa46   : > { %v4369_v40 = vsel %vm3609_vm5, %v4355_v37, %v4368_v18  ;;  %v4371_v43 = vsel %vm3609_vm5, %v4358_v31, %v4370_v24  ;;  %12974 = vst [vmem:[#allocation274_spill] sm:$0xff] %v9120_v61  ;;  %v4439_v37 = vrot.slane %v9115_v51, %v7007_v4  ;;  %v4443_v55 = vrot.slane %v9120_v61, %v7007_v4 }
 0xa47   : > { %v4374_v44 = vrot.slane %v4335_v3, 4  ;;  %v4373_v6 = vsel %vm3609_vm5, %v4361_v25, %v4372_v17  ;;  %v4447_v31 = vrot.slane %v9133_v29, %v7007_v4  ;;  %v4551_v25 = vrot.slane %v9115_v51, %v7030_v11  ;;  %v12999_v4 = vld [vmem:[#allocation16_spill] sm:$0xff] }
 0xa48   : > { %4384 = vrot.lane.b32.xlu0 %v4365_v49, %s6914_s11  ;;  %v4555_v50 = vrot.slane %v9120_v61, %v7030_v11  ;;  %v4559_v46 = vrot.slane %v9133_v29, %v7030_v11  ;;  %v4563_v1 = vrot.slane %v9138_v35, %v7030_v11 }
 0xa49   : > { %4386 = vrot.lane.b32.xlu1 %v4367_v5, %s6914_s11  ;;  %v4375_v13 = vsel %vm3609_vm5, %v4364_v34, %v4374_v44 }
 0xa4c   : > { %4388 = vrot.lane.b32.xlu0 %v4369_v40, %s6914_s11 }
 0xa4d   : > { %4390 = vrot.lane.b32.xlu1 %v4371_v43, %s6914_s11 }
 0xa50   : > { %4392 = vrot.lane.b32.xlu0 %v4373_v6, %s6914_s11  ;;  %v9189_v6 = vld [vmem:[%s7061_s20] sm:$0xe0] }
 0xa51   : > { %4394 = vrot.lane.b32.xlu1 %v4375_v13, %s6914_s11 }
 0xa54   : > { %4456 = vrot.lane.b32.xlu0 %v4439_v37, %s6913_s9  ;;  %v9192_v37 = vld [vmem:[%s7061_s20 + $0x8] sm:$0xe0] }
 0xa55   : > { %4458 = vrot.lane.b32.xlu1 %v4443_v55, %s6913_s9 }
 0xa58   : > { %4460 = vrot.lane.b32.xlu0 %v4447_v31, %s6913_s9 }
 0xa59   : > { %4462 = vrot.lane.b32.xlu1 %v4451_v12, %s6913_s9 }
 0xa5c   : > { %4568 = vrot.lane.b32.xlu0 %v4551_v25, %s6914_s11 }
 0xa5d   : > { %4570 = vrot.lane.b32.xlu1 %v4555_v50, %s6914_s11 }
 0xa60   : > { %4572 = vrot.lane.b32.xlu0 %v4559_v46, %s6914_s11 }
 0xa61   : > { %4574 = vrot.lane.b32.xlu1 %v4563_v1, %s6914_s11 }
 0xab1   : > { %v9160_v32 = vpop.permute.xlu0 %4376 }
 0xab2   : > { %12977 = vst [vmem:[#allocation277_spill] sm:$0xff] %v9160_v32 }
 0xab3   : > { %v9162_v7 = vpop.permute.xlu1 %4378 }
 0xab4   : > { %12978 = vst [vmem:[#allocation278_spill] sm:$0xff] %v9162_v7 }
 0xab6   : > { %v9164_v48 = vpop.permute.xlu0 %4380 }
 0xab7   : > { %12979 = vst [vmem:[#allocation279_spill] sm:$0xff] %v9164_v48  ;;  %v9166_v10 = vpop.permute.xlu1 %4382 }
 0xab8   : > { %12980 = vst [vmem:[#allocation280_spill] sm:$0xff] %v9166_v10 }
 0xaba   : > { %v9168_v34 = vpop.permute.xlu0 %4384 }
 0xabb   : > { %12981 = vst [vmem:[#allocation281_spill] sm:$0xff] %v9168_v34  ;;  %v9170_v2 = vpop.permute.xlu1 %4386  ;;  %v9219_v34 = vld [vmem:[%s7061_s20 + $0x20] sm:$0xe0] }
 0xabc   : > { %12982 = vst [vmem:[#allocation282_spill] sm:$0xff] %v9170_v2  ;;  %v9204_v2 = vld [vmem:[%s7061_s20 + $0x18] sm:$0xe0] }
 0xabe   : > { %v9172_v49 = vpop.permute.xlu0 %4388 }
 0xabf   : > { %12983 = vst [vmem:[#allocation283_spill] sm:$0xff] %v9172_v49  ;;  %v9174_v18 = vpop.permute.xlu1 %4390 }
 0xac0   : > { %12984 = vst [vmem:[#allocation284_spill] sm:$0xff] %v9174_v18 }
 0xac2   : > { %v9176_v24 = vpop.permute.xlu0 %4392 }
 0xac3   : > { %12985 = vst [vmem:[#allocation285_spill] sm:$0xff] %v9176_v24  ;;  %v9178_v5 = vpop.permute.xlu1 %4394 }
 0xac4   : > { %12986 = vst [vmem:[#allocation286_spill] sm:$0xff] %v9178_v5 }
 0xac6   : > { %v9180_v3 = vpop.permute.xlu0 %4456 }
 0xac7   : > { %12987 = vst [vmem:[#allocation287_spill] sm:$0xff] %v9180_v3  ;;  %v9182_v17 = vpop.permute.xlu1 %4458 }
 0xac8   : > { %12988 = vst [vmem:[#allocation288_spill] sm:$0xff] %v9182_v17 }
 0xaca   : > { %v9184_v40 = vpop.permute.xlu0 %4460 }
 0xacb   : > { %12989 = vst [vmem:[#allocation289_spill] sm:$0xff] %v9184_v40  ;;  %v9186_v43 = vpop.permute.xlu1 %4462  ;;  %v9200_v40 = vld [vmem:[%s7061_s20 + $0x10] sm:$0xe0] }
 0xacc   : > { %12990 = vst [vmem:[#allocation290_spill] sm:$0xff] %v9186_v43  ;;  %v9240_v43 = vld [vmem:[%s7061_s20 + $0x80] sm:$0x1f] }
 0xacd   : > { %12992 = vst [vmem:[#allocation292_spill] sm:$0xff] %v9240_v43 }
 0xace   : > { %v4569_v44 = vpop.permute.xlu0 %4568 }
 0xacf   : > { %v4571_v13 = vpop.permute.xlu1 %4570  ;;  %v4584_v31 = vmul.f32 %v4569_v44, %v9189_v6  ;;  %v4589_v12 = vmul.f32 %v8751_v41, %v4569_v44 }
 0xad0   : > { %v4576_v55 = vsel %vm332_vm0, %v4569_v44, %v4571_v13 }
 0xad1   : > { %v4585_v25 = vmul.f32 %v4576_v55, %v9192_v37  ;;  %v4590_v50 = vmul.f32 %v8990_v8, %v4576_v55  ;;  %v4614_v1 = vrot.slane %v4584_v31, 5  ;;  %v4615_v17 = vrot.slane %v4589_v12, 5  ;;  %v9210_v31 = vld [vmem:[%s7061_s20 + $0x60] sm:$0x1f] }
 0xad2   : > { %v4573_v46 = vpop.permute.xlu0 %4572  ;;  %v4594_v7 = vmul.f32 %v4569_v44, %v9210_v31  ;;  %v4595_v44 = vmul.f32 %v4576_v55, %v9223_v39 }
 0xad3   : > { %v4575_v5 = vpop.permute.xlu1 %4574  ;;  %v4577_v3 = vsel %vm332_vm0, %v4571_v13, %v4573_v46  ;;  %v4617_v24 = vrot.slane %v4585_v25, 5  ;;  %v4618_v18 = vrot.slane %v4590_v50, 5  ;;  %v4616_v12 = vsel %vm4502_vm6, %v4614_v1, %v4615_v17 }
 0xad4   : > { %v4578_v49 = vsel %vm332_vm0, %v4573_v46, %v4575_v5  ;;  %v4586_v10 = vmul.f32 %v4577_v3, %v9200_v40  ;;  %v4591_v48 = vmul.f32 %v8995_v20, %v4577_v3  ;;  %4639 = vrot.lane.b32.xlu0 %v4616_v12, %s6915_s22  ;;  %v9229_v12 = vld [vmem:[%s7061_s20 + $0x70] sm:$0x1f] }
 0xad5   : > { %v4587_v32 = vmul.f32 %v4578_v49, %v9204_v2  ;;  %v4592_v13 = vmul.f32 %v9002_v15, %v4578_v49  ;;  %v4619_v46 = vsel %vm4502_vm6, %v4617_v24, %v4618_v18 }
 0xad6   : > { %v4620_v25 = vrot.slane %v4586_v10, 5  ;;  %v4621_v50 = vrot.slane %v4591_v48, 5  ;;  %4641 = vrot.lane.b32.xlu1 %v4619_v46, %s6915_s22  ;;  %v4588_v48 = vmul.f32 %v4575_v5, %v9219_v34  ;;  %v4593_v10 = vmul.f32 %v9007_v38, %v4575_v5 }
 0xad7   : > { %v4623_v9 = vrot.slane %v4587_v32, 5  ;;  %v4624_v62 = vrot.slane %v4592_v13, 5  ;;  %v4596_v32 = vmul.f32 %v4577_v3, %v9229_v12  ;;  %v4629_v13 = vrot.slane %v4594_v7, 5 }
 0xad8   : > { %v4622_v1 = vsel %vm4502_vm6, %v4620_v25, %v4621_v50  ;;  %v4626_v46 = vrot.slane %v4588_v48, 5  ;;  %v4627_v45 = vrot.slane %v4593_v10, 5  ;;  %v9237_v25 = vld [vmem:[%s7061_s20 + $0x78] sm:$0x1f]  ;;  %v4598_v7 = vmul.f32 %v4575_v5, %v9240_v43 }
 0xad9   : > { %v4625_v24 = vsel %vm4502_vm6, %v4623_v9, %v4624_v62  ;;  %4643 = vrot.lane.b32.xlu0 %v4622_v1, %s6915_s22  ;;  %12991 = vst [vmem:[#allocation291_spill] sm:$0xff] %v9237_v25  ;;  %v4597_v53 = vmul.f32 %v4578_v49, %v9237_v25  ;;  %v4631_v9 = vrot.slane %v4595_v44, 5  ;;  %v4633_v63 = vrot.slane %v4596_v32, 5  ;;  %v13006_v25 = vld [vmem:[#allocation20_spill] sm:$0xff] }
 0xada   : > { %4645 = vrot.lane.b32.xlu1 %v4625_v24, %s6915_s22  ;;  %v4628_v0 = vsel %vm4502_vm6, %v4626_v46, %v4627_v45  ;;  %v4630_v55 = vsel %vm4502_vm6, %v4615_v17, %v4629_v13  ;;  %v4637_v49 = vrot.slane %v4598_v7, 5  ;;  %v277_v5 = vsel %vm275_vm7, %v7170_v60, %v7164_v57  ;;  %v6713_v24 = vld [vmem:[%s7061_s20] sm:$0xff]  ;;  %v9284_v13 = vld [vmem:[%s7061_s20 + $0x18] sm:$0xff] }
 0xadb   : > { %v4635_v3 = vrot.slane %v4597_v53, 5  ;;  %v4632_v1 = vsel %vm4502_vm6, %v4618_v18, %v4631_v9  ;;  %v4634_v48 = vsel %vm4502_vm6, %v4621_v50, %v4633_v63  ;;  %v4694_v63 = vrot.slane %v9120_v61, %v7047_v16  ;;  %v9288_v9 = vld [vmem:[%s7061_s20 + $0x20] sm:$0xff] }
 0xadc   : > { %v4638_v17 = vsel %vm4502_vm6, %v4627_v45, %v4637_v49  ;;  %v4698_v53 = vrot.slane %v9133_v29, %v7047_v16  ;;  %v4702_v45 = vrot.slane %v9138_v35, %v7047_v16  ;;  %v276_v18 = vsel %vm275_vm7, %v7166_v58, %v7170_v60  ;;  %v6716_v60 = vld [vmem:[%s7061_s20 + $0x8] sm:$0xff]  ;;  %v13003_v35 = vld [vmem:[#allocation37_spill] sm:$0xff]  ;;  %v13004_v29 = vld [vmem:[#allocation24_spill] sm:$0xff] }
 0xadd   : > { %4647 = vrot.lane.b32.xlu0 %v4628_v0, %s6915_s22  ;;  %v4636_v10 = vsel %vm4502_vm6, %v4624_v62, %v4635_v3  ;;  %v4690_v0 = vrot.slane %v9115_v51, %v7047_v16  ;;  %v278_v62 = vsel %vm275_vm7, %v7164_v57, %v7168_v59  ;;  %v293_v50 = vmul.f32 %v9007_v38, %v7168_v59  ;;  %v6717_v3 = vld [vmem:[%s7061_s20 + $0x10] sm:$0xff]  ;;  %v13008_v51 = vld [vmem:[#allocation38_spill] sm:$0xff] }
 0xade   : > { %4649 = vrot.lane.b32.xlu1 %v4630_v55, %s6915_s22  ;;  %v284_v44 = vmul.f32 %v6713_v24, %v7166_v58  ;;  %v289_v32 = vmul.f32 %v8751_v41, %v7166_v58  ;;  %v287_v46 = vmul.f32 %v9284_v13, %v278_v62  ;;  %v288_v55 = vmul.f32 %v9288_v9, %v7168_v59  ;;  %v12998_v24 = vld [vmem:[#allocation33_spill] sm:$0xff] }
 0xadf   : > { %v292_v57 = vmul.f32 %v9002_v15, %v278_v62  ;;  %v285_v7 = vmul.f32 %v6716_v60, %v276_v18  ;;  %v290_v49 = vmul.f32 %v8990_v8, %v276_v18  ;;  %v291_v58 = vmul.f32 %v8995_v20, %v277_v5  ;;  %v12995_v18 = vld [vmem:[#allocation22_spill] sm:$0xff] }
 0xae0   : > { %v562_v41 = vsel %vm275_vm7, %v7192_v22, %v7190_v21  ;;  %v563_v59 = vsel %vm275_vm7, %v7190_v21, %v7196_v26  ;;  %v404_v21 = vadd.f32 %v12995_v18, %v288_v55  ;;  %v385_v30 = vsel %vm381_vm1, %v12998_v24, %v12995_v18  ;;  %v13002_v18 = vld [vmem:[#allocation26_spill] sm:$0xff] }
 0xae1   : > { %4651 = vrot.lane.b32.xlu0 %v4632_v1, %s6915_s22  ;;  %v286_v1 = vmul.f32 %v6717_v3, %v277_v5  ;;  %v12996_v5 = vld [vmem:[#allocation31_spill] sm:$0xff]  ;;  %v9330_v16 = vmul.f32 %v8990_v8, %v7208_v36  ;;  %v486_v43 = vsel %vm332_vm0, %v13004_v29, %v13003_v35 }
 0xae2   : > { %4653 = vrot.lane.b32.xlu1 %v4634_v48, %s6915_s22  ;;  %v409_v48 = vadd.f32 %v7344_v54, %v293_v50  ;;  %v12997_v50 = vld [vmem:[#allocation21_spill] sm:$0xff]  ;;  %v508_v47 = vadd.f32 %v13002_v18, %v404_v21 }
 0xae5   : > { %4655 = vrot.lane.b32.xlu0 %v4636_v10, %s6915_s22  ;;  %v564_v10 = vsel %vm275_vm7, %v7196_v26, %v7194_v23  ;;  %v382_v26 = vsel %vm381_vm1, %v12997_v50, %v12996_v5  ;;  %v13001_v50 = vld [vmem:[#allocation19_spill] sm:$0xff] }
 0xae6   : > { %4657 = vrot.lane.b32.xlu1 %v4638_v17, %s6915_s22  ;;  %v565_v17 = vsel %vm275_vm7, %v7200_v28, %v7198_v27  ;;  %v617_v52 = vsel %vm275_vm7, %v7206_v33, %v13001_v50  ;;  %v400_v42 = vadd.f32 %v382_v26, %v284_v44  ;;  %v13011_v26 = vld [vmem:[#allocation42_spill] sm:$0xff] }
 0xae9   : > { %4707 = vrot.lane.b32.xlu0 %v4690_v0, %s6915_s22  ;;  %v616_v0 = vsel %vm275_vm7, %v7208_v36, %v7206_v33  ;;  %v13007_v33 = vld [vmem:[#allocation35_spill] sm:$0xff] }
 0xaea   : > { %4709 = vrot.lane.b32.xlu1 %v4694_v63, %s6915_s22  ;;  %v12993_v63 = vld [vmem:[#allocation25_spill] sm:$0xff]  ;;  %v625_v11 = vmul.f32 %v6717_v3, %v616_v0  ;;  %v13005_v3 = vld [vmem:[#allocation36_spill] sm:$0xff] }
 0xaeb   : > { %v386_v61 = vsel %vm381_vm1, %v13006_v25, %v13005_v3  ;;  %v387_v21 = vsel %vm381_vm1, %v13005_v3, %v13007_v33 }
 0xaed   : > { %4711 = vrot.lane.b32.xlu0 %v4698_v53, %s6915_s22  ;;  %v513_v53 = vadd.f32 %v12993_v63, %v409_v48  ;;  %v624_v48 = vmul.f32 %v6716_v60, %v7208_v36  ;;  %v403_v36 = vadd.f32 %v385_v30, %v287_v46  ;;  %v13009_v30 = vld [vmem:[#allocation39_spill] sm:$0xff]  ;;  %v13010_v46 = vld [vmem:[#allocation40_spill] sm:$0xff] }
 0xaee   : > { %4713 = vrot.lane.b32.xlu1 %v4702_v45, %s6915_s22  ;;  %v12994_v45 = vld [vmem:[#allocation17_spill] sm:$0xff]  ;;  %v489_v44 = vsel %vm332_vm0, %v13009_v30, %v13002_v18  ;;  %v487_v29 = vsel %vm332_vm0, %v13003_v35, %v13010_v46  ;;  %v488_v25 = vsel %vm332_vm0, %v13010_v46, %v13009_v30  ;;  %v406_v35 = vadd.f32 %v387_v21, %v290_v49 }
 0xaef   : > { %v566_v62 = vsel %vm275_vm7, %v7198_v27, %v12994_v45  ;;  %v567_v14 = vsel %vm275_vm7, %v12994_v45, %v12999_v4  ;;  %v13000_v27 = vld [vmem:[#allocation34_spill] sm:$0xff]  ;;  %v587_v60 = vadd.f32 %v12999_v4, %v513_v53  ;;  %v389_v53 = vsel %vm381_vm1, %v13008_v51, %v7344_v54 }
 0xaf0   : > { %v383_v55 = vsel %vm381_vm1, %v12996_v5, %v13000_v27  ;;  %v384_v45 = vsel %vm381_vm1, %v13000_v27, %v12998_v24  ;;  %v388_v24 = vsel %vm381_vm1, %v13007_v33, %v13008_v51  ;;  %v13012_v27 = vld [vmem:[#allocation23_spill] sm:$0xff]  ;;  %v13014_v33 = vld [vmem:[#allocation44_spill] sm:$0xff]  ;;  %v582_v51 = vadd.f32 %v7194_v23, %v508_v47 }
 0xaf1   : > { %v401_v5 = vadd.f32 %v383_v55, %v285_v7  ;;  %v402_v4 = vadd.f32 %v384_v45, %v286_v1  ;;  %v504_v7 = vadd.f32 %v486_v43, %v400_v42  ;;  %v490_v1 = vsel %vm332_vm0, %v13012_v27, %v13011_v26  ;;  %v13013_v55 = vld [vmem:[#allocation41_spill] sm:$0xff] }
 0xaf2   : > { %v491_v18 = vsel %vm332_vm0, %v13011_v26, %v13013_v55  ;;  %v405_v45 = vadd.f32 %v386_v61, %v289_v32  ;;  %v407_v3 = vadd.f32 %v388_v24, %v291_v58  ;;  %v492_v42 = vsel %vm332_vm0, %v13013_v55, %v13014_v33  ;;  %v13015_v32 = vld [vmem:[#allocation18_spill] sm:$0xff] }
 0xaf3   : > { %v507_v43 = vadd.f32 %v489_v44, %v403_v36  ;;  %v505_v30 = vadd.f32 %v487_v29, %v401_v5  ;;  %v506_v46 = vadd.f32 %v488_v25, %v402_v4  ;;  %v493_v54 = vsel %vm332_vm0, %v13014_v33, %v12993_v63  ;;  %v6718_v36 = vld [vmem:[%s7061_s20 + $0x28] sm:$0xff]  ;;  %v13017_v25 = vld [vmem:[#allocation28_spill] sm:$0xff] }
 0xaf4   : > { %v408_v27 = vadd.f32 %v389_v53, %v292_v57  ;;  %v509_v19 = vadd.f32 %v490_v1, %v405_v45  ;;  %v510_v26 = vadd.f32 %v491_v18, %v406_v35  ;;  %v630_v61 = vmul.f32 %v8995_v20, %v616_v0 }
 0xaf5   : > { %v633_v49 = vmul.f32 %v9021_v56, %v13015_v32  ;;  %v578_v58 = vadd.f32 %v7192_v22, %v504_v7  ;;  %v511_v21 = vadd.f32 %v492_v42, %v407_v3  ;;  %v628_v5 = vmul.f32 %v6718_v36, %v13015_v32  ;;  %v13016_v22 = vld [vmem:[#allocation43_spill] sm:$0xff]  ;;  %v13020_v3 = vld [vmem:[#allocation45_spill] sm:$0xff]  ;;  %v13022_v42 = vld [vmem:[#allocation48_spill] sm:$0xff] }
 0xaf6   : > { %v618_v63 = vsel %vm275_vm7, %v13001_v50, %v13015_v32  ;;  %v626_v47 = vmul.f32 %v9284_v13, %v617_v52  ;;  %v512_v23 = vadd.f32 %v493_v54, %v408_v27  ;;  %v581_v24 = vadd.f32 %v564_v10, %v507_v43  ;;  %v13026_v27 = vld [vmem:[#allocation32_spill] sm:$0xff] }
 0xaf7   : > { %v643_v57 = vadd.f32 %v633_v49, %v587_v60  ;;  %v579_v4 = vadd.f32 %v562_v41, %v505_v30  ;;  %v580_v0 = vadd.f32 %v563_v59, %v506_v46  ;;  %v638_v44 = vadd.f32 %v628_v5, %v582_v51  ;;  %v13018_v60 = vld [vmem:[#allocation29_spill] sm:$0xff]  ;;  %v13019_v41 = vld [vmem:[#allocation30_spill] sm:$0xff]  ;;  %v13024_v30 = vld [vmem:[#allocation47_spill] sm:$0xff] }
 0xaf8   : > { %v583_v56 = vadd.f32 %v7200_v28, %v509_v19  ;;  %v584_v29 = vadd.f32 %v565_v17, %v510_v26  ;;  %v720_v7 = vsel %vm381_vm1, %v13017_v25, %v13016_v22  ;;  %v627_v53 = vmul.f32 %v9288_v9, %v618_v63  ;;  %v13025_v51 = vld [vmem:[#allocation49_spill] sm:$0xff]  ;;  %v13029_v5 = vld [vmem:[#allocation51_spill] sm:$0xff] }
 0xaf9   : > { %v631_v1 = vmul.f32 %v9002_v15, %v617_v52  ;;  %v634_v50 = vadd.f32 %v624_v48, %v578_v58  ;;  %v585_v55 = vadd.f32 %v566_v62, %v511_v21  ;;  %v632_v13 = vmul.f32 %v9007_v38, %v618_v63  ;;  %v13021_v52 = vld [vmem:[#allocation46_spill] sm:$0xff]  ;;  %v13028_v21 = vld [vmem:[#allocation52_spill] sm:$0xff] }
 0xafa   : > { %v9398_v10 = vadd.f32 %v13018_v60, %v643_v57  ;;  %v742_v59 = vadd.f32 %v13019_v41, %v638_v44  ;;  %v586_v18 = vadd.f32 %v567_v14, %v512_v23  ;;  %v637_v19 = vadd.f32 %v627_v53, %v581_v24  ;;  %v13030_v24 = vld [vmem:[#allocation54_spill] sm:$0xff] }
 0xafb   : > { %v635_v28 = vadd.f32 %v625_v11, %v579_v4  ;;  %v636_v17 = vadd.f32 %v626_v47, %v580_v0  ;;  %v738_v45 = vadd.f32 %v720_v7, %v634_v50  ;;  %v640_v35 = vadd.f32 %v630_v61, %v584_v29  ;;  %v13023_v11 = vld [vmem:[#allocation27_spill] sm:$0xff]  ;;  %v13027_v61 = vld [vmem:[#allocation50_spill] sm:$0xff] }
 0xafc   : > { %v723_v9 = vsel %vm381_vm1, %v13020_v3, %v13019_v41  ;;  %v721_v62 = vsel %vm381_vm1, %v13016_v22, %v13021_v52  ;;  %v639_v48 = vadd.f32 %v9330_v16, %v583_v56  ;;  %v641_v33 = vadd.f32 %v631_v1, %v585_v55  ;;  %v13031_v29 = vld [vmem:[#allocation62_spill] sm:$0xff]  ;;  %v13032_v22 = vld [vmem:[#allocation59_spill] sm:$0xff]  ;;  %v13033_v1 = vld [vmem:[#allocation60_spill] sm:$0xff] }
 0xafd   : > { %v722_v14 = vsel %vm381_vm1, %v13021_v52, %v13020_v3  ;;  %v724_v43 = vsel %vm381_vm1, %v13023_v11, %v13022_v42  ;;  %v725_v46 = vsel %vm381_vm1, %v13022_v42, %v13024_v30  ;;  %v642_v54 = vadd.f32 %v632_v13, %v586_v18  ;;  %v13034_v55 = vld [vmem:[#allocation61_spill] sm:$0xff]  ;;  %v13035_v18 = vld [vmem:[#allocation56_spill] sm:$0xff] }
 0xafe   : > { %v824_v26 = vsel %vm332_vm0, %v13026_v27, %v13025_v51  ;;  %v726_v16 = vsel %vm381_vm1, %v13024_v30, %v13027_v61  ;;  %v727_v32 = vsel %vm381_vm1, %v13027_v61, %v13018_v60  ;;  %v741_v49 = vadd.f32 %v723_v9, %v637_v19  ;;  %v13036_v19 = vld [vmem:[#allocation53_spill] sm:$0xff]  ;;  %v9466_v9 = vld [vmem:[%s7061_s20 + $0x30] sm:$0xff] }
 0xaff   : > { %v739_v58 = vadd.f32 %v721_v62, %v635_v28  ;;  %v825_v36 = vsel %vm332_vm0, %v13025_v51, %v13028_v21  ;;  %v826_v63 = vsel %vm332_vm0, %v13028_v21, %v13029_v5  ;;  %v740_v47 = vadd.f32 %v722_v14, %v636_v17  ;;  %v6719_v17 = vld [vmem:[%s7061_s20] sm:$0xfe]  ;;  %v9471_v52 = vld [vmem:[%s7061_s20 + $0x10] sm:$0xfe]  ;;  %v9481_v11 = vld [vmem:[%s7061_s20 + $0x18] sm:$0xfe] }
 0xb00   : > { %v743_v23 = vadd.f32 %v724_v43, %v639_v48  ;;  %v744_v57 = vadd.f32 %v725_v46, %v640_v35  ;;  %v827_v4 = vsel %vm332_vm0, %v13029_v5, %v13030_v24  ;;  %v9435_v0 = vadd.f32 %v824_v26, %v738_v45  ;;  %v13037_v35 = vld [vmem:[#allocation55_spill] sm:$0xff]  ;;  %v6724_v46 = vld [vmem:[%s7061_s20 + $0x60] sm:$0x1]  ;;  %v9488_v51 = vld [vmem:[%s7061_s20 + $0x20] sm:$0xfe] }
 0xb01   : > { %v745_v44 = vadd.f32 %v726_v16, %v641_v33  ;;  %v9437_v56 = vadd.f32 %v727_v32, %v642_v54  ;;  %v893_v25 = vsel %vm275_vm7, %v13032_v22, %v13031_v29  ;;  %v9442_v7 = vadd.f32 %v825_v36, %v739_v58  ;;  %v9476_v33 = vld [vmem:[%s7061_s20 + $0x8] sm:$0xfe]  ;;  %13038 = vst [vmem:[#allocation25_spill] sm:$0xff] %v9488_v51  ;;  %v9495_v61 = vld [vmem:[%s7061_s20 + $0x70] sm:$0x1]  ;;  %v13039_v32 = vld [vmem:[#allocation58_spill] sm:$0xff] }
 0xb02   : > { %v9444_v53 = vadd.f32 %v826_v63, %v740_v47  ;;  %v892_v50 = vsel %vm275_vm7, %v13033_v1, %v13032_v22  ;;  %v894_v13 = vsel %vm275_vm7, %v13031_v29, %v13034_v55  ;;  %v9452_v60 = vadd.f32 %v827_v4, %v741_v49  ;;  %v9502_v58 = vld [vmem:[%s7061_s20 + $0x68] sm:$0x1]  ;;  %v9506_v5 = vld [vmem:[%s7061_s20 + $0x78] sm:$0x1] }
 0xb03   : > { %v9455_v41 = vadd.f32 %v13030_v24, %v742_v59  ;;  %v828_v28 = vsel %vm332_vm0, %v13036_v19, %v13035_v18  ;;  %v900_v45 = vmul.f32 %v6719_v17, %v13033_v1  ;;  %v829_v3 = vsel %vm332_vm0, %v13035_v18, %v13037_v35  ;;  %13040 = vst [vmem:[#allocation17_spill] sm:$0xff] %v9506_v5  ;;  %v9510_v24 = vld [vmem:[%s7061_s20 + $0x80] sm:$0x1] }
 0xb04   : > { %v905_v59 = vmul.f32 %v9466_v9, %v13033_v1  ;;  %v902_v62 = vmul.f32 %v9471_v52, %v893_v25  ;;  %v907_v48 = vmul.f32 %v8995_v20, %v893_v25  ;;  %v901_v14 = vmul.f32 %v9476_v33, %v892_v50 }
 0xb05   : > { %v906_v42 = vmul.f32 %v8990_v8, %v892_v50  ;;  %v903_v43 = vmul.f32 %v9481_v11, %v894_v13  ;;  %v908_v30 = vmul.f32 %v9002_v15, %v894_v13  ;;  %v910_v54 = vmul.f32 %v6724_v46, %v13033_v1 }
 0xb06   : > { %v904_v27 = vmul.f32 %v9488_v51, %v13034_v55  ;;  %v909_v26 = vmul.f32 %v9007_v38, %v13034_v55  ;;  %v912_v16 = vmul.f32 %v9495_v61, %v893_v25  ;;  %v830_v49 = vsel %vm332_vm0, %v13037_v35, %v13039_v32 }
 0xb07   : > { %v911_v21 = vmul.f32 %v9502_v58, %v892_v50  ;;  %v931_v36 = vrot.slane %v900_v45, 1  ;;  %v913_v63 = vmul.f32 %v9506_v5, %v894_v13  ;;  %v932_v47 = vrot.slane %v905_v59, 1  ;;  %v13043_v59 = vld [vmem:[#allocation57_spill] sm:$0xff] }
 0xb08   : > { %v914_v4 = vmul.f32 %v9510_v24, %v13034_v55  ;;  %v937_v29 = vrot.slane %v902_v62, 1  ;;  %v938_v22 = vrot.slane %v907_v48, 1  ;;  %v934_v25 = vrot.slane %v901_v14, 1 }
 0xb09   : > { %v935_v1 = vrot.slane %v906_v42, 1  ;;  %v940_v18 = vrot.slane %v903_v43, 1  ;;  %v941_v19 = vrot.slane %v908_v30, 1  ;;  %v946_v50 = vrot.slane %v910_v54, 1 }
 0xb0a   : > { %v943_v45 = vrot.slane %v904_v27, 1  ;;  %v944_v35 = vrot.slane %v909_v26, 1  ;;  %v950_v46 = vrot.slane %v912_v16, 1  ;;  %v847_v13 = vadd.f32 %v828_v28, %v743_v23 }
 0xb0b   : > { %v831_v5 = vsel %vm332_vm0, %v13039_v32, %v13043_v59  ;;  %v948_v55 = vrot.slane %v911_v21, 1  ;;  %v952_v62 = vrot.slane %v913_v63, 1  ;;  %v848_v48 = vadd.f32 %v829_v3, %v744_v57  ;;  %v13047_v63 = vld [vmem:[#allocation63_spill] sm:$0xff] }
 0xb0c   : > { %v954_v14 = vrot.slane %v914_v4, 1  ;;  %v939_v42 = vsel %vm930_vm2, %v937_v29, %v938_v22  ;;  %v933_v43 = vsel %vm930_vm2, %v931_v36, %v932_v47  ;;  %v851_v30 = vadd.f32 %v13043_v59, %v9398_v10  ;;  %v13046_v36 = vld [vmem:[#allocation64_spill] sm:$0xff]  ;;  %v13048_v29 = vld [vmem:[#allocation66_spill] sm:$0xff] }
 0xb0d   : > { %v849_v54 = vadd.f32 %v830_v49, %v745_v44  ;;  %v942_v27 = vsel %vm930_vm2, %v940_v18, %v941_v19  ;;  %v936_v23 = vsel %vm930_vm2, %v934_v25, %v935_v1  ;;  %v850_v26 = vadd.f32 %v831_v5, %v9437_v56  ;;  %v13049_v25 = vld [vmem:[#allocation65_spill] sm:$0xff]  ;;  %v13053_v59 = vld [vmem:[#allocation70_spill] sm:$0xff] }
 0xb0e   : > { %v951_v16 = vsel %vm930_vm2, %v938_v22, %v950_v46  ;;  %v945_v57 = vsel %vm930_vm2, %v943_v45, %v944_v35  ;;  %v947_v3 = vsel %vm930_vm2, %v932_v47, %v946_v50  ;;  %v953_v21 = vsel %vm930_vm2, %v941_v19, %v952_v62  ;;  %v13051_v19 = vld [vmem:[#allocation68_spill] sm:$0xff] }
 0xb0f   : > { %v966_v10 = vadd.f32 %v933_v43, %v9435_v0  ;;  %v968_v44 = vadd.f32 %v939_v42, %v9444_v53  ;;  %v949_v49 = vsel %vm930_vm2, %v935_v1, %v948_v55  ;;  %v1087_v56 = vsel %vm381_vm1, %v13047_v63, %v13046_v36  ;;  %v13054_v55 = vld [vmem:[#allocation67_spill] sm:$0xff] }
 0xb10   : > { %v967_v5 = vadd.f32 %v936_v23, %v9442_v7  ;;  %v969_v4 = vadd.f32 %v942_v27, %v9452_v60  ;;  %v955_v47 = vsel %vm930_vm2, %v944_v35, %v954_v14  ;;  %v1088_v22 = vsel %vm381_vm1, %v13046_v36, %v13048_v29  ;;  %v13055_v14 = vld [vmem:[#allocation69_spill] sm:$0xff]  ;;  %v13056_v27 = vld [vmem:[#allocation72_spill] sm:$0xff] }
 0xb11   : > { %v1089_v0 = vsel %vm381_vm1, %v13048_v29, %v13049_v25  ;;  %v970_v53 = vadd.f32 %v945_v57, %v9455_v41  ;;  %v971_v1 = vadd.f32 %v947_v3, %v847_v13  ;;  %v1090_v7 = vsel %vm381_vm1, %v13049_v25, %v13051_v19  ;;  %v13058_v57 = vld [vmem:[#allocation74_spill] sm:$0xff]  ;;  %v13059_v3 = vld [vmem:[#allocation73_spill] sm:$0xff] }
 0xb12   : > { %v972_v60 = vadd.f32 %v949_v49, %v848_v48  ;;  %v973_v50 = vadd.f32 %v951_v16, %v849_v54  ;;  %v974_v45 = vadd.f32 %v953_v21, %v850_v26  ;;  %v1105_v46 = vadd.f32 %v1087_v56, %v966_v10  ;;  %v13057_v54 = vld [vmem:[#allocation71_spill] sm:$0xff]  ;;  %v13062_v56 = vld [vmem:[#allocation76_spill] sm:$0xff] }
 0xb13   : > { %v1091_v62 = vsel %vm381_vm1, %v13054_v55, %v13053_v59  ;;  %v1092_v41 = vsel %vm381_vm1, %v13053_v59, %v13055_v14  ;;  %v975_v13 = vadd.f32 %v955_v47, %v851_v30  ;;  %v1106_v42 = vadd.f32 %v1088_v22, %v967_v5  ;;  %v13060_v10 = vld [vmem:[#allocation75_spill] sm:$0xff]  ;;  %v13064_v22 = vld [vmem:[#allocation77_spill] sm:$0xff] }
 0xb14   : > { %v1107_v43 = vadd.f32 %v1089_v0, %v968_v44  ;;  %v1093_v48 = vsel %vm381_vm1, %v13055_v14, %v13056_v27  ;;  %v1094_v23 = vsel %vm381_vm1, %v13056_v27, %v13057_v54  ;;  %v1108_v26 = vadd.f32 %v1090_v7, %v969_v4  ;;  %v13065_v0 = vld [vmem:[#allocation79_spill] sm:$0xff]  ;;  %v13068_v55 = vld [vmem:[#allocation81_spill] sm:$0xff]  ;;  %v13069_v14 = vld [vmem:[#allocation82_spill] sm:$0xff] }
 0xb15   : > { %v1109_v16 = vadd.f32 %v13051_v19, %v970_v53  ;;  %v1226_v21 = vsel %vm332_vm0, %v13059_v3, %v13058_v57  ;;  %v1227_v30 = vsel %vm332_vm0, %v13058_v57, %v13060_v10  ;;  %v1110_v49 = vadd.f32 %v1091_v62, %v971_v1  ;;  %v13066_v53 = vld [vmem:[#allocation78_spill] sm:$0xff]  ;;  %v13071_v27 = vld [vmem:[#allocation83_spill] sm:$0xff] }
 0xb16   : > { %v1111_v36 = vadd.f32 %v1092_v41, %v972_v60  ;;  %v1114_v63 = vadd.f32 %v13057_v54, %v975_v13  ;;  %v1228_v5 = vsel %vm332_vm0, %v13060_v10, %v13062_v56  ;;  %v1112_v47 = vadd.f32 %v1093_v48, %v973_v50  ;;  %v13067_v60 = vld [vmem:[#allocation80_spill] sm:$0xff]  ;;  %v13074_v3 = vld [vmem:[#allocation86_spill] sm:$0xff] }
 0xb17   : > { %v1113_v29 = vadd.f32 %v1094_v23, %v974_v45  ;;  %v1229_v25 = vsel %vm332_vm0, %v13062_v56, %v13064_v22  ;;  %v1230_v19 = vsel %vm332_vm0, %v13066_v53, %v13065_v0  ;;  %v1244_v1 = vadd.f32 %v1226_v21, %v1105_v46  ;;  %v13070_v13 = vld [vmem:[#allocation84_spill] sm:$0xff]  ;;  %v13073_v23 = vld [vmem:[#allocation85_spill] sm:$0xff] }
 0xb18   : > { %v1245_v7 = vadd.f32 %v1227_v30, %v1106_v42  ;;  %v1231_v59 = vsel %vm332_vm0, %v13065_v0, %v13067_v60  ;;  %v1232_v62 = vsel %vm332_vm0, %v13067_v60, %v13068_v55  ;;  %v1246_v50 = vadd.f32 %v1228_v5, %v1107_v43  ;;  %v13076_v56 = vld [vmem:[#allocation88_spill] sm:$0xff]  ;;  %v13077_v5 = vld [vmem:[#allocation87_spill] sm:$0xff]  ;;  %v13078_v0 = vld [vmem:[#allocation89_spill] sm:$0xff] }
 0xb19   : > { %v1248_v45 = vadd.f32 %v13064_v22, %v1109_v16  ;;  %v1233_v41 = vsel %vm332_vm0, %v13068_v55, %v13069_v14  ;;  %v1330_v46 = vsel %vm275_vm7, %v13071_v27, %v13070_v13  ;;  %v1247_v48 = vadd.f32 %v1229_v25, %v1108_v26 }
 0xb1a   : > { %v1249_v54 = vadd.f32 %v1230_v19, %v1110_v49  ;;  %v1331_v57 = vsel %vm275_vm7, %v13070_v13, %v13073_v23  ;;  %v1332_v43 = vsel %vm275_vm7, %v13073_v23, %v13074_v3  ;;  %v1250_v21 = vadd.f32 %v1231_v59, %v1111_v36 }
 0xb1b   : > { %v1253_v10 = vadd.f32 %v13069_v14, %v1114_v63  ;;  %v1251_v30 = vadd.f32 %v1232_v62, %v1112_v47  ;;  %v1333_v22 = vsel %vm275_vm7, %v13077_v5, %v13076_v56  ;;  %v1252_v26 = vadd.f32 %v1233_v41, %v1113_v29  ;;  %v13080_v14 = vld [vmem:[#allocation92_spill] sm:$0xff]  ;;  %v13081_v41 = vld [vmem:[#allocation91_spill] sm:$0xff] }
 0xb1c   : > { %v9620_v49 = vadd.f32 %v13071_v27, %v1244_v1  ;;  %v9622_v25 = vadd.f32 %v1330_v46, %v1245_v7  ;;  %v1334_v53 = vsel %vm275_vm7, %v13076_v56, %v13078_v0  ;;  %v9628_v19 = vadd.f32 %v13074_v3, %v1248_v45  ;;  %v13079_v1 = vld [vmem:[#allocation90_spill] sm:$0xff] }
 0xb1d   : > { %v9630_v36 = vadd.f32 %v1331_v57, %v1246_v50  ;;  %v9632_v63 = vadd.f32 %v1332_v43, %v1247_v48  ;;  %v9635_v47 = vadd.f32 %v13077_v5, %v1249_v54  ;;  %v9637_v60 = vadd.f32 %v1333_v22, %v1250_v21 }
 0xb1e   : > { %v1335_v7 = vsel %vm275_vm7, %v13078_v0, %v13079_v1  ;;  %v9647_v50 = vadd.f32 %v13079_v1, %v1253_v10  ;;  %v9649_v45 = vadd.f32 %v1334_v53, %v1251_v30  ;;  %v1384_v13 = vsel %vm275_vm7, %v13081_v41, %v13080_v14 }
 0xb1f   : > { %v9660_v23 = vadd.f32 %v1335_v7, %v1252_v26  ;;  %v9664_v57 = vmul.f32 %v9476_v33, %v13081_v41  ;;  %v9668_v3 = vmul.f32 %v8990_v8, %v13081_v41  ;;  %v9672_v43 = vmul.f32 %v9502_v58, %v13081_v41 }
 0xb20   : > { %v9678_v33 = vmul.f32 %v9471_v52, %v1384_v13  ;;  %v9695_v7 = vmul.f32 %v8995_v20, %v1384_v13 }
 0xb46   : > { %v9514_v17 = vpop.permute.xlu0 %4639 }
 0xb47   : > { %13041 = vst [vmem:[#allocation22_spill] sm:$0xff] %v9514_v17 }
 0xb48   : > { %v9516_v51 = vpop.permute.xlu1 %4641 }
 0xb49   : > { %13042 = vst [vmem:[#allocation31_spill] sm:$0xff] %v9516_v51 }
 0xb4b   : > { %v9527_v28 = vpop.permute.xlu0 %4643 }
 0xb4c   : > { %13044 = vst [vmem:[#allocation21_spill] sm:$0xff] %v9527_v28  ;;  %v9533_v32 = vpop.permute.xlu1 %4645 }
 0xb4d   : > { %13045 = vst [vmem:[#allocation33_spill] sm:$0xff] %v9533_v32  ;;  %v9781_v32 = vld [vmem:[%s7061_s20 + $0x50] sm:$0xff] }
 0xb4f   : > { %v9552_v18 = vpop.permute.xlu0 %4647 }
 0xb50   : > { %13050 = vst [vmem:[#allocation16_spill] sm:$0xff] %v9552_v18  ;;  %v9557_v35 = vpop.permute.xlu1 %4649 }
 0xb51   : > { %13052 = vst [vmem:[#allocation34_spill] sm:$0xff] %v9557_v35 }
 0xb53   : > { %v9578_v44 = vpop.permute.xlu0 %4651 }
 0xb54   : > { %13061 = vst [vmem:[#allocation19_spill] sm:$0xff] %v9578_v44  ;;  %v9584_v4 = vpop.permute.xlu1 %4653 }
 0xb55   : > { %13063 = vst [vmem:[#allocation26_spill] sm:$0xff] %v9584_v4  ;;  %v13091_v4 = vld [vmem:[#allocation25_spill] sm:$0xff] }
 0xb57   : > { %v9605_v42 = vpop.permute.xlu0 %4655 }
 0xb58   : > { %13072 = vst [vmem:[#allocation37_spill] sm:$0xff] %v9605_v42  ;;  %v9613_v16 = vpop.permute.xlu1 %4657 }
 0xb59   : > { %13075 = vst [vmem:[#allocation24_spill] sm:$0xff] %v9613_v16 }
 0xb5b   : > { %v4708_v29 = vpop.permute.xlu0 %4707 }
 0xb5c   : > { %v4710_v59 = vpop.permute.xlu1 %4709  ;;  %v4723_v55 = vmul.f32 %v4708_v29, %v9189_v6  ;;  %v9644_v62 = vmul.f32 %v9466_v9, %v4708_v29  ;;  %v4733_v52 = vmul.f32 %v4708_v29, %v9210_v31 }
 0xb5d   : > { %v4715_v27 = vsel %vm381_vm1, %v4708_v29, %v4710_v59 }
 0xb5e   : > { %v4753_v46 = vrot.slane %v4723_v55, 5  ;;  %v4754_v48 = vrot.slane %v9644_v62, 5  ;;  %v4724_v54 = vmul.f32 %v4715_v27, %v9192_v37  ;;  %v9658_v6 = vmul.f32 %v8990_v8, %v4715_v27 }
 0xb5f   : > { %v4712_v21 = vpop.permute.xlu0 %4711 }
 0xb60   : > { %v4714_v10 = vpop.permute.xlu1 %4713  ;;  %v4716_v30 = vsel %vm381_vm1, %v4710_v59, %v4712_v21  ;;  %v4755_v56 = vsel %vm4502_vm6, %v4753_v46, %v4754_v48  ;;  %v4756_v5 = vrot.slane %v4724_v54, 5  ;;  %v12644_v22 = vrot.slane %v9658_v6, 5 }
 0xb61   : > { %v4717_v26 = vsel %vm381_vm1, %v4712_v21, %v4714_v10  ;;  %v4725_v8 = vmul.f32 %v4716_v30, %v9200_v40  ;;  %v9683_v0 = vmul.f32 %v8995_v20, %v4716_v30  ;;  %4778 = vrot.lane.b32.xlu0 %v4755_v56, %s6914_s11  ;;  %v9698_v59 = vmul.f32 %v9495_v61, %v1384_v13 }
 0xb62   : > { %v4726_v58 = vmul.f32 %v4717_v26, %v9204_v2  ;;  %v9688_v53 = vmul.f32 %v9002_v15, %v4717_v26  ;;  %v4758_v1 = vsel %vm4502_vm6, %v4756_v5, %v12644_v22  ;;  %v4727_v54 = vmul.f32 %v4714_v10, %v9219_v34  ;;  %v9764_v22 = vld [vmem:[%s7061_s20 + $0x40] sm:$0xff] }
 0xb63   : > { %v4759_v55 = vrot.slane %v4725_v8, 5  ;;  %v4760_v62 = vrot.slane %v9683_v0, 5  ;;  %4780 = vrot.lane.b32.xlu1 %v4758_v1, %s6914_s11  ;;  %v9708_v29 = vmul.f32 %v9007_v38, %v4714_v10  ;;  %v4734_v61 = vmul.f32 %v4715_v27, %v9223_v39  ;;  %v13083_v27 = vld [vmem:[#allocation273_spill] sm:$0xff]  ;;  %v6730_v0 = vld [vmem:[%s7061_s20 + $0x28] sm:$0xfe] }
 0xb64   : > { %v4762_v41 = vrot.slane %v4726_v58, 5  ;;  %v12643_v46 = vrot.slane %v9688_v53, 5  ;;  %v4735_v13 = vmul.f32 %v4716_v30, %v9229_v12  ;;  %v4768_v56 = vrot.slane %v4733_v52, 5  ;;  %v13082_v58 = vld [vmem:[#allocation12_spill] sm:$0xff] }
 0xb65   : > { %v4761_v20 = vsel %vm4502_vm6, %v4759_v55, %v4760_v62  ;;  %v4765_v5 = vrot.slane %v4727_v54, 5  ;;  %v4766_v38 = vrot.slane %v9708_v29, 5  ;;  %v4829_v30 = vrot.slane %v13083_v27, %v13082_v58  ;;  %v13085_v54 = vld [vmem:[#allocation274_spill] sm:$0xff]  ;;  %v13087_v29 = vld [vmem:[#allocation291_spill] sm:$0xff] }
 0xb66   : > { %v4764_v21 = vsel %vm4502_vm6, %v4762_v41, %v12643_v46  ;;  %4782 = vrot.lane.b32.xlu0 %v4761_v20, %s6914_s11  ;;  %v13084_v41 = vld [vmem:[#allocation93_spill] sm:$0xff]  ;;  %v4833_v20 = vrot.slane %v13085_v54, %v13082_v58  ;;  %v4736_v15 = vmul.f32 %v4717_v26, %v13087_v29  ;;  %v4770_v1 = vrot.slane %v4734_v61, 5  ;;  %v13088_v54 = vld [vmem:[#allocation292_spill] sm:$0xff] }
 0xb67   : > { %4784 = vrot.lane.b32.xlu1 %v4764_v21, %s6914_s11  ;;  %v1385_v52 = vsel %vm275_vm7, %v13080_v14, %v13084_v41  ;;  %v13086_v21 = vld [vmem:[#allocation94_spill] sm:$0xff]  ;;  %v4767_v27 = vsel %vm4502_vm6, %v4765_v5, %v4766_v38  ;;  %v4772_v14 = vrot.slane %v4735_v13, 5  ;;  %v4769_v31 = vsel %vm4502_vm6, %v4754_v48, %v4768_v56  ;;  %v9751_v5 = vld [vmem:[%s7061_s20 + $0x38] sm:$0xff]  ;;  %v13089_v13 = vld [vmem:[#allocation275_spill] sm:$0xff] }
 0xb68   : > { %v9731_v8 = vmul.f32 %v6730_v0, %v13086_v21  ;;  %v1386_v55 = vsel %vm275_vm7, %v13084_v41, %v13086_v21  ;;  %v4737_v46 = vmul.f32 %v4714_v10, %v13088_v54  ;;  %v9742_v0 = vld [vmem:[%s7061_s20 + $0x58] sm:$0xff]  ;;  %v4842_v61 = vmul.f32 %v4829_v30, %v9192_v37  ;;  %v6733_v56 = vld [vmem:[%s7061_s20 + $0x88] sm:$0x1]  ;;  %v13090_v37 = vld [vmem:[#allocation276_spill] sm:$0xff] }
 0xb69   : > { %v9746_v26 = vmul.f32 %v9742_v0, %v13086_v21  ;;  %v9754_v48 = vmul.f32 %v9751_v5, %v4829_v30  ;;  %v4837_v10 = vrot.slane %v13089_v13, %v13082_v58  ;;  %v9760_v41 = vmul.f32 %v6733_v56, %v13086_v21  ;;  %v9777_v56 = vld [vmem:[%s7061_s20 + $0x48] sm:$0xff] }
 0xb6a   : > { %4786 = vrot.lane.b32.xlu0 %v4767_v27, %s6914_s11  ;;  %v4843_v27 = vmul.f32 %v4833_v20, %v9200_v40  ;;  %v4841_v16 = vrot.slane %v13090_v37, %v13082_v58  ;;  %v1394_v42 = vmul.f32 %v9481_v11, %v1385_v52  ;;  %v1395_v35 = vmul.f32 %v13091_v4, %v1386_v55 }
 0xb6b   : > { %4788 = vrot.lane.b32.xlu1 %v4769_v31, %s6914_s11  ;;  %v9767_v31 = vmul.f32 %v9764_v22, %v4833_v20  ;;  %v4774_v44 = vrot.slane %v4736_v15, 5  ;;  %v13092_v13 = vrot.slane %v9658_v6, 5  ;;  %v1399_v40 = vmul.f32 %v9777_v56, %v1385_v52 }
 0xb6c   : > { %v1400_v28 = vmul.f32 %v9781_v32, %v1386_v55  ;;  %v4773_v17 = vsel %vm4502_vm6, %v4760_v62, %v4772_v14  ;;  %v4776_v11 = vrot.slane %v4737_v46, 5  ;;  %v4866_v4 = vrot.slane %v4842_v61, 5  ;;  %v13093_v14 = vld [vmem:[#allocation17_spill] sm:$0xff] }
 0xb6d   : > { %v4771_v21 = vsel %vm4502_vm6, %v13092_v13, %v4770_v1  ;;  %v4867_v6 = vrot.slane %v9754_v48, 5  ;;  %v4844_v15 = vmul.f32 %v4837_v10, %v9204_v2  ;;  %v9790_v1 = vmul.f32 %v9777_v56, %v4837_v10 }
 0xb6e   : > { %4790 = vrot.lane.b32.xlu0 %v4771_v21, %s6914_s11  ;;  %v4869_v37 = vrot.slane %v4843_v27, 5  ;;  %v4870_v13 = vrot.slane %v9767_v31, 5  ;;  %v4845_v58 = vmul.f32 %v4841_v16, %v9219_v34  ;;  %v9795_v62 = vmul.f32 %v9781_v32, %v4841_v16 }
 0xb6f   : > { %4792 = vrot.lane.b32.xlu1 %v4773_v17, %s6914_s11  ;;  %v1404_v46 = vmul.f32 %v13093_v14, %v1385_v52  ;;  %v1405_v17 = vmul.f32 %v9510_v24, %v1386_v55  ;;  %v1428_v61 = vrot.slane %v1394_v42, 1  ;;  %v13094_v48 = vrot.slane %v9688_v53, 5 }
 0xb70   : > { %v1429_v21 = vrot.slane %v1399_v40, 1  ;;  %v1431_v51 = vrot.slane %v1395_v35, 1  ;;  %v1432_v18 = vrot.slane %v1400_v28, 1  ;;  %v4777_v27 = vsel %vm4502_vm6, %v4766_v38, %v4776_v11 }
 0xb71   : > { %v4775_v2 = vsel %vm4502_vm6, %v13094_v48, %v4774_v44  ;;  %v4868_v34 = vsel %vm4502_vm6, %v4866_v4, %v4867_v6  ;;  %v4872_v31 = vrot.slane %v4844_v15, 5  ;;  %v4873_v52 = vrot.slane %v9790_v1, 5 }
 0xb72   : > { %4794 = vrot.lane.b32.xlu0 %v4775_v2, %s6914_s11  ;;  %v4850_v24 = vmul.f32 %v4829_v30, %v9223_v39  ;;  %v4871_v42 = vsel %vm4502_vm6, %v4869_v37, %v4870_v13  ;;  %v4875_v53 = vrot.slane %v4845_v58, 5  ;;  %v4876_v44 = vrot.slane %v9795_v62, 5 }
 0xb73   : > { %4796 = vrot.lane.b32.xlu1 %v4777_v27, %s6914_s11  ;;  %v4851_v28 = vmul.f32 %v4833_v20, %v9229_v12  ;;  %v1434_v35 = vrot.slane %v9731_v8, 1  ;;  %v1435_v38 = vrot.slane %v9746_v26, 1  ;;  %v1445_v55 = vrot.slane %v9760_v41, 1 }
 0xb74   : > { %v13095_v40 = vrot.slane %v9668_v3, 1  ;;  %v13096_v11 = vrot.slane %v9664_v57, 1  ;;  %v1441_v39 = vrot.slane %v1404_v46, 1  ;;  %v13097_v30 = vrot.slane %v9695_v7, 1  ;;  %v13105_v7 = vld [vmem:[#allocation97_spill] sm:$0xff] }
 0xb75   : > { %v13098_v58 = vrot.slane %v9678_v33, 1  ;;  %v1430_v12 = vsel %vm930_vm2, %v1428_v61, %v1429_v21  ;;  %v1433_v8 = vsel %vm930_vm2, %v1431_v51, %v1432_v18  ;;  %v1443_v20 = vrot.slane %v1405_v17, 1 }
 0xb76   : > { %v1424_v4 = vsel %vm930_vm2, %v13096_v11, %v13095_v40  ;;  %4886 = vrot.lane.b32.xlu0 %v4868_v34, %s6913_s9  ;;  %v4874_v57 = vsel %vm4502_vm6, %v4872_v31, %v4873_v52  ;;  %v4878_v26 = vrot.slane %v4850_v24, 5  ;;  %v4852_v41 = vmul.f32 %v4837_v10, %v13087_v29  ;;  %v13106_v24 = vld [vmem:[#allocation98_spill] sm:$0xff]  ;;  %v13109_v11 = vld [vmem:[#allocation100_spill] sm:$0xff] }
 0xb77   : > { %v1427_v15 = vsel %vm930_vm2, %v13098_v58, %v13097_v30  ;;  %4888 = vrot.lane.b32.xlu1 %v4871_v42, %s6913_s9  ;;  %v1457_v1 = vadd.f32 %v1424_v4, %v9620_v49  ;;  %v4877_v33 = vsel %vm4502_vm6, %v4875_v53, %v4876_v44  ;;  %v4880_v37 = vrot.slane %v4851_v28, 5  ;;  %v13110_v4 = vld [vmem:[#allocation102_spill] sm:$0xff] }
 0xb78   : > { %v4853_v62 = vmul.f32 %v4841_v16, %v13088_v54  ;;  %v1458_v14 = vadd.f32 %v1427_v15, %v9622_v25  ;;  %v1459_v51 = vadd.f32 %v1430_v12, %v9630_v36  ;;  %v1436_v46 = vsel %vm930_vm2, %v1434_v35, %v1435_v38  ;;  %v13103_v54 = vld [vmem:[#allocation96_spill] sm:$0xff]  ;;  %v13107_v35 = vld [vmem:[#allocation99_spill] sm:$0xff] }
 0xb79   : > { %v1460_v17 = vadd.f32 %v1433_v8, %v9632_v63  ;;  %v13099_v61 = vrot.slane %v9672_v43, 1  ;;  %v13100_v48 = vmov %v13095_v40  ;;  %v13101_v49 = vrot.slane %v9698_v59, 1  ;;  %v13104_v63 = vld [vmem:[#allocation95_spill] sm:$0xff]  ;;  %v13108_v40 = vld [vmem:[#allocation101_spill] sm:$0xff]  ;;  %v13112_v12 = vld [vmem:[#allocation104_spill] sm:$0xff] }
 0xb7a   : > { %v13102_v10 = vmov %v13097_v30  ;;  %v1446_v25 = vsel %vm930_vm2, %v1435_v38, %v1445_v55  ;;  %v1442_v36 = vsel %vm930_vm2, %v1429_v21, %v1441_v39  ;;  %4890 = vrot.lane.b32.xlu0 %v4874_v57, %s6913_s9  ;;  %v1578_v43 = vsel %vm381_vm1, %v13104_v63, %v13103_v54  ;;  %v13111_v30 = vld [vmem:[#allocation103_spill] sm:$0xff]  ;;  %v13114_v57 = vld [vmem:[#allocation105_spill] sm:$0xff] }
 0xb7b   : > { %v1438_v29 = vsel %vm930_vm2, %v13100_v48, %v13099_v61  ;;  %v1440_v16 = vsel %vm930_vm2, %v13102_v10, %v13101_v49  ;;  %v1444_v3 = vsel %vm930_vm2, %v1432_v18, %v1443_v20  ;;  %4892 = vrot.lane.b32.xlu1 %v4877_v33, %s6913_s9  ;;  %v4879_v59 = vsel %vm4502_vm6, %v4867_v6, %v4878_v26  ;;  %v13113_v20 = vld [vmem:[#allocation106_spill] sm:$0xff]  ;;  %v13118_v61 = vld [vmem:[#allocation109_spill] sm:$0xff] }
 0xb7c   : > { %v4882_v2 = vrot.slane %v4852_v41, 5  ;;  %v1579_v27 = vsel %vm381_vm1, %v13103_v54, %v13105_v7  ;;  %v1461_v34 = vadd.f32 %v1436_v46, %v9628_v19  ;;  %v4881_v21 = vsel %vm4502_vm6, %v4870_v13, %v4880_v37  ;;  %v13115_v41 = vld [vmem:[#allocation107_spill] sm:$0xff]  ;;  %v13116_v37 = vld [vmem:[#allocation108_spill] sm:$0xff] }
 0xb7d   : > { %v4884_v31 = vrot.slane %v4853_v62, 5  ;;  %v1580_v42 = vsel %vm381_vm1, %v13105_v7, %v13106_v24  ;;  %v1462_v18 = vadd.f32 %v1438_v29, %v9635_v47  ;;  %v1463_v53 = vadd.f32 %v1440_v16, %v9637_v60  ;;  %v9918_v29 = vld [vmem:[%s12382_s1 + $0xa8] sm:$0x7f] }
 0xb7e   : > { %v1466_v6 = vadd.f32 %v1446_v25, %v9647_v50  ;;  %v1596_v28 = vadd.f32 %v1578_v43, %v1457_v1  ;;  %v1581_v38 = vsel %vm381_vm1, %v13106_v24, %v13107_v35  ;;  %v1464_v19 = vadd.f32 %v1442_v36, %v9649_v45  ;;  %4894 = vrot.lane.b32.xlu0 %v4879_v59, %s6913_s9  ;;  %v13119_v36 = vld [vmem:[#allocation116_spill] sm:$0xff]  ;;  %v13120_v54 = vld [vmem:[#allocation115_spill] sm:$0xff] }
 0xb7f   : > { %v1465_v13 = vadd.f32 %v1444_v3, %v9660_v23  ;;  %v1597_v55 = vadd.f32 %v1579_v27, %v1458_v14  ;;  %v1582_v47 = vsel %vm381_vm1, %v13109_v11, %v13108_v40  ;;  %v1583_v60 = vsel %vm381_vm1, %v13108_v40, %v13110_v4  ;;  %4896 = vrot.lane.b32.xlu1 %v4881_v21, %s6913_s9  ;;  %v13117_v14 = vld [vmem:[#allocation13_spill] sm:$0xff]  ;;  %v13121_v59 = vld [vmem:[#allocation111_spill] sm:$0xff]  ;;  %v13123_v27 = vld [vmem:[#allocation112_spill] sm:$0xff] }
 0xb80   : > { %v4883_v50 = vsel %vm4502_vm6, %v4873_v52, %v4882_v2  ;;  %v1598_v39 = vadd.f32 %v1580_v42, %v1459_v51  ;;  %v1600_v45 = vadd.f32 %v13107_v35, %v1461_v34  ;;  %v1584_v23 = vsel %vm381_vm1, %v13110_v4, %v13111_v30  ;;  %v13122_v2 = vld [vmem:[#allocation110_spill] sm:$0xff] }
 0xb81   : > { %v4885_v58 = vsel %vm4502_vm6, %v4876_v44, %v4884_v31  ;;  %v1599_v15 = vadd.f32 %v1581_v38, %v1460_v17  ;;  %v1585_v8 = vsel %vm381_vm1, %v13111_v30, %v13112_v12  ;;  %v1717_v26 = vsel %vm332_vm0, %v13114_v57, %v13113_v20  ;;  %v9902_v44 = vld [vmem:[%s12382_s1 + $0xa0] sm:$0x7f]  ;;  %v13124_v31 = vld [vmem:[#allocation117_spill] sm:$0xff]  ;;  %v9961_v38 = vld [vmem:[%s7061_s20 + $0x8] sm:$0xfc] }
 0xb82   : > { %v1718_v52 = vsel %vm332_vm0, %v13113_v20, %v13115_v41  ;;  %v1601_v1 = vadd.f32 %v1582_v47, %v1462_v18  ;;  %v1602_v33 = vadd.f32 %v1583_v60, %v1463_v53  ;;  %v1719_v62 = vsel %vm332_vm0, %v13115_v41, %v13116_v37  ;;  %4898 = vrot.lane.b32.xlu0 %v4883_v50, %s6913_s9  ;;  %v13125_v42 = vld [vmem:[#allocation118_spill] sm:$0xff]  ;;  %v9954_v53 = vld [vmem:[%s12382_s1 + $0xb0] sm:$0x7f] }
 0xb83   : > { %v4931_v51 = vrot.slane %v9902_v44, %v13117_v14  ;;  %v9907_v46 = vadd.f32 %v13112_v12, %v1466_v6  ;;  %v9909_v17 = vadd.f32 %v1584_v23, %v1464_v19  ;;  %v1720_v48 = vsel %vm332_vm0, %v13116_v37, %v13118_v61  ;;  %4900 = vrot.lane.b32.xlu1 %v4885_v58, %s6913_s9  ;;  %v9986_v50 = vld [vmem:[%s7061_s20 + $0x10] sm:$0xfc] }
 0xb84   : > { %v4935_v49 = vrot.slane %v9918_v29, %v13117_v14  ;;  %v9922_v10 = vadd.f32 %v1585_v8, %v1465_v13  ;;  %v9924_v16 = vadd.f32 %v1717_v26, %v1596_v28  ;;  %v9926_v25 = vadd.f32 %v1718_v52, %v1597_v55  ;;  %v6740_v28 = vld [vmem:[%s7061_s20] sm:$0xfc]  ;;  %v9972_v55 = vld [vmem:[%s12382_s1 + $0xb8] sm:$0x7f] }
 0xb85   : > { %v1785_v63 = vsel %vm275_vm7, %v13120_v54, %v13119_v36  ;;  %v9931_v43 = vadd.f32 %v1719_v62, %v1598_v39  ;;  %v9934_v3 = vadd.f32 %v13118_v61, %v1600_v45  ;;  %v1721_v7 = vsel %vm332_vm0, %v13122_v2, %v13121_v59  ;;  %v9990_v45 = vld [vmem:[%s7061_s20 + $0x18] sm:$0xfc]  ;;  %v10000_v8 = vld [vmem:[%s7061_s20 + $0x20] sm:$0xfc] }
 0xb86   : > { %v1722_v34 = vsel %vm332_vm0, %v13121_v59, %v13123_v27  ;;  %v9942_v21 = vadd.f32 %v1720_v48, %v1599_v15  ;;  %v1786_v24 = vsel %vm275_vm7, %v13119_v36, %v13124_v31  ;;  %v1787_v18 = vsel %vm275_vm7, %v13124_v31, %v13125_v42  ;;  %4948 = vrot.lane.b32.xlu0 %v4931_v51, %s6913_s9  ;;  %v9996_v15 = vld [vmem:[%s7061_s20 + $0x68] sm:$0x3]  ;;  %v13126_v26 = vld [vmem:[#allocation14_spill] sm:$0xff]  ;;  %v10020_v48 = vld [vmem:[%s7061_s20 + $0x70] sm:$0x3] }
 0xb87   : > { %v4939_v6 = vrot.slane %v9954_v53, %v13117_v14  ;;  %v1793_v35 = vmul.f32 %v6740_v28, %v13120_v54  ;;  %v1794_v19 = vmul.f32 %v9961_v38, %v1785_v63  ;;  %v9966_v13 = vmul.f32 %v9466_v9, %v13120_v54  ;;  %4950 = vrot.lane.b32.xlu1 %v4935_v49, %s6913_s9  ;;  %v6743_v9 = vld [vmem:[%s7061_s20 + $0x60] sm:$0x3]  ;;  %v10024_v36 = vld [vmem:[%s7061_s20 + $0x78] sm:$0x3] }
 0xb88   : > { %v4943_v40 = vrot.slane %v9972_v55, %v13117_v14  ;;  %v9976_v11 = vadd.f32 %v1721_v7, %v1601_v1  ;;  %v9978_v47 = vadd.f32 %v1722_v34, %v1602_v33  ;;  %v9981_v4 = vmul.f32 %v9751_v5, %v1785_v63  ;;  %v10015_v51 = vld [vmem:[%s7061_s20 + $0x80] sm:$0x3]  ;;  %v13127_v34 = vld [vmem:[#allocation113_spill] sm:$0xff] }
 0xb89   : > { %v1803_v60 = vmul.f32 %v6743_v9, %v13120_v54  ;;  %v1795_v39 = vmul.f32 %v9986_v50, %v1786_v24  ;;  %v1796_v30 = vmul.f32 %v9990_v45, %v1787_v18  ;;  %v1800_v23 = vmul.f32 %v9764_v22, %v1786_v24 }
 0xb8a   : > { %v1801_v58 = vmul.f32 %v9777_v56, %v1787_v18  ;;  %v1804_v12 = vmul.f32 %v9996_v15, %v1785_v63  ;;  %v1797_v20 = vmul.f32 %v10000_v8, %v13125_v42  ;;  %v1802_v57 = vmul.f32 %v9781_v32, %v13125_v42  ;;  %4952 = vrot.lane.b32.xlu0 %v4939_v6, %s6913_s9 }
 0xb8b   : > { %v5042_v41 = vrot.slane %v9902_v44, %v13126_v26  ;;  %v1824_v52 = vrot.slane %v1793_v35, 2  ;;  %v1825_v1 = vrot.slane %v9966_v13, 2  ;;  %v1827_v33 = vrot.slane %v1794_v19, 2  ;;  %4954 = vrot.lane.b32.xlu1 %v4943_v40, %s6913_s9 }
 0xb8c   : > { %v5046_v37 = vrot.slane %v9918_v29, %v13126_v26  ;;  %v1828_v62 = vrot.slane %v9981_v4, 2  ;;  %v1807_v61 = vmul.f32 %v10015_v51, %v13125_v42  ;;  %v1805_v49 = vmul.f32 %v10020_v48, %v1786_v24  ;;  %v13128_v24 = vld [vmem:[#allocation114_spill] sm:$0xff] }
 0xb8d   : > { %v1806_v54 = vmul.f32 %v10024_v36, %v1787_v18  ;;  %v1830_v63 = vrot.slane %v1795_v39, 2  ;;  %v1831_v59 = vrot.slane %v1800_v23, 2  ;;  %v1833_v2 = vrot.slane %v1796_v30, 2 }
 0xb8e   : > { %v1834_v7 = vrot.slane %v1801_v58, 2  ;;  %v1723_v31 = vsel %vm332_vm0, %v13123_v27, %v13127_v34  ;;  %v1836_v6 = vrot.slane %v1797_v20, 2  ;;  %v1837_v28 = vrot.slane %v1802_v57, 2  ;;  %5059 = vrot.lane.b32.xlu0 %v5042_v41, %s6914_s11 }
 0xb8f   : > { %v5050_v42 = vrot.slane %v9954_v53, %v13126_v26  ;;  %v1744_v35 = vadd.f32 %v13128_v24, %v9907_v46  ;;  %v1724_v18 = vsel %vm332_vm0, %v13127_v34, %v13128_v24  ;;  %v1839_v19 = vrot.slane %v1803_v60, 2  ;;  %5061 = vrot.lane.b32.xlu1 %v5046_v37, %s6914_s11 }
 0xb90   : > { %v5054_v27 = vrot.slane %v9972_v55, %v13126_v26  ;;  %v1841_v13 = vrot.slane %v1804_v12, 2  ;;  %v1847_v40 = vrot.slane %v1807_v61, 2  ;;  %v1826_v4 = vsel %vm1823_vm3, %v1824_v52, %v1825_v1  ;;  %v13129_v12 = vld [vmem:[#allocation15_spill] sm:$0xff] }
 0xb91   : > { %v1829_v9 = vsel %vm1823_vm3, %v1827_v33, %v1828_v62  ;;  %v1843_v39 = vrot.slane %v1805_v49, 2  ;;  %v1845_v30 = vrot.slane %v1806_v54, 2  ;;  %v1832_v46 = vsel %vm1823_vm3, %v1830_v63, %v1831_v59  ;;  %v13131_v54 = vld [vmem:[#allocation119_spill] sm:$0xff] }
 0xb92   : > { %v1835_v23 = vsel %vm1823_vm3, %v1833_v2, %v1834_v7  ;;  %v1742_v58 = vadd.f32 %v1723_v31, %v9909_v17  ;;  %v1743_v60 = vadd.f32 %v1724_v18, %v9922_v10  ;;  %v1838_v20 = vsel %vm1823_vm3, %v1836_v6, %v1837_v28  ;;  %5063 = vrot.lane.b32.xlu0 %v5050_v42, %s6914_s11  ;;  %v13132_v2 = vld [vmem:[#allocation121_spill] sm:$0xff] }
 0xb93   : > { %v5181_v57 = vrot.slane %v9902_v44, %v13129_v12  ;;  %v1859_v41 = vadd.f32 %v1826_v4, %v9924_v16  ;;  %v1860_v52 = vadd.f32 %v1829_v9, %v9926_v25  ;;  %v1840_v33 = vsel %vm1823_vm3, %v1825_v1, %v1839_v19  ;;  %5065 = vrot.lane.b32.xlu1 %v5054_v27, %s6914_s11  ;;  %v13130_v44 = vld [vmem:[#allocation120_spill] sm:$0xff]  ;;  %v13135_v42 = vld [vmem:[#allocation125_spill] sm:$0xff] }
 0xb94   : > { %v5185_v17 = vrot.slane %v9918_v29, %v13129_v12  ;;  %v1861_v10 = vadd.f32 %v1832_v46, %v9931_v43  ;;  %v1862_v37 = vadd.f32 %v1835_v23, %v9942_v21  ;;  %v1842_v61 = vsel %vm1823_vm3, %v1828_v62, %v1841_v13  ;;  %v13133_v43 = vld [vmem:[#allocation122_spill] sm:$0xff] }
 0xb95   : > { %v1848_v49 = vsel %vm1823_vm3, %v1837_v28, %v1847_v40  ;;  %v1980_v16 = vsel %vm381_vm1, %v13131_v54, %v13130_v44  ;;  %v1863_v25 = vadd.f32 %v1838_v20, %v9934_v3  ;;  %v1844_v1 = vsel %vm1823_vm3, %v1831_v59, %v1843_v39  ;;  %v13134_v3 = vld [vmem:[#allocation123_spill] sm:$0xff]  ;;  %v13140_v23 = vld [vmem:[#allocation10_spill] sm:$0xff] }
 0xb96   : > { %v1846_v63 = vsel %vm1823_vm3, %v1834_v7, %v1845_v30  ;;  %v1981_v29 = vsel %vm381_vm1, %v13130_v44, %v13132_v2  ;;  %v1982_v21 = vsel %vm381_vm1, %v13132_v2, %v13133_v43  ;;  %v1864_v62 = vadd.f32 %v1840_v33, %v9976_v11  ;;  %5198 = vrot.lane.b32.xlu0 %v5181_v57, %s6915_s22  ;;  %v10087_v11 = vld [vmem:[%s12382_s1 + $0xc0] sm:$0x7f]  ;;  %v13138_v40 = vld [vmem:[#allocation127_spill] sm:$0xff]  ;;  %v13139_v30 = vld [vmem:[#allocation128_spill] sm:$0xff] }
 0xb97   : > { %v5189_v34 = vrot.slane %v9954_v53, %v13129_v12  ;;  %v1983_v59 = vsel %vm381_vm1, %v13133_v43, %v13134_v3  ;;  %v1865_v7 = vadd.f32 %v1842_v61, %v9978_v47  ;;  %v1868_v31 = vadd.f32 %v1848_v49, %v1744_v35  ;;  %5200 = vrot.lane.b32.xlu1 %v5185_v17, %s6915_s22  ;;  %v13136_v53 = vld [vmem:[#allocation124_spill] sm:$0xff]  ;;  %v10095_v47 = vld [vmem:[%s12382_s1 + $0xc8] sm:$0x7f]  ;;  %v13141_v20 = vld [vmem:[#allocation130_spill] sm:$0xff] }
 0xb98   : > { %v5193_v6 = vrot.slane %v9972_v55, %v13129_v12  ;;  %v1998_v28 = vadd.f32 %v1980_v16, %v1859_v41  ;;  %v1984_v24 = vsel %vm381_vm1, %v13136_v53, %v13135_v42  ;;  %v1866_v18 = vadd.f32 %v1844_v1, %v1742_v58  ;;  %v13137_v55 = vld [vmem:[#allocation126_spill] sm:$0xff]  ;;  %v13142_v57 = vld [vmem:[#allocation129_spill] sm:$0xff]  ;;  %v13144_v44 = vld [vmem:[#allocation132_spill] sm:$0xff] }
 0xb99   : > { %v1867_v19 = vadd.f32 %v1846_v63, %v1743_v60  ;;  %v1999_v35 = vadd.f32 %v1981_v29, %v1860_v52  ;;  %v2000_v27 = vadd.f32 %v1982_v21, %v1861_v10  ;;  %v1985_v13 = vsel %vm381_vm1, %v13135_v42, %v13137_v55  ;;  %v13143_v52 = vld [vmem:[#allocation131_spill] sm:$0xff]  ;;  %v10122_v10 = vld [vmem:[%s12382_s1 + $0xd0] sm:$0x7f]  ;;  %v10131_v16 = vld [vmem:[%s12382_s1 + $0xd8] sm:$0x7f] }
 0xb9a   : > { %v1986_v4 = vsel %vm381_vm1, %v13137_v55, %v13138_v40  ;;  %v2001_v9 = vadd.f32 %v1983_v59, %v1862_v37  ;;  %v2002_v39 = vadd.f32 %v13134_v3, %v1863_v25  ;;  %v1987_v46 = vsel %vm381_vm1, %v13138_v40, %v13139_v30  ;;  %5202 = vrot.lane.b32.xlu0 %v5189_v34, %s6915_s22  ;;  %v13145_v1 = vld [vmem:[#allocation133_spill] sm:$0xff]  ;;  %v13146_v2 = vld [vmem:[#allocation135_spill] sm:$0xff]  ;;  %v13147_v29 = vld [vmem:[#allocation134_spill] sm:$0xff] }
 0xb9b   : > { %v5444_v58 = vrot.slane %v10087_v11, %v13140_v23  ;;  %v2003_v60 = vadd.f32 %v1984_v24, %v1864_v62  ;;  %v2119_v41 = vsel %vm332_vm0, %v13142_v57, %v13141_v20  ;;  %v2120_v33 = vsel %vm332_vm0, %v13141_v20, %v13143_v52  ;;  %5204 = vrot.lane.b32.xlu1 %v5193_v6, %s6915_s22  ;;  %v13148_v21 = vld [vmem:[#allocation136_spill] sm:$0xff]  ;;  %v13149_v59 = vld [vmem:[#allocation137_spill] sm:$0xff]  ;;  %v13150_v53 = vld [vmem:[#allocation138_spill] sm:$0xff] }
 0xb9c   : > { %v5448_v17 = vrot.slane %v10095_v47, %v13140_v23  ;;  %v2004_v37 = vadd.f32 %v1985_v13, %v1865_v7  ;;  %v2007_v61 = vadd.f32 %v13139_v30, %v1868_v31  ;;  %v2005_v49 = vadd.f32 %v1986_v4, %v1866_v18  ;;  %v13151_v55 = vld [vmem:[#allocation140_spill] sm:$0xff]  ;;  %v13152_v13 = vld [vmem:[#allocation139_spill] sm:$0xff] }
 0xb9d   : > { %v2121_v54 = vsel %vm332_vm0, %v13143_v52, %v13144_v44  ;;  %v2006_v25 = vadd.f32 %v1987_v46, %v1867_v19  ;;  %v2122_v63 = vsel %vm332_vm0, %v13144_v44, %v13145_v1  ;;  %v2123_v43 = vsel %vm332_vm0, %v13147_v29, %v13146_v2  ;;  %v13154_v46 = vld [vmem:[#allocation142_spill] sm:$0xff]  ;;  %v13155_v20 = vld [vmem:[#allocation148_spill] sm:$0xff]  ;;  %v13156_v57 = vld [vmem:[#allocation147_spill] sm:$0xff] }
 0xb9e   : > { %v2124_v62 = vsel %vm332_vm0, %v13146_v2, %v13148_v21  ;;  %v2137_v34 = vadd.f32 %v2119_v41, %v1998_v28  ;;  %v2138_v3 = vadd.f32 %v2120_v33, %v1999_v35  ;;  %v2125_v7 = vsel %vm332_vm0, %v13148_v21, %v13149_v59  ;;  %5461 = vrot.lane.b32.xlu0 %v5444_v58, %s6914_s11  ;;  %v13157_v52 = vld [vmem:[#allocation11_spill] sm:$0xff] }
 0xb9f   : > { %v5452_v31 = vrot.slane %v10122_v10, %v13140_v23  ;;  %v2139_v6 = vadd.f32 %v2121_v54, %v2000_v27  ;;  %v2141_v42 = vadd.f32 %v13145_v1, %v2002_v39  ;;  %v2126_v24 = vsel %vm332_vm0, %v13149_v59, %v13150_v53  ;;  %5463 = vrot.lane.b32.xlu1 %v5448_v17, %s6914_s11  ;;  %v13153_v39 = vld [vmem:[#allocation141_spill] sm:$0xff]  ;;  %v13158_v1 = vld [vmem:[#allocation143_spill] sm:$0xff] }
 0xba0   : > { %v5456_v28 = vrot.slane %v10131_v16, %v13140_v23  ;;  %v2140_v18 = vadd.f32 %v2122_v63, %v2001_v9  ;;  %v2142_v19 = vadd.f32 %v2123_v43, %v2003_v60  ;;  %v10155_v35 = vadd.f32 %v2124_v62, %v2004_v37  ;;  %v13160_v43 = vld [vmem:[#allocation149_spill] sm:$0xff]  ;;  %v13161_v62 = vld [vmem:[#allocation150_spill] sm:$0xff] }
 0xba1   : > { %v2223_v40 = vsel %vm275_vm7, %v13152_v13, %v13151_v55  ;;  %v10161_v27 = vadd.f32 %v13150_v53, %v2007_v61  ;;  %v10163_v4 = vadd.f32 %v2125_v7, %v2005_v49  ;;  %v2224_v30 = vsel %vm275_vm7, %v13151_v55, %v13153_v39 }
 0xba2   : > { %v2225_v9 = vsel %vm275_vm7, %v13153_v39, %v13154_v46  ;;  %v10171_v58 = vadd.f32 %v2126_v24, %v2006_v25  ;;  %v10174_v60 = vadd.f32 %v13152_v13, %v2137_v34  ;;  %v2277_v41 = vsel %vm275_vm7, %v13156_v57, %v13155_v20  ;;  %5465 = vrot.lane.b32.xlu0 %v5452_v31, %s6914_s11  ;;  %v6751_v13 = vld [vmem:[%s7061_s20 + $0x28] sm:$0xfc]  ;;  %v6752_v39 = vld [vmem:[%s7061_s20 + $0x88] sm:$0x3] }
 0xba3   : > { %v5583_v33 = vrot.slane %v10087_v11, %v13157_v52  ;;  %v10182_v17 = vadd.f32 %v2223_v40, %v2138_v3  ;;  %v2285_v37 = vmul.f32 %v9961_v38, %v13156_v57  ;;  %v10188_v61 = vmul.f32 %v9751_v5, %v13156_v57  ;;  %5467 = vrot.lane.b32.xlu1 %v5456_v28, %s6914_s11  ;;  %v13159_v38 = vld [vmem:[#allocation144_spill] sm:$0xff]  ;;  %v13162_v3 = vld [vmem:[#allocation145_spill] sm:$0xff] }
 0xba4   : > { %v5587_v49 = vrot.slane %v10095_v47, %v13157_v52  ;;  %v10194_v44 = vadd.f32 %v13154_v46, %v2141_v42  ;;  %v10196_v54 = vadd.f32 %v2224_v30, %v2139_v6  ;;  %v10198_v25 = vadd.f32 %v2225_v9, %v2140_v18 }
 0xba5   : > { %v10201_v63 = vadd.f32 %v13158_v1, %v2142_v19  ;;  %v2226_v2 = vsel %vm275_vm7, %v13158_v1, %v13159_v38  ;;  %v2286_v29 = vmul.f32 %v9986_v50, %v2277_v41  ;;  %v2278_v21 = vsel %vm275_vm7, %v13155_v20, %v13160_v43  ;;  %v13163_v20 = vld [vmem:[#allocation146_spill] sm:$0xff] }
 0xba6   : > { %v2279_v34 = vsel %vm275_vm7, %v13160_v43, %v13161_v62  ;;  %v2227_v59 = vsel %vm275_vm7, %v13159_v38, %v13162_v3  ;;  %v2291_v7 = vmul.f32 %v9764_v22, %v2277_v41  ;;  %v2295_v31 = vmul.f32 %v9996_v15, %v13156_v57  ;;  %5600 = vrot.lane.b32.xlu0 %v5583_v33, %s6915_s22 }
 0xba7   : > { %v5591_v50 = vrot.slane %v10122_v10, %v13157_v52  ;;  %v2296_v6 = vmul.f32 %v10020_v48, %v2277_v41  ;;  %v2315_v42 = vrot.slane %v2285_v37, 2  ;;  %v2316_v53 = vrot.slane %v10188_v61, 2  ;;  %5602 = vrot.lane.b32.xlu1 %v5587_v49, %s6915_s22 }
 0xba8   : > { %v5595_v24 = vrot.slane %v10131_v16, %v13157_v52  ;;  %v2287_v28 = vmul.f32 %v9990_v45, %v2278_v21  ;;  %v2288_v15 = vmul.f32 %v10000_v8, %v2279_v34  ;;  %v2292_v18 = vmul.f32 %v9777_v56, %v2278_v21 }
 0xba9   : > { %v2293_v19 = vmul.f32 %v9781_v32, %v2279_v34  ;;  %v2318_v55 = vrot.slane %v2286_v29, 2  ;;  %v2289_v48 = vmul.f32 %v6751_v13, %v13161_v62  ;;  %v2294_v40 = vmul.f32 %v9742_v0, %v13161_v62 }
 0xbaa   : > { %v2299_v30 = vmul.f32 %v6752_v39, %v13161_v62  ;;  %v2319_v46 = vrot.slane %v2291_v7, 2  ;;  %v2297_v9 = vmul.f32 %v10024_v36, %v2278_v21  ;;  %v2298_v45 = vmul.f32 %v10015_v51, %v2279_v34  ;;  %5604 = vrot.lane.b32.xlu0 %v5591_v50, %s6915_s22  ;;  %v13167_v39 = vld [vmem:[#allocation154_spill] sm:$0xff] }
 0xbab   : > { %v5935_v8 = vrot.slane %v10087_v11, %v13126_v26  ;;  %v2228_v57 = vsel %vm275_vm7, %v13162_v3, %v13163_v20  ;;  %v2330_v41 = vrot.slane %v2295_v31, 2  ;;  %v2332_v33 = vrot.slane %v2296_v6, 2  ;;  %5606 = vrot.lane.b32.xlu1 %v5595_v24, %s6915_s22 }
 0xbac   : > { %v5939_v37 = vrot.slane %v10095_v47, %v13126_v26  ;;  %v2321_v61 = vrot.slane %v2287_v28, 2  ;;  %v2322_v36 = vrot.slane %v2292_v18, 2  ;;  %v2324_v49 = vrot.slane %v2288_v15, 2  ;;  %v13164_v18 = vld [vmem:[#allocation152_spill] sm:$0xff] }
 0xbad   : > { %v2325_v51 = vrot.slane %v2293_v19, 2  ;;  %v2327_v1 = vrot.slane %v2289_v48, 2  ;;  %v2328_v38 = vrot.slane %v2294_v40, 2  ;;  %v2338_v29 = vrot.slane %v2299_v30, 2  ;;  %v13165_v19 = vld [vmem:[#allocation151_spill] sm:$0xff]  ;;  %v13166_v48 = vld [vmem:[#allocation153_spill] sm:$0xff] }
 0xbae   : > { %v2317_v43 = vsel %vm1823_vm3, %v2315_v42, %v2316_v53  ;;  %v2334_v21 = vrot.slane %v2297_v9, 2  ;;  %v2336_v62 = vrot.slane %v2298_v45, 2  ;;  %v2320_v34 = vsel %vm1823_vm3, %v2318_v55, %v2319_v46  ;;  %5952 = vrot.lane.b32.xlu0 %v5935_v8, %s6914_s11 }
 0xbaf   : > { %v5943_v3 = vrot.slane %v10122_v10, %v13126_v26  ;;  %v2245_v7 = vadd.f32 %v2226_v2, %v10155_v35  ;;  %v2248_v31 = vadd.f32 %v13163_v20, %v10161_v27  ;;  %v2246_v50 = vadd.f32 %v2227_v59, %v10163_v4  ;;  %5954 = vrot.lane.b32.xlu1 %v5939_v37, %s6914_s11  ;;  %v13168_v20 = vld [vmem:[#allocation155_spill] sm:$0xff] }
 0xbb0   : > { %v5947_v6 = vrot.slane %v10131_v16, %v13126_v26  ;;  %v2247_v42 = vadd.f32 %v2228_v57, %v10171_v58  ;;  %v2350_v24 = vadd.f32 %v2317_v43, %v10174_v60  ;;  %v2323_v28 = vsel %vm1823_vm3, %v2321_v61, %v2322_v36  ;;  %v13169_v57 = vld [vmem:[#allocation157_spill] sm:$0xff]  ;;  %v13171_v61 = vld [vmem:[#allocation158_spill] sm:$0xff] }
 0xbb1   : > { %v2326_v15 = vsel %vm1823_vm3, %v2324_v49, %v2325_v51  ;;  %v2351_v35 = vadd.f32 %v2320_v34, %v10182_v17  ;;  %v2329_v2 = vsel %vm1823_vm3, %v2327_v1, %v2328_v38  ;;  %v2331_v27 = vsel %vm1823_vm3, %v2316_v53, %v2330_v41  ;;  %v13170_v41 = vld [vmem:[#allocation156_spill] sm:$0xff]  ;;  %v13172_v1 = vld [vmem:[#allocation159_spill] sm:$0xff]  ;;  %v13174_v43 = vld [vmem:[#allocation162_spill] sm:$0xff] }
 0xbb2   : > { %v2333_v4 = vsel %vm1823_vm3, %v2319_v46, %v2332_v33  ;;  %v2339_v59 = vsel %vm1823_vm3, %v2328_v38, %v2338_v29  ;;  %v2335_v26 = vsel %vm1823_vm3, %v2322_v36, %v2334_v21  ;;  %v2337_v58 = vsel %vm1823_vm3, %v2325_v51, %v2336_v62  ;;  %5956 = vrot.lane.b32.xlu0 %v5943_v3, %s6914_s11  ;;  %v13173_v29 = vld [vmem:[#allocation160_spill] sm:$0xff]  ;;  %v13175_v21 = vld [vmem:[#allocation161_spill] sm:$0xff] }
 0xbb3   : > { %v6074_v60 = vrot.slane %v10087_v11, %v13129_v12  ;;  %v2471_v17 = vsel %vm381_vm1, %v13165_v19, %v13164_v18  ;;  %v2352_v55 = vadd.f32 %v2323_v28, %v10196_v54  ;;  %v2353_v53 = vadd.f32 %v2326_v15, %v10198_v25  ;;  %5958 = vrot.lane.b32.xlu1 %v5947_v6, %s6914_s11  ;;  %v13179_v28 = vld [vmem:[#allocation172_spill] sm:$0xff]  ;;  %v13180_v15 = vld [vmem:[#allocation171_spill] sm:$0xff] }
 0xbb4   : > { %v6078_v13 = vrot.slane %v10095_v47, %v13129_v12  ;;  %v2472_v40 = vsel %vm381_vm1, %v13164_v18, %v13166_v48  ;;  %v2473_v11 = vsel %vm381_vm1, %v13166_v48, %v13167_v39  ;;  %v2354_v30 = vadd.f32 %v2329_v2, %v10194_v44  ;;  %v6753_v18 = vld [vmem:[%s7061_s20] sm:$0xf8]  ;;  %v10352_v48 = vld [vmem:[%s7061_s20 + $0x8] sm:$0xf8] }
 0xbb5   : > { %v2355_v46 = vadd.f32 %v2331_v27, %v10201_v63  ;;  %v2356_v54 = vadd.f32 %v2333_v4, %v2245_v7  ;;  %v2359_v9 = vadd.f32 %v2339_v59, %v2248_v31  ;;  %v2357_v25 = vadd.f32 %v2335_v26, %v2246_v50  ;;  %v13176_v7 = vld [vmem:[#allocation163_spill] sm:$0xff]  ;;  %v13181_v59 = vld [vmem:[#allocation173_spill] sm:$0xff] }
 0xbb6   : > { %v2358_v45 = vadd.f32 %v2337_v58, %v2247_v42  ;;  %v2489_v8 = vadd.f32 %v2471_v17, %v2350_v24  ;;  %v2474_v47 = vsel %vm381_vm1, %v13167_v39, %v13168_v20  ;;  %v2475_v33 = vsel %vm381_vm1, %v13170_v41, %v13169_v57  ;;  %6091 = vrot.lane.b32.xlu0 %v6074_v60, %s6915_s22  ;;  %v13178_v42 = vld [vmem:[#allocation165_spill] sm:$0xff]  ;;  %v13182_v17 = vld [vmem:[#allocation174_spill] sm:$0xff]  ;;  %v10356_v39 = vld [vmem:[%s7061_s20 + $0x30] sm:$0xff] }
 0xbb7   : > { %v6082_v44 = vrot.slane %v10122_v10, %v13129_v12  ;;  %v2490_v37 = vadd.f32 %v2472_v40, %v2351_v35  ;;  %v2491_v63 = vadd.f32 %v2473_v11, %v2352_v55  ;;  %v2476_v36 = vsel %vm381_vm1, %v13169_v57, %v13171_v61  ;;  %6093 = vrot.lane.b32.xlu1 %v6078_v13, %s6915_s22  ;;  %v6757_v57 = vld [vmem:[%s7061_s20 + $0x60] sm:$0x7] }
 0xbb8   : > { %v6086_v49 = vrot.slane %v10131_v16, %v13129_v12  ;;  %v2493_v51 = vadd.f32 %v13168_v20, %v2354_v30  ;;  %v2477_v38 = vsel %vm381_vm1, %v13171_v61, %v13172_v1  ;;  %v2478_v10 = vsel %vm381_vm1, %v13172_v1, %v13173_v29  ;;  %v13177_v16 = vld [vmem:[#allocation164_spill] sm:$0xff]  ;;  %v13183_v30 = vld [vmem:[#allocation167_spill] sm:$0xff] }
 0xbb9   : > { %v2610_v62 = vsel %vm332_vm0, %v13175_v21, %v13174_v43  ;;  %v2492_v34 = vadd.f32 %v2474_v47, %v2353_v53  ;;  %v2494_v3 = vadd.f32 %v2475_v33, %v2355_v46  ;;  %v2611_v12 = vsel %vm332_vm0, %v13174_v43, %v13176_v7  ;;  %v13184_v46 = vld [vmem:[#allocation166_spill] sm:$0xff]  ;;  %v13185_v20 = vld [vmem:[#allocation168_spill] sm:$0xff]  ;;  %v10375_v33 = vld [vmem:[%s7061_s20 + $0x18] sm:$0xf8] }
 0xbba   : > { %v2612_v31 = vsel %vm332_vm0, %v13176_v7, %v13177_v16  ;;  %v2495_v50 = vadd.f32 %v2476_v36, %v2356_v54  ;;  %v10322_v6 = vadd.f32 %v13173_v29, %v2359_v9  ;;  %v2613_v24 = vsel %vm332_vm0, %v13177_v16, %v13178_v42  ;;  %6095 = vrot.lane.b32.xlu0 %v6082_v44, %s6915_s22  ;;  %v10396_v21 = vld [vmem:[%s7061_s20 + $0x70] sm:$0x7]  ;;  %v10400_v7 = vld [vmem:[%s7061_s20 + $0x78] sm:$0x7] }
 0xbbb   : > { %v2678_v35 = vsel %vm275_vm7, %v13180_v15, %v13179_v28  ;;  %v2496_v2 = vadd.f32 %v2477_v38, %v2357_v25  ;;  %v2497_v27 = vadd.f32 %v2478_v10, %v2358_v45  ;;  %v10331_v4 = vadd.f32 %v2610_v62, %v2489_v8  ;;  %6097 = vrot.lane.b32.xlu1 %v6086_v49, %s6915_s22  ;;  %v10365_v25 = vld [vmem:[%s7061_s20 + $0x10] sm:$0xf8]  ;;  %v10384_v49 = vld [vmem:[%s7061_s20 + $0x20] sm:$0xf8]  ;;  %v10391_v10 = vld [vmem:[%s7061_s20 + $0x80] sm:$0x7] }
 0xbbc   : > { %v2679_v26 = vsel %vm275_vm7, %v13179_v28, %v13181_v59  ;;  %v10337_v58 = vadd.f32 %v2611_v12, %v2490_v37  ;;  %v10339_v60 = vadd.f32 %v2612_v31, %v2491_v63  ;;  %v2686_v19 = vmul.f32 %v6753_v18, %v13180_v15  ;;  %v10380_v63 = vld [vmem:[%s7061_s20 + $0x68] sm:$0x7]  ;;  %v13187_v28 = vld [vmem:[#allocation170_spill] sm:$0xff] }
 0xbbd   : > { %v2680_v55 = vsel %vm275_vm7, %v13181_v59, %v13182_v17  ;;  %v10346_v53 = vadd.f32 %v2613_v24, %v2492_v34  ;;  %v10349_v13 = vadd.f32 %v13178_v42, %v2493_v51  ;;  %v2687_v40 = vmul.f32 %v10352_v48, %v2678_v35  ;;  %v13186_v42 = vld [vmem:[#allocation169_spill] sm:$0xff] }
 0xbbe   : > { %v2691_v11 = vmul.f32 %v10356_v39, %v13180_v15  ;;  %v2614_v54 = vsel %vm332_vm0, %v13184_v46, %v13183_v30  ;;  %v2692_v9 = vmul.f32 %v9751_v5, %v2678_v35  ;;  %v2688_v45 = vmul.f32 %v10365_v25, %v2679_v26 }
 0xbbf   : > { %v2693_v8 = vmul.f32 %v9764_v22, %v2679_v26  ;;  %v2615_v47 = vsel %vm332_vm0, %v13183_v30, %v13185_v20  ;;  %v2696_v41 = vmul.f32 %v6757_v57, %v13180_v15  ;;  %v2689_v44 = vmul.f32 %v10375_v33, %v2680_v55 }
 0xbc0   : > { %v2694_v37 = vmul.f32 %v9777_v56, %v2680_v55  ;;  %v2697_v61 = vmul.f32 %v10380_v63, %v2678_v35  ;;  %v2717_v36 = vrot.slane %v2686_v19, 3  ;;  %v2690_v51 = vmul.f32 %v10384_v49, %v13182_v17 }
 0xbc1   : > { %v2695_v1 = vmul.f32 %v9781_v32, %v13182_v17  ;;  %v2718_v38 = vrot.slane %v2691_v11, 3  ;;  %v2720_v29 = vrot.slane %v2687_v40, 3  ;;  %v2700_v43 = vmul.f32 %v10391_v10, %v13182_v17 }
 0xbc2   : > { %v2698_v62 = vmul.f32 %v10396_v21, %v2679_v26  ;;  %v2721_v34 = vrot.slane %v2692_v9, 3  ;;  %v2699_v12 = vmul.f32 %v10400_v7, %v2680_v55  ;;  %v2723_v16 = vrot.slane %v2688_v45, 3 }
 0xbc3   : > { %v2724_v31 = vrot.slane %v2693_v8, 3  ;;  %v2616_v24 = vsel %vm332_vm0, %v13185_v20, %v13186_v42  ;;  %v2617_v15 = vsel %vm332_vm0, %v13186_v42, %v13187_v28  ;;  %v2726_v35 = vrot.slane %v2689_v44, 3  ;;  %v13194_v42 = vld [vmem:[#allocation180_spill] sm:$0xff] }
 0xbc4   : > { %v2727_v59 = vrot.slane %v2694_v37, 3  ;;  %v2732_v18 = vrot.slane %v2696_v41, 3  ;;  %v2734_v19 = vrot.slane %v2697_v61, 3  ;;  %v2729_v26 = vrot.slane %v2690_v51, 3 }
 0xbc5   : > { %v2730_v17 = vrot.slane %v2695_v1, 3  ;;  %v2633_v40 = vadd.f32 %v2614_v54, %v2494_v3  ;;  %v2740_v11 = vrot.slane %v2700_v43, 3  ;;  %v2736_v30 = vrot.slane %v2698_v62, 3  ;;  %v13190_v1 = vld [vmem:[#allocation177_spill] sm:$0xff]  ;;  %v13191_v43 = vld [vmem:[#allocation178_spill] sm:$0xff] }
 0xbc6   : > { %v2719_v55 = vsel %vm2716_vm4, %v2717_v36, %v2718_v38  ;;  %v2634_v46 = vadd.f32 %v2615_v47, %v2495_v50  ;;  %v2738_v9 = vrot.slane %v2699_v12, 3  ;;  %v2722_v45 = vsel %vm2716_vm4, %v2720_v29, %v2721_v34  ;;  %v13192_v12 = vld [vmem:[#allocation179_spill] sm:$0xff] }
 0xbc7   : > { %v2725_v8 = vsel %vm2716_vm4, %v2723_v16, %v2724_v31  ;;  %v2637_v20 = vadd.f32 %v13187_v28, %v10322_v6  ;;  %v2635_v57 = vadd.f32 %v2616_v24, %v2496_v2  ;;  %v2636_v44 = vadd.f32 %v2617_v15, %v2497_v27  ;;  %v13188_v2 = vld [vmem:[#allocation176_spill] sm:$0xff]  ;;  %v13189_v27 = vld [vmem:[#allocation175_spill] sm:$0xff] }
 0xbc8   : > { %v2728_v41 = vsel %vm2716_vm4, %v2726_v35, %v2727_v59  ;;  %v2752_v37 = vadd.f32 %v2719_v55, %v10331_v4  ;;  %v2731_v3 = vsel %vm2716_vm4, %v2729_v26, %v2730_v17  ;;  %v2733_v54 = vsel %vm2716_vm4, %v2718_v38, %v2732_v18 }
 0xbc9   : > { %v2735_v50 = vsel %vm2716_vm4, %v2721_v34, %v2734_v19  ;;  %v2753_v47 = vadd.f32 %v2722_v45, %v10337_v58  ;;  %v2754_v61 = vadd.f32 %v2725_v8, %v10339_v60  ;;  %v2741_v36 = vsel %vm2716_vm4, %v2730_v17, %v2740_v11  ;;  %v13196_v17 = vld [vmem:[#allocation183_spill] sm:$0xff]  ;;  %v13197_v11 = vld [vmem:[#allocation184_spill] sm:$0xff]  ;;  %v13199_v45 = vld [vmem:[#allocation185_spill] sm:$0xff] }
 0xbca   : > { %v2737_v6 = vsel %vm2716_vm4, %v2724_v31, %v2736_v30  ;;  %v2873_v51 = vsel %vm381_vm1, %v13189_v27, %v13188_v2  ;;  %v2874_v4 = vsel %vm381_vm1, %v13188_v2, %v13190_v1  ;;  %v2755_v38 = vadd.f32 %v2728_v41, %v10346_v53  ;;  %v13193_v31 = vld [vmem:[#allocation181_spill] sm:$0xff]  ;;  %v13205_v27 = vld [vmem:[#allocation192_spill] sm:$0xff] }
 0xbcb   : > { %v2739_v29 = vsel %vm2716_vm4, %v2727_v59, %v2738_v9  ;;  %v2875_v58 = vsel %vm381_vm1, %v13190_v1, %v13191_v43  ;;  %v2756_v60 = vadd.f32 %v2731_v3, %v10349_v13  ;;  %v2757_v62 = vadd.f32 %v2733_v54, %v2633_v40  ;;  %v13195_v59 = vld [vmem:[#allocation182_spill] sm:$0xff]  ;;  %v13202_v54 = vld [vmem:[#allocation189_spill] sm:$0xff] }
 0xbcc   : > { %v2758_v34 = vadd.f32 %v2735_v50, %v2634_v46  ;;  %v2876_v16 = vsel %vm381_vm1, %v13191_v43, %v13192_v12  ;;  %v2877_v24 = vsel %vm381_vm1, %v13194_v42, %v13193_v31  ;;  %v2761_v28 = vadd.f32 %v2741_v36, %v2637_v20  ;;  %v13198_v9 = vld [vmem:[#allocation186_spill] sm:$0xff]  ;;  %v13200_v20 = vld [vmem:[#allocation187_spill] sm:$0xff] }
 0xbcd   : > { %v2759_v53 = vadd.f32 %v2737_v6, %v2635_v57  ;;  %v2891_v15 = vadd.f32 %v2873_v51, %v2752_v37  ;;  %v2892_v35 = vadd.f32 %v2874_v4, %v2753_v47  ;;  %v2878_v18 = vsel %vm381_vm1, %v13193_v31, %v13195_v59  ;;  %v13201_v37 = vld [vmem:[#allocation188_spill] sm:$0xff]  ;;  %v13203_v36 = vld [vmem:[#allocation191_spill] sm:$0xff]  ;;  %v13204_v6 = vld [vmem:[#allocation190_spill] sm:$0xff] }
 0xbce   : > { %v2760_v19 = vadd.f32 %v2739_v29, %v2636_v44  ;;  %v2893_v13 = vadd.f32 %v2875_v58, %v2754_v61  ;;  %v2895_v26 = vadd.f32 %v13192_v12, %v2756_v60  ;;  %v2879_v40 = vsel %vm381_vm1, %v13195_v59, %v13196_v17  ;;  %v13207_v43 = vld [vmem:[#allocation194_spill] sm:$0xff]  ;;  %v13208_v12 = vld [vmem:[#allocation196_spill] sm:$0xff] }
 0xbcf   : > { %v2880_v30 = vsel %vm381_vm1, %v13196_v17, %v13197_v11  ;;  %v2894_v55 = vadd.f32 %v2876_v16, %v2755_v38  ;;  %v2896_v46 = vadd.f32 %v2877_v24, %v2757_v62  ;;  %v3012_v8 = vsel %vm332_vm0, %v13199_v45, %v13198_v9  ;;  %v13206_v38 = vld [vmem:[#allocation193_spill] sm:$0xff]  ;;  %v13209_v16 = vld [vmem:[#allocation195_spill] sm:$0xff]  ;;  %v13217_v45 = vld [vmem:[#allocation206_spill] sm:$0xff] }
 0xbd0   : > { %v3013_v57 = vsel %vm332_vm0, %v13198_v9, %v13200_v20  ;;  %v2897_v44 = vadd.f32 %v2878_v18, %v2758_v34  ;;  %v2900_v41 = vadd.f32 %v13197_v11, %v2761_v28  ;;  %v3014_v3 = vsel %vm332_vm0, %v13200_v20, %v13201_v37  ;;  %v13214_v17 = vld [vmem:[#allocation203_spill] sm:$0xff] }
 0xbd1   : > { %v3015_v50 = vsel %vm332_vm0, %v13201_v37, %v13202_v54  ;;  %v2898_v47 = vadd.f32 %v2879_v40, %v2759_v53  ;;  %v2899_v61 = vadd.f32 %v2880_v30, %v2760_v19  ;;  %v3016_v2 = vsel %vm332_vm0, %v13204_v6, %v13203_v36  ;;  %v13212_v19 = vld [vmem:[#allocation198_spill] sm:$0xff] }
 0xbd2   : > { %v3017_v51 = vsel %vm332_vm0, %v13203_v36, %v13205_v27  ;;  %v3030_v1 = vadd.f32 %v3012_v8, %v2891_v15  ;;  %v3031_v4 = vadd.f32 %v3013_v57, %v2892_v35  ;;  %v3018_v29 = vsel %vm332_vm0, %v13205_v27, %v13206_v38  ;;  %v13211_v15 = vld [vmem:[#allocation197_spill] sm:$0xff] }
 0xbd3   : > { %v3019_v58 = vsel %vm332_vm0, %v13206_v38, %v13207_v43  ;;  %v3032_v60 = vadd.f32 %v3014_v3, %v2893_v13  ;;  %v3033_v62 = vadd.f32 %v3015_v50, %v2894_v55  ;;  %v3034_v34 = vadd.f32 %v13202_v54, %v2895_v26  ;;  %v10480_v42 = vpop.permute.xlu0 %4778  ;;  %v13213_v26 = vld [vmem:[#allocation204_spill] sm:$0xff]  ;;  %v13219_v54 = vld [vmem:[#allocation199_spill] sm:$0xff] }
 0xbd4   : > { %v3116_v31 = vsel %vm275_vm7, %v13209_v16, %v13208_v12  ;;  %13210 = vst [vmem:[#allocation36_spill] sm:$0xff] %v10480_v42  ;;  %v3035_v24 = vadd.f32 %v3016_v2, %v2896_v46  ;;  %v3036_v28 = vadd.f32 %v3017_v51, %v2897_v44  ;;  %v3039_v53 = vadd.f32 %v13207_v43, %v2900_v41  ;;  %v13216_v46 = vld [vmem:[#allocation205_spill] sm:$0xff]  ;;  %v13218_v3 = vld [vmem:[#allocation200_spill] sm:$0xff] }
 0xbd5   : > { %v3117_v35 = vsel %vm275_vm7, %v13208_v12, %v13211_v15  ;;  %v3037_v59 = vadd.f32 %v3018_v29, %v2898_v47  ;;  %v3038_v18 = vadd.f32 %v3019_v58, %v2899_v61  ;;  %v3118_v13 = vsel %vm275_vm7, %v13211_v15, %v13212_v19  ;;  %v10492_v11 = vpop.permute.xlu1 %4780  ;;  %v13222_v29 = vld [vmem:[#allocation201_spill] sm:$0xff] }
 0xbd6   : > { %v3170_v40 = vsel %vm275_vm7, %v13214_v17, %v13213_v26  ;;  %13215 = vst [vmem:[#allocation20_spill] sm:$0xff] %v10492_v11  ;;  %v3132_v30 = vadd.f32 %v13209_v16, %v3030_v1  ;;  %v3133_v55 = vadd.f32 %v3116_v31, %v3031_v4  ;;  %v3171_v9 = vsel %vm275_vm7, %v13213_v26, %v13216_v46  ;;  %v13225_v31 = vld [vmem:[#allocation202_spill] sm:$0xff] }
 0xbd7   : > { %v3172_v8 = vsel %vm275_vm7, %v13216_v46, %v13217_v45  ;;  %v10502_v20 = vadd.f32 %v13212_v19, %v3034_v34  ;;  %v3134_v57 = vadd.f32 %v3117_v35, %v3032_v60  ;;  %v3178_v44 = vmul.f32 %v10352_v48, %v13214_v17 }
 0xbd8   : > { %v3183_v41 = vmul.f32 %v9751_v5, %v13214_v17  ;;  %v3135_v37 = vadd.f32 %v3118_v13, %v3033_v62  ;;  %v3119_v50 = vsel %vm275_vm7, %v13219_v54, %v13218_v3  ;;  %v3179_v47 = vmul.f32 %v10365_v25, %v3170_v40  ;;  %v10513_v36 = vpop.permute.xlu0 %4782  ;;  %v6764_v25 = vld [vmem:[%s7061_s20 + $0x28] sm:$0xf8] }
 0xbd9   : > { %v3184_v61 = vmul.f32 %v9764_v22, %v3170_v40  ;;  %13220 = vst [vmem:[#allocation35_spill] sm:$0xff] %v10513_v36  ;;  %v3180_v6 = vmul.f32 %v10375_v33, %v3171_v9  ;;  %v3181_v2 = vmul.f32 %v10384_v49, %v3172_v8  ;;  %v3185_v48 = vmul.f32 %v9777_v56, %v3171_v9  ;;  %v10519_v27 = vpop.permute.xlu1 %4784  ;;  %v6765_v49 = vld [vmem:[%s7061_s20 + $0x88] sm:$0x7] }
 0xbda   : > { %v3186_v5 = vmul.f32 %v9781_v32, %v3172_v8  ;;  %13221 = vst [vmem:[#allocation38_spill] sm:$0xff] %v10519_v27  ;;  %v3188_v51 = vmul.f32 %v10380_v63, %v13214_v17  ;;  %v3189_v1 = vmul.f32 %v10396_v21, %v3170_v40  ;;  %v3182_v22 = vmul.f32 %v6764_v25, %v13217_v45 }
 0xbdb   : > { %v3187_v4 = vmul.f32 %v9742_v0, %v13217_v45  ;;  %v3208_v33 = vrot.slane %v3178_v44, 3  ;;  %v3209_v38 = vrot.slane %v3183_v41, 3  ;;  %v3192_v56 = vmul.f32 %v6765_v49, %v13217_v45 }
 0xbdc   : > { %v3190_v32 = vmul.f32 %v10400_v7, %v3171_v9  ;;  %v3120_v43 = vsel %vm275_vm7, %v13218_v3, %v13222_v29  ;;  %v3211_v63 = vrot.slane %v3179_v47, 3  ;;  %v3212_v58 = vrot.slane %v3184_v61, 3  ;;  %v10535_v60 = vpop.permute.xlu0 %4786 }
 0xbdd   : > { %v3191_v21 = vmul.f32 %v10391_v10, %v3172_v8  ;;  %13223 = vst [vmem:[#allocation39_spill] sm:$0xff] %v10535_v60  ;;  %v3214_v62 = vrot.slane %v3180_v6, 3  ;;  %v3215_v34 = vrot.slane %v3185_v48, 3  ;;  %v3217_v0 = vrot.slane %v3181_v2, 3  ;;  %v10537_v16 = vpop.permute.xlu1 %4788 }
 0xbde   : > { %v3218_v12 = vrot.slane %v3186_v5, 3  ;;  %13224 = vst [vmem:[#allocation40_spill] sm:$0xff] %v10537_v16  ;;  %v3121_v7 = vsel %vm275_vm7, %v13222_v29, %v13225_v31  ;;  %v3223_v15 = vrot.slane %v3188_v51, 3  ;;  %v3220_v35 = vrot.slane %v3182_v22, 3  ;;  %v13229_v5 = vld [vmem:[#allocation207_spill] sm:$0xff]  ;;  %v13231_v22 = vld [vmem:[#allocation209_spill] sm:$0xff] }
 0xbdf   : > { %v3221_v19 = vrot.slane %v3187_v4, 3  ;;  %v3225_v13 = vrot.slane %v3189_v1, 3  ;;  %v3231_v26 = vrot.slane %v3192_v56, 3  ;;  %v3227_v17 = vrot.slane %v3190_v32, 3  ;;  %v13232_v4 = vld [vmem:[#allocation210_spill] sm:$0xff]  ;;  %v13234_v32 = vld [vmem:[#allocation211_spill] sm:$0xff] }
 0xbe0   : > { %v3210_v10 = vsel %vm2716_vm4, %v3208_v33, %v3209_v38  ;;  %v3137_v40 = vadd.f32 %v13219_v54, %v3035_v24  ;;  %v3138_v46 = vadd.f32 %v3119_v50, %v3036_v28  ;;  %v3229_v9 = vrot.slane %v3191_v21, 3  ;;  %v10545_v8 = vpop.permute.xlu0 %4790  ;;  %v13236_v21 = vld [vmem:[#allocation212_spill] sm:$0xff] }
 0xbe1   : > { %v3213_v45 = vsel %vm2716_vm4, %v3211_v63, %v3212_v58  ;;  %13226 = vst [vmem:[#allocation42_spill] sm:$0xff] %v10545_v8  ;;  %v3141_v44 = vadd.f32 %v13225_v31, %v3039_v53  ;;  %v3139_v41 = vadd.f32 %v3120_v43, %v3037_v59  ;;  %v3216_v3 = vsel %vm2716_vm4, %v3214_v62, %v3215_v34  ;;  %v10550_v61 = vpop.permute.xlu1 %4792  ;;  %v13228_v59 = vld [vmem:[#allocation208_spill] sm:$0xff]  ;;  %v10883_v8 = vld [vmem:[%s7061_s20 + $0x78] sm:$0x1f] }
 0xbe2   : > { %v3219_v47 = vsel %vm2716_vm4, %v3217_v0, %v3218_v12  ;;  %13227 = vst [vmem:[#allocation23_spill] sm:$0xff] %v10550_v61  ;;  %v3140_v6 = vadd.f32 %v3121_v7, %v3038_v18  ;;  %v3243_v2 = vadd.f32 %v3210_v10, %v3132_v30  ;;  %v3222_v48 = vsel %vm2716_vm4, %v3220_v35, %v3221_v19  ;;  %v13238_v7 = vld [vmem:[#allocation215_spill] sm:$0xff]  ;;  %v13239_v35 = vld [vmem:[#allocation216_spill] sm:$0xff]  ;;  %v13241_v10 = vld [vmem:[#allocation218_spill] sm:$0xff] }
 0xbe3   : > { %v3224_v24 = vsel %vm2716_vm4, %v3209_v38, %v3223_v15  ;;  %v3244_v28 = vadd.f32 %v3213_v45, %v3133_v55  ;;  %v3226_v54 = vsel %vm2716_vm4, %v3212_v58, %v3225_v13  ;;  %v3232_v50 = vsel %vm2716_vm4, %v3221_v19, %v3231_v26  ;;  %v13235_v58 = vld [vmem:[#allocation213_spill] sm:$0xff] }
 0xbe4   : > { %v3228_v53 = vsel %vm2716_vm4, %v3215_v34, %v3227_v17  ;;  %v3364_v51 = vsel %vm381_vm1, %v13229_v5, %v13228_v59  ;;  %v3245_v1 = vadd.f32 %v3216_v3, %v3134_v57  ;;  %v3246_v25 = vadd.f32 %v3219_v47, %v3135_v37  ;;  %v10561_v30 = vpop.permute.xlu0 %4794  ;;  %v13237_v34 = vld [vmem:[#allocation214_spill] sm:$0xff]  ;;  %v13245_v47 = vld [vmem:[#allocation220_spill] sm:$0xff] }
 0xbe5   : > { %v3230_v18 = vsel %vm2716_vm4, %v3218_v12, %v3229_v9  ;;  %13230 = vst [vmem:[#allocation41_spill] sm:$0xff] %v10561_v30  ;;  %v3365_v55 = vsel %vm381_vm1, %v13228_v59, %v13231_v22  ;;  %v3366_v33 = vsel %vm381_vm1, %v13231_v22, %v13232_v4  ;;  %v3247_v38 = vadd.f32 %v3222_v48, %v10502_v20  ;;  %v10570_v56 = vpop.permute.xlu1 %4796  ;;  %v13243_v9 = vld [vmem:[#allocation219_spill] sm:$0xff] }
 0xbe6   : > { %v3248_v49 = vadd.f32 %v3224_v24, %v3137_v40  ;;  %13233 = vst [vmem:[#allocation44_spill] sm:$0xff] %v10570_v56  ;;  %v3367_v57 = vsel %vm381_vm1, %v13232_v4, %v13234_v32  ;;  %v3249_v37 = vadd.f32 %v3226_v54, %v3138_v46  ;;  %v3252_v29 = vadd.f32 %v3232_v50, %v3141_v44  ;;  %v13242_v40 = vld [vmem:[#allocation217_spill] sm:$0xff]  ;;  %v13247_v50 = vld [vmem:[#allocation228_spill] sm:$0xff] }
 0xbe7   : > { %v3250_v43 = vadd.f32 %v3228_v53, %v3139_v41  ;;  %v3382_v63 = vadd.f32 %v3364_v51, %v3243_v2  ;;  %v3368_v62 = vsel %vm381_vm1, %v13236_v21, %v13235_v58  ;;  %v3369_v0 = vsel %vm381_vm1, %v13235_v58, %v13237_v34  ;;  %v13246_v2 = vld [vmem:[#allocation221_spill] sm:$0xff]  ;;  %v13248_v53 = vld [vmem:[#allocation227_spill] sm:$0xff] }
 0xbe8   : > { %v3251_v20 = vadd.f32 %v3230_v18, %v3140_v6  ;;  %v3383_v12 = vadd.f32 %v3365_v55, %v3244_v28  ;;  %v3384_v31 = vadd.f32 %v3366_v33, %v3245_v1  ;;  %v3370_v15 = vsel %vm381_vm1, %v13237_v34, %v13238_v7  ;;  %v10587_v13 = vpop.permute.xlu0 %4886  ;;  %v13249_v1 = vld [vmem:[#allocation229_spill] sm:$0xff]  ;;  %v13250_v18 = vld [vmem:[#allocation230_spill] sm:$0xff] }
 0xbe9   : > { %v3371_v19 = vsel %vm381_vm1, %v13238_v7, %v13239_v35  ;;  %13240 = vst [vmem:[#allocation18_spill] sm:$0xff] %v10587_v13  ;;  %v3385_v26 = vadd.f32 %v3367_v57, %v3246_v25  ;;  %v3386_v17 = vadd.f32 %v13234_v32, %v3247_v38  ;;  %v3503_v46 = vsel %vm332_vm0, %v13242_v40, %v13241_v10  ;;  %v10596_v44 = vpop.permute.xlu1 %4888  ;;  %v10663_v7 = vld [vmem:[%s7061_s20 + $0x40] sm:$0xff]  ;;  %v13260_v56 = vld [vmem:[#allocation225_spill] sm:$0xff] }
 0xbea   : > { %v3504_v45 = vsel %vm332_vm0, %v13241_v10, %v13243_v9  ;;  %13244 = vst [vmem:[#allocation43_spill] sm:$0xff] %v10596_v44  ;;  %v10598_v41 = vadd.f32 %v3368_v62, %v3248_v49  ;;  %v10600_v3 = vadd.f32 %v3369_v0, %v3249_v37  ;;  %v3505_v6 = vsel %vm332_vm0, %v13243_v9, %v13245_v47  ;;  %v6766_v49 = vld [vmem:[%s7061_s20] sm:$0xf0]  ;;  %v13253_v37 = vld [vmem:[#allocation223_spill] sm:$0xff]  ;;  %v10651_v62 = vld [vmem:[%s7061_s20 + $0x38] sm:$0xff] }
 0xbeb   : > { %v3506_v48 = vsel %vm332_vm0, %v13245_v47, %v13246_v2  ;;  %v10609_v24 = vadd.f32 %v13239_v35, %v3252_v29  ;;  %v10611_v28 = vadd.f32 %v3370_v15, %v3250_v43  ;;  %v10613_v54 = vadd.f32 %v3371_v19, %v3251_v20  ;;  %v13254_v29 = vld [vmem:[#allocation222_spill] sm:$0xff]  ;;  %13255 = vst [vmem:[#allocation30_spill] sm:$0xff] %v10651_v62  ;;  %v10655_v0 = vld [vmem:[%s7061_s20 + $0x10] sm:$0xf0]  ;;  %v10667_v35 = vld [vmem:[%s7061_s20 + $0x48] sm:$0xff] }
 0xbec   : > { %v3571_v59 = vsel %vm275_vm7, %v13248_v53, %v13247_v50  ;;  %v10618_v5 = vadd.f32 %v3503_v46, %v3382_v63  ;;  %v10620_v51 = vadd.f32 %v3504_v45, %v3383_v12  ;;  %v3572_v25 = vsel %vm275_vm7, %v13247_v50, %v13249_v1  ;;  %v10628_v55 = vpop.permute.xlu0 %4890  ;;  %v10645_v63 = vld [vmem:[%s7061_s20 + $0x8] sm:$0xf0]  ;;  %v10659_v12 = vld [vmem:[%s7061_s20 + $0x18] sm:$0xf0]  ;;  %13256 = vst [vmem:[#allocation45_spill] sm:$0xff] %v10663_v7  ;;  %v10681_v45 = vld [vmem:[%s7061_s20 + $0x50] sm:$0xff] }
 0xbed   : > { %v3573_v22 = vsel %vm275_vm7, %v13249_v1, %v13250_v18  ;;  %13251 = vst [vmem:[#allocation28_spill] sm:$0xff] %v10628_v55  ;;  %v10630_v4 = vadd.f32 %v3505_v6, %v3384_v31  ;;  %v10632_v33 = vadd.f32 %v3506_v48, %v3385_v26  ;;  %v10635_v38 = vadd.f32 %v13246_v2, %v3386_v17  ;;  %v10639_v57 = vpop.permute.xlu1 %4892  ;;  %v13257_v26 = vld [vmem:[#allocation224_spill] sm:$0xff]  ;;  %v6773_v10 = vld [vmem:[%s7061_s20 + $0x60] sm:$0xf]  ;;  %v10676_v46 = vld [vmem:[%s7061_s20 + $0x20] sm:$0xf0] }
 0xbee   : > { %v3579_v32 = vmul.f32 %v6766_v49, %v13248_v53  ;;  %13252 = vst [vmem:[#allocation29_spill] sm:$0xff] %v10639_v57  ;;  %v3507_v43 = vsel %vm332_vm0, %v13254_v29, %v13253_v37  ;;  %v3580_v58 = vmul.f32 %v10645_v63, %v3571_v59  ;;  %v3584_v21 = vmul.f32 %v10356_v39, %v13248_v53  ;;  %v10688_v2 = vld [vmem:[%s7061_s20 + $0x68] sm:$0xf]  ;;  %v10692_v1 = vld [vmem:[%s7061_s20 + $0x80] sm:$0xf] }
 0xbef   : > { %v3585_v34 = vmul.f32 %v10651_v62, %v3571_v59  ;;  %v3581_v20 = vmul.f32 %v10655_v0, %v3572_v25  ;;  %v3582_v31 = vmul.f32 %v10659_v12, %v3573_v22  ;;  %v3586_v15 = vmul.f32 %v10663_v7, %v3572_v25  ;;  %v10697_v49 = vld [vmem:[%s7061_s20 + $0x70] sm:$0xf] }
 0xbf0   : > { %v3587_v19 = vmul.f32 %v10667_v35, %v3573_v22  ;;  %v3508_v17 = vsel %vm332_vm0, %v13253_v37, %v13257_v26  ;;  %v3589_v40 = vmul.f32 %v6773_v10, %v13248_v53  ;;  %v3583_v9 = vmul.f32 %v10676_v46, %v13250_v18  ;;  %v10685_v6 = vpop.permute.xlu0 %4894 }
 0xbf1   : > { %v3588_v47 = vmul.f32 %v10681_v45, %v13250_v18  ;;  %13258 = vst [vmem:[#allocation46_spill] sm:$0xff] %v10685_v6  ;;  %v3590_v48 = vmul.f32 %v10688_v2, %v3571_v59  ;;  %v3610_v50 = vrot.slane %v3579_v32, 4  ;;  %v3593_v53 = vmul.f32 %v10692_v1, %v13250_v18  ;;  %v10700_v29 = vpop.permute.xlu1 %4896  ;;  %v10703_v6 = vld [vmem:[%s7061_s20 + $0x78] sm:$0xf] }
 0xbf2   : > { %v3591_v37 = vmul.f32 %v10697_v49, %v3572_v25  ;;  %13259 = vst [vmem:[#allocation48_spill] sm:$0xff] %v10700_v29  ;;  %v3611_v10 = vrot.slane %v3584_v21, 4  ;;  %v3613_v52 = vrot.slane %v3580_v58, 4  ;;  %v3614_v23 = vrot.slane %v3585_v34, 4  ;;  %v13262_v21 = vld [vmem:[#allocation226_spill] sm:$0xff] }
 0xbf3   : > { %v3592_v55 = vmul.f32 %v10703_v6, %v3573_v22  ;;  %v3616_v59 = vrot.slane %v3581_v20, 4  ;;  %v3617_v32 = vrot.slane %v3586_v15, 4  ;;  %v3619_v13 = vrot.slane %v3582_v31, 4 }
 0xbf4   : > { %v3620_v44 = vrot.slane %v3587_v19, 4  ;;  %v3509_v18 = vsel %vm332_vm0, %v13257_v26, %v13260_v56  ;;  %v3625_v30 = vrot.slane %v3589_v40, 4  ;;  %v3622_v61 = vrot.slane %v3583_v9, 4  ;;  %v10709_v16 = vpop.permute.xlu0 %4898 }
 0xbf5   : > { %v3623_v25 = vrot.slane %v3588_v47, 4  ;;  %13261 = vst [vmem:[#allocation27_spill] sm:$0xff] %v10709_v16  ;;  %v3510_v58 = vsel %vm332_vm0, %v13260_v56, %v13262_v21  ;;  %v3627_v34 = vrot.slane %v3590_v48, 4  ;;  %v3633_v29 = vrot.slane %v3593_v53, 4  ;;  %v10714_v20 = vpop.permute.xlu1 %4900  ;;  %v10879_v16 = vld [vmem:[%s7061_s20 + $0x70] sm:$0x1f] }
 0xbf6   : > { %v3629_v22 = vrot.slane %v3591_v37, 4  ;;  %13263 = vst [vmem:[#allocation47_spill] sm:$0xff] %v10714_v20  ;;  %v3526_v31 = vadd.f32 %v3507_v43, %v10598_v41  ;;  %v3527_v15 = vadd.f32 %v3508_v17, %v10600_v3  ;;  %v3631_v19 = vrot.slane %v3592_v55, 4  ;;  %v13267_v37 = vld [vmem:[#allocation231_spill] sm:$0xff] }
 0xbf7   : > { %v3612_v26 = vsel %vm3609_vm5, %v3610_v50, %v3611_v10  ;;  %v3530_v40 = vadd.f32 %v13262_v21, %v10609_v24  ;;  %v3615_v9 = vsel %vm3609_vm5, %v3613_v52, %v3614_v23  ;;  %v3618_v47 = vsel %vm3609_vm5, %v3616_v59, %v3617_v32 }
 0xbf8   : > { %v3621_v56 = vsel %vm3609_vm5, %v3619_v13, %v3620_v44  ;;  %v3528_v48 = vadd.f32 %v3509_v18, %v10611_v28  ;;  %v3529_v53 = vadd.f32 %v3510_v58, %v10613_v54  ;;  %v3624_v41 = vsel %vm3609_vm5, %v3622_v61, %v3623_v25  ;;  %v10728_v55 = vpop.permute.xlu0 %4948  ;;  %v13266_v54 = vld [vmem:[#allocation232_spill] sm:$0xff]  ;;  %v13272_v58 = vld [vmem:[#allocation237_spill] sm:$0xff] }
 0xbf9   : > { %v3626_v3 = vsel %vm3609_vm5, %v3611_v10, %v3625_v30  ;;  %13264 = vst [vmem:[#allocation49_spill] sm:$0xff] %v10728_v55  ;;  %v3645_v43 = vadd.f32 %v3612_v26, %v10618_v5  ;;  %v3628_v24 = vsel %vm3609_vm5, %v3614_v23, %v3627_v34  ;;  %v3634_v52 = vsel %vm3609_vm5, %v3623_v25, %v3633_v29  ;;  %v10734_v50 = vpop.permute.xlu1 %4950  ;;  %v13268_v10 = vld [vmem:[#allocation233_spill] sm:$0xff]  ;;  %v13273_v34 = vld [vmem:[#allocation236_spill] sm:$0xff] }
 0xbfa   : > { %v3630_v17 = vsel %vm3609_vm5, %v3617_v32, %v3629_v22  ;;  %13265 = vst [vmem:[#allocation32_spill] sm:$0xff] %v10734_v50  ;;  %v3646_v13 = vadd.f32 %v3615_v9, %v10620_v51  ;;  %v3647_v28 = vadd.f32 %v3618_v47, %v10630_v4  ;;  %v3648_v61 = vadd.f32 %v3621_v56, %v10632_v33  ;;  %v13269_v32 = vld [vmem:[#allocation234_spill] sm:$0xff]  ;;  %v13276_v9 = vld [vmem:[#allocation239_spill] sm:$0xff]  ;;  %v13277_v56 = vld [vmem:[#allocation240_spill] sm:$0xff] }
 0xbfb   : > { %v3632_v30 = vsel %vm3609_vm5, %v3620_v44, %v3631_v19  ;;  %v3766_v5 = vsel %vm381_vm1, %v13267_v37, %v13266_v54  ;;  %v3767_v23 = vsel %vm381_vm1, %v13266_v54, %v13268_v10  ;;  %v3649_v29 = vadd.f32 %v3624_v41, %v10635_v38  ;;  %v13271_v44 = vld [vmem:[#allocation235_spill] sm:$0xff]  ;;  %v13274_v19 = vld [vmem:[#allocation238_spill] sm:$0xff]  ;;  %v13281_v37 = vld [vmem:[#allocation244_spill] sm:$0xff] }
 0xbfc   : > { %v3650_v59 = vadd.f32 %v3626_v3, %v3526_v31  ;;  %v3768_v51 = vsel %vm381_vm1, %v13268_v10, %v13269_v32  ;;  %v3651_v4 = vadd.f32 %v3628_v24, %v3527_v15  ;;  %v3654_v18 = vadd.f32 %v3634_v52, %v3530_v40  ;;  %v10750_v25 = vpop.permute.xlu0 %4952  ;;  %v13278_v24 = vld [vmem:[#allocation242_spill] sm:$0xff]  ;;  %v13279_v52 = vld [vmem:[#allocation241_spill] sm:$0xff] }
 0xbfd   : > { %v3652_v33 = vadd.f32 %v3630_v17, %v3528_v48  ;;  %13270 = vst [vmem:[#allocation50_spill] sm:$0xff] %v10750_v25  ;;  %v3769_v21 = vsel %vm381_vm1, %v13269_v32, %v13271_v44  ;;  %v3770_v22 = vsel %vm381_vm1, %v13273_v34, %v13272_v58  ;;  %v3771_v38 = vsel %vm381_vm1, %v13272_v58, %v13274_v19  ;;  %v10761_v26 = vpop.permute.xlu1 %4954  ;;  %v13280_v17 = vld [vmem:[#allocation243_spill] sm:$0xff]  ;;  %v13282_v32 = vld [vmem:[#allocation245_spill] sm:$0xff]  ;;  %v13289_v50 = vld [vmem:[#allocation250_spill] sm:$0xff] }
 0xbfe   : > { %v3653_v31 = vadd.f32 %v3632_v30, %v3529_v53  ;;  %13275 = vst [vmem:[#allocation52_spill] sm:$0xff] %v10761_v26  ;;  %v3784_v15 = vadd.f32 %v3766_v5, %v3645_v43  ;;  %v3785_v40 = vadd.f32 %v3767_v23, %v3646_v13  ;;  %v3772_v47 = vsel %vm381_vm1, %v13274_v19, %v13276_v9  ;;  %v13288_v25 = vld [vmem:[#allocation249_spill] sm:$0xff] }
 0xbff   : > { %v3773_v48 = vsel %vm381_vm1, %v13276_v9, %v13277_v56  ;;  %v3786_v41 = vadd.f32 %v3768_v51, %v3647_v28  ;;  %v3788_v3 = vadd.f32 %v13271_v44, %v3649_v29  ;;  %v3905_v53 = vsel %vm332_vm0, %v13279_v52, %v13278_v24 }
 0xc00   : > { %v3906_v43 = vsel %vm332_vm0, %v13278_v24, %v13280_v17  ;;  %v3787_v13 = vadd.f32 %v3769_v21, %v3648_v61  ;;  %v3789_v30 = vadd.f32 %v3770_v22, %v3650_v59  ;;  %v3790_v54 = vadd.f32 %v3771_v38, %v3651_v4  ;;  %v5060_v28 = vpop.permute.xlu0 %5059  ;;  %v10791_v21 = vld [vmem:[%s7061_s20 + $0x8] sm:$0xe0] }
 0xc01   : > { %v3907_v5 = vsel %vm332_vm0, %v13280_v17, %v13281_v37  ;;  %v10780_v10 = vadd.f32 %v13277_v56, %v3654_v18  ;;  %v10782_v23 = vadd.f32 %v3772_v47, %v3652_v33  ;;  %v10784_v29 = vadd.f32 %v3773_v48, %v3653_v31  ;;  %v5062_v61 = vpop.permute.xlu1 %5061  ;;  %13283 = vst [vmem:[#allocation51_spill] sm:$0xff] %v10791_v21  ;;  %v10798_v33 = vld [vmem:[%s7061_s20 + $0x10] sm:$0xe0] }
 0xc02   : > { %v3908_v51 = vsel %vm332_vm0, %v13281_v37, %v13282_v32  ;;  %v3923_v59 = vadd.f32 %v3905_v53, %v3784_v15  ;;  %v3924_v44 = vadd.f32 %v3906_v43, %v3785_v40  ;;  %v5067_v4 = vsel %vm332_vm0, %v5060_v28, %v5062_v61  ;;  %13284 = vst [vmem:[#allocation54_spill] sm:$0xff] %v10798_v33  ;;  %v13285_v15 = vld [vmem:[#allocation247_spill] sm:$0xff]  ;;  %v13286_v40 = vld [vmem:[#allocation246_spill] sm:$0xff]  ;;  %v13287_v17 = vld [vmem:[#allocation248_spill] sm:$0xff] }
 0xc03   : > { %v5075_v58 = vmul.f32 %v10791_v21, %v5060_v28  ;;  %v3925_v34 = vadd.f32 %v3907_v5, %v3786_v41  ;;  %v10795_v18 = vmul.f32 %v10651_v62, %v5060_v28  ;;  %v5076_v22 = vmul.f32 %v10798_v33, %v5067_v4 }
 0xc04   : > { %v10802_v19 = vmul.f32 %v10663_v7, %v5067_v4  ;;  %v10804_v38 = vadd.f32 %v3908_v51, %v3787_v13  ;;  %v3927_v31 = vadd.f32 %v13282_v32, %v3788_v3  ;;  %v3909_v9 = vsel %vm332_vm0, %v13286_v40, %v13285_v15  ;;  %v5064_v47 = vpop.permute.xlu0 %5063  ;;  %v10823_v13 = vld [vmem:[%s7061_s20 + $0x18] sm:$0xe0]  ;;  %v10830_v51 = vld [vmem:[%s7061_s20 + $0x20] sm:$0xe0]  ;;  %v10845_v40 = vld [vmem:[%s7061_s20 + $0x68] sm:$0x1f] }
 0xc05   : > { %v5105_v56 = vrot.slane %v5075_v58, 5  ;;  %v10810_v48 = vpop.permute.xlu1 %5065  ;;  %v5068_v41 = vsel %vm332_vm0, %v5062_v61, %v5064_v47  ;;  %v5106_v24 = vrot.slane %v10795_v18, 5  ;;  %v5108_v52 = vrot.slane %v5076_v22, 5 }
 0xc06   : > { %v12666_v53 = vrot.slane %v10802_v19, 5  ;;  %v3910_v3 = vsel %vm332_vm0, %v13285_v15, %v13287_v17  ;;  %v10820_v43 = vsel %vm332_vm0, %v5064_v47, %v10810_v48  ;;  %v5077_v37 = vmul.f32 %v10823_v13, %v5068_v41 }
 0xc07   : > { %v10827_v5 = vmul.f32 %v10667_v35, %v5068_v41  ;;  %v3928_v32 = vadd.f32 %v3909_v9, %v3789_v30  ;;  %v5078_v61 = vmul.f32 %v10830_v51, %v10820_v43  ;;  %v10836_v58 = vmul.f32 %v10681_v45, %v10820_v43 }
 0xc08   : > { %v5107_v18 = vsel %vm4502_vm6, %v5105_v56, %v5106_v24  ;;  %v5111_v22 = vrot.slane %v5077_v37, 5  ;;  %v5110_v30 = vsel %vm4502_vm6, %v5108_v52, %v12666_v53  ;;  %v5085_v9 = vmul.f32 %v10845_v40, %v5060_v28  ;;  %v10852_v37 = vld [vmem:[%s7061_s20 + $0x28] sm:$0xe0]  ;;  %v10863_v28 = vld [vmem:[%s7061_s20 + $0x58] sm:$0xff] }
 0xc09   : > { %v5112_v15 = vrot.slane %v10827_v5, 5  ;;  %5130 = vrot.lane.b32.xlu0 %v5107_v18, %s6915_s22  ;;  %v3929_v47 = vadd.f32 %v3910_v3, %v3790_v54  ;;  %v3911_v56 = vsel %vm332_vm0, %v13287_v17, %v13288_v25  ;;  %v5114_v5 = vrot.slane %v5078_v61, 5  ;;  %5132 = vrot.lane.b32.xlu1 %v5110_v30, %s6915_s22  ;;  %v13290_v3 = vld [vmem:[#allocation252_spill] sm:$0xff]  ;;  %v13291_v61 = vld [vmem:[#allocation251_spill] sm:$0xff]  ;;  %v13292_v30 = vld [vmem:[#allocation253_spill] sm:$0xff] }
 0xc0a   : > { %v3912_v52 = vsel %vm332_vm0, %v13288_v25, %v13289_v50  ;;  %v5079_v54 = vmul.f32 %v10810_v48, %v10852_v37  ;;  %v10867_v17 = vmul.f32 %v10863_v28, %v10810_v48  ;;  %v4009_v18 = vsel %vm275_vm7, %v13291_v61, %v13290_v3 }
 0xc0b   : > { %v5113_v53 = vsel %vm4502_vm6, %v5111_v22, %v5112_v15  ;;  %v4010_v20 = vsel %vm275_vm7, %v13290_v3, %v13292_v30  ;;  %v13293_v25 = vrot.slane %v10836_v58, 5  ;;  %v5086_v55 = vmul.f32 %v10879_v16, %v5067_v4 }
 0xc0c   : > { %v5087_v27 = vmul.f32 %v10883_v8, %v5068_v41  ;;  %v5120_v36 = vrot.slane %v5085_v9, 5  ;;  %v5117_v42 = vrot.slane %v5079_v54, 5  ;;  %v12675_v11 = vrot.slane %v10867_v17, 5  ;;  %v13294_v41 = vld [vmem:[#allocation254_spill] sm:$0xff] }
 0xc0d   : > { %v5116_v22 = vsel %vm4502_vm6, %v5114_v5, %v13293_v25  ;;  %5134 = vrot.lane.b32.xlu0 %v5113_v53, %s6915_s22  ;;  %v3932_v3 = vadd.f32 %v13289_v50, %v10780_v10  ;;  %v3930_v14 = vadd.f32 %v3911_v56, %v10782_v23  ;;  %v3931_v5 = vadd.f32 %v3912_v52, %v10784_v29  ;;  %v13295_v50 = vld [vmem:[#allocation256_spill] sm:$0xff]  ;;  %v13296_v10 = vld [vmem:[#allocation255_spill] sm:$0xff] }
 0xc0e   : > { %v10893_v25 = vadd.f32 %v13291_v61, %v3923_v59  ;;  %5136 = vrot.lane.b32.xlu1 %v5116_v22, %s6915_s22  ;;  %v10896_v4 = vadd.f32 %v4009_v18, %v3924_v44  ;;  %v10899_v53 = vadd.f32 %v13294_v41, %v3927_v31  ;;  %v4011_v9 = vsel %vm275_vm7, %v13292_v30, %v13294_v41  ;;  %v13297_v29 = vld [vmem:[#allocation260_spill] sm:$0xff]  ;;  %v13298_v59 = vld [vmem:[#allocation259_spill] sm:$0xff]  ;;  %v13299_v18 = vld [vmem:[#allocation257_spill] sm:$0xff] }
 0xc0f   : > { %v10904_v54 = vadd.f32 %v4010_v20, %v3925_v34  ;;  %v4012_v23 = vsel %vm275_vm7, %v13296_v10, %v13295_v50  ;;  %v4063_v56 = vsel %vm275_vm7, %v13298_v59, %v13297_v29  ;;  %v5119_v44 = vsel %vm4502_vm6, %v5117_v42, %v12675_v11  ;;  %v13300_v61 = vld [vmem:[#allocation258_spill] sm:$0xff] }
 0xc10   : > { %v5122_v31 = vrot.slane %v5086_v55, 5  ;;  %v4013_v52 = vsel %vm275_vm7, %v13295_v50, %v13299_v18  ;;  %v4014_v20 = vsel %vm275_vm7, %v13299_v18, %v13300_v61  ;;  %v5124_v34 = vrot.slane %v5087_v27, 5 }
 0xc11   : > { %v5121_v30 = vsel %vm4502_vm6, %v5106_v24, %v5120_v36  ;;  %5138 = vrot.lane.b32.xlu0 %v5119_v44, %s6915_s22  ;;  %v10924_v22 = vadd.f32 %v4011_v9, %v10804_v38  ;;  %v10927_v41 = vadd.f32 %v13296_v10, %v3928_v32  ;;  %v10931_v42 = vmul.f32 %v10645_v63, %v13298_v59 }
 0xc12   : > { %v10935_v55 = vmul.f32 %v10651_v62, %v13298_v59  ;;  %5140 = vrot.lane.b32.xlu1 %v5121_v30, %s6915_s22  ;;  %v10938_v27 = vadd.f32 %v4012_v23, %v3929_v47  ;;  %v10941_v36 = vadd.f32 %v13300_v61, %v3932_v3  ;;  %v10944_v38 = vmul.f32 %v10655_v0, %v4063_v56  ;;  %v13302_v0 = vld [vmem:[#allocation261_spill] sm:$0xff]  ;;  %v6790_v61 = vld [vmem:[%s7061_s20 + $0x28] sm:$0xf0]  ;;  %v6791_v30 = vld [vmem:[%s7061_s20 + $0x88] sm:$0xf] }
 0xc13   : > { %v10948_v24 = vmul.f32 %v10688_v2, %v13298_v59  ;;  %v10950_v63 = vadd.f32 %v4013_v52, %v3930_v14  ;;  %v10952_v32 = vadd.f32 %v4014_v20, %v3931_v5  ;;  %v10955_v9 = vmul.f32 %v10663_v7, %v4063_v56  ;;  %v10971_v5 = vld [vmem:[%s12382_s1 + $0xc0] sm:$0x7f] }
 0xc14   : > { %v13301_v47 = vrot.slane %v10802_v19, 5  ;;  %v10961_v3 = vmul.f32 %v10697_v49, %v4063_v56  ;;  %v4064_v2 = vsel %vm275_vm7, %v13297_v29, %v13302_v0  ;;  %v5125_v14 = vsel %vm4502_vm6, %v5112_v15, %v5124_v34  ;;  %13303 = vst [vmem:[#allocation62_spill] sm:$0xff] %v10971_v5  ;;  %v13304_v19 = vld [vmem:[#allocation9_spill] sm:$0xff]  ;;  %v5201_v49 = vpop.permute.xlu1 %5200  ;;  %v13305_v59 = vld [vmem:[#allocation262_spill] sm:$0xff]  ;;  %v10984_v56 = vld [vmem:[%s12382_s1 + $0xc8] sm:$0x7f] }
 0xc15   : > { %v5332_v10 = vrot.slane %v10971_v5, %v13304_v19  ;;  %v4101_v23 = vrot.slane %v10931_v42, 4  ;;  %v4065_v15 = vsel %vm275_vm7, %v13302_v0, %v13305_v59  ;;  %13306 = vst [vmem:[#allocation59_spill] sm:$0xff] %v10984_v56  ;;  %v5336_v44 = vrot.slane %v10984_v56, %v13304_v19  ;;  %v11007_v0 = vld [vmem:[%s7061_s20 + $0x80] sm:$0x1f] }
 0xc16   : > { %v5123_v50 = vsel %vm4502_vm6, %v13301_v47, %v5122_v31  ;;  %5144 = vrot.lane.b32.xlu1 %v5125_v14, %s6915_s22  ;;  %v5199_v31 = vpop.permute.xlu0 %5198  ;;  %v4104_v18 = vrot.slane %v10944_v38, 4  ;;  %v10992_v20 = vmul.f32 %v6790_v61, %v13305_v59  ;;  %v10996_v34 = vmul.f32 %v10863_v28, %v13305_v59 }
 0xc17   : > { %5142 = vrot.lane.b32.xlu0 %v5123_v50, %s6915_s22  ;;  %v11000_v42 = vmul.f32 %v6791_v30, %v13305_v59  ;;  %v4073_v47 = vmul.f32 %v10659_v12, %v4064_v2  ;;  %v11004_v50 = vld [vmem:[%s7061_s20 + $0x88] sm:$0x1f]  ;;  %v5088_v38 = vmul.f32 %v11007_v0, %v10820_v43  ;;  %v5206_v14 = vsel %vm381_vm1, %v5199_v31, %v5201_v49  ;;  %v11020_v12 = vld [vmem:[%s12382_s1 + $0xd0] sm:$0x7f] }
 0xc18   : > { %13307 = vst [vmem:[#allocation60_spill] sm:$0xff] %v11004_v50  ;;  %v4074_v61 = vmul.f32 %v10676_v46, %v4065_v15  ;;  %v11014_v52 = vmul.f32 %v10667_v35, %v4064_v2  ;;  %13308 = vst [vmem:[#allocation61_spill] sm:$0xff] %v11020_v12  ;;  %v5340_v59 = vrot.slane %v11020_v12, %v13304_v19  ;;  %v11033_v46 = vld [vmem:[%s12382_s1 + $0xd8] sm:$0x7f]  ;;  %v4118_v12 = vrot.slane %v10961_v3, 4 }
 0xc19   : > { %v5089_v43 = vmul.f32 %v10810_v48, %v11004_v50  ;;  %v11027_v30 = vmul.f32 %v10681_v45, %v4065_v15  ;;  %13309 = vst [vmem:[#allocation56_spill] sm:$0xff] %v11033_v46  ;;  %v5214_v11 = vmul.f32 %v10791_v21, %v5199_v31  ;;  %v11039_v29 = vmul.f32 %v10651_v62, %v5199_v31 }
 0xc1a   : > { %5351 = vrot.lane.b32.xlu1 %v5336_v44, %s6913_s9  ;;  %v4105_v48 = vrot.slane %v10955_v9, 4  ;;  %v5215_v56 = vmul.f32 %v10798_v33, %v5206_v14  ;;  %v11045_v44 = vmul.f32 %v10663_v7, %v5206_v14  ;;  %v4113_v5 = vrot.slane %v10992_v20, 4  ;;  %v5203_v21 = vpop.permute.xlu0 %5202  ;;  %v11053_v33 = vpop.permute.xlu1 %5204 }
 0xc1b   : > { %5349 = vrot.lane.b32.xlu0 %v5332_v10, %s6913_s9  ;;  %v5344_v10 = vrot.slane %v11033_v46, %v13304_v19  ;;  %v4114_v57 = vrot.slane %v10996_v34, 4  ;;  %v4083_v19 = vmul.f32 %v10703_v6, %v4064_v2  ;;  %v5126_v46 = vrot.slane %v5088_v38, 5 }
 0xc1c   : > { %v4124_v60 = vrot.slane %v11000_v42, 4  ;;  %v4107_v26 = vrot.slane %v4073_v47, 4  ;;  %v4108_v9 = vrot.slane %v11014_v52, 4  ;;  %v5128_v3 = vrot.slane %v5089_v43, 5 }
 0xc1d   : > { %v4110_v7 = vrot.slane %v4074_v61, 4  ;;  %v4111_v62 = vrot.slane %v11027_v30, 4  ;;  %v5244_v20 = vrot.slane %v5214_v11, 5  ;;  %v5245_v6 = vrot.slane %v11039_v29, 5 }
 0xc1e   : > { %5355 = vrot.lane.b32.xlu1 %v5344_v10, %s6913_s9  ;;  %v4084_v2 = vmul.f32 %v10692_v1, %v4065_v15  ;;  %v5247_v34 = vrot.slane %v5215_v56, 5  ;;  %v5248_v42 = vrot.slane %v11045_v44, 5  ;;  %v5207_v52 = vsel %vm381_vm1, %v5201_v49, %v5203_v21 }
 0xc1f   : > { %5353 = vrot.lane.b32.xlu0 %v5340_v59, %s6913_s9  ;;  %v4120_v47 = vrot.slane %v4083_v19, 4  ;;  %v13310_v38 = vrot.slane %v10836_v58, 5  ;;  %v5208_v61 = vsel %vm381_vm1, %v5203_v21, %v11053_v33  ;;  %v5224_v43 = vmul.f32 %v10845_v40, %v5199_v31 }
 0xc20   : > { %v13311_v11 = vrot.slane %v10935_v55, 4  ;;  %v4106_v1 = vsel %vm3609_vm5, %v4104_v18, %v4105_v48  ;;  %v5225_v15 = vmul.f32 %v10879_v16, %v5206_v14  ;;  %v13312_v49 = vrot.slane %v10867_v17, 5 }
 0xc21   : > { %v5127_v59 = vsel %vm4502_vm6, %v13310_v38, %v5126_v46  ;;  %v4109_v58 = vsel %vm3609_vm5, %v4107_v26, %v4108_v9  ;;  %v4112_v21 = vsel %vm3609_vm5, %v4110_v7, %v4111_v62  ;;  %v5216_v56 = vmul.f32 %v10823_v13, %v5207_v52 }
 0xc22   : > { %v4103_v29 = vsel %vm3609_vm5, %v4101_v23, %v13311_v11  ;;  %v5129_v19 = vsel %vm4502_vm6, %v13312_v49, %v5128_v3  ;;  %v5246_v23 = vsel %vm4502_vm6, %v5244_v20, %v5245_v6  ;;  %v11082_v31 = vmul.f32 %v10667_v35, %v5207_v52  ;;  %v13318_v49 = vld [vmem:[#allocation266_spill] sm:$0xff] }
 0xc23   : > { %5146 = vrot.lane.b32.xlu0 %v5127_v59, %s6915_s22  ;;  %5148 = vrot.lane.b32.xlu1 %v5129_v19, %s6915_s22  ;;  %v5249_v18 = vsel %vm4502_vm6, %v5247_v34, %v5248_v42  ;;  %v5217_v17 = vmul.f32 %v10830_v51, %v5208_v61  ;;  %v11087_v14 = vmul.f32 %v10681_v45, %v5208_v61  ;;  %v4122_v30 = vrot.slane %v4084_v2, 4 }
 0xc24   : > { %v4136_v26 = vadd.f32 %v4103_v29, %v10893_v25  ;;  %v4137_v7 = vadd.f32 %v4106_v1, %v10896_v4  ;;  %v5259_v46 = vrot.slane %v5224_v43, 5  ;;  %v4138_v10 = vadd.f32 %v4109_v58, %v10904_v54  ;;  %v11147_v58 = vld [vmem:[%s7061_s20] sm:$0xc0] }
 0xc25   : > { %v4115_v44 = vsel %vm3609_vm5, %v4113_v5, %v4114_v57  ;;  %v11094_v3 = vadd.f32 %v4112_v21, %v10924_v22  ;;  %v5261_v20 = vrot.slane %v5225_v15, 5  ;;  %v13313_v34 = vrot.slane %v10948_v24, 4  ;;  %v13317_v15 = vld [vmem:[#allocation265_spill] sm:$0xff]  ;;  %13319 = vst [vmem:[#allocation53_spill] sm:$0xff] %v11147_v58 }
 0xc26   : > { %v13314_v38 = vmov %v13311_v11  ;;  %v4119_v25 = vsel %vm3609_vm5, %v4105_v48, %v4118_v12  ;;  %v4125_v4 = vsel %vm3609_vm5, %v4114_v57, %v4124_v60  ;;  %v4121_v54 = vsel %vm3609_vm5, %v4108_v9, %v4120_v47  ;;  %v5464_v9 = vpop.permute.xlu1 %5463  ;;  %v13316_v47 = vld [vmem:[#allocation263_spill] sm:$0xff] }
 0xc27   : > { %5269 = vrot.lane.b32.xlu0 %v5246_v23, %s6914_s11  ;;  %v4117_v2 = vsel %vm3609_vm5, %v13314_v38, %v13313_v34  ;;  %5271 = vrot.lane.b32.xlu1 %v5249_v18, %s6914_s11  ;;  %v5250_v5 = vrot.slane %v5216_v56, 5  ;;  %v5251_v22 = vrot.slane %v11082_v31, 5  ;;  %v5253_v59 = vrot.slane %v5217_v17, 5  ;;  %v11151_v56 = vld [vmem:[%s7061_s20 + $0x8] sm:$0xc0]  ;;  %v13320_v18 = vld [vmem:[#allocation290_spill] sm:$0xff] }
 0xc28   : > { %v5254_v43 = vrot.slane %v11087_v14, 5  ;;  %v4140_v24 = vadd.f32 %v4115_v44, %v10899_v53  ;;  %v5260_v55 = vsel %vm4502_vm6, %v5245_v6, %v5259_v46  ;;  %v5218_v11 = vmul.f32 %v11053_v33, %v10852_v37  ;;  %v13315_v6 = vld [vmem:[#allocation264_spill] sm:$0xff] }
 0xc29   : > { %v11114_v60 = vmul.f32 %v10863_v28, %v11053_v33  ;;  %v11117_v57 = vadd.f32 %v4117_v2, %v10927_v41  ;;  %v11120_v12 = vadd.f32 %v4119_v25, %v10938_v27  ;;  %v5226_v48 = vmul.f32 %v10883_v8, %v5207_v52  ;;  %v5462_v52 = vpop.permute.xlu0 %5461  ;;  %v13321_v2 = vld [vmem:[#allocation267_spill] sm:$0xff] }
 0xc2a   : > { %v5262_v53 = vsel %vm4502_vm6, %v5248_v42, %v5261_v20  ;;  %v4257_v29 = vsel %vm381_vm1, %v13316_v47, %v13315_v6  ;;  %v11129_v1 = vadd.f32 %v4125_v4, %v10941_v36  ;;  %v4123_v41 = vsel %vm3609_vm5, %v4111_v62, %v4122_v30 }
 0xc2b   : > { %5279 = vrot.lane.b32.xlu0 %v5260_v55, %s6914_s11  ;;  %v11133_v27 = vadd.f32 %v4121_v54, %v10950_v63  ;;  %5281 = vrot.lane.b32.xlu1 %v5262_v53, %s6914_s11  ;;  %v4258_v42 = vsel %vm381_vm1, %v13315_v6, %v13317_v15  ;;  %v4259_v19 = vsel %vm381_vm1, %v13317_v15, %v13318_v49  ;;  %v5256_v63 = vrot.slane %v5218_v11, 5  ;;  %v11191_v53 = vld [vmem:[%s7061_s20 + $0x60] sm:$0x3f]  ;;  %v13325_v6 = vld [vmem:[#allocation268_spill] sm:$0xff] }
 0xc2c   : > { %v5255_v36 = vsel %vm4502_vm6, %v5253_v59, %v5254_v43  ;;  %v5252_v62 = vsel %vm4502_vm6, %v5250_v5, %v5251_v22  ;;  %v5257_v21 = vrot.slane %v11114_v60, 5  ;;  %v5469_v23 = vsel %vm332_vm0, %v5462_v52, %v5464_v9  ;;  %13323 = vst [vmem:[#allocation55_spill] sm:$0xff] %v11191_v53 }
 0xc2d   : > { %v5227_v31 = vmul.f32 %v11007_v0, %v5208_v61  ;;  %v4476_v17 = vmul.f32 %v10830_v51, %v13320_v18  ;;  %v11159_v30 = vmul.f32 %v10681_v45, %v13320_v18  ;;  %v5263_v46 = vrot.slane %v5226_v48, 5  ;;  %v5466_v5 = vpop.permute.xlu0 %5465  ;;  %v11188_v48 = vpop.permute.xlu1 %5467 }
 0xc2e   : > { %v5228_v44 = vmul.f32 %v11053_v33, %v11004_v50  ;;  %v11164_v20 = vadd.f32 %v4257_v29, %v4136_v26  ;;  %v4144_v34 = vadd.f32 %v4123_v41, %v10952_v32  ;;  %v5477_v61 = vmul.f32 %v5462_v52, %v11147_v58  ;;  %v13322_v26 = vld [vmem:[#allocation30_spill] sm:$0xff]  ;;  %v11201_v29 = vld [vmem:[%s7061_s20 + $0x68] sm:$0x3f] }
 0xc2f   : > { %5273 = vrot.lane.b32.xlu0 %v5252_v62, %s6914_s11  ;;  %5275 = vrot.lane.b32.xlu1 %v5255_v36, %s6914_s11  ;;  %v11170_v51 = vmul.f32 %v10356_v39, %v5462_v52  ;;  %v11172_v38 = vadd.f32 %v4258_v42, %v4137_v7  ;;  %v4260_v25 = vsel %vm381_vm1, %v13318_v49, %v13321_v2  ;;  %v5265_v59 = vrot.slane %v5227_v31, 5  ;;  %v11206_v49 = vld [vmem:[%s7061_s20 + $0x10] sm:$0xc0] }
 0xc30   : > { %v5478_v33 = vmul.f32 %v5469_v23, %v11151_v56  ;;  %v11179_v4 = vmul.f32 %v13322_v26, %v5469_v23  ;;  %v11181_v32 = vadd.f32 %v4259_v19, %v4138_v10  ;;  %v4279_v54 = vadd.f32 %v13321_v2, %v4140_v24  ;;  %v13324_v24 = vld [vmem:[#allocation269_spill] sm:$0xff] }
 0xc31   : > { %v5258_v39 = vsel %vm4502_vm6, %v5256_v63, %v5257_v21  ;;  %v4515_v7 = vrot.slane %v4476_v17, 5  ;;  %v12695_v55 = vrot.slane %v11159_v30, 5  ;;  %v5264_v11 = vsel %vm4502_vm6, %v5251_v22, %v5263_v46  ;;  %v11221_v17 = vld [vmem:[%s7061_s20 + $0x18] sm:$0xc0]  ;;  %v13327_v46 = vld [vmem:[#allocation271_spill] sm:$0xff] }
 0xc32   : > { %v5267_v60 = vrot.slane %v5228_v44, 5  ;;  %v11194_v10 = vadd.f32 %v4260_v25, %v11094_v3  ;;  %v4261_v47 = vsel %vm381_vm1, %v13325_v6, %v13324_v24  ;;  %v5507_v22 = vrot.slane %v5477_v61, 6  ;;  %v13326_v3 = vld [vmem:[#allocation270_spill] sm:$0xff]  ;;  %v13328_v61 = vld [vmem:[#allocation272_spill] sm:$0xff] }
 0xc33   : > { %5277 = vrot.lane.b32.xlu0 %v5258_v39, %s6914_s11  ;;  %5283 = vrot.lane.b32.xlu1 %v5264_v11, %s6914_s11  ;;  %v5508_v41 = vrot.slane %v11170_v51, 6  ;;  %v5510_v15 = vrot.slane %v5478_v33, 6  ;;  %v5511_v42 = vrot.slane %v11179_v4, 6  ;;  %v5470_v19 = vsel %vm332_vm0, %v5464_v9, %v5466_v5  ;;  %v13329_v51 = vld [vmem:[#allocation281_spill] sm:$0xff] }
 0xc34   : > { %v4262_v36 = vsel %vm381_vm1, %v13324_v24, %v13326_v3  ;;  %v5266_v62 = vsel %vm4502_vm6, %v5254_v43, %v5265_v59  ;;  %v11217_v63 = vsel %vm332_vm0, %v5466_v5, %v11188_v48  ;;  %v5487_v31 = vmul.f32 %v5462_v52, %v11191_v53  ;;  %v13330_v4 = vld [vmem:[#allocation45_spill] sm:$0xff]  ;;  %v13331_v24 = vld [vmem:[#allocation52_spill] sm:$0xff] }
 0xc35   : > { %v4263_v9 = vsel %vm381_vm1, %v13326_v3, %v13327_v46  ;;  %v4517_v44 = vsel %vm4502_vm6, %v4515_v7, %v12695_v55  ;;  %v5488_v14 = vmul.f32 %v5469_v23, %v11201_v29  ;;  %v5268_v43 = vsel %vm4502_vm6, %v5257_v21, %v5267_v60  ;;  %v11263_v3 = vld [vmem:[%s7061_s20 + $0x20] sm:$0xc0] }
 0xc36   : > { %v4264_v52 = vsel %vm381_vm1, %v13327_v46, %v13328_v61  ;;  %v4418_v2 = vadd.f32 %v13329_v51, %v4279_v54  ;;  %v5479_v25 = vmul.f32 %v5470_v19, %v11206_v49  ;;  %v5509_v33 = vsel %vm5395_vm8, %v5507_v22, %v5508_v41 }
 0xc37   : > { %5285 = vrot.lane.b32.xlu0 %v5266_v62, %s6914_s11  ;;  %5287 = vrot.lane.b32.xlu1 %v5268_v43, %s6914_s11  ;;  %v11240_v39 = vmul.f32 %v13330_v4, %v5470_v19  ;;  %v5512_v21 = vsel %vm5395_vm8, %v5510_v15, %v5511_v42  ;;  %v5480_v23 = vmul.f32 %v11217_v63, %v11221_v17  ;;  %v5522_v11 = vrot.slane %v5487_v31, 6  ;;  %v13335_v62 = vld [vmem:[#allocation16_spill] sm:$0xff] }
 0xc38   : > { %v11247_v5 = vmul.f32 %v10667_v35, %v11217_v63  ;;  %v4280_v54 = vadd.f32 %v4261_v47, %v11117_v57  ;;  %v4281_v59 = vadd.f32 %v4262_v36, %v11120_v12  ;;  %v4542_v7 = vadd.f32 %v4517_v44, %v4418_v2  ;;  %v13333_v47 = vld [vmem:[#allocation278_spill] sm:$0xff]  ;;  %v11275_v31 = vld [vmem:[%s7061_s20 + $0x70] sm:$0x3f] }
 0xc39   : > { %v11253_v60 = vadd.f32 %v13328_v61, %v11129_v1  ;;  %v4968_v6 = vmul.f32 %v13331_v24, %v10852_v37  ;;  %v11259_v22 = vmul.f32 %v10863_v28, %v13331_v24  ;;  %v5524_v15 = vrot.slane %v5488_v14, 6  ;;  %v13334_v1 = vld [vmem:[#allocation277_spill] sm:$0xff] }
 0xc3a   : > { %v11266_v57 = vadd.f32 %v4263_v9, %v11133_v27  ;;  %v11268_v12 = vadd.f32 %v4264_v52, %v4144_v34  ;;  %v4396_v36 = vsel %vm332_vm0, %v13334_v1, %v13333_v47  ;;  %v4681_v37 = vadd.f32 %v13335_v62, %v4542_v7  ;;  %v13336_v9 = vld [vmem:[#allocation39_spill] sm:$0xff]  ;;  %v13340_v1 = vld [vmem:[#allocation282_spill] sm:$0xff] }
 0xc3b   : > { %13332 = vst [vmem:[#allocation58_spill] sm:$0xff] %v11259_v22  ;;  %5532 = vrot.lane.b32.xlu0 %v5509_v33, %s6915_s22  ;;  %5534 = vrot.lane.b32.xlu1 %v5512_v21, %s6915_s22  ;;  %v5513_v28 = vrot.slane %v5479_v25, 6  ;;  %v5514_v46 = vrot.slane %v11240_v39, 6  ;;  %v5516_v44 = vrot.slane %v5480_v23, 6  ;;  %v12696_v27 = vrot.slane %v11247_v5, 6  ;;  %v11292_v39 = vpop.permute.xlu1 %5602  ;;  %v13337_v23 = vld [vmem:[#allocation279_spill] sm:$0xff] }
 0xc3c   : > { %v4820_v34 = vadd.f32 %v13336_v9, %v4681_v37  ;;  %v5523_v14 = vsel %vm5395_vm8, %v5508_v41, %v5522_v11  ;;  %v5481_v43 = vmul.f32 %v11188_v48, %v11263_v3  ;;  %v11286_v61 = vmul.f32 %v10681_v45, %v11188_v48  ;;  %v11295_v21 = vld [vmem:[%s7061_s20 + $0x78] sm:$0x3f]  ;;  %v13338_v11 = vld [vmem:[#allocation280_spill] sm:$0xff] }
 0xc3d   : > { %v5006_v52 = vrot.slane %v4968_v6, 5  ;;  %v5489_v25 = vmul.f32 %v5470_v19, %v11275_v31  ;;  %v5525_v33 = vsel %vm5395_vm8, %v5511_v42, %v5524_v15  ;;  %v11298_v41 = vadd.f32 %v4396_v36, %v11164_v20  ;;  %v11311_v42 = vld [vmem:[%s7061_s20 + $0x80] sm:$0x3f]  ;;  %v13339_v15 = vld [vmem:[#allocation283_spill] sm:$0xff]  ;;  %v13341_v36 = vld [vmem:[#allocation29_spill] sm:$0xff] }
 0xc3e   : > { %v4397_v7 = vsel %vm332_vm0, %v13333_v47, %v13337_v23  ;;  %v4398_v6 = vsel %vm332_vm0, %v13337_v23, %v13338_v11  ;;  %v4399_v19 = vsel %vm332_vm0, %v13338_v11, %v13329_v51  ;;  %v4400_v20 = vsel %vm332_vm0, %v13340_v1, %v13339_v15  ;;  %v5601_v23 = vpop.permute.xlu0 %5600  ;;  %v13342_v1 = vld [vmem:[#allocation284_spill] sm:$0xff] }
 0xc3f   : > { %5542 = vrot.lane.b32.xlu0 %v5523_v14, %s6915_s22  ;;  %5544 = vrot.lane.b32.xlu1 %v5525_v33, %s6915_s22  ;;  %v4922_v37 = vadd.f32 %v13341_v36, %v4820_v34  ;;  %v5518_v47 = vsel %vm5395_vm8, %v5516_v44, %v12696_v27  ;;  %v5515_v14 = vsel %vm5395_vm8, %v5513_v28, %v5514_v46  ;;  %v5519_v55 = vrot.slane %v5481_v43, 6  ;;  %v11341_v27 = vld [vmem:[%s7061_s20 + $0x30] sm:$0xff] }
 0xc40   : > { %v5520_v51 = vrot.slane %v11286_v61, 6  ;;  %v5608_v33 = vsel %vm381_vm1, %v5601_v23, %v11292_v39  ;;  %v5490_v11 = vmul.f32 %v11217_v63, %v11295_v21  ;;  %v4401_v34 = vsel %vm332_vm0, %v13339_v15, %v13342_v1  ;;  %13344 = vst [vmem:[#allocation57_spill] sm:$0xff] %v11341_v27 }
 0xc41   : > { %v5526_v2 = vrot.slane %v5489_v25, 6  ;;  %v5491_v28 = vmul.f32 %v11188_v48, %v11311_v42  ;;  %v13343_v44 = vrot.slane %v11259_v22, 5  ;;  %v11336_v61 = vadd.f32 %v4397_v7, %v11172_v38 }
 0xc42   : > { %v5616_v63 = vmul.f32 %v5601_v23, %v11147_v58  ;;  %v11344_v25 = vmul.f32 %v11341_v27, %v5601_v23  ;;  %v11349_v48 = vadd.f32 %v4398_v6, %v11181_v32  ;;  %v5617_v38 = vmul.f32 %v5608_v33, %v11151_v56  ;;  %v13347_v6 = vld [vmem:[#allocation288_spill] sm:$0xff] }
 0xc43   : > { %5536 = vrot.lane.b32.xlu0 %v5515_v14, %s6915_s22  ;;  %v5008_v43 = vsel %vm4502_vm6, %v5006_v52, %v13343_v44  ;;  %5538 = vrot.lane.b32.xlu1 %v5518_v47, %s6915_s22  ;;  %v11352_v14 = vadd.f32 %v4399_v19, %v11194_v10  ;;  %v11356_v52 = vmul.f32 %v13322_v26, %v5608_v33  ;;  %v13348_v10 = vld [vmem:[#allocation287_spill] sm:$0xff]  ;;  %v5530_v22 = vrot.slane %v5491_v28, 6 }
 0xc44   : > { %v11346_v15 = vadd.f32 %v5008_v43, %v4922_v37  ;;  %v11358_v7 = vadd.f32 %v4400_v20, %v4280_v54  ;;  %v11360_v47 = vadd.f32 %v4401_v34, %v4281_v59  ;;  %v5521_v44 = vsel %vm5395_vm8, %v5519_v55, %v5520_v51  ;;  %v13346_v43 = vld [vmem:[#allocation285_spill] sm:$0xff]  ;;  %v13349_v54 = vld [vmem:[#allocation286_spill] sm:$0xff]  ;;  %v13351_v28 = vld [vmem:[#allocation51_spill] sm:$0xff] }
 0xc45   : > { %v5528_v37 = vrot.slane %v5490_v11, 6  ;;  %v4402_v32 = vsel %vm332_vm0, %v13342_v1, %v13346_v43  ;;  %v4464_v19 = vsel %vm275_vm7, %v13348_v10, %v13347_v6  ;;  %v5527_v58 = vsel %vm5395_vm8, %v5514_v46, %v5526_v2  ;;  %v13350_v20 = vld [vmem:[#allocation289_spill] sm:$0xff]  ;;  %v6796_v34 = vld [vmem:[%s7061_s20] sm:$0xe0] }
 0xc46   : > { %13345 = vst [vmem:[#allocation64_spill] sm:$0xff] %v11346_v15  ;;  %v11373_v59 = vadd.f32 %v13349_v54, %v11253_v60  ;;  %v4465_v55 = vsel %vm275_vm7, %v13347_v6, %v13350_v20  ;;  %v5646_v11 = vrot.slane %v5616_v63, 6  ;;  %v5647_v1 = vrot.slane %v11344_v25, 6 }
 0xc47   : > { %5540 = vrot.lane.b32.xlu0 %v5521_v44, %s6915_s22  ;;  %5546 = vrot.lane.b32.xlu1 %v5527_v58, %s6915_s22  ;;  %v4472_v15 = vmul.f32 %v6796_v34, %v13348_v10  ;;  %v4466_v46 = vsel %vm275_vm7, %v13350_v20, %v13320_v18  ;;  %v5649_v2 = vrot.slane %v5617_v38, 6  ;;  %v5650_v60 = vrot.slane %v11356_v52, 6  ;;  %v13353_v20 = vld [vmem:[#allocation54_spill] sm:$0xff] }
 0xc48   : > { %v4473_v44 = vmul.f32 %v13351_v28, %v4464_v19  ;;  %v11389_v6 = vmul.f32 %v11341_v27, %v13348_v10  ;;  %v13352_v58 = vrot.slane %v11247_v5, 6  ;;  %v5626_v25 = vmul.f32 %v5601_v23, %v11191_v53 }
 0xc49   : > { %v11396_v34 = vmul.f32 %v13322_v26, %v4464_v19  ;;  %v4474_v38 = vmul.f32 %v13353_v20, %v4465_v55  ;;  %v5627_v52 = vmul.f32 %v5608_v33, %v11201_v29  ;;  %v5531_v50 = vsel %vm5395_vm8, %v5520_v51, %v5530_v22  ;;  %v6797_v33 = vld [vmem:[%s7061_s20 + $0x60] sm:$0x1f] }
 0xc4a   : > { %v5529_v63 = vsel %vm5395_vm8, %v13352_v58, %v5528_v37  ;;  %v4475_v27 = vmul.f32 %v10823_v13, %v4466_v46  ;;  %v4479_v24 = vmul.f32 %v13330_v4, %v4465_v55  ;;  %v11405_v5 = vmul.f32 %v10667_v35, %v4466_v46 }
 0xc4b   : > { %5548 = vrot.lane.b32.xlu0 %v5529_v63, %s6915_s22  ;;  %5550 = vrot.lane.b32.xlu1 %v5531_v50, %s6915_s22  ;;  %v5648_v26 = vsel %vm5395_vm8, %v5646_v11, %v5647_v1  ;;  %v4403_v23 = vsel %vm332_vm0, %v13346_v43, %v13349_v54  ;;  %v4482_v22 = vmul.f32 %v6797_v33, %v13348_v10  ;;  %v4503_v37 = vrot.slane %v4472_v15, 5  ;;  %v11422_v10 = vpop.permute.xlu1 %5606 }
 0xc4c   : > { %v4483_v51 = vmul.f32 %v10845_v40, %v4464_v19  ;;  %v5651_v13 = vsel %vm5395_vm8, %v5649_v2, %v5650_v60  ;;  %v4504_v58 = vrot.slane %v11389_v6, 5  ;;  %v4486_v63 = vmul.f32 %v11007_v0, %v13320_v18  ;;  %v5605_v6 = vpop.permute.xlu0 %5604 }
 0xc4d   : > { %v5661_v50 = vrot.slane %v5626_v25, 6  ;;  %v4506_v20 = vrot.slane %v4473_v44, 5  ;;  %v4507_v11 = vrot.slane %v11396_v34, 5  ;;  %v4484_v53 = vmul.f32 %v10879_v16, %v4465_v55 }
 0xc4e   : > { %v5663_v43 = vrot.slane %v5627_v52, 6  ;;  %v4509_v19 = vrot.slane %v4474_v38, 5  ;;  %v4510_v54 = vrot.slane %v4479_v24, 5  ;;  %v4512_v2 = vrot.slane %v4475_v27, 5  ;;  %v13355_v52 = vld [vmem:[#allocation62_spill] sm:$0xff] }
 0xc4f   : > { %5671 = vrot.lane.b32.xlu0 %v5648_v26, %s6914_s11  ;;  %v4513_v15 = vrot.slane %v11405_v5, 5  ;;  %5673 = vrot.lane.b32.xlu1 %v5651_v13, %s6914_s11  ;;  %v4421_v0 = vadd.f32 %v4402_v32, %v11266_v57  ;;  %v4518_v18 = vrot.slane %v4482_v22, 5  ;;  %v4520_v44 = vrot.slane %v4483_v51, 5  ;;  %v13354_v32 = vld [vmem:[#allocation13_spill] sm:$0xff]  ;;  %v13356_v26 = vld [vmem:[#allocation59_spill] sm:$0xff] }
 0xc50   : > { %v4485_v25 = vmul.f32 %v10883_v8, %v4466_v46  ;;  %v4526_v16 = vrot.slane %v4486_v63, 5  ;;  %v4505_v55 = vsel %vm4502_vm6, %v4503_v37, %v4504_v58  ;;  %v5662_v34 = vsel %vm5395_vm8, %v5647_v1, %v5661_v50 }
 0xc51   : > { %v5610_v24 = vsel %vm381_vm1, %v5605_v6, %v11422_v10  ;;  %v4508_v27 = vsel %vm4502_vm6, %v4506_v20, %v4507_v11  ;;  %v5609_v38 = vsel %vm381_vm1, %v11292_v39, %v5605_v6  ;;  %v5664_v57 = vsel %vm5395_vm8, %v5650_v60, %v5663_v43 }
 0xc52   : > { %v5824_v8 = vrot.slane %v13355_v52, %v13354_v32  ;;  %v4522_v46 = vrot.slane %v4484_v53, 5  ;;  %v4511_v5 = vsel %vm4502_vm6, %v4509_v19, %v4510_v54  ;;  %v4514_v1 = vsel %vm4502_vm6, %v4512_v2, %v4513_v15 }
 0xc53   : > { %5681 = vrot.lane.b32.xlu0 %v5662_v34, %s6914_s11  ;;  %5683 = vrot.lane.b32.xlu1 %v5664_v57, %s6914_s11  ;;  %v5828_v33 = vrot.slane %v13356_v26, %v13354_v32  ;;  %v4422_v22 = vadd.f32 %v4403_v23, %v11268_v12  ;;  %v4524_v39 = vrot.slane %v4485_v25, 5  ;;  %v5619_v51 = vmul.f32 %v5610_v24, %v11221_v17  ;;  %v13357_v23 = vld [vmem:[#allocation61_spill] sm:$0xff] }
 0xc54   : > { %v11447_v60 = vmul.f32 %v10667_v35, %v5610_v24  ;;  %v4538_v13 = vadd.f32 %v4505_v55, %v11298_v41  ;;  %v4539_v53 = vadd.f32 %v4508_v27, %v11336_v61  ;;  %v5618_v37 = vmul.f32 %v5609_v38, %v11206_v49  ;;  %v13362_v27 = vld [vmem:[#allocation21_spill] sm:$0xff] }
 0xc55   : > { %v5623_v63 = vmul.f32 %v13330_v4, %v5609_v38  ;;  %v4540_v50 = vadd.f32 %v4511_v5, %v11349_v48  ;;  %v4541_v20 = vadd.f32 %v4514_v1, %v11352_v14  ;;  %v4519_v12 = vsel %vm4502_vm6, %v4504_v58, %v4518_v18  ;;  %v13359_v4 = vld [vmem:[#allocation56_spill] sm:$0xff]  ;;  %v13360_v14 = vld [vmem:[#allocation31_spill] sm:$0xff]  ;;  %v13361_v58 = vld [vmem:[#allocation22_spill] sm:$0xff] }
 0xc56   : > { %v5832_v35 = vrot.slane %v13357_v23, %v13354_v32  ;;  %v4521_v43 = vsel %vm4502_vm6, %v4507_v11, %v4520_v44  ;;  %v13358_v41 = vrot.slane %v11159_v30, 5  ;;  %v4523_v19 = vsel %vm4502_vm6, %v4510_v54, %v4522_v46 }
 0xc57   : > { %5841 = vrot.lane.b32.xlu0 %v5824_v8, %s6913_s9  ;;  %5843 = vrot.lane.b32.xlu1 %v5828_v33, %s6913_s9  ;;  %v5836_v48 = vrot.slane %v13359_v4, %v13354_v32  ;;  %v4659_v2 = vsel %vm381_vm1, %v13361_v58, %v13360_v14  ;;  %v4525_v6 = vsel %vm4502_vm6, %v4513_v15, %v4524_v39  ;;  %v5655_v18 = vrot.slane %v5619_v51, 6 }
 0xc58   : > { %v4527_v61 = vsel %vm4502_vm6, %v13358_v41, %v4526_v16  ;;  %v5656_v11 = vrot.slane %v11447_v60, 6  ;;  %v5652_v44 = vrot.slane %v5618_v37, 6  ;;  %v5653_v30 = vrot.slane %v5623_v63, 6  ;;  %v13366_v37 = vld [vmem:[#allocation34_spill] sm:$0xff] }
 0xc59   : > { %v5620_v25 = vmul.f32 %v11422_v10, %v11263_v3  ;;  %v11476_v54 = vmul.f32 %v10681_v45, %v11422_v10  ;;  %v4543_v16 = vadd.f32 %v4519_v12, %v11358_v7  ;;  %v4544_v55 = vadd.f32 %v4521_v43, %v11360_v47  ;;  %v13363_v45 = vld [vmem:[#allocation12_spill] sm:$0xff]  ;;  %v13364_v47 = vld [vmem:[#allocation33_spill] sm:$0xff] }
 0xc5a   : > { %v4547_v34 = vadd.f32 %v4527_v61, %v11373_v59  ;;  %v5628_v15 = vmul.f32 %v5609_v38, %v11275_v31  ;;  %v4660_v57 = vsel %vm381_vm1, %v13360_v14, %v13362_v27  ;;  %v4545_v32 = vadd.f32 %v4523_v19, %v4421_v0 }
 0xc5b   : > { %5845 = vrot.lane.b32.xlu0 %v5832_v35, %s6913_s9  ;;  %v11486_v8 = vadd.f32 %v4525_v6, %v4422_v22  ;;  %5847 = vrot.lane.b32.xlu1 %v5836_v48, %s6913_s9  ;;  %v5722_v7 = vrot.slane %v13355_v52, %v13363_v45  ;;  %v11491_v46 = vadd.f32 %v4659_v2, %v4538_v13  ;;  %v5658_v1 = vrot.slane %v5620_v25, 6  ;;  %v13367_v48 = vld [vmem:[#allocation26_spill] sm:$0xff]  ;;  %v13368_v2 = vld [vmem:[#allocation37_spill] sm:$0xff] }
 0xc5c   : > { %v4661_v59 = vsel %vm381_vm1, %v13362_v27, %v13364_v47  ;;  %v5657_v38 = vsel %vm5395_vm8, %v5655_v18, %v5656_v11  ;;  %v5726_v0 = vrot.slane %v13356_v26, %v13363_v45  ;;  %v5654_v5 = vsel %vm5395_vm8, %v5652_v44, %v5653_v30  ;;  %v13365_v26 = vld [vmem:[#allocation19_spill] sm:$0xff] }
 0xc5d   : > { %v5659_v52 = vrot.slane %v11476_v54, 6  ;;  %v5629_v33 = vmul.f32 %v5610_v24, %v11295_v21  ;;  %v4678_v22 = vadd.f32 %v4660_v57, %v4539_v53  ;;  %v4662_v39 = vsel %vm381_vm1, %v13364_v47, %v13335_v62  ;;  %v11516_v24 = vld [vmem:[%s7061_s20 + $0x38] sm:$0xff]  ;;  %v11545_v54 = vld [vmem:[%s7061_s20 + $0x48] sm:$0xff]  ;;  %v11553_v57 = vld [vmem:[%s7061_s20 + $0x50] sm:$0xff] }
 0xc5e   : > { %v5665_v51 = vrot.slane %v5628_v15, 6  ;;  %v5630_v13 = vmul.f32 %v11422_v10, %v11311_v42  ;;  %v4663_v63 = vsel %vm381_vm1, %v13366_v37, %v13365_v26  ;;  %v5735_v12 = vmul.f32 %v5722_v7, %v11151_v56  ;;  %v11525_v10 = vld [vmem:[%s7061_s20 + $0x40] sm:$0xff] }
 0xc5f   : > { %5675 = vrot.lane.b32.xlu0 %v5654_v5, %s6914_s11  ;;  %5677 = vrot.lane.b32.xlu1 %v5657_v38, %s6914_s11  ;;  %v11519_v53 = vmul.f32 %v11516_v24, %v5722_v7  ;;  %v5730_v62 = vrot.slane %v13357_v23, %v13363_v45  ;;  %v4679_v35 = vadd.f32 %v4661_v59, %v4540_v50  ;;  %v5667_v50 = vrot.slane %v5629_v33, 6  ;;  %v13369_v38 = vld [vmem:[#allocation24_spill] sm:$0xff] }
 0xc60   : > { %v5736_v43 = vmul.f32 %v5726_v0, %v11206_v49  ;;  %v11528_v41 = vmul.f32 %v11525_v10, %v5726_v0  ;;  %v5734_v61 = vrot.slane %v13359_v4, %v13363_v45  ;;  %v4680_v19 = vadd.f32 %v4662_v39, %v4541_v20  ;;  %v11565_v39 = vpop.permute.xlu1 %5954 }
 0xc61   : > { %v4664_v14 = vsel %vm381_vm1, %v13365_v26, %v13367_v48  ;;  %v5660_v58 = vsel %vm5395_vm8, %v5658_v1, %v5659_v52  ;;  %v4682_v23 = vadd.f32 %v4663_v63, %v4543_v16  ;;  %v4665_v6 = vsel %vm381_vm1, %v13367_v48, %v13368_v2  ;;  %v13371_v26 = vld [vmem:[#allocation36_spill] sm:$0xff]  ;;  %v13372_v63 = vld [vmem:[#allocation35_spill] sm:$0xff] }
 0xc62   : > { %v5666_v18 = vsel %vm5395_vm8, %v5653_v30, %v5665_v51  ;;  %v5669_v44 = vrot.slane %v5630_v13, 6  ;;  %v5759_v20 = vrot.slane %v5735_v12, 6  ;;  %v5760_v4 = vrot.slane %v11519_v53, 6  ;;  %v13370_v13 = vld [vmem:[#allocation20_spill] sm:$0xff]  ;;  %v11575_v12 = vpop.permute.xlu0 %5952 }
 0xc63   : > { %5679 = vrot.lane.b32.xlu0 %v5660_v58, %s6914_s11  ;;  %5685 = vrot.lane.b32.xlu1 %v5666_v18, %s6914_s11  ;;  %v5737_v25 = vmul.f32 %v5730_v62, %v11221_v17  ;;  %v11548_v16 = vmul.f32 %v11545_v54, %v5730_v62  ;;  %v5762_v15 = vrot.slane %v5736_v43, 6  ;;  %v5763_v27 = vrot.slane %v11528_v41, 6  ;;  %v13374_v18 = vld [vmem:[#allocation42_spill] sm:$0xff] }
 0xc64   : > { %v5738_v30 = vmul.f32 %v5734_v61, %v11263_v3  ;;  %v11556_v47 = vmul.f32 %v11553_v57, %v5734_v61  ;;  %v4683_v59 = vadd.f32 %v4664_v14, %v4544_v55  ;;  %v4686_v5 = vadd.f32 %v13369_v38, %v4547_v34 }
 0xc65   : > { %v4666_v1 = vsel %vm381_vm1, %v13368_v2, %v13369_v38  ;;  %v5668_v33 = vsel %vm5395_vm8, %v5656_v11, %v5667_v50  ;;  %v4684_v51 = vadd.f32 %v4665_v6, %v4545_v32  ;;  %v4798_v37 = vsel %vm332_vm0, %v13371_v26, %v13370_v13  ;;  %v13373_v50 = vld [vmem:[#allocation38_spill] sm:$0xff] }
 0xc66   : > { %v4799_v55 = vsel %vm332_vm0, %v13370_v13, %v13372_v63  ;;  %v5670_v34 = vsel %vm5395_vm8, %v5659_v52, %v5669_v44  ;;  %v5761_v60 = vsel %vm5395_vm8, %v5759_v20, %v5760_v4  ;;  %v5765_v11 = vrot.slane %v5737_v25, 6  ;;  %v13375_v44 = vld [vmem:[#allocation40_spill] sm:$0xff]  ;;  %v13376_v25 = vld [vmem:[#allocation23_spill] sm:$0xff] }
 0xc67   : > { %5687 = vrot.lane.b32.xlu0 %v5668_v33, %s6914_s11  ;;  %5689 = vrot.lane.b32.xlu1 %v5670_v34, %s6914_s11  ;;  %v5766_v32 = vrot.slane %v11548_v16, 6  ;;  %v5743_v53 = vmul.f32 %v5722_v7, %v11201_v29  ;;  %v5764_v43 = vsel %vm5395_vm8, %v5762_v15, %v5763_v27  ;;  %v5768_v41 = vrot.slane %v5738_v30, 6  ;;  %v13378_v16 = vld [vmem:[#allocation44_spill] sm:$0xff]  ;;  %v11607_v15 = vpop.permute.xlu1 %5958 }
 0xc68   : > { %v5769_v48 = vrot.slane %v11556_v47, 6  ;;  %v5744_v52 = vmul.f32 %v5726_v0, %v11275_v31  ;;  %v4685_v14 = vadd.f32 %v4666_v1, %v11486_v8  ;;  %v4816_v58 = vadd.f32 %v4798_v37, %v11491_v46  ;;  %v13377_v8 = vld [vmem:[#allocation41_spill] sm:$0xff]  ;;  %v5957_v1 = vpop.permute.xlu0 %5956 }
 0xc69   : > { %v4800_v2 = vsel %vm332_vm0, %v13372_v63, %v13373_v50  ;;  %v4817_v6 = vadd.f32 %v4799_v55, %v4678_v22  ;;  %v4801_v7 = vsel %vm332_vm0, %v13373_v50, %v13336_v9  ;;  %v4802_v20 = vsel %vm332_vm0, %v13375_v44, %v13374_v18  ;;  %v13380_v50 = vld [vmem:[#allocation18_spill] sm:$0xff] }
 0xc6a   : > { %v4803_v0 = vsel %vm332_vm0, %v13374_v18, %v13376_v25  ;;  %v4804_v46 = vsel %vm332_vm0, %v13376_v25, %v13377_v8  ;;  %v4805_v22 = vsel %vm332_vm0, %v13377_v8, %v13378_v16  ;;  %v5767_v9 = vsel %vm5395_vm8, %v5765_v11, %v5766_v32  ;;  %v13379_v11 = vld [vmem:[#allocation43_spill] sm:$0xff]  ;;  %v13381_v18 = vld [vmem:[#allocation28_spill] sm:$0xff]  ;;  %v13384_v25 = vld [vmem:[#allocation46_spill] sm:$0xff] }
 0xc6b   : > { %5779 = vrot.lane.b32.xlu0 %v5761_v60, %s6913_s9  ;;  %5781 = vrot.lane.b32.xlu1 %v5764_v43, %s6913_s9  ;;  %v5771_v30 = vrot.slane %v5743_v53, 6  ;;  %v5745_v47 = vmul.f32 %v5730_v62, %v11295_v21  ;;  %v4818_v38 = vadd.f32 %v4800_v2, %v4679_v35  ;;  %v5770_v33 = vsel %vm5395_vm8, %v5768_v41, %v5769_v48  ;;  %v11638_v2 = vpop.permute.xlu1 %6093 }
 0xc6c   : > { %v5773_v13 = vrot.slane %v5744_v52, 6  ;;  %v5746_v26 = vmul.f32 %v5734_v61, %v11311_v42  ;;  %v4819_v37 = vadd.f32 %v4801_v7, %v4680_v19  ;;  %v4821_v63 = vadd.f32 %v4802_v20, %v4682_v23 }
 0xc6d   : > { %v4822_v55 = vadd.f32 %v4803_v0, %v4683_v59  ;;  %v4825_v34 = vadd.f32 %v13378_v16, %v4686_v5  ;;  %v4823_v60 = vadd.f32 %v4804_v46, %v4684_v51  ;;  %v4824_v43 = vadd.f32 %v4805_v22, %v4685_v14  ;;  %v13382_v59 = vld [vmem:[#allocation49_spill] sm:$0xff]  ;;  %v13385_v46 = vld [vmem:[#allocation27_spill] sm:$0xff] }
 0xc6e   : > { %v4902_v53 = vsel %vm275_vm7, %v13380_v50, %v13379_v11  ;;  %v4903_v62 = vsel %vm275_vm7, %v13379_v11, %v13381_v18  ;;  %v4904_v35 = vsel %vm275_vm7, %v13381_v18, %v13341_v36  ;;  %v5960_v61 = vsel %vm332_vm0, %v11575_v12, %v11565_v39 }
 0xc6f   : > { %5783 = vrot.lane.b32.xlu0 %v5767_v9, %s6913_s9  ;;  %5785 = vrot.lane.b32.xlu1 %v5770_v33, %s6913_s9  ;;  %v5772_v19 = vsel %vm5395_vm8, %v5760_v4, %v5771_v30  ;;  %v5775_v23 = vrot.slane %v5745_v47, 6  ;;  %v4964_v5 = vmul.f32 %v13351_v28, %v13382_v59  ;;  %v11632_v51 = vmul.f32 %v11516_v24, %v13382_v59  ;;  %v13386_v33 = vld [vmem:[#allocation47_spill] sm:$0xff] }
 0xc70   : > { %v5774_v41 = vsel %vm5395_vm8, %v5763_v27, %v5773_v13  ;;  %v5777_v52 = vrot.slane %v5746_v26, 6  ;;  %v4918_v36 = vadd.f32 %v13380_v50, %v4816_v58  ;;  %v11636_v14 = vadd.f32 %v4902_v53, %v4817_v6  ;;  %v11654_v58 = vpop.permute.xlu0 %6091  ;;  %v13383_v6 = vld [vmem:[#allocation48_spill] sm:$0xff] }
 0xc71   : > { %v5968_v4 = vmul.f32 %v11575_v12, %v11151_v56  ;;  %v11644_v7 = vmul.f32 %v11516_v24, %v11575_v12  ;;  %v11646_v28 = vadd.f32 %v4903_v62, %v4818_v38  ;;  %v11648_v44 = vadd.f32 %v4904_v35, %v4819_v37  ;;  %v11695_v62 = vpop.permute.xlu1 %6097 }
 0xc72   : > { %v5969_v27 = vmul.f32 %v5960_v61, %v11206_v49  ;;  %v11652_v20 = vmul.f32 %v11525_v10, %v5960_v61  ;;  %v4905_v0 = vsel %vm275_vm7, %v13384_v25, %v13383_v6  ;;  %v11661_v8 = vadd.f32 %v13384_v25, %v4821_v63  ;;  %v6803_v25 = vld [vmem:[%s7061_s20 + $0x70] sm:$0x1f] }
 0xc73   : > { %5787 = vrot.lane.b32.xlu0 %v5772_v19, %s6913_s9  ;;  %v4906_v16 = vsel %vm275_vm7, %v13383_v6, %v13385_v46  ;;  %5789 = vrot.lane.b32.xlu1 %v5774_v41, %s6913_s9  ;;  %v5776_v22 = vsel %vm5395_vm8, %v5766_v32, %v5775_v23  ;;  %v11670_v9 = vmul.f32 %v10845_v40, %v13382_v59  ;;  %v4994_v30 = vrot.slane %v4964_v5, 5  ;;  %v11711_v23 = vld [vmem:[%s7061_s20 + $0x28] sm:$0xc0] }
 0xc74   : > { %v4995_v47 = vrot.slane %v11632_v51, 5  ;;  %v5778_v38 = vsel %vm5395_vm8, %v5769_v48, %v5777_v52  ;;  %v4907_v13 = vsel %vm275_vm7, %v13385_v46, %v13386_v33  ;;  %v5998_v26 = vrot.slane %v5968_v4, 6  ;;  %13388 = vst [vmem:[#allocation63_spill] sm:$0xff] %v11711_v23  ;;  %v13389_v4 = vld [vmem:[#allocation50_spill] sm:$0xff]  ;;  %v13390_v46 = vld [vmem:[#allocation52_spill] sm:$0xff] }
 0xc75   : > { %v5999_v37 = vrot.slane %v11644_v7, 6  ;;  %v5978_v63 = vmul.f32 %v11575_v12, %v11201_v29  ;;  %v5979_v32 = vmul.f32 %v5960_v61, %v11275_v31  ;;  %v6001_v11 = vrot.slane %v5969_v27, 6  ;;  %v13387_v61 = vld [vmem:[#allocation32_spill] sm:$0xff] }
 0xc76   : > { %v6002_v40 = vrot.slane %v11652_v20, 6  ;;  %v5961_v50 = vsel %vm332_vm0, %v11565_v39, %v5957_v1  ;;  %v11685_v48 = vadd.f32 %v4905_v0, %v4822_v55  ;;  %v11688_v53 = vadd.f32 %v13386_v33, %v4825_v34  ;;  %v11703_v34 = vpop.permute.xlu0 %6095  ;;  %v6802_v27 = vld [vmem:[%s7061_s20 + $0x10] sm:$0xe0] }
 0xc77   : > { %5791 = vrot.lane.b32.xlu0 %v5776_v22, %s6913_s9  ;;  %v11690_v18 = vadd.f32 %v4906_v16, %v4823_v60  ;;  %v5962_v12 = vsel %vm332_vm0, %v5957_v1, %v11607_v15  ;;  %5793 = vrot.lane.b32.xlu1 %v5778_v38, %s6913_s9  ;;  %v11697_v35 = vadd.f32 %v4907_v13, %v4824_v43  ;;  %v5009_v55 = vrot.slane %v11670_v9, 5 }
 0xc78   : > { %v4956_v39 = vsel %vm275_vm7, %v13382_v59, %v13387_v61  ;;  %v4996_v60 = vsel %vm4502_vm6, %v4994_v30, %v4995_v47  ;;  %v5970_v1 = vmul.f32 %v5961_v50, %v11221_v17  ;;  %v11708_v19 = vmul.f32 %v11545_v54, %v5961_v50 }
 0xc79   : > { %v6000_v43 = vsel %vm5395_vm8, %v5998_v26, %v5999_v37  ;;  %v6013_v5 = vrot.slane %v5978_v63, 6  ;;  %v6015_v51 = vrot.slane %v5979_v32, 6  ;;  %v5971_v59 = vmul.f32 %v5962_v12, %v11263_v3  ;;  %v11741_v26 = vld [vmem:[%s7061_s20 + $0x58] sm:$0xff] }
 0xc7a   : > { %v11716_v41 = vmul.f32 %v11553_v57, %v5962_v12  ;;  %v6003_v52 = vsel %vm5395_vm8, %v6001_v11, %v6002_v40  ;;  %v4957_v7 = vsel %vm275_vm7, %v13387_v61, %v13389_v4  ;;  %v11725_v20 = vmul.f32 %v6802_v27, %v4956_v39  ;;  %13391 = vst [vmem:[#allocation66_spill] sm:$0xff] %v11741_v26 }
 0xc7b   : > { %6023 = vrot.lane.b32.xlu0 %v6000_v43, %s6915_s22  ;;  %6025 = vrot.lane.b32.xlu1 %v6003_v52, %s6915_s22  ;;  %v11728_v6 = vmul.f32 %v11525_v10, %v4956_v39  ;;  %v11731_v0 = vmul.f32 %v6803_v25, %v4956_v39  ;;  %v4958_v16 = vsel %vm275_vm7, %v13389_v4, %v13390_v46  ;;  %v5131_v30 = vpop.permute.xlu0 %5130  ;;  %v6004_v33 = vrot.slane %v5970_v1, 6  ;;  %v5133_v32 = vpop.permute.xlu1 %5132  ;;  %v6805_v52 = vld [vmem:[%s7061_s20 + $0x18] sm:$0xe0] }
 0xc7c   : > { %v5980_v22 = vmul.f32 %v5961_v50, %v11295_v21  ;;  %v5972_v9 = vmul.f32 %v11607_v15, %v11711_v23  ;;  %v5029_v38 = vadd.f32 %v4996_v60, %v4918_v36  ;;  %v6005_v13 = vrot.slane %v11708_v19, 6  ;;  %v13392_v60 = vld [vmem:[#allocation60_spill] sm:$0xff]  ;;  %v11757_v19 = vld [vmem:[%s7061_s20 + $0x88] sm:$0x3f] }
 0xc7d   : > { %v11745_v63 = vmul.f32 %v11741_v26, %v11607_v15  ;;  %v6014_v11 = vsel %vm5395_vm8, %v5999_v37, %v6013_v5  ;;  %v5150_v50 = vsel %vm381_vm1, %v5131_v30, %v5133_v32  ;;  %v6016_v36 = vsel %vm5395_vm8, %v6002_v40, %v6015_v51  ;;  %13393 = vst [vmem:[#allocation65_spill] sm:$0xff] %v11757_v19  ;;  %v6806_v51 = vld [vmem:[%s7061_s20 + $0x20] sm:$0xe0] }
 0xc7e   : > { %v6007_v61 = vrot.slane %v5971_v59, 6  ;;  %v6008_v39 = vrot.slane %v11716_v41, 6  ;;  %v11754_v1 = vmul.f32 %v13390_v46, %v13392_v60  ;;  %v11759_v43 = vadd.f32 %v5150_v50, %v5029_v38 }
 0xc7f   : > { %6033 = vrot.lane.b32.xlu0 %v6014_v11, %s6915_s22  ;;  %6035 = vrot.lane.b32.xlu1 %v6016_v36, %s6915_s22  ;;  %v11764_v5 = vsel %vm4502_vm6, %v4995_v47, %v5009_v55  ;;  %v11767_v40 = vmul.f32 %v6805_v52, %v4957_v7  ;;  %v11770_v59 = vmul.f32 %v6806_v51, %v4958_v16  ;;  %v5135_v27 = vpop.permute.xlu0 %5134  ;;  %v6010_v25 = vrot.slane %v5972_v9, 6 }
 0xc80   : > { %v11773_v41 = vmul.f32 %v11545_v54, %v4957_v7  ;;  %v5981_v4 = vmul.f32 %v5962_v12, %v11311_v42  ;;  %v6011_v46 = vrot.slane %v11745_v63, 6  ;;  %v5137_v30 = vpop.permute.xlu1 %5136  ;;  %v11778_v47 = vsel %vm381_vm1, %v5133_v32, %v5135_v27  ;;  %v6807_v32 = vld [vmem:[%s7061_s20 + $0x78] sm:$0x1f] }
 0xc81   : > { %v6006_v55 = vsel %vm5395_vm8, %v6004_v33, %v6005_v13  ;;  %v6017_v38 = vrot.slane %v5980_v22, 6  ;;  %v5982_v11 = vmul.f32 %v11607_v15, %v11757_v19  ;;  %v11784_v50 = vsel %vm381_vm1, %v5135_v27, %v5137_v30  ;;  %v6808_v15 = vld [vmem:[%s7061_s20 + $0x80] sm:$0x1f] }
 0xc82   : > { %v6009_v12 = vsel %vm5395_vm8, %v6007_v61, %v6008_v39  ;;  %v11790_v63 = vmul.f32 %v11553_v57, %v4958_v16  ;;  %v11793_v36 = vmul.f32 %v6807_v32, %v4957_v7  ;;  %v6099_v22 = vsel %vm381_vm1, %v11654_v58, %v11638_v2 }
 0xc83   : > { %6027 = vrot.lane.b32.xlu0 %v6006_v55, %s6915_s22  ;;  %6029 = vrot.lane.b32.xlu1 %v6009_v12, %s6915_s22  ;;  %v11800_v33 = vmul.f32 %v6808_v15, %v4958_v16  ;;  %v6107_v61 = vmul.f32 %v11654_v58, %v11151_v56  ;;  %v11806_v60 = vmul.f32 %v11516_v24, %v11654_v58  ;;  %v5139_v52 = vpop.permute.xlu0 %5138  ;;  %v13395_v55 = vld [vmem:[#allocation64_spill] sm:$0xff]  ;;  %v6019_v32 = vrot.slane %v5981_v4, 6 }
 0xc84   : > { %v6100_v7 = vsel %vm381_vm1, %v11638_v2, %v11703_v34  ;;  %v5141_v51 = vpop.permute.xlu1 %5140  ;;  %v11812_v27 = vsel %vm381_vm1, %v5137_v30, %v5139_v52  ;;  %v11815_v12 = vadd.f32 %v5139_v52, %v13395_v55  ;;  %v6012_v16 = vsel %vm5395_vm8, %v6010_v25, %v6011_v46 }
 0xc85   : > { %13394 = vst [vmem:[#allocation68_spill] sm:$0xff] %v11812_v27  ;;  %v6021_v56 = vrot.slane %v5982_v11, 6  ;;  %v6108_v15 = vmul.f32 %v6099_v22, %v11206_v49  ;;  %v6113_v9 = vmul.f32 %v11525_v10, %v6099_v22  ;;  %v6018_v37 = vsel %vm5395_vm8, %v6005_v13, %v6017_v38 }
 0xc86   : > { %v5000_v2 = vrot.slane %v11767_v40, 5  ;;  %v5003_v27 = vrot.slane %v11770_v59, 5  ;;  %v6117_v4 = vmul.f32 %v11654_v58, %v11201_v29  ;;  %v6137_v25 = vrot.slane %v6107_v61, 6 }
 0xc87   : > { %6031 = vrot.lane.b32.xlu0 %v6012_v16, %s6915_s22  ;;  %6037 = vrot.lane.b32.xlu1 %v6018_v37, %s6915_s22  ;;  %v6138_v11 = vrot.slane %v11806_v60, 6  ;;  %v6118_v13 = vmul.f32 %v6099_v22, %v11275_v31  ;;  %v11832_v55 = vmul.f32 %v6100_v7, %v11221_v17  ;;  %v11835_v40 = vmul.f32 %v11545_v54, %v6100_v7 }
 0xc88   : > { %v11837_v59 = vpop.permute.xlu1 %5144  ;;  %v6020_v37 = vsel %vm5395_vm8, %v6008_v39, %v6019_v32  ;;  %v6140_v29 = vrot.slane %v6108_v15, 6  ;;  %v6141_v58 = vrot.slane %v6113_v9, 6  ;;  %v6022_v22 = vsel %vm5395_vm8, %v6011_v46, %v6021_v56 }
 0xc89   : > { %v5143_v38 = vpop.permute.xlu0 %5142  ;;  %v5013_v17 = vrot.slane %v11793_v36, 5  ;;  %v5015_v60 = vrot.slane %v11800_v33, 5  ;;  %v11852_v52 = vmul.f32 %v6100_v7, %v11295_v21  ;;  %v6101_v39 = vsel %vm381_vm1, %v11703_v34, %v11695_v62 }
 0xc8a   : > { %v11840_v16 = vsel %vm381_vm1, %v5141_v51, %v5143_v38  ;;  %v11845_v61 = vsel %vm381_vm1, %v5143_v38, %v11837_v59  ;;  %v6152_v9 = vrot.slane %v6117_v4, 6  ;;  %v11860_v51 = vmul.f32 %v11695_v62, %v11711_v23 }
 0xc8b   : > { %6039 = vrot.lane.b32.xlu0 %v6020_v37, %s6915_s22  ;;  %6041 = vrot.lane.b32.xlu1 %v6022_v22, %s6915_s22  ;;  %v11864_v46 = vmul.f32 %v11741_v26, %v11695_v62  ;;  %v4998_v36 = vrot.slane %v11728_v6, 5  ;;  %v6154_v7 = vrot.slane %v6118_v13, 6  ;;  %v6143_v32 = vrot.slane %v11832_v55, 6 }
 0xc8c   : > { %v6144_v56 = vrot.slane %v11835_v40, 6  ;;  %v5352_v34 = vpop.permute.xlu1 %5351  ;;  %v6139_v15 = vsel %vm5395_vm8, %v6137_v25, %v6138_v11  ;;  %v6110_v4 = vmul.f32 %v6101_v39, %v11263_v3  ;;  %v11872_v38 = vmul.f32 %v11553_v57, %v6101_v39 }
 0xc8d   : > { %v5350_v33 = vpop.permute.xlu0 %5349  ;;  %v6142_v6 = vsel %vm5395_vm8, %v6140_v29, %v6141_v58  ;;  %v6156_v13 = vrot.slane %v11852_v52, 6  ;;  %v11881_v55 = vmul.f32 %v6101_v39, %v11311_v42  ;;  %v6121_v25 = vmul.f32 %v11695_v62, %v11757_v19 }
 0xc8e   : > { %v11875_v37 = vsel %vm275_vm7, %v5350_v33, %v5352_v34  ;;  %v5011_v40 = vrot.slane %v11731_v0, 5  ;;  %v6149_v22 = vrot.slane %v11860_v51, 6  ;;  %v6150_v30 = vrot.slane %v11864_v46, 6  ;;  %v13400_v46 = vld [vmem:[#allocation58_spill] sm:$0xff] }
 0xc8f   : > { %6162 = vrot.lane.b32.xlu0 %v6139_v15, %s6914_s11  ;;  %6164 = vrot.lane.b32.xlu1 %v6142_v6, %s6914_s11  ;;  %v13396_v15 = vrot.slane %v11725_v20, 5  ;;  %v13397_v52 = vrot.slane %v11773_v41, 5  ;;  %v13398_v23 = vrot.slane %v11790_v63, 5  ;;  %v6153_v51 = vsel %vm5395_vm8, %v6138_v11, %v6152_v9 }
 0xc90   : > { %v11898_v0 = vpop.permute.xlu1 %5355  ;;  %v13399_v20 = vrot.slane %v11754_v1, 5  ;;  %v5012_v1 = vsel %vm4502_vm6, %v4998_v36, %v5011_v40  ;;  %v13402_v9 = vrot.slane %v11773_v41, 5  ;;  %v5034_v41 = vadd.f32 %v11764_v5, %v11661_v8 }
 0xc91   : > { %v4999_v29 = vsel %vm4502_vm6, %v13396_v15, %v4998_v36  ;;  %v5002_v39 = vsel %vm4502_vm6, %v5000_v2, %v13397_v52  ;;  %v5354_v26 = vpop.permute.xlu0 %5353  ;;  %v5005_v62 = vsel %vm4502_vm6, %v5003_v27, %v13398_v23  ;;  %v13401_v15 = vrot.slane %v13400_v46, 5 }
 0xc92   : > { %v11901_v6 = vsel %vm275_vm7, %v5352_v34, %v5354_v26  ;;  %v11911_v2 = vsel %vm275_vm7, %v5354_v26, %v11898_v0  ;;  %v6155_v23 = vsel %vm5395_vm8, %v6141_v58, %v6154_v7  ;;  %v6146_v27 = vrot.slane %v6110_v4, 6  ;;  %v13403_v26 = vld [vmem:[#allocation53_spill] sm:$0xff] }
 0xc93   : > { %v5018_v19 = vsel %vm4502_vm6, %v13401_v15, %v13399_v20  ;;  %6172 = vrot.lane.b32.xlu0 %v6153_v51, %s6914_s11  ;;  %v6147_v34 = vrot.slane %v11872_v38, 6  ;;  %v6160_v52 = vrot.slane %v6121_v25, 6  ;;  %v5031_v11 = vadd.f32 %v5002_v39, %v11646_v28  ;;  %6174 = vrot.lane.b32.xlu1 %v6155_v23, %s6914_s11  ;;  %v13404_v15 = vld [vmem:[#allocation57_spill] sm:$0xff] }
 0xc94   : > { %v5014_v20 = vsel %vm4502_vm6, %v13402_v9, %v5013_v17  ;;  %v5365_v46 = vmul.f32 %v5350_v33, %v13403_v26  ;;  %v11924_v51 = vmul.f32 %v13404_v15, %v5350_v33  ;;  %v5038_v58 = vadd.f32 %v5018_v19, %v11688_v53  ;;  %v13408_v9 = vld [vmem:[#allocation9_spill] sm:$0xff] }
 0xc95   : > { %v13405_v7 = vrot.slane %v11790_v63, 5  ;;  %v5147_v28 = vpop.permute.xlu0 %5146  ;;  %v5030_v36 = vadd.f32 %v4999_v29, %v11636_v14  ;;  %v5032_v38 = vadd.f32 %v5005_v62, %v11648_v44  ;;  %v5149_v17 = vpop.permute.xlu1 %5148  ;;  %v6145_v25 = vsel %vm5395_vm8, %v6143_v32, %v6144_v56  ;;  %v11949_v14 = vld [vmem:[%s12383_s2] sm:$0xf]  ;;  %v13406_v63 = vld [vmem:[#allocation55_spill] sm:$0xff] }
 0xc96   : > { %v11936_v40 = vadd.f32 %v5012_v1, %v11685_v48  ;;  %v11938_v39 = vadd.f32 %v5149_v17, %v5038_v58  ;;  %v11942_v53 = vsel %vm381_vm1, %v11837_v59, %v5147_v28  ;;  %v6148_v19 = vsel %vm5395_vm8, %v6146_v27, %v6147_v34  ;;  %v13407_v27 = vld [vmem:[#allocation10_spill] sm:$0xff] }
 0xc97   : > { %v5016_v4 = vsel %vm4502_vm6, %v13405_v7, %v5015_v60  ;;  %6166 = vrot.lane.b32.xlu0 %v6145_v25, %s6914_s11  ;;  %v11952_v44 = vadd.f32 %v5014_v20, %v11690_v18  ;;  %v11958_v48 = vsel %vm381_vm1, %v5147_v28, %v5149_v17  ;;  %6168 = vrot.lane.b32.xlu1 %v6148_v19, %s6914_s11  ;;  %v6158_v5 = vrot.slane %v11881_v55, 6  ;;  %v11972_v55 = vld [vmem:[%s7061_s20 + $0x8] sm:$0xc0]  ;;  %v13410_v25 = vld [vmem:[#allocation68_spill] sm:$0xff] }
 0xc98   : > { %v11955_v8 = vadd.f32 %v5016_v4, %v11697_v35  ;;  %v5375_v59 = vmul.f32 %v5350_v33, %v13406_v63  ;;  %v5396_v60 = vrot.slane %v5365_v46, 6  ;;  %v5397_v32 = vrot.slane %v11924_v51, 6 }
 0xc99   : > { %v5270_v29 = vpop.permute.xlu0 %5269  ;;  %v6157_v62 = vsel %vm5395_vm8, %v6144_v56, %v6156_v13  ;;  %v5272_v18 = vpop.permute.xlu1 %5271  ;;  %v6151_v23 = vsel %vm5395_vm8, %v6149_v22, %v6150_v30  ;;  %v6161_v35 = vsel %vm5395_vm8, %v6150_v30, %v6160_v52  ;;  %v6219_v1 = vrot.slane %v11949_v14, %v13407_v27  ;;  %v13409_v13 = vld [vmem:[#allocation11_spill] sm:$0xff] }
 0xc9a   : > { %v6215_v20 = vrot.slane %v11949_v14, %v13408_v9  ;;  %v5366_v33 = vmul.f32 %v11972_v55, %v11875_v37  ;;  %v5289_v26 = vsel %vm332_vm0, %v5270_v29, %v5272_v18  ;;  %v6227_v56 = vrot.slane %v11949_v14, %v13363_v45 }
 0xc9b   : > { %6170 = vrot.lane.b32.xlu0 %v6151_v23, %s6914_s11  ;;  %v6223_v30 = vrot.slane %v11949_v14, %v13409_v13  ;;  %v5169_v22 = vadd.f32 %v11778_v47, %v5030_v36  ;;  %v11985_v52 = vmul.f32 %v11516_v24, %v11875_v37  ;;  %v5307_v46 = vadd.f32 %v5289_v26, %v11759_v43 }
 0xc9c   : > { %6176 = vrot.lane.b32.xlu1 %v6157_v62, %s6914_s11  ;;  %v6159_v15 = vsel %vm5395_vm8, %v6147_v34, %v6158_v5  ;;  %v5411_v51 = vrot.slane %v5375_v59, 6  ;;  %v5367_v58 = vmul.f32 %v11901_v6, %v11206_v49  ;;  %v11994_v7 = vmul.f32 %v11525_v10, %v11901_v6 }
 0xc9d   : > { %v5280_v47 = vpop.permute.xlu0 %5279  ;;  %v5398_v4 = vsel %vm5395_vm8, %v5396_v60, %v5397_v32  ;;  %v5170_v28 = vadd.f32 %v11784_v50, %v5031_v11  ;;  %v5173_v43 = vadd.f32 %v11840_v16, %v5034_v41  ;;  %v5369_v34 = vmul.f32 %v11898_v0, %v11263_v3  ;;  %v5282_v36 = vpop.permute.xlu1 %5281  ;;  %v12012_v16 = vld [vmem:[%s7061_s20 + $0x18] sm:$0xc0]  ;;  %v12022_v41 = vld [vmem:[%s7061_s20 + $0x68] sm:$0x3f] }
 0xc9e   : > { %v12001_v17 = vadd.f32 %v5398_v4, %v5307_v46  ;;  %v5171_v49 = vadd.f32 %v13410_v25, %v5032_v38  ;;  %v5399_v19 = vrot.slane %v5366_v33, 6  ;;  %v12006_v5 = vmul.f32 %v11553_v57, %v11898_v0 }
 0xc9f   : > { %v5293_v63 = vsel %vm332_vm0, %v5280_v47, %v5282_v36  ;;  %6178 = vrot.lane.b32.xlu0 %v6159_v15, %s6914_s11  ;;  %v5400_v50 = vrot.slane %v11985_v52, 6  ;;  %v5368_v3 = vmul.f32 %v12012_v16, %v11911_v2  ;;  %v12018_v11 = vmul.f32 %v11545_v54, %v11911_v2 }
 0xca0   : > { %v5312_v38 = vadd.f32 %v5293_v63, %v5173_v43  ;;  %6180 = vrot.lane.b32.xlu1 %v6161_v35, %s6914_s11  ;;  %v5376_v59 = vmul.f32 %v12022_v41, %v11875_v37  ;;  %v5402_v60 = vrot.slane %v5367_v58, 6  ;;  %v5403_v29 = vrot.slane %v11994_v7, 6  ;;  %s12284_s11 = sand.u32 1, %s6903_s16  }
 0xca1   : > { %v5274_v62 = vpop.permute.xlu0 %5273  ;;  %v5412_v23 = vsel %vm5395_vm8, %v5397_v32, %v5411_v51  ;;  %v5379_v27 = vmul.f32 %v11898_v0, %v11311_v42  ;;  %v5408_v9 = vrot.slane %v5369_v34, 6  ;;  %v5276_v33 = vpop.permute.xlu1 %5275  ;;  %v5409_v35 = vrot.slane %v12006_v5, 6  ;;  %s6633_s30 = sshll.u32 %s12284_s11, 6  ;;  %s6508_s7 = scalar_lea.sflag [#allocation5], %s12284_s11 }
 0xca2   : > { %v5290_v26 = vsel %vm332_vm0, %v5272_v18, %v5274_v62  ;;  %v5436_v13 = vadd.f32 %v5412_v23, %v5312_v38  ;;  %v5377_v52 = vmul.f32 %v11901_v6, %v11275_v31  ;;  %v5291_v37 = vsel %vm332_vm0, %v5274_v62, %v5276_v33 }
 0xca3   : > { %v5308_v46 = vadd.f32 %v5290_v26, %v5169_v22  ;;  %6228 = vrot.lane.b32.xlu0 %v6215_v20, %s6913_s9  ;;  %v5405_v15 = vrot.slane %v5368_v3, 6  ;;  %v5406_v32 = vrot.slane %v12018_v11, 6  ;;  %v5309_v51 = vadd.f32 %v5291_v37, %v5170_v28 }
 0xca4   : > { %6230 = vrot.lane.b32.xlu1 %v6219_v1, %s6913_s9  ;;  %v5401_v42 = vsel %vm5395_vm8, %v5399_v19, %v5400_v50  ;;  %v5413_v0 = vrot.slane %v5376_v59, 6  ;;  %v5378_v18 = vmul.f32 %v11911_v2, %v11295_v21  ;;  %v5404_v31 = vsel %vm5395_vm8, %v5402_v60, %v5403_v29 }
 0xca5   : > { %v5278_v58 = vpop.permute.xlu0 %5277  ;;  %v5432_v6 = vadd.f32 %v5401_v42, %v5308_v46  ;;  %v5174_v22 = vadd.f32 %v11845_v61, %v11936_v40  ;;  %v5284_v20 = vpop.permute.xlu1 %5283  ;;  %v5433_v4 = vadd.f32 %v5404_v31, %v5309_v51  ;;  %v5419_v1 = vrot.slane %v5379_v27, 6 }
 0xca6   : > { %v5292_v7 = vsel %vm332_vm0, %v5276_v33, %v5278_v58  ;;  %v5311_v47 = vadd.f32 %v5278_v58, %v11815_v12  ;;  %v5294_v28 = vsel %vm332_vm0, %v5282_v36, %v5284_v20  ;;  %v5410_v21 = vsel %vm5395_vm8, %v5408_v9, %v5409_v35 }
 0xca7   : > { %v5310_v43 = vadd.f32 %v5292_v7, %v5171_v49  ;;  %6232 = vrot.lane.b32.xlu0 %v6223_v30, %s6913_s9  ;;  %v5415_v2 = vrot.slane %v5377_v52, 6  ;;  %v5313_v34 = vadd.f32 %v5294_v28, %v5174_v22  ;;  %v5407_v61 = vsel %vm5395_vm8, %v5405_v15, %v5406_v32 }
 0xca8   : > { %6234 = vrot.lane.b32.xlu1 %v6227_v56, %s6913_s9  ;;  %v5435_v40 = vadd.f32 %v5410_v21, %v5311_v47  ;;  %v5417_v12 = vrot.slane %v5378_v18, 6  ;;  %v5175_v25 = vadd.f32 %v11942_v53, %v11952_v44  ;;  %v5414_v49 = vsel %vm5395_vm8, %v5400_v50, %v5413_v0 }
 0xca9   : > { %v5286_v36 = vpop.permute.xlu0 %5285  ;;  %v5434_v30 = vadd.f32 %v5407_v61, %v5310_v43  ;;  %v5176_v19 = vadd.f32 %v11958_v48, %v11955_v8  ;;  %v5288_v5 = vpop.permute.xlu1 %5287  ;;  %v5437_v3 = vadd.f32 %v5414_v49, %v5313_v34  ;;  %v5420_v38 = vsel %vm5395_vm8, %v5409_v35, %v5419_v1 }
 0xcaa   : > { %v5295_v63 = vsel %vm332_vm0, %v5284_v20, %v5286_v36  ;;  %v5316_v45 = vadd.f32 %v5288_v5, %v11938_v39  ;;  %v5296_v14 = vsel %vm332_vm0, %v5286_v36, %v5288_v5  ;;  %v5416_v53 = vsel %vm5395_vm8, %v5403_v29, %v5415_v2 }
 0xcab   : > { %v5314_v56 = vadd.f32 %v5295_v63, %v5175_v25  ;;  %v5315_v11 = vadd.f32 %v5296_v14, %v5176_v19  ;;  %v5418_v59 = vsel %vm5395_vm8, %v5406_v32, %v5417_v12 }
 0xcac   : > { %v5440_v50 = vadd.f32 %v5420_v38, %v5316_v45 }
 0xcad   : > { %v5533_v44 = vpop.permute.xlu0 %5532  ;;  %v5438_v60 = vadd.f32 %v5416_v53, %v5314_v56  ;;  %v5535_v8 = vpop.permute.xlu1 %5534  ;;  %v5439_v48 = vadd.f32 %v5418_v59, %v5315_v11 }
 0xcae   : > { %v5552_v62 = vsel %vm381_vm1, %v5533_v44, %v5535_v8  ;;  %v6812_v44 = vld [vmem:[%s7061_s20 + $0x10] sm:$0xc0] }
 0xcaf   : > { %v5570_v23 = vadd.f32 %v5552_v62, %v12001_v17  ;;  %v13412_v62 = vld [vmem:[#allocation66_spill] sm:$0xff] }
 0xcb1   : > { %v5543_v39 = vpop.permute.xlu0 %5542  ;;  %v5545_v27 = vpop.permute.xlu1 %5544 }
 0xcb2   : > { %v5556_v9 = vsel %vm381_vm1, %v5543_v39, %v5545_v27 }
 0xcb3   : > { %v5575_v33 = vadd.f32 %v5556_v9, %v5436_v13 }
 0xcb5   : > { %v5537_v26 = vpop.permute.xlu0 %5536  ;;  %v5539_v35 = vpop.permute.xlu1 %5538 }
 0xcb6   : > { %v5553_v29 = vsel %vm381_vm1, %v5535_v8, %v5537_v26  ;;  %v5554_v52 = vsel %vm381_vm1, %v5537_v26, %v5539_v35 }
 0xcb7   : > { %v5571_v37 = vadd.f32 %v5553_v29, %v5432_v6  ;;  %v12070_v46 = vadd.f32 %v5554_v52, %v5433_v4 }
 0xcb9   : > { %v5541_v15 = vpop.permute.xlu0 %5540  ;;  %v5547_v32 = vpop.permute.xlu1 %5546 }
 0xcba   : > { %v5555_v51 = vsel %vm381_vm1, %v5539_v35, %v5541_v15  ;;  %v12073_v42 = vadd.f32 %v5541_v15, %v5435_v40  ;;  %v5557_v17 = vsel %vm381_vm1, %v5545_v27, %v5547_v32 }
 0xcbb   : > { %v12076_v0 = vadd.f32 %v5555_v51, %v5434_v30  ;;  %v5576_v13 = vadd.f32 %v5557_v17, %v5437_v3 }
 0xcbd   : > { %v5549_v18 = vpop.permute.xlu0 %5548  ;;  %v5551_v58 = vpop.permute.xlu1 %5550 }
 0xcbe   : > { %v5558_v31 = vsel %vm381_vm1, %v5547_v32, %v5549_v18  ;;  %v12079_v22 = vadd.f32 %v5551_v58, %v5440_v50  ;;  %v5559_v6 = vsel %vm381_vm1, %v5549_v18, %v5551_v58 }
 0xcbf   : > { %v12082_v20 = vadd.f32 %v5558_v31, %v5438_v60  ;;  %v12084_v7 = vadd.f32 %v5559_v6, %v5439_v48  ;;  %v13411_v48 = vld [vmem:[#allocation63_spill] sm:$0xff] }
 0xcc1   : > { %v5672_v47 = vpop.permute.xlu0 %5671  ;;  %v5674_v4 = vpop.permute.xlu1 %5673 }
 0xcc2   : > { %v5691_v1 = vsel %vm332_vm0, %v5672_v47, %v5674_v4 }
 0xcc3   : > { %v5709_v28 = vadd.f32 %v5691_v1, %v5570_v23 }
 0xcc5   : > { %v5682_v43 = vpop.permute.xlu0 %5681  ;;  %v5684_v21 = vpop.permute.xlu1 %5683 }
 0xcc6   : > { %v5695_v2 = vsel %vm332_vm0, %v5682_v43, %v5684_v21 }
 0xcc7   : > { %v12088_v34 = vadd.f32 %v5695_v2, %v5575_v33  ;;  %v6813_v33 = vld [vmem:[%s7061_s20 + $0x70] sm:$0x3f] }
 0xcc9   : > { %v5842_v61 = vpop.permute.xlu0 %5841  ;;  %v5844_v40 = vpop.permute.xlu1 %5843 }
 0xcca   : > { %v5849_v12 = vsel %vm275_vm7, %v5842_v61, %v5844_v40  ;;  %v5857_v56 = vmul.f32 %v11972_v55, %v5842_v61  ;;  %v12100_v11 = vmul.f32 %v11516_v24, %v5842_v61  ;;  %v12111_v60 = vmul.f32 %v12022_v41, %v5842_v61 }
 0xccb   : > { %v5858_v50 = vmul.f32 %v6812_v44, %v5849_v12  ;;  %v12108_v59 = vmul.f32 %v11525_v10, %v5849_v12  ;;  %v12122_v26 = vmul.f32 %v6813_v33, %v5849_v12  ;;  %v6814_v10 = vld [vmem:[%s7061_s20 + $0x20] sm:$0xc0] }
 0xccc   : > { %v5887_v39 = vrot.slane %v5857_v56, 6  ;;  %v5888_v27 = vrot.slane %v12100_v11, 6 }
 0xccd   : > { %v5846_v25 = vpop.permute.xlu0 %5845  ;;  %v5848_v36 = vpop.permute.xlu1 %5847  ;;  %v5890_v29 = vrot.slane %v5858_v50, 6  ;;  %v5891_v52 = vrot.slane %v12108_v59, 6  ;;  %v6816_v59 = vld [vmem:[%s7061_s20 + $0x80] sm:$0x3f] }
 0xcce   : > { %v5850_v49 = vsel %vm275_vm7, %v5844_v40, %v5846_v25  ;;  %v12093_v30 = vsel %vm275_vm7, %v5846_v25, %v5848_v36  ;;  %v5861_v55 = vmul.f32 %v5848_v36, %v13411_v48  ;;  %v12115_v24 = vmul.f32 %v13412_v62, %v5848_v36 }
 0xccf   : > { %v5859_v9 = vmul.f32 %v12012_v16, %v5850_v49  ;;  %v5860_v41 = vmul.f32 %v6814_v10, %v12093_v30  ;;  %v12127_v35 = vmul.f32 %v11545_v54, %v5850_v49  ;;  %v12133_v15 = vmul.f32 %v11553_v57, %v12093_v30 }
 0xcd0   : > { %v5899_v16 = vrot.slane %v5861_v55, 6  ;;  %v5900_v51 = vrot.slane %v12115_v24, 6  ;;  %v5889_v31 = vsel %vm5395_vm8, %v5887_v39, %v5888_v27  ;;  %v5892_v61 = vsel %vm5395_vm8, %v5890_v29, %v5891_v52 }
 0xcd1   : > { %v5676_v19 = vpop.permute.xlu0 %5675  ;;  %v5678_v5 = vpop.permute.xlu1 %5677  ;;  %v5893_v58 = vrot.slane %v5859_v9, 6  ;;  %v5894_v47 = vrot.slane %v12127_v35, 6  ;;  %v5897_v43 = vrot.slane %v12133_v15, 6  ;;  %v5904_v40 = vrot.slane %v12122_v26, 6 }
 0xcd2   : > { %v5692_v63 = vsel %vm332_vm0, %v5674_v4, %v5676_v19  ;;  %v5693_v17 = vsel %vm332_vm0, %v5676_v19, %v5678_v5  ;;  %v5896_v4 = vrot.slane %v5860_v41, 6  ;;  %v5901_v50 = vsel %vm5395_vm8, %v5899_v16, %v5900_v51 }
 0xcd3   : > { %v5710_v3 = vadd.f32 %v5692_v63, %v5571_v37  ;;  %v5902_v37 = vrot.slane %v12111_v60, 6  ;;  %v13413_v63 = vld [vmem:[#allocation65_spill] sm:$0xff]  ;;  %v5895_v44 = vsel %vm5395_vm8, %v5893_v58, %v5894_v47 }
 0xcd4   : > { %v5898_v55 = vsel %vm5395_vm8, %v5896_v4, %v5897_v43 }
 0xcd5   : > { %v5680_v45 = vpop.permute.xlu0 %5679  ;;  %v12096_v14 = vpop.permute.xlu1 %5685  ;;  %v5903_v33 = vsel %vm5395_vm8, %v5888_v27, %v5902_v37 }
 0xcd6   : > { %v5696_v38 = vsel %vm332_vm0, %v5684_v21, %v12096_v14  ;;  %v5694_v54 = vsel %vm332_vm0, %v5678_v5, %v5680_v45  ;;  %v5711_v21 = vadd.f32 %v5693_v17, %v12070_v46 }
 0xcd7   : > { %v12104_v53 = vadd.f32 %v5696_v38, %v5576_v13  ;;  %v5712_v12 = vadd.f32 %v5694_v54, %v12076_v0  ;;  %v5870_v0 = vmul.f32 %v6816_v59, %v12093_v30 }
 0xcd9   : > { %v5688_v8 = vpop.permute.xlu0 %5687  ;;  %v12117_v23 = vpop.permute.xlu1 %5689  ;;  %v5908_v29 = vrot.slane %v5870_v0, 6 }
 0xcda   : > { %v5697_v62 = vsel %vm332_vm0, %v12096_v14, %v5688_v8  ;;  %v5698_v9 = vsel %vm332_vm0, %v5688_v8, %v12117_v23  ;;  %v5718_v14 = vadd.f32 %v12117_v23, %v12079_v22 }
 0xcdb   : > { %v5716_v15 = vadd.f32 %v5697_v62, %v12082_v20  ;;  %v5717_v8 = vadd.f32 %v5698_v9, %v12084_v7  ;;  %v5909_v54 = vsel %vm5395_vm8, %v5897_v43, %v5908_v29 }
 0xcdd   : > { %v5780_v32 = vpop.permute.xlu0 %5779  ;;  %v5782_v13 = vpop.permute.xlu1 %5781 }
 0xcde   : > { %v5811_v18 = vadd.f32 %v5780_v32, %v5709_v28  ;;  %v5795_v6 = vsel %vm275_vm7, %v5780_v32, %v5782_v13  ;;  %v5713_v28 = vadd.f32 %v5680_v45, %v12073_v42  ;;  %v6815_v42 = vld [vmem:[%s7061_s20 + $0x78] sm:$0x3f]  ;;  %v5905_v32 = vsel %vm5395_vm8, %v5891_v52, %v5904_v40  ;;  %s6634_s20 = sshll.u32 %s12284_s11, 3 }
 0xcdf   : > { %v5812_v57 = vadd.f32 %v5795_v6, %v5710_v3  ;;  %v5871_v3 = vmul.f32 %v5848_v36, %v13413_v63  ;;  %v5869_v45 = vmul.f32 %v6815_v42, %v5850_v49  ;;  %s201_s27 = scalar_lea.vmem [#allocation4], %s6634_s20 }
 0xce0   : > { %v12141_v1 = vadd.f32 %v5889_v31, %v5811_v18  ;;  %s6538_s29 = sshll.u32 %s201_s27, 4  ;;  %s12296_s29 = int_to_ptr.vmem [resolvable:$true] %s6538_s29 }
 0xce1   : > { %v5784_v2 = vpop.permute.xlu0 %5783  ;;  %v5786_v25 = vpop.permute.xlu1 %5785  ;;  %v12150_v5 = vadd.f32 %v5892_v61, %v5812_v57  ;;  %v5910_v26 = vrot.slane %v5871_v3, 6  ;;  %v5906_v10 = vrot.slane %v5869_v45, 6  ;;  %s6817_s8 = scalar_lea.vmem %s12296_s29, 128  ;;  %p6824_p0 = scmp.lt.s32.totalorder %s12296_s29, %s6822_s12 }
 0xce2   : > { %v5796_v19 = vsel %vm275_vm7, %v5782_v13, %v5784_v2  ;;  %v5815_v56 = vadd.f32 %v5786_v25, %v5713_v28  ;;  %v5797_v46 = vsel %vm275_vm7, %v5784_v2, %v5786_v25  ;;  %p6818_p11 = scmp.ne.s32.totalorder %s12296_s29, %s6817_s8  ;;  %p6825_p1 = scmp.lt.s32.totalorder %s6823_s13, %s6817_s8 }
 0xce3   : > { %v5813_v11 = vadd.f32 %v5796_v19, %v5711_v21  ;;  %v5814_v38 = vadd.f32 %v5797_v46, %v5712_v12  ;;  %v5911_v58 = vsel %vm5395_vm8, %v5900_v51, %v5910_v26  ;;  %v5907_v22 = vsel %vm5395_vm8, %v5894_v47, %v5906_v10 }
 0xce4   : > { %v5926_v36 = vadd.f32 %v5901_v50, %v5815_v56  ;;  %p6819_p12 = pnand %p6818_p11, %p6983_p5  ;;  %p6826_p2 = por %p6825_p1, %p6824_p0 }
 0xce5   : > { %v5788_v60 = vpop.permute.xlu0 %5787  ;;  %v12159_v48 = vadd.f32 %v5895_v44, %v5813_v11  ;;  %v5790_v24 = vpop.permute.xlu1 %5789  ;;  %v5925_v39 = vadd.f32 %v5898_v55, %v5814_v38 }
 0xce6   : > { %v5816_v49 = vadd.f32 %v5788_v60, %v12088_v34  ;;  %v5798_v30 = vsel %vm275_vm7, %v5788_v60, %v5790_v24  ;;  %p6820_p13 = pneg %p6819_p12 }
 0xce7   : > { %v5817_v41 = vadd.f32 %v5798_v30, %v12104_v53 }
 0xce8   : > { %v5927_v35 = vadd.f32 %v5903_v33, %v5816_v49  ;;  %p6827_p3 = pnand %p6826_p2, %p6820_p13 }
 0xce9   : > { %v5792_v34 = vpop.permute.xlu0 %5791  ;;  %v5794_v16 = vpop.permute.xlu1 %5793  ;;  %v5928_v37 = vadd.f32 %v5905_v32, %v5817_v41 }
 0xcea   : > { %v5799_v27 = vsel %vm275_vm7, %v5790_v24, %v5792_v34  ;;  %v5820_v17 = vadd.f32 %v5794_v16, %v5718_v14  ;;  %v5800_v13 = vsel %vm275_vm7, %v5792_v34, %v5794_v16 }
 0xceb   : > { %v5818_v53 = vadd.f32 %v5799_v27, %v5716_v15  ;;  %v5819_v18 = vadd.f32 %v5800_v13, %v5717_v8 }
 0xcec   : > { %v5931_v20 = vadd.f32 %v5911_v58, %v5820_v17 }
 0xced   : > { %v6024_v23 = vpop.permute.xlu0 %6023  ;;  %v5929_v52 = vadd.f32 %v5907_v22, %v5818_v53  ;;  %v6026_v31 = vpop.permute.xlu1 %6025  ;;  %v5930_v7 = vadd.f32 %v5909_v54, %v5819_v18 }
 0xcee   : > { %v6043_v3 = vsel %vm381_vm1, %v6024_v23, %v6026_v31 }
 0xcef   : > { %v6061_v45 = vadd.f32 %v6043_v3, %v12141_v1 }
 0xcf1   : > { %v6034_v6 = vpop.permute.xlu0 %6033  ;;  %v6036_v4 = vpop.permute.xlu1 %6035 }
 0xcf2   : > { %v6047_v43 = vsel %vm381_vm1, %v6034_v6, %v6036_v4 }
 0xcf3   : > { %v6066_v44 = vadd.f32 %v6047_v43, %v5927_v35 }
 0xcf5   : > { %v6028_v57 = vpop.permute.xlu0 %6027  ;;  %v6030_v21 = vpop.permute.xlu1 %6029 }
 0xcf6   : > { %v6044_v56 = vsel %vm381_vm1, %v6026_v31, %v6028_v57  ;;  %v6045_v11 = vsel %vm381_vm1, %v6028_v57, %v6030_v21 }
 0xcf7   : > { %v6062_v50 = vadd.f32 %v6044_v56, %v12150_v5  ;;  %v6063_v60 = vadd.f32 %v6045_v11, %v12159_v48 }
 0xcf9   : > { %v6032_v28 = vpop.permute.xlu0 %6031  ;;  %v6038_v2 = vpop.permute.xlu1 %6037 }
 0xcfa   : > { %v6046_v38 = vsel %vm381_vm1, %v6030_v21, %v6032_v28  ;;  %v6048_v59 = vsel %vm381_vm1, %v6036_v4, %v6038_v2  ;;  %v6065_v55 = vadd.f32 %v6032_v28, %v5926_v36 }
 0xcfb   : > { %v6064_v9 = vadd.f32 %v6046_v38, %v5925_v39  ;;  %v6067_v26 = vadd.f32 %v6048_v59, %v5928_v37 }
 0xcfd   : > { %v6040_v61 = vpop.permute.xlu0 %6039  ;;  %v6042_v40 = vpop.permute.xlu1 %6041 }
 0xcfe   : > { %v6049_v0 = vsel %vm381_vm1, %v6038_v2, %v6040_v61  ;;  %v6050_v1 = vsel %vm381_vm1, %v6040_v61, %v6042_v40  ;;  %v6070_v10 = vadd.f32 %v6042_v40, %v5931_v20 }
 0xcff   : > { %v6068_v41 = vadd.f32 %v6049_v0, %v5929_v52  ;;  %v6069_v15 = vadd.f32 %v6050_v1, %v5930_v7 }
 0xd01   : > { %v6163_v12 = vpop.permute.xlu0 %6162  ;;  %v6165_v25 = vpop.permute.xlu1 %6164 }
 0xd02   : > { %v6182_v62 = vsel %vm332_vm0, %v6163_v12, %v6165_v25 }
 0xd03   : > { %v6200_v48 = vadd.f32 %v6182_v62, %v6061_v45 }
 0xd05   : > { %v6173_v51 = vpop.permute.xlu0 %6172  ;;  %v6175_v19 = vpop.permute.xlu1 %6174 }
 0xd06   : > { %v6186_v24 = vsel %vm332_vm0, %v6173_v51, %v6175_v19 }
 0xd07   : > { %v6205_v36 = vadd.f32 %v6186_v24, %v6066_v44 }
 0xd09   : > { %v6167_v47 = vpop.permute.xlu0 %6166  ;;  %v6169_v63 = vpop.permute.xlu1 %6168 }
 0xd0a   : > { %v6183_v33 = vsel %vm332_vm0, %v6165_v25, %v6167_v47  ;;  %v6184_v30 = vsel %vm332_vm0, %v6167_v47, %v6169_v63 }
 0xd0b   : > { %v6201_v39 = vadd.f32 %v6183_v33, %v6062_v50  ;;  %v6202_v34 = vadd.f32 %v6184_v30, %v6063_v60 }
 0xd0d   : > { %v6171_v46 = vpop.permute.xlu0 %6170 }
 0xd0e   : > { %v6177_v42 = vpop.permute.xlu1 %6176  ;;  %v6185_v29 = vsel %vm332_vm0, %v6169_v63, %v6171_v46  ;;  %v6204_v32 = vadd.f32 %v6171_v46, %v6065_v55 }
 0xd0f   : > { %v6187_v35 = vsel %vm332_vm0, %v6175_v19, %v6177_v42  ;;  %v6203_v53 = vadd.f32 %v6185_v29, %v6064_v9 }
 0xd10   : > { %v6206_v16 = vadd.f32 %v6187_v35, %v6067_v26 }
 0xd11   : > { %v6179_v49 = vpop.permute.xlu0 %6178 }
 0xd12   : > { %v6181_v5 = vpop.permute.xlu1 %6180  ;;  %v6188_v14 = vsel %vm332_vm0, %v6177_v42, %v6179_v49 }
 0xd13   : > { %v6189_v27 = vsel %vm332_vm0, %v6179_v49, %v6181_v5  ;;  %v6209_v18 = vadd.f32 %v6181_v5, %v6070_v10  ;;  %v6207_v58 = vadd.f32 %v6188_v14, %v6068_v41 }
 0xd14   : > { %v6208_v31 = vadd.f32 %v6189_v27, %v6069_v15 }
 0xd15   : > { %v6229_v8 = vpop.permute.xlu0 %6228 }
 0xd16   : > { %v6231_v17 = vpop.permute.xlu1 %6230  ;;  %v12199_v37 = vadd.f32 %v6229_v8, %v6200_v48  ;;  %v12201_v13 = vadd.f32 %v6229_v8, %v6205_v36 }
 0xd17   : > { %v6236_v22 = vsel %vm275_vm7, %v6229_v8, %v6231_v17 }
 0xd18   : > { %v12204_v23 = vadd.f32 %v6236_v22, %v6201_v39  ;;  %v12206_v20 = vadd.f32 %v6236_v22, %v6206_v16  ;;  %v6309_v54 = vsel %vm6308_vm9, %v12199_v37, 0.0  ;;  %v6310_v52 = vsel %vm6308_vm9, %v12201_v13, 0.0 }
 0xd19   : > { %v6311_v7 = vadd.f32 %v6310_v52, %v6309_v54  ;;  %v6402_v6 = vmul.f32 %v12199_v37, %v12199_v37  ;;  %v6407_v4 = vmul.f32 %v12201_v13, %v12201_v13  ;;  %v6233_v57 = vpop.permute.xlu0 %6232 }
 0xd1a   : > { %v6318_v21 = vadd.f32 %v12206_v20, %v12204_v23  ;;  %v6403_v28 = vmul.f32 %v12204_v23, %v12204_v23  ;;  %v6408_v2 = vmul.f32 %v12206_v20, %v12206_v20  ;;  %v6235_v61 = vpop.permute.xlu1 %6234  ;;  %v6237_v40 = vsel %vm275_vm7, %v6231_v17, %v6233_v57 }
 0xd1b   : > { %v6312_v12 = vrot.slane %v6311_v7, 4  ;;  %v6412_v25 = vsel %vm6308_vm9, %v6402_v6, 0.0  ;;  %v6413_v51 = vsel %vm6308_vm9, %v6407_v4, 0.0  ;;  %v12225_v19 = vadd.f32 %v6235_v61, %v6204_v32 }
 0xd1c   : > { %v6319_v47 = vrot.slane %v6318_v21, 4  ;;  %v6414_v63 = vadd.f32 %v6413_v51, %v6412_v25  ;;  %v6421_v3 = vadd.f32 %v6408_v2, %v6403_v28  ;;  %v12227_v43 = vadd.f32 %v6235_v61, %v6209_v18 }
 0xd1d   : > { %v6313_v56 = vadd.f32 %v6312_v12, %v6311_v7  ;;  %v6339_v46 = vsel %vm275_vm7, %v12225_v19, 0.0  ;;  %v6406_v11 = vmul.f32 %v12225_v19, %v12225_v19  ;;  %v6238_v42 = vsel %vm275_vm7, %v6233_v57, %v6235_v61 }
 0xd1e   : > { %v6320_v45 = vadd.f32 %v6319_v47, %v6318_v21  ;;  %v6415_v38 = vrot.slane %v6414_v63, 4  ;;  %v6422_v44 = vrot.slane %v6421_v3, 4  ;;  %v6340_v50 = vsel %vm275_vm7, %v12227_v43, 0.0 }
 0xd1f   : > { %v6314_v59 = vrot.slane %v6313_v56, 2  ;;  %v6341_v0 = vadd.f32 %v6340_v50, %v6339_v46  ;;  %v6411_v60 = vmul.f32 %v12227_v43, %v12227_v43  ;;  %v6442_v55 = vsel %vm275_vm7, %v6406_v11, 0.0 }
 0xd20   : > { %v6321_v62 = vrot.slane %v6320_v45, 2  ;;  %v6416_v24 = vadd.f32 %v6415_v38, %v6414_v63  ;;  %v6423_v49 = vadd.f32 %v6422_v44, %v6421_v3  ;;  %v12239_v9 = vadd.f32 %v6237_v40, %v6202_v34 }
 0xd21   : > { %v6315_v1 = vadd.f32 %v6314_v59, %v6313_v56  ;;  %v6342_v33 = vrot.slane %v6341_v0, 4  ;;  %v6443_v30 = vsel %vm275_vm7, %v6411_v60, 0.0  ;;  %v12242_v5 = vadd.f32 %v6238_v42, %v6203_v53 }
 0xd22   : > { %v6322_v26 = vadd.f32 %v6321_v62, %v6320_v45  ;;  %v6417_v10 = vrot.slane %v6416_v24, 2  ;;  %v6424_v41 = vrot.slane %v6423_v49, 2  ;;  %v6444_v35 = vadd.f32 %v6443_v30, %v6442_v55 }
 0xd23   : > { %v6316_v48 = vrot.slane %v6315_v1, 1  ;;  %v6343_v36 = vadd.f32 %v6342_v33, %v6341_v0  ;;  %v12244_v29 = vadd.f32 %v6237_v40, %v6207_v58  ;;  %v12246_v14 = vadd.f32 %v6238_v42, %v6208_v31 }
 0xd24   : > { %v6323_v15 = vrot.slane %v6322_v26, 1  ;;  %v6418_v39 = vadd.f32 %v6417_v10, %v6416_v24  ;;  %v6425_v34 = vadd.f32 %v6424_v41, %v6423_v49  ;;  %v6445_v32 = vrot.slane %v6444_v35, 4  ;;  %v13414_v24 = vld [vmem:[#allocation8_spill] sm:$0xff] }
 0xd25   : > { %v6344_v8 = vrot.slane %v6343_v36, 2  ;;  %v6325_v16 = vadd.f32 %v12244_v29, %v12239_v9  ;;  %v6332_v27 = vadd.f32 %v12246_v14, %v12242_v5  ;;  %v6317_v17 = vadd.f32 %v6316_v48, %v6315_v1 }
 0xd26   : > { %v6324_v53 = vadd.f32 %v6323_v15, %v6322_v26  ;;  %v6419_v18 = vrot.slane %v6418_v39, 1  ;;  %v6426_v22 = vrot.slane %v6425_v34, 1  ;;  %v6404_v52 = vmul.f32 %v12239_v9, %v12239_v9 }
 0xd27   : > { %v6326_v54 = vrot.slane %v6325_v16, 4  ;;  %v6333_v58 = vrot.slane %v6332_v27, 4  ;;  %v6916_v31 = vmov 1966171168   ;;  %v6446_v57 = vadd.f32 %v6445_v32, %v6444_v35 }
 0xd28   : > { %v6356_v7 = vunpack.c.l.s4 %v6916_v31  ;;  %v6420_v6 = vadd.f32 %v6419_v18, %v6418_v39  ;;  %v6427_v4 = vadd.f32 %v6426_v22, %v6425_v34  ;;  %v6405_v21 = vmul.f32 %v12242_v5, %v12242_v5 }
 0xd29   : > { %v6345_v28 = vadd.f32 %v6344_v8, %v6343_v36  ;;  %v6327_v2 = vadd.f32 %v6326_v54, %v6325_v16  ;;  %v6334_v61 = vadd.f32 %v6333_v58, %v6332_v27  ;;  %v6409_v40 = vmul.f32 %v12244_v29, %v12244_v29 }
 0xd2a   : > { %v6410_v12 = vmul.f32 %v12246_v14, %v12246_v14  ;;  %v6353_v25 = vcombine.low %v6317_v17, %v6324_v53  ;;  %v6456_v51 = vcombine.low %v6420_v6, %v6427_v4  ;;  %v6447_v56 = vrot.slane %v6446_v57, 2 }
 0xd2b   : > { %v6328_v47 = vrot.slane %v6327_v2, 2  ;;  %v6335_v63 = vrot.slane %v6334_v61, 2  ;;  %v6428_v3 = vadd.f32 %v6409_v40, %v6404_v52  ;;  %v6357_v11 = vunpack.c.0.s8 %v6356_v7 }
 0xd2c   : > { %v6435_v46 = vadd.f32 %v6410_v12, %v6405_v21  ;;  %v6346_v42 = vrot.slane %v6345_v28, 1  ;;  %v6448_v55 = vadd.f32 %v6447_v56, %v6446_v57 }
 0xd2d   : > { %v6329_v45 = vadd.f32 %v6328_v47, %v6327_v2  ;;  %v6336_v38 = vadd.f32 %v6335_v63, %v6334_v61  ;;  %v6429_v44 = vrot.slane %v6428_v3, 4  ;;  %v6360_v49 = vsub.s32 %v6357_v11, %v13414_v24 }
 0xd2e   : > { %v6436_v50 = vrot.slane %v6435_v46, 4  ;;  %v6347_v26 = vadd.f32 %v6346_v42, %v6345_v28  ;;  %v6449_v36 = vrot.slane %v6448_v55, 1 }
 0xd2f   : > { %v6330_v59 = vrot.slane %v6329_v45, 1  ;;  %v6337_v0 = vrot.slane %v6336_v38, 1  ;;  %v6430_v60 = vadd.f32 %v6429_v44, %v6428_v3  ;;  %v6361_v39 = vrot.slane %v6353_v25, %v6360_v49 }
 0xd30   : > { %v6437_v62 = vadd.f32 %v6436_v50, %v6435_v46  ;;  %v6375_v32 = vrot.slane %v6347_v26, %v6360_v49  ;;  %v6450_v53 = vadd.f32 %v6449_v36, %v6448_v55  ;;  %v6464_v52 = vrot.slane %v6456_v51, %v6360_v49 }
 0xd31   : > { %v6331_v1 = vadd.f32 %v6330_v59, %v6329_v45  ;;  %v6338_v33 = vadd.f32 %v6337_v0, %v6336_v38  ;;  %v6431_v30 = vrot.slane %v6430_v60, 2 }
 0xd32   : > { %v6438_v10 = vrot.slane %v6437_v62, 2  ;;  %v6390_v22 = vrot.slane %v6375_v32, %v6360_v49  ;;  %v6478_v7 = vrot.slane %v6450_v53, %v6360_v49 }
 0xd33   : > { %v6354_v41 = vcombine.low %v6331_v1, %v6338_v33  ;;  %v6432_v35 = vadd.f32 %v6431_v30, %v6430_v60 }
 0xd34   : > { %v6439_v48 = vadd.f32 %v6438_v10, %v6437_v62  ;;  %v6493_v57 = vrot.slane %v6478_v7, %v6360_v49 }
 0xd35   : > { %v6433_v15 = vrot.slane %v6432_v35, 1  ;;  %v6368_v34 = vrot.slane %v6354_v41, %v6360_v49 }
 0xd36   : > { %v6440_v8 = vrot.slane %v6439_v48, 1 }
 0xd37   : > { %v6434_v16 = vadd.f32 %v6433_v15, %v6432_v35  ;;  %v6376_v27 = vcombine.low %v6361_v39, %v6368_v34 }
 0xd38   : > { %v6441_v17 = vadd.f32 %v6440_v8, %v6439_v48 }
 0xd39   : > { %v6383_v18 = vrot.slane %v6376_v27, %v6360_v49 }
 0xd3a   : > { %v6457_v54 = vcombine.low %v6434_v16, %v6441_v17 }
 0xd3b   : > { %v6391_v58 = vcombine.low %v6383_v18, %v6390_v22 }
 0xd3c   : > { %v6471_v31 = vrot.slane %v6457_v54, %v6360_v49 }
 0xd3d   : > { %6392 = vrot.lane.b32.xlu0 %v6391_v58, %s6915_s22 }
 0xd3e   : > { %v6479_v6 = vcombine.low %v6464_v52, %v6471_v31 }
 0xd40   : > { %v6486_v4 = vrot.slane %v6479_v6, %v6360_v49 }
 0xd41   : > { %6264 = vrot.lane.b32.xlu0 %v12199_v37, %s6915_s22 }
 0xd42   : > { %v6494_v21 = vcombine.low %v6486_v4, %v6493_v57 }
 0xd44   : > { %6495 = vrot.lane.b32.xlu1 %v6494_v21, %s6915_s22 }
 0xd45   : > { %6268 = vrot.lane.b32.xlu0 %v12239_v9, %s6915_s22 }
 0xd48   : > { %6266 = vrot.lane.b32.xlu1 %v12204_v23, %s6915_s22  ;;  %v13415_v23 = vlaneseq }
 0xd49   : > { %6272 = vrot.lane.b32.xlu0 %v12225_v19, %s6915_s22 }
 0xd4a   : > { %vm6399_vm10 = vcmp.lt.s32.totalorder %v13415_v23, 512 }
 0xd4c   : > { %6270 = vrot.lane.b32.xlu1 %v12242_v5, %s6915_s22 }
 0xd4d   : > { %6276 = vrot.lane.b32.xlu0 %v12206_v20, %s6915_s22 }
 0xd50   : > { %6274 = vrot.lane.b32.xlu1 %v12201_v13, %s6915_s22 }
 0xd51   : > { %6280 = vrot.lane.b32.xlu0 %v12246_v14, %s6915_s22 }
 0xd54   : > { %6278 = vrot.lane.b32.xlu1 %v12244_v29, %s6915_s22 }
 0xd58   : > { %6282 = vrot.lane.b32.xlu1 %v12227_v43, %s6915_s22 }
 0xdaf   : > { %v6393_v37 = vpop.permute.xlu0 %6392 }
 0xdb0   : > { %v6394_v20 = vrot.slane %v6393_v37, 1 }
 0xdb2   : > { %v6395_v13 = vsel %vm381_vm1, %v6393_v37, %v6394_v20 }
 0xdb3   : > { %6401 = vst.msk [vmem:[%s201_s27] ss:$2 sm:$0xf] %vm6399_vm10, %v6395_v13  ;;  %v6265_v19 = vpop.permute.xlu0 %6264 }
 0xdb6   : > { %v6496_v43 = vpop.permute.xlu1 %6495 }
 0xdb7   : > { %v6497_v9 = vrot.slane %v6496_v43, 1  ;;  %v6269_v5 = vpop.permute.xlu0 %6268 }
 0xdb9   : > { %v6498_v29 = vsel %vm381_vm1, %v6496_v43, %v6497_v9 }
 0xdba   : > { %6636 = vst.msk [vmem:[%s201_s27 + $0x1] ss:$2 sm:$0xf] %vm6399_vm10, %v6498_v29  ;;  %v6267_v14 = vpop.permute.xlu1 %6266 }
 0xdbb   : > { %v6284_v28 = vsel %vm381_vm1, %v6265_v19, %v6267_v14  ;;  %v6285_v2 = vsel %vm381_vm1, %v6267_v14, %v6269_v5  ;;  %v6273_v61 = vpop.permute.xlu0 %6272 }
 0xdbc   : > { %6830 = shalt.err (!%p6827_p3)
}
 0xdbd   : > { %s6831_s14 = scalar_lea.hbm %s12294_s6, 128  ;;  %s6835_s27 = scalar_lea.hbm %s12385_s4, 256 }
 0xdbe   : > { %p6832_p4 = scmp.ne.s32.totalorder %s12294_s6, %s6831_s14  ;;  %p6836_p9 = scmp.lt.u32.totalorder %s12294_s6, %s12385_s4 }
 0xdbf   : > { %p6837_p10 = scmp.lt.u32.totalorder %s6835_s27, %s6831_s14  ;;  %p6839_p12 = scmp.lt.u32.totalorder %s6831_s14, %s12294_s6 }
 0xdc0   : > { %p6833_p7 = pnand %p6832_p4, %p6983_p5 }
 0xdc1   : > { %p6838_p11 = por %p6837_p10, %p6836_p9 }
 0xdc2   : > { %p6834_p8 = pneg %p6833_p7 }
 0xdc3   : > { %p6840_p13 = por %p6839_p12, %p6838_p11 }
 0xdc5   : > { %p6841_p0 = pnand %p6840_p13, %p6834_p8 }
 0xdc7   : > { %6844 = shalt.err (!%p6841_p0)
}
 0xdc8   : > { %6649 = dma.vmem_to_hbm [thread:$0]  (%p6983_p5), %s12296_s29, 128, %s12294_s6, %s6508_s7   ;;  %v6271_v40 = vpop.permute.xlu1 %6270  ;;  %v6277_v51 = vpop.permute.xlu0 %6276 }
 0xdc9   : > { %s194_s5 = scalar_lea.vmem [#allocation2], %s6633_s30  ;;  %v6286_v12 = vsel %vm381_vm1, %v6269_v5, %v6271_v40  ;;  %v6287_v25 = vsel %vm381_vm1, %v6271_v40, %v6273_v61  ;;  %s6645_s30 = sshll.u32 %s6966_s19, 10 }
 0xdca   : > { %6300 = vst [vmem:[%s194_s5] sm:$0xff] %v6284_v28  ;;  %6301 = vst [vmem:[%s194_s5 + $0x8] sm:$0xff] %v6285_v2  ;;  %s6521_s29 = sshll.u32 %s194_s5, 4  ;;  %s12336_s8 = scalar_lea.hbm %s12384_s3, %s6645_s30  ;;  %s12331_s29 = int_to_ptr.vmem [resolvable:$true] %s6521_s29 }
 0xdcb   : > { %6302 = vst [vmem:[%s194_s5 + $0x10] sm:$0xff] %v6286_v12  ;;  %6303 = vst [vmem:[%s194_s5 + $0x18] sm:$0xff] %v6287_v25  ;;  %s6503_s10 = scalar_lea.sflag [#allocation3], %s12284_s11  ;;  %s6845_s12 = scalar_lea.vmem %s12331_s29, 1024 }
 0xdcc   : > { %v6275_v47 = vpop.permute.xlu1 %6274  ;;  %v6281_v3 = vpop.permute.xlu0 %6280  ;;  %p6846_p1 = scmp.ne.s32.totalorder %s12331_s29, %s6845_s12  ;;  %s6918_s19 = smov [#allocation2]  }
 0xdcd   : > { %v6288_v63 = vsel %vm381_vm1, %v6275_v47, %v6277_v51  ;;  %s6849_s13 = sshll.u32 %s6918_s19, 4  ;;  %s6850_s13 = int_to_ptr.vmem [resolvable:$false] %s6849_s13 }
 0xdce   : > { %6304 = vst [vmem:[%s194_s5 + $0x20] sm:$0xff] %v6288_v63  ;;  %p6847_p2 = pnand %p6846_p1, %p6983_p5  ;;  %s6851_s14 = scalar_lea.vmem %s6850_s13, 2048 }
 0xdcf   : > { %p6852_p4 = scmp.lt.s32.totalorder %s12331_s29, %s6850_s13  ;;  %p6853_p7 = scmp.lt.s32.totalorder %s6851_s14, %s6845_s12 }
 0xdd0   : > { %v6279_v56 = vpop.permute.xlu1 %6278  ;;  %p6848_p3 = pneg %p6847_p2 }
 0xdd1   : > { %v6289_v46 = vsel %vm381_vm1, %v6277_v51, %v6279_v56  ;;  %v6290_v11 = vsel %vm381_vm1, %v6279_v56, %v6281_v3  ;;  %p6854_p8 = por %p6853_p7, %p6852_p4 }
 0xdd2   : > { %6305 = vst [vmem:[%s194_s5 + $0x28] sm:$0xff] %v6289_v46  ;;  %6306 = vst [vmem:[%s194_s5 + $0x30] sm:$0xff] %v6290_v11 }
 0xdd3   : > { %p6855_p9 = pnand %p6854_p8, %p6848_p3 }
 0xdd4   : > { %v6283_v42 = vpop.permute.xlu1 %6282 }
 0xdd5   : > { %v6291_v45 = vsel %vm381_vm1, %v6281_v3, %v6283_v42 }
 0xdd6   : > { %6307 = vst [vmem:[%s194_s5 + $0x38] sm:$0xff] %v6291_v45 }
 0xdd7   : > { %6858 = shalt.err (!%p6855_p9)
}
 0xdd8   : > { %s6859_s23 = scalar_lea.hbm %s12336_s8, 1024  ;;  %s6863_s28 = scalar_lea.hbm %s12384_s3, 2048 }
 0xdd9   : > { %p6860_p10 = scmp.ne.s32.totalorder %s12336_s8, %s6859_s23  ;;  %p6864_p13 = scmp.lt.u32.totalorder %s12336_s8, %s12384_s3 }
 0xdda   : > { %p6865_p0 = scmp.lt.u32.totalorder %s6863_s28, %s6859_s23  ;;  %p6867_p2 = scmp.lt.u32.totalorder %s6859_s23, %s12336_s8 }
 0xddb   : > { %p6861_p11 = pnand %p6860_p10, %p6983_p5 }
 0xddc   : > { %p6866_p1 = por %p6865_p0, %p6864_p13 }
 0xddd   : > { %p6862_p12 = pneg %p6861_p11 }
 0xdde   : > { %p6868_p3 = por %p6867_p2, %p6866_p1 }
 0xde0   : > { %p6869_p4 = pnand %p6868_p3, %p6862_p12 }
 0xde2   : > { %6872 = shalt.err (!%p6869_p4)
}
 0xde3   : > { %s6919_s30 = smov 512  }
 0xde4   : > { %6648 = dma.vmem_to_hbm [thread:$0]  (%p6983_p5), %s12331_s29, 1024, %s12336_s8, %s6503_s10, %s6919_s30, %s6919_s30, %s6913_s9  }
 0xde5 PF: > { %p6659_p7 = scmp.ge.s32.totalorder %s6911_s18, 2  ;;  %s6550_s6 = sand.u32 1, %s6899_s15  }
 0xde6   : > { %s6551_s7 = scalar_lea.sflag [#allocation3], %s6550_s6 }
 0xde7   : > { %p6653_p8 = pnand %p6659_p7, %p6987_p6 }
 0xde9   : > { %6890 = dma.done.wait (!%p6653_p8), %s6551_s7, 1024  }
 0xdea   : > { %6892 = vsyncadd (!%p6653_p8), %s6551_s7, 4294966272  ;;  %s6560_s12 = scalar_lea.sflag [#allocation5], %s6550_s6 }
 0xdeb   : > { %6894 = dma.done.wait (!%p6653_p8), %s6560_s12, 128  }
 0xdec   : > { %6896 = vsyncadd (!%p6653_p8), %s6560_s12, 4294967168  ;;  %p18_p5 = scmp.ge.s32.totalorder %s6970_s21, 4   ;;  %s13416_s15 = smov %s6903_s16 }
 0xded   : > { %s13417_s16 = smov %s6907_s17  ;;  %s13418_s17 = smov %s6981_s24 }
 0xdee   : > { %s13419_s18 = smov %s6970_s21  ;;  %20 = sbr.rel (!%p18_p5) target bundleno = 5 (0x5), region = 85 }
 0xdf5   :  { %6565 = vsyncpa [#allocation3], 1 }
 0xdf6   :  { %6567 = vsyncpa [#allocation3 + $0x1], 1 }
 0xdf7   :  { %6568 = vsyncpa [#allocation5], 1 }
 0xdf8   :  { %6570 = vsyncpa [#allocation5 + $0x1], 1 }

</bundles_post_ra>
